<compile_context>
chip_gen: v7x
topology: tpu7x:2x2x1
jax: 0.10.0
libtpu: 0.0.40
codegen_flags: <defaults>
</compile_context>

<pallas_src>
import functools

import jax
import jax.numpy as jnp
from jax.experimental import pallas as pl
from jax.experimental.pallas import tpu as pltpu

F32 = jnp.float32
_NEG = -1e30   # additive mask for cross-batch attention pairs (f32-safe)


# ----------------------------- in-kernel helpers -----------------------------

def _dot(a, b):
    # Default MXU precision (bf16-truncated operands); pass
    # precision=jax.lax.Precision.HIGHEST if bit-closeness to torch matters.
    return jnp.dot(a, b, preferred_element_type=F32)


def _dot_nt(a, b):
    # a @ b.T without materializing an explicit transpose.
    return jax.lax.dot_general(a, b, (((1,), (1,)), ((), ())),
                               preferred_element_type=F32)


def _layernorm(x, g, b, eps):
    u = jnp.mean(x, axis=-1, keepdims=True)
    v = jnp.mean(jnp.square(x - u), axis=-1, keepdims=True)
    return (x - u) * jax.lax.rsqrt(v + eps) * g + b


def _gelu(x):
    # TODO(synk): torch nn.GELU() default is exact (erf); tanh approximation is
    # used since erf has no guaranteed Mosaic lowering (max diff ~1e-3).
    return jax.nn.gelu(x, approximate=True)


def _softmax_last(x):
    m = jnp.max(x, axis=-1, keepdims=True)
    e = jnp.exp(x - m)
    return e * pl.reciprocal(jnp.sum(e, axis=-1, keepdims=True), approx=True)


# ------------------------------- fused kernel --------------------------------

def _ht_fused_kernel(act_ref, emb_ref, w_ref, b_ref, o_ref, *,
                     B, T, HW, E, num_heads, wmap, bmap, eps_ln2d, eps_ln):
    S = T + 1
    BS = B * S
    N = B * T * HW
    hd = E // num_heads
    scale = 1.0 / float(hd) ** 0.5
    gcols = wmap['w1'][2]          # 4 * c1 (conv1 channels x 4 sub-pixels)

    def W(name):
        off, r, c = wmap[name]
        return w_ref[off:off + r, :c]

    def Bv(name):
        i, n = bmap[name]
        return b_ref[i:i + 1, :n]

    # ---- dose_downscaling as matmuls ----------------------------------------
    # act rows [0:N)   : space-to-depth doses, 16 cols = (kh2, kw2, kh1, kw1)
    # act rows [N:2N)  : images, channels-last, same (frame, h2, w2) row order
    x4 = act_ref[0:N, :16]
    y1 = _dot(x4, W('w1')) + Bv('b1')                        # conv1 (block-diag)
    # per-pixel channel LayerNorm2d on the 4 interleaved conv1 pixels via one
    # grouped-mean projection of [y1, y1^2]  (var = E[x^2] - mu^2).
    moms = _dot(jnp.concatenate([y1, y1 * y1], axis=-1), W('pavg2'))
    mu, ex2 = moms[:, :gcols], moms[:, gcols:2 * gcols]
    var = ex2 - mu * mu
    a1 = _gelu((y1 - mu) * jax.lax.rsqrt(var + eps_ln2d) * Bv('g1') + Bv('be1'))

    y2 = _dot(a1, W('w2')) + Bv('b2')                        # conv2
    a2 = _gelu(_layernorm(y2, Bv('g2'), Bv('be2'), eps_ln2d))
    comb = _dot(a2, W('w3')) + Bv('b3') + act_ref[N:2 * N, :]   # conv3 + images

    # ---- AdaptiveMaxPool2d((1,1)) per frame + meta token ---------------------
    pooled = jnp.max(comb.reshape(B * T, HW, E), axis=1)     # (B*T, E)
    meta_emb = _dot(emb_ref[...], W('me')) + Bv('meb')       # (B, E)
    parts = []
    for b in range(B):
        parts.append(pooled[b * T:(b + 1) * T, :])
        parts.append(meta_emb[b:b + 1, :])
    seq = jnp.concatenate(parts, axis=0)                     # (B*S, E)

    # ---- ResidualCrossAttentionBlock (self-attn; dropout = eval identity) ----
    hq = _layernorm(seq, Bv('ln1g'), Bv('ln1b'), eps_ln)
    qkv = _dot(hq, W('wqkv')) + Bv('bqkv')                   # (B*S, 3E)
    q, k, v = qkv[:, :E], qkv[:, E:2 * E], qkv[:, 2 * E:3 * E]

    # additive mask blocking cross-batch pairs (iota + compares, no int divide)
    ri = jax.lax.broadcasted_iota(jnp.int32, (BS, BS), 0)
    ci = jax.lax.broadcasted_iota(jnp.int32, (BS, BS), 1)
    same = None
    for b in range(B):
        rin = (ri >= b * S) & (ri < (b + 1) * S)
        cin = (ci >= b * S) & (ci < (b + 1) * S)
        blk = rin & cin
        same = blk if same is None else (same | blk)
    amask = jnp.where(same, 0.0, _NEG)

    ctx_parts = []
    for h in range(num_heads):
        lo, hi = h * hd, (h + 1) * hd
        s_h = _dot_nt(q[:, lo:hi], k[:, lo:hi]) * scale + amask   # (B*S, B*S)
        ctx_parts.append(_dot(_softmax_last(s_h), v[:, lo:hi]))
    ctx = jnp.concatenate(ctx_parts, axis=-1)                # (B*S, E)

    x1 = seq + _dot(ctx, W('wout')) + Bv('bout')
    h2 = _layernorm(x1, Bv('ln2g'), Bv('ln2b'), eps_ln)
    mlp = _gelu(_dot(h2, W('wfc')) + Bv('bfc'))
    x2 = x1 + _dot(mlp, W('wpr')) + Bv('bpr')                # (B*S, E)

    # ---- atten_pool_t (Linear-Tanh-Linear-Softmax over time) + classifier ----
    hp = jnp.tanh(_dot(x2, W('pw1')) + Bv('pb1'))
    sp = _dot(hp, W('pw2')) + Bv('pb2')                      # (B*S, 1)
    rows = []
    for b in range(B):
        xb = x2[b * S:(b + 1) * S, :]
        sb = sp[b * S:(b + 1) * S, :]
        eb = jnp.exp(sb - jnp.max(sb, axis=0, keepdims=True))
        ab = eb * pl.reciprocal(jnp.sum(eb, axis=0, keepdims=True), approx=True)
        rows.append(jnp.sum(ab * xb, axis=0, keepdims=True))
    pooled_t = jnp.concatenate(rows, axis=0)                 # (B, E)

    o_ref[...] = _dot(pooled_t, W('cls')) + Bv('clsb')


# --------------------------- parameter packing (hoisted) ----------------------

def _stack_weights(named):
    mats = [(n, jnp.asarray(m, F32)) for n, m in named]
    width = -(-max(int(m.shape[1]) for _, m in mats) // 128) * 128
    blocks, offs, off = [], {}, 0
    for name, m in mats:
        r, c = int(m.shape[0]), int(m.shape[1])
        rp = -(-r // 8) * 8
        blocks.append(jnp.zeros((rp, width), F32).at[:r, :c].set(m))
        offs[name] = (off, r, c)
        off += rp
    return jnp.concatenate(blocks, axis=0), offs


def _stack_rows(named):
    vecs = [(n, jnp.asarray(v, F32).reshape(1, -1)) for n, v in named]
    width = -(-max(int(v.shape[1]) for _, v in vecs) // 128) * 128
    rows, offs = [], {}
    for i, (name, v) in enumerate(vecs):
        n = int(v.shape[1])
        rows.append(jnp.pad(v, ((0, 0), (0, width - n))))
        offs[name] = (i, n)
    slab = jnp.concatenate(rows, axis=0)
    r = slab.shape[0]
    rp = -(-r // 8) * 8
    if rp != r:
        slab = jnp.pad(slab, ((0, rp - r), (0, 0)))
    return slab, offs


def pack_params(params):
    """One-time packing of every weight/bias into two VMEM slabs (4 input DMAs
    total per forward); keeps parameter-only transforms out of the call path."""
    c1 = params['c1_w'].shape[1]
    eye4 = jnp.eye(4, dtype=F32)
    # conv1 (2x2/s2, Cin=1) applied to the 4 sub-2x2 patches of each row at once
    w1blk = jnp.kron(eye4, params['c1_w'].astype(F32))             # (16, 4*c1)
    # grouped-mean projector for per-pixel channel LN2d of conv1 output,
    # block-diagonal twice so mu and E[x^2] come from one matmul.
    pavg = jnp.kron(eye4, jnp.full((c1, c1), 1.0 / c1, F32))
    pavg2 = jnp.kron(jnp.eye(2, dtype=F32), pavg)                  # (8c1, 8c1)
    wslab, wmap = _stack_weights([
        ('w1', w1blk), ('pavg2', pavg2), ('w2', params['c2_w']),
        ('w3', params['c3_w']), ('me', params['me_w']),
        ('wqkv', params['a_wqkv']), ('wout', params['a_wout']),
        ('wfc', params['a_wfc']), ('wpr', params['a_wpr']),
        ('pw1', params['p_w1']), ('pw2', params['p_w2']), ('cls', params['cls_w']),
    ])
    bslab, bmap = _stack_rows([
        ('b1', jnp.tile(params['c1_b'], 4)), ('g1', jnp.tile(params['ln1_g'], 4)),
        ('be1', jnp.tile(params['ln1_b'], 4)),
        ('b2', params['c2_b']), ('g2', params['ln2_g']), ('be2', params['ln2_b']),
        ('b3', params['c3_b']), ('meb', params['me_b']),
        ('ln1g', params['a_ln1_g']), ('ln1b', params['a_ln1_b']),
        ('bqkv', params['a_bqkv']), ('bout', params['a_bout']),
        ('ln2g', params['a_ln2_g']), ('ln2b', params['a_ln2_b']),
        ('bfc', params['a_bfc']), ('bpr', params['a_bpr']),
        ('pb1', params['p_b1']), ('pb2', params['p_b2']), ('clsb', params['cls_b']),
    ])
    return wslab, bslab, wmap, bmap


# --------------------------------- forward ------------------------------------

def ht_forward(wslab, bslab, batch, *, wmap, bmap, embed_dim, num_heads,
               num_classes):
    doses, images = batch['doses'], batch['images']
    meta, blood = batch['meta'], batch['blood']
    B, T, H, W = doses.shape
    E = embed_dim
    H2, W2 = H // 4, W // 4
    HW = H2 * W2
    BT = B * T
    N = BT * HW
    nc = num_classes

    # Per-call activation prep (data-dependent only): one 4x4 space-to-depth of
    # the raw doses (so both stride-2 convs become in-kernel matmuls) and the
    # NCHW->rows flatten of images; both row-stacked into a single input slab.
    d = doses.astype(F32).reshape(BT, H2, 2, 2, W2, 2, 2)
    d = jnp.transpose(d, (0, 1, 4, 2, 5, 3, 6))    # (n, h2, w2, kh2, kw2, kh1, kw1)
    x4 = d.reshape(N, 16)                          # 16 = Cin(1) * 4 pos * 2 * 2
    img = jnp.transpose(images.astype(F32).reshape(BT, E, H2, W2),
                        (0, 2, 3, 1)).reshape(N, E)
    act = jnp.concatenate([jnp.pad(x4, ((0, 0), (0, E - 16))), img], axis=0)
    emb_in = jnp.concatenate([meta, blood], axis=1).astype(F32)     # (B, M)

    kernel = functools.partial(
        _ht_fused_kernel, B=B, T=T, HW=HW, E=E, num_heads=num_heads,
        wmap=wmap, bmap=bmap,
        eps_ln2d=1e-6,   # TODO(synk): LayerNorm2d class not shown; eps assumed 1e-6
        eps_ln=1e-5)

    def fs(a):
        nd = a.ndim
        return pl.BlockSpec(a.shape, lambda i, _nd=nd: (0,) * _nd)

    # TODO(synk): on v7x (2 TensorCores) this could use grid=(B,) with
    # dimension_semantics=("parallel",) to split the batch across cores; on
    # v5e/v6e a single fused grid step has the lowest fixed overhead.
    return pl.pallas_call(
        kernel,
        out_shape=jax.ShapeDtypeStruct((B, nc), F32),
        grid=(1,),
        in_specs=[fs(act), fs(emb_in), fs(wslab), fs(bslab)],
        out_specs=pl.BlockSpec((B, nc), lambda i: (0, 0)),
        compiler_params=pltpu.CompilerParams(dimension_semantics=("arbitrary",)),
    )(act, emb_in, wslab, bslab)


# ------------------------------ parameter init --------------------------------

def init_params(key, *, embed_dim, meta_dim, blood_dim, num_classes):
    E = embed_dim
    c1, c2 = E // 16, E // 4
    ks = iter(jax.random.split(key, 24))

    def nrm(shape, scale=0.02):
        return scale * jax.random.normal(next(ks), shape, F32)

    p = {}
    # dose_downscaling (conv weights in matmul layout: rows=(kh,kw,cin), cols=cout)
    p['c1_w'], p['c1_b'] = nrm((1 * 2 * 2, c1)), nrm((c1,))
    p['ln1_g'], p['ln1_b'] = jnp.ones((c1,), F32), jnp.zeros((c1,), F32)
    p['c2_w'], p['c2_b'] = nrm((c1 * 2 * 2, c2)), nrm((c2,))
    p['ln2_g'], p['ln2_b'] = jnp.ones((c2,), F32), jnp.zeros((c2,), F32)
    p['c3_w'], p['c3_b'] = nrm((c2, E)), nrm((E,))
    # meta+blood embedding
    p['me_w'], p['me_b'] = nrm((meta_dim + blood_dim, E)), nrm((E,))
    # ResidualCrossAttentionBlock
    p['a_ln1_g'], p['a_ln1_b'] = jnp.ones((E,), F32), jnp.zeros((E,), F32)
    p['a_wqkv'], p['a_bqkv'] = nrm((E, 3 * E)), nrm((3 * E,))
    p['a_wout'], p['a_bout'] = nrm((E, E)), nrm((E,))
    p['a_ln2_g'], p['a_ln2_b'] = jnp.ones((E,), F32), jnp.zeros((E,), F32)
    p['a_wfc'], p['a_bfc'] = nrm((E, 4 * E)), nrm((4 * E,))
    p['a_wpr'], p['a_bpr'] = nrm((4 * E, E)), nrm((E,))
    # atten_pool_t + classifier
    p['p_w1'], p['p_b1'] = nrm((E, E // 2)), nrm((E // 2,))
    p['p_w2'], p['p_b2'] = nrm((E // 2, 1)), nrm((1,))
    p['cls_w'], p['cls_b'] = nrm((E, num_classes)), nrm((num_classes,))
    return p


# ----------------------------------- main --------------------------------------

if __name__ == "__main__":
    B, T, H, W = 2, 4, 32, 32
    embed_dim, num_heads, num_classes = 32, 4, 3
    meta_dim, blood_dim = 8, 8

    key = jax.random.PRNGKey(0)
    k_param, k_d, k_i, k_m, k_b = jax.random.split(key, 5)

    params = init_params(k_param, embed_dim=embed_dim, meta_dim=meta_dim,
                         blood_dim=blood_dim, num_classes=num_classes)
    wslab, bslab, wmap, bmap = pack_params(params)

    batch = {
        'doses': jax.random.normal(k_d, (B, T, H, W), F32),
        'images': jax.random.normal(k_i, (B, T, embed_dim, H // 4, W // 4), F32),
        'meta': jax.random.normal(k_m, (B, meta_dim), F32),
        'blood': jax.random.normal(k_b, (B, blood_dim), F32),
    }

    fwd = jax.jit(functools.partial(ht_forward, wmap=wmap, bmap=bmap,
                                    embed_dim=embed_dim, num_heads=num_heads,
                                    num_classes=num_classes))
    logits = jax.block_until_ready(fwd(wslab, bslab, batch))
    assert logits.shape == (B, num_classes), logits.shape
    assert bool(jnp.all(jnp.isfinite(logits)))
    print("KERNEL_OK")
</pallas_src>

<mosaic_0001>
module attributes {stable_mosaic.version = 11 : i64} {
  func.func @_ht_fused_kernel(%arg0: i32, %arg1: memref<1024x32xf32, #tpu.memory_space<vmem>>, %arg2: memref<2x16xf32, #tpu.memory_space<vmem>>, %arg3: memref<368x128xf32, #tpu.memory_space<vmem>>, %arg4: memref<24x128xf32, #tpu.memory_space<vmem>>, %arg5: memref<2x3xf32, #tpu.memory_space<vmem>>) attributes {dimension_semantics = [#tpu.dimension_semantics<arbitrary>], iteration_bounds = array<i64: 1>, scalar_prefetch = 0 : i64, scratch_operands = 0 : i64, tpu.core_type = #tpu.core_type<tc>, window_params = [{pipeline_mode = #tpu.pipeline_mode<synchronous>, transform_indices = @transform_0, window_bounds = array<i64: 1024, 32>}, {pipeline_mode = #tpu.pipeline_mode<synchronous>, transform_indices = @transform_1, window_bounds = array<i64: 2, 16>}, {pipeline_mode = #tpu.pipeline_mode<synchronous>, transform_indices = @transform_2, window_bounds = array<i64: 368, 128>}, {pipeline_mode = #tpu.pipeline_mode<synchronous>, transform_indices = @transform_3, window_bounds = array<i64: 24, 128>}, {pipeline_mode = #tpu.pipeline_mode<synchronous>, transform_indices = @transform_4, window_bounds = array<i64: 2, 3>}]} {
    %c0 = arith.constant 0 : index
    %c0_0 = arith.constant 0 : index
    %0 = vector.load %arg1[%c0, %c0_0] : memref<1024x32xf32, #tpu.memory_space<vmem>>, vector<512x16xf32>
    %c0_1 = arith.constant 0 : index
    %c0_2 = arith.constant 0 : index
    %1 = vector.load %arg3[%c0_1, %c0_2] : memref<368x128xf32, #tpu.memory_space<vmem>>, vector<16x8xf32>
    %cst = arith.constant dense<0.000000e+00> : vector<512x8xf32>
    %2 = tpu.matmul %0, %1, %cst {dimension_numbers = #tpu.dot_dimension_numbers<[1], [0], [0], [1], [0, 0, 1, 1], [], []>} : vector<512x16xf32>, vector<16x8xf32>, vector<512x8xf32> -> vector<512x8xf32>
    %c0_3 = arith.constant 0 : index
    %c0_4 = arith.constant 0 : index
    %3 = vector.load %arg4[%c0_3, %c0_4] : memref<24x128xf32, #tpu.memory_space<vmem>>, vector<1x8xf32>
    %4 = vector.broadcast %3 : vector<1x8xf32> to vector<512x8xf32>
    %5 = arith.addf %2, %4 : vector<512x8xf32>
    %6 = arith.mulf %5, %5 : vector<512x8xf32>
    %7 = tpu.concatenate %5, %6 in 1 : vector<512x8xf32>, vector<512x8xf32> -> vector<512x16xf32>
    %c16 = arith.constant 16 : index
    %c0_5 = arith.constant 0 : index
    %8 = vector.load %arg3[%c16, %c0_5] : memref<368x128xf32, #tpu.memory_space<vmem>>, vector<16x16xf32>
    %cst_6 = arith.constant dense<0.000000e+00> : vector<512x16xf32>
    %9 = tpu.matmul %7, %8, %cst_6 {dimension_numbers = #tpu.dot_dimension_numbers<[1], [0], [0], [1], [0, 0, 1, 1], [], []>} : vector<512x16xf32>, vector<16x16xf32>, vector<512x16xf32> -> vector<512x16xf32>
    %10 = vector.extract_strided_slice %9 {offsets = [0, 0], sizes = [512, 8], strides = [1, 1]} : vector<512x16xf32> to vector<512x8xf32>
    %11 = vector.extract_strided_slice %9 {offsets = [0, 8], sizes = [512, 8], strides = [1, 1]} : vector<512x16xf32> to vector<512x8xf32>
    %12 = arith.mulf %10, %10 : vector<512x8xf32>
    %13 = arith.subf %11, %12 : vector<512x8xf32>
    %14 = arith.subf %5, %10 : vector<512x8xf32>
    %cst_7 = arith.constant 9.99999997E-7 : f32
    %15 = vector.broadcast %cst_7 : f32 to vector<512x8xf32>
    %16 = arith.addf %13, %15 : vector<512x8xf32>
    %17 = math.rsqrt %16 : vector<512x8xf32>
    %18 = arith.mulf %14, %17 : vector<512x8xf32>
    %c1 = arith.constant 1 : index
    %c0_8 = arith.constant 0 : index
    %19 = vector.load %arg4[%c1, %c0_8] : memref<24x128xf32, #tpu.memory_space<vmem>>, vector<1x8xf32>
    %20 = vector.broadcast %19 : vector<1x8xf32> to vector<512x8xf32>
    %21 = arith.mulf %18, %20 : vector<512x8xf32>
    %c2 = arith.constant 2 : index
    %c0_9 = arith.constant 0 : index
    %22 = vector.load %arg4[%c2, %c0_9] : memref<24x128xf32, #tpu.memory_space<vmem>>, vector<1x8xf32>
    %23 = vector.broadcast %22 : vector<1x8xf32> to vector<512x8xf32>
    %24 = arith.addf %21, %23 : vector<512x8xf32>
    %25 = arith.mulf %24, %24 : vector<512x8xf32>
    %26 = arith.mulf %24, %25 : vector<512x8xf32>
    %cst_10 = arith.constant 4.471500e-02 : f32
    %27 = vector.broadcast %cst_10 : f32 to vector<512x8xf32>
    %28 = arith.mulf %27, %26 : vector<512x8xf32>
    %29 = arith.addf %24, %28 : vector<512x8xf32>
    %cst_11 = arith.constant 0.797884583 : f32
    %30 = vector.broadcast %cst_11 : f32 to vector<512x8xf32>
    %31 = arith.mulf %30, %29 : vector<512x8xf32>
    %32 = math.tanh %31 : vector<512x8xf32>
    %cst_12 = arith.constant 1.000000e+00 : f32
    %33 = vector.broadcast %cst_12 : f32 to vector<512x8xf32>
    %34 = arith.addf %33, %32 : vector<512x8xf32>
    %cst_13 = arith.constant 5.000000e-01 : f32
    %35 = vector.broadcast %cst_13 : f32 to vector<512x8xf32>
    %36 = arith.mulf %35, %34 : vector<512x8xf32>
    %37 = arith.mulf %24, %36 : vector<512x8xf32>
    %c32 = arith.constant 32 : index
    %c0_14 = arith.constant 0 : index
    %38 = vector.load %arg3[%c32, %c0_14] : memref<368x128xf32, #tpu.memory_space<vmem>>, vector<8x8xf32>
    %cst_15 = arith.constant dense<0.000000e+00> : vector<512x8xf32>
    %39 = tpu.matmul %37, %38, %cst_15 {dimension_numbers = #tpu.dot_dimension_numbers<[1], [0], [0], [1], [0, 0, 1, 1], [], []>} : vector<512x8xf32>, vector<8x8xf32>, vector<512x8xf32> -> vector<512x8xf32>
    %c3 = arith.constant 3 : index
    %c0_16 = arith.constant 0 : index
    %40 = vector.load %arg4[%c3, %c0_16] : memref<24x128xf32, #tpu.memory_space<vmem>>, vector<1x8xf32>
    %41 = vector.broadcast %40 : vector<1x8xf32> to vector<512x8xf32>
    %42 = arith.addf %39, %41 : vector<512x8xf32>
    %c4 = arith.constant 4 : index
    %c0_17 = arith.constant 0 : index
    %43 = vector.load %arg4[%c4, %c0_17] : memref<24x128xf32, #tpu.memory_space<vmem>>, vector<1x8xf32>
    %c5 = arith.constant 5 : index
    %c0_18 = arith.constant 0 : index
    %44 = vector.load %arg4[%c5, %c0_18] : memref<24x128xf32, #tpu.memory_space<vmem>>, vector<1x8xf32>
    %cst_19 = arith.constant dense<0.000000e+00> : vector<512xf32>
    %45 = vector.multi_reduction <add>, %42, %cst_19 [1] : vector<512x8xf32> to vector<512xf32>
    %46 = vector.shape_cast %45 : vector<512xf32> to vector<512x1xf32>
    %cst_20 = arith.constant 8.000000e+00 : f32
    %47 = vector.broadcast %cst_20 : f32 to vector<512x1xf32>
    %48 = arith.divf %46, %47 : vector<512x1xf32>
    %49 = vector.broadcast %48 : vector<512x1xf32> to vector<512x8xf32>
    %50 = arith.subf %42, %49 : vector<512x8xf32>
    %51 = arith.mulf %50, %50 : vector<512x8xf32>
    %cst_21 = arith.constant dense<0.000000e+00> : vector<512xf32>
    %52 = vector.multi_reduction <add>, %51, %cst_21 [1] : vector<512x8xf32> to vector<512xf32>
    %53 = vector.shape_cast %52 : vector<512xf32> to vector<512x1xf32>
    %cst_22 = arith.constant 8.000000e+00 : f32
    %54 = vector.broadcast %cst_22 : f32 to vector<512x1xf32>
    %55 = arith.divf %53, %54 : vector<512x1xf32>
    %56 = vector.broadcast %48 : vector<512x1xf32> to vector<512x8xf32>
    %57 = arith.subf %42, %56 : vector<512x8xf32>
    %cst_23 = arith.constant 9.99999997E-7 : f32
    %58 = vector.broadcast %cst_23 : f32 to vector<512x1xf32>
    %59 = arith.addf %55, %58 : vector<512x1xf32>
    %60 = math.rsqrt %59 : vector<512x1xf32>
    %61 = vector.broadcast %60 : vector<512x1xf32> to vector<512x8xf32>
    %62 = arith.mulf %57, %61 : vector<512x8xf32>
    %63 = vector.broadcast %43 : vector<1x8xf32> to vector<512x8xf32>
    %64 = arith.mulf %62, %63 : vector<512x8xf32>
    %65 = vector.broadcast %44 : vector<1x8xf32> to vector<512x8xf32>
    %66 = arith.addf %64, %65 : vector<512x8xf32>
    %67 = arith.mulf %66, %66 : vector<512x8xf32>
    %68 = arith.mulf %66, %67 : vector<512x8xf32>
    %cst_24 = arith.constant 4.471500e-02 : f32
    %69 = vector.broadcast %cst_24 : f32 to vector<512x8xf32>
    %70 = arith.mulf %69, %68 : vector<512x8xf32>
    %71 = arith.addf %66, %70 : vector<512x8xf32>
    %cst_25 = arith.constant 0.797884583 : f32
    %72 = vector.broadcast %cst_25 : f32 to vector<512x8xf32>
    %73 = arith.mulf %72, %71 : vector<512x8xf32>
    %74 = math.tanh %73 : vector<512x8xf32>
    %cst_26 = arith.constant 1.000000e+00 : f32
    %75 = vector.broadcast %cst_26 : f32 to vector<512x8xf32>
    %76 = arith.addf %75, %74 : vector<512x8xf32>
    %cst_27 = arith.constant 5.000000e-01 : f32
    %77 = vector.broadcast %cst_27 : f32 to vector<512x8xf32>
    %78 = arith.mulf %77, %76 : vector<512x8xf32>
    %79 = arith.mulf %66, %78 : vector<512x8xf32>
    %c40 = arith.constant 40 : index
    %c0_28 = arith.constant 0 : index
    %80 = vector.load %arg3[%c40, %c0_28] : memref<368x128xf32, #tpu.memory_space<vmem>>, vector<8x32xf32>
    %cst_29 = arith.constant dense<0.000000e+00> : vector<512x32xf32>
    %81 = tpu.matmul %79, %80, %cst_29 {dimension_numbers = #tpu.dot_dimension_numbers<[1], [0], [0], [1], [0, 0, 1, 1], [], []>} : vector<512x8xf32>, vector<8x32xf32>, vector<512x32xf32> -> vector<512x32xf32>
    %c6 = arith.constant 6 : index
    %c0_30 = arith.constant 0 : index
    %82 = vector.load %arg4[%c6, %c0_30] : memref<24x128xf32, #tpu.memory_space<vmem>>, vector<1x32xf32>
    %83 = vector.broadcast %82 : vector<1x32xf32> to vector<512x32xf32>
    %84 = arith.addf %81, %83 : vector<512x32xf32>
    %c512 = arith.constant 512 : index
    %c0_31 = arith.constant 0 : index
    %85 = vector.load %arg1[%c512, %c0_31] : memref<1024x32xf32, #tpu.memory_space<vmem>>, vector<512x32xf32>
    %86 = arith.addf %84, %85 : vector<512x32xf32>
    %87 = vector.shape_cast %86 : vector<512x32xf32> to vector<8x64x32xf32>
    %cst_32 = arith.constant dense<0xFF800000> : vector<8x32xf32>
    %88 = vector.multi_reduction <maximumf>, %87, %cst_32 [1] : vector<8x64x32xf32> to vector<8x32xf32>
    %c0_33 = arith.constant 0 : index
    %c0_34 = arith.constant 0 : index
    %89 = vector.load %arg2[%c0_33, %c0_34] : memref<2x16xf32, #tpu.memory_space<vmem>>, vector<2x16xf32>
    %c48 = arith.constant 48 : index
    %c0_35 = arith.constant 0 : index
    %90 = vector.load %arg3[%c48, %c0_35] : memref<368x128xf32, #tpu.memory_space<vmem>>, vector<16x32xf32>
    %cst_36 = arith.constant dense<0.000000e+00> : vector<2x32xf32>
    %91 = tpu.matmul %89, %90, %cst_36 {dimension_numbers = #tpu.dot_dimension_numbers<[1], [0], [0], [1], [0, 0, 1, 1], [], []>} : vector<2x16xf32>, vector<16x32xf32>, vector<2x32xf32> -> vector<2x32xf32>
    %c7 = arith.constant 7 : index
    %c0_37 = arith.constant 0 : index
    %92 = vector.load %arg4[%c7, %c0_37] : memref<24x128xf32, #tpu.memory_space<vmem>>, vector<1x32xf32>
    %93 = vector.broadcast %92 : vector<1x32xf32> to vector<2x32xf32>
    %94 = arith.addf %91, %93 : vector<2x32xf32>
    %95 = vector.extract_strided_slice %88 {offsets = [0, 0], sizes = [4, 32], strides = [1, 1]} : vector<8x32xf32> to vector<4x32xf32>
    %96 = vector.extract_strided_slice %94 {offsets = [0, 0], sizes = [1, 32], strides = [1, 1]} : vector<2x32xf32> to vector<1x32xf32>
    %97 = vector.extract_strided_slice %88 {offsets = [4, 0], sizes = [4, 32], strides = [1, 1]} : vector<8x32xf32> to vector<4x32xf32>
    %98 = vector.extract_strided_slice %94 {offsets = [1, 0], sizes = [1, 32], strides = [1, 1]} : vector<2x32xf32> to vector<1x32xf32>
    %99 = tpu.concatenate %95, %96, %97, %98 in 0 : vector<4x32xf32>, vector<1x32xf32>, vector<4x32xf32>, vector<1x32xf32> -> vector<10x32xf32>
    %c8 = arith.constant 8 : index
    %c0_38 = arith.constant 0 : index
    %100 = vector.load %arg4[%c8, %c0_38] : memref<24x128xf32, #tpu.memory_space<vmem>>, vector<1x32xf32>
    %c9 = arith.constant 9 : index
    %c0_39 = arith.constant 0 : index
    %101 = vector.load %arg4[%c9, %c0_39] : memref<24x128xf32, #tpu.memory_space<vmem>>, vector<1x32xf32>
    %cst_40 = arith.constant dense<0.000000e+00> : vector<10xf32>
    %102 = vector.multi_reduction <add>, %99, %cst_40 [1] : vector<10x32xf32> to vector<10xf32>
    %103 = vector.shape_cast %102 : vector<10xf32> to vector<10x1xf32>
    %cst_41 = arith.constant 3.200000e+01 : f32
    %104 = vector.broadcast %cst_41 : f32 to vector<10x1xf32>
    %105 = arith.divf %103, %104 : vector<10x1xf32>
    %106 = vector.broadcast %105 : vector<10x1xf32> to vector<10x32xf32>
    %107 = arith.subf %99, %106 : vector<10x32xf32>
    %108 = arith.mulf %107, %107 : vector<10x32xf32>
    %cst_42 = arith.constant dense<0.000000e+00> : vector<10xf32>
    %109 = vector.multi_reduction <add>, %108, %cst_42 [1] : vector<10x32xf32> to vector<10xf32>
    %110 = vector.shape_cast %109 : vector<10xf32> to vector<10x1xf32>
    %cst_43 = arith.constant 3.200000e+01 : f32
    %111 = vector.broadcast %cst_43 : f32 to vector<10x1xf32>
    %112 = arith.divf %110, %111 : vector<10x1xf32>
    %113 = vector.broadcast %105 : vector<10x1xf32> to vector<10x32xf32>
    %114 = arith.subf %99, %113 : vector<10x32xf32>
    %cst_44 = arith.constant 9.99999974E-6 : f32
    %115 = vector.broadcast %cst_44 : f32 to vector<10x1xf32>
    %116 = arith.addf %112, %115 : vector<10x1xf32>
    %117 = math.rsqrt %116 : vector<10x1xf32>
    %118 = vector.broadcast %117 : vector<10x1xf32> to vector<10x32xf32>
    %119 = arith.mulf %114, %118 : vector<10x32xf32>
    %120 = vector.broadcast %100 : vector<1x32xf32> to vector<10x32xf32>
    %121 = arith.mulf %119, %120 : vector<10x32xf32>
    %122 = vector.broadcast %101 : vector<1x32xf32> to vector<10x32xf32>
    %123 = arith.addf %121, %122 : vector<10x32xf32>
    %c64 = arith.constant 64 : index
    %c0_45 = arith.constant 0 : index
    %124 = vector.load %arg3[%c64, %c0_45] : memref<368x128xf32, #tpu.memory_space<vmem>>, vector<32x96xf32>
    %cst_46 = arith.constant dense<0.000000e+00> : vector<10x96xf32>
    %125 = tpu.matmul %123, %124, %cst_46 {dimension_numbers = #tpu.dot_dimension_numbers<[1], [0], [0], [1], [0, 0, 1, 1], [], []>} : vector<10x32xf32>, vector<32x96xf32>, vector<10x96xf32> -> vector<10x96xf32>
    %c10 = arith.constant 10 : index
    %c0_47 = arith.constant 0 : index
    %126 = vector.load %arg4[%c10, %c0_47] : memref<24x128xf32, #tpu.memory_space<vmem>>, vector<1x96xf32>
    %127 = vector.broadcast %126 : vector<1x96xf32> to vector<10x96xf32>
    %128 = arith.addf %125, %127 : vector<10x96xf32>
    %129 = vector.extract_strided_slice %128 {offsets = [0, 0], sizes = [10, 32], strides = [1, 1]} : vector<10x96xf32> to vector<10x32xf32>
    %130 = vector.extract_strided_slice %128 {offsets = [0, 32], sizes = [10, 32], strides = [1, 1]} : vector<10x96xf32> to vector<10x32xf32>
    %131 = vector.extract_strided_slice %128 {offsets = [0, 64], sizes = [10, 32], strides = [1, 1]} : vector<10x96xf32> to vector<10x32xf32>
    %132 = tpu.iota {dimensions = array<i32: 0>} : vector<10x10xi32>
    %133 = tpu.iota {dimensions = array<i32: 1>} : vector<10x10xi32>
    %c0_i32 = arith.constant 0 : i32
    %134 = vector.broadcast %c0_i32 : i32 to vector<10x10xi32>
    %135 = arith.cmpi sge, %132, %134 : vector<10x10xi32>
    %c5_i32 = arith.constant 5 : i32
    %136 = vector.broadcast %c5_i32 : i32 to vector<10x10xi32>
    %137 = arith.cmpi slt, %132, %136 : vector<10x10xi32>
    %138 = arith.andi %135, %137 : vector<10x10xi1>
    %c0_i32_48 = arith.constant 0 : i32
    %139 = vector.broadcast %c0_i32_48 : i32 to vector<10x10xi32>
    %140 = arith.cmpi sge, %133, %139 : vector<10x10xi32>
    %c5_i32_49 = arith.constant 5 : i32
    %141 = vector.broadcast %c5_i32_49 : i32 to vector<10x10xi32>
    %142 = arith.cmpi slt, %133, %141 : vector<10x10xi32>
    %143 = arith.andi %140, %142 : vector<10x10xi1>
    %144 = arith.andi %138, %143 : vector<10x10xi1>
    %c5_i32_50 = arith.constant 5 : i32
    %145 = vector.broadcast %c5_i32_50 : i32 to vector<10x10xi32>
    %146 = arith.cmpi sge, %132, %145 : vector<10x10xi32>
    %c10_i32 = arith.constant 10 : i32
    %147 = vector.broadcast %c10_i32 : i32 to vector<10x10xi32>
    %148 = arith.cmpi slt, %132, %147 : vector<10x10xi32>
    %149 = arith.andi %146, %148 : vector<10x10xi1>
    %c5_i32_51 = arith.constant 5 : i32
    %150 = vector.broadcast %c5_i32_51 : i32 to vector<10x10xi32>
    %151 = arith.cmpi sge, %133, %150 : vector<10x10xi32>
    %c10_i32_52 = arith.constant 10 : i32
    %152 = vector.broadcast %c10_i32_52 : i32 to vector<10x10xi32>
    %153 = arith.cmpi slt, %133, %152 : vector<10x10xi32>
    %154 = arith.andi %151, %153 : vector<10x10xi1>
    %155 = arith.andi %149, %154 : vector<10x10xi1>
    %156 = arith.ori %144, %155 : vector<10x10xi1>
    %cst_53 = arith.constant 0.000000e+00 : f32
    %cst_54 = arith.constant -1.000000e+30 : f32
    %157 = vector.broadcast %cst_53 : f32 to vector<10x10xf32>
    %158 = vector.broadcast %cst_54 : f32 to vector<10x10xf32>
    %159 = arith.select %156, %157, %158 : vector<10x10xi1>, vector<10x10xf32>
    %160 = vector.extract_strided_slice %129 {offsets = [0, 0], sizes = [10, 8], strides = [1, 1]} : vector<10x32xf32> to vector<10x8xf32>
    %161 = vector.extract_strided_slice %130 {offsets = [0, 0], sizes = [10, 8], strides = [1, 1]} : vector<10x32xf32> to vector<10x8xf32>
    %cst_55 = arith.constant dense<0.000000e+00> : vector<10x10xf32>
    %162 = tpu.matmul %160, %161, %cst_55 {dimension_numbers = #tpu.dot_dimension_numbers<[1], [1], [0], [0], [0, 0, 1, 0], [], []>} : vector<10x8xf32>, vector<10x8xf32>, vector<10x10xf32> -> vector<10x10xf32>
    %cst_56 = arith.constant 0.353553385 : f32
    %163 = vector.broadcast %cst_56 : f32 to vector<10x10xf32>
    %164 = arith.mulf %162, %163 : vector<10x10xf32>
    %165 = arith.addf %164, %159 : vector<10x10xf32>
    %cst_57 = arith.constant dense<0xFF800000> : vector<10xf32>
    %166 = vector.multi_reduction <maximumf>, %165, %cst_57 [1] : vector<10x10xf32> to vector<10xf32>
    %167 = vector.shape_cast %166 : vector<10xf32> to vector<10x1xf32>
    %168 = vector.broadcast %167 : vector<10x1xf32> to vector<10x10xf32>
    %169 = arith.subf %165, %168 : vector<10x10xf32>
    %170 = math.exp %169 : vector<10x10xf32>
    %cst_58 = arith.constant dense<0.000000e+00> : vector<10xf32>
    %171 = vector.multi_reduction <add>, %170, %cst_58 [1] : vector<10x10xf32> to vector<10xf32>
    %172 = vector.shape_cast %171 : vector<10xf32> to vector<10x1xf32>
    %173 = tpu.reciprocal %172 {approx = true} : vector<10x1xf32> -> vector<10x1xf32>
    %174 = vector.broadcast %173 : vector<10x1xf32> to vector<10x10xf32>
    %175 = arith.mulf %170, %174 : vector<10x10xf32>
    %176 = vector.extract_strided_slice %131 {offsets = [0, 0], sizes = [10, 8], strides = [1, 1]} : vector<10x32xf32> to vector<10x8xf32>
    %cst_59 = arith.constant dense<0.000000e+00> : vector<10x8xf32>
    %177 = tpu.matmul %175, %176, %cst_59 {dimension_numbers = #tpu.dot_dimension_numbers<[1], [0], [0], [1], [0, 0, 1, 1], [], []>} : vector<10x10xf32>, vector<10x8xf32>, vector<10x8xf32> -> vector<10x8xf32>
    %178 = vector.extract_strided_slice %129 {offsets = [0, 8], sizes = [10, 8], strides = [1, 1]} : vector<10x32xf32> to vector<10x8xf32>
    %179 = vector.extract_strided_slice %130 {offsets = [0, 8], sizes = [10, 8], strides = [1, 1]} : vector<10x32xf32> to vector<10x8xf32>
    %cst_60 = arith.constant dense<0.000000e+00> : vector<10x10xf32>
    %180 = tpu.matmul %178, %179, %cst_60 {dimension_numbers = #tpu.dot_dimension_numbers<[1], [1], [0], [0], [0, 0, 1, 0], [], []>} : vector<10x8xf32>, vector<10x8xf32>, vector<10x10xf32> -> vector<10x10xf32>
    %cst_61 = arith.constant 0.353553385 : f32
    %181 = vector.broadcast %cst_61 : f32 to vector<10x10xf32>
    %182 = arith.mulf %180, %181 : vector<10x10xf32>
    %183 = arith.addf %182, %159 : vector<10x10xf32>
    %cst_62 = arith.constant dense<0xFF800000> : vector<10xf32>
    %184 = vector.multi_reduction <maximumf>, %183, %cst_62 [1] : vector<10x10xf32> to vector<10xf32>
    %185 = vector.shape_cast %184 : vector<10xf32> to vector<10x1xf32>
    %186 = vector.broadcast %185 : vector<10x1xf32> to vector<10x10xf32>
    %187 = arith.subf %183, %186 : vector<10x10xf32>
    %188 = math.exp %187 : vector<10x10xf32>
    %cst_63 = arith.constant dense<0.000000e+00> : vector<10xf32>
    %189 = vector.multi_reduction <add>, %188, %cst_63 [1] : vector<10x10xf32> to vector<10xf32>
    %190 = vector.shape_cast %189 : vector<10xf32> to vector<10x1xf32>
    %191 = tpu.reciprocal %190 {approx = true} : vector<10x1xf32> -> vector<10x1xf32>
    %192 = vector.broadcast %191 : vector<10x1xf32> to vector<10x10xf32>
    %193 = arith.mulf %188, %192 : vector<10x10xf32>
    %194 = vector.extract_strided_slice %131 {offsets = [0, 8], sizes = [10, 8], strides = [1, 1]} : vector<10x32xf32> to vector<10x8xf32>
    %cst_64 = arith.constant dense<0.000000e+00> : vector<10x8xf32>
    %195 = tpu.matmul %193, %194, %cst_64 {dimension_numbers = #tpu.dot_dimension_numbers<[1], [0], [0], [1], [0, 0, 1, 1], [], []>} : vector<10x10xf32>, vector<10x8xf32>, vector<10x8xf32> -> vector<10x8xf32>
    %196 = vector.extract_strided_slice %129 {offsets = [0, 16], sizes = [10, 8], strides = [1, 1]} : vector<10x32xf32> to vector<10x8xf32>
    %197 = vector.extract_strided_slice %130 {offsets = [0, 16], sizes = [10, 8], strides = [1, 1]} : vector<10x32xf32> to vector<10x8xf32>
    %cst_65 = arith.constant dense<0.000000e+00> : vector<10x10xf32>
    %198 = tpu.matmul %196, %197, %cst_65 {dimension_numbers = #tpu.dot_dimension_numbers<[1], [1], [0], [0], [0, 0, 1, 0], [], []>} : vector<10x8xf32>, vector<10x8xf32>, vector<10x10xf32> -> vector<10x10xf32>
    %cst_66 = arith.constant 0.353553385 : f32
    %199 = vector.broadcast %cst_66 : f32 to vector<10x10xf32>
    %200 = arith.mulf %198, %199 : vector<10x10xf32>
    %201 = arith.addf %200, %159 : vector<10x10xf32>
    %cst_67 = arith.constant dense<0xFF800000> : vector<10xf32>
    %202 = vector.multi_reduction <maximumf>, %201, %cst_67 [1] : vector<10x10xf32> to vector<10xf32>
    %203 = vector.shape_cast %202 : vector<10xf32> to vector<10x1xf32>
    %204 = vector.broadcast %203 : vector<10x1xf32> to vector<10x10xf32>
    %205 = arith.subf %201, %204 : vector<10x10xf32>
    %206 = math.exp %205 : vector<10x10xf32>
    %cst_68 = arith.constant dense<0.000000e+00> : vector<10xf32>
    %207 = vector.multi_reduction <add>, %206, %cst_68 [1] : vector<10x10xf32> to vector<10xf32>
    %208 = vector.shape_cast %207 : vector<10xf32> to vector<10x1xf32>
    %209 = tpu.reciprocal %208 {approx = true} : vector<10x1xf32> -> vector<10x1xf32>
    %210 = vector.broadcast %209 : vector<10x1xf32> to vector<10x10xf32>
    %211 = arith.mulf %206, %210 : vector<10x10xf32>
    %212 = vector.extract_strided_slice %131 {offsets = [0, 16], sizes = [10, 8], strides = [1, 1]} : vector<10x32xf32> to vector<10x8xf32>
    %cst_69 = arith.constant dense<0.000000e+00> : vector<10x8xf32>
    %213 = tpu.matmul %211, %212, %cst_69 {dimension_numbers = #tpu.dot_dimension_numbers<[1], [0], [0], [1], [0, 0, 1, 1], [], []>} : vector<10x10xf32>, vector<10x8xf32>, vector<10x8xf32> -> vector<10x8xf32>
    %214 = vector.extract_strided_slice %129 {offsets = [0, 24], sizes = [10, 8], strides = [1, 1]} : vector<10x32xf32> to vector<10x8xf32>
    %215 = vector.extract_strided_slice %130 {offsets = [0, 24], sizes = [10, 8], strides = [1, 1]} : vector<10x32xf32> to vector<10x8xf32>
    %cst_70 = arith.constant dense<0.000000e+00> : vector<10x10xf32>
    %216 = tpu.matmul %214, %215, %cst_70 {dimension_numbers = #tpu.dot_dimension_numbers<[1], [1], [0], [0], [0, 0, 1, 0], [], []>} : vector<10x8xf32>, vector<10x8xf32>, vector<10x10xf32> -> vector<10x10xf32>
    %cst_71 = arith.constant 0.353553385 : f32
    %217 = vector.broadcast %cst_71 : f32 to vector<10x10xf32>
    %218 = arith.mulf %216, %217 : vector<10x10xf32>
    %219 = arith.addf %218, %159 : vector<10x10xf32>
    %cst_72 = arith.constant dense<0xFF800000> : vector<10xf32>
    %220 = vector.multi_reduction <maximumf>, %219, %cst_72 [1] : vector<10x10xf32> to vector<10xf32>
    %221 = vector.shape_cast %220 : vector<10xf32> to vector<10x1xf32>
    %222 = vector.broadcast %221 : vector<10x1xf32> to vector<10x10xf32>
    %223 = arith.subf %219, %222 : vector<10x10xf32>
    %224 = math.exp %223 : vector<10x10xf32>
    %cst_73 = arith.constant dense<0.000000e+00> : vector<10xf32>
    %225 = vector.multi_reduction <add>, %224, %cst_73 [1] : vector<10x10xf32> to vector<10xf32>
    %226 = vector.shape_cast %225 : vector<10xf32> to vector<10x1xf32>
    %227 = tpu.reciprocal %226 {approx = true} : vector<10x1xf32> -> vector<10x1xf32>
    %228 = vector.broadcast %227 : vector<10x1xf32> to vector<10x10xf32>
    %229 = arith.mulf %224, %228 : vector<10x10xf32>
    %230 = vector.extract_strided_slice %131 {offsets = [0, 24], sizes = [10, 8], strides = [1, 1]} : vector<10x32xf32> to vector<10x8xf32>
    %cst_74 = arith.constant dense<0.000000e+00> : vector<10x8xf32>
    %231 = tpu.matmul %229, %230, %cst_74 {dimension_numbers = #tpu.dot_dimension_numbers<[1], [0], [0], [1], [0, 0, 1, 1], [], []>} : vector<10x10xf32>, vector<10x8xf32>, vector<10x8xf32> -> vector<10x8xf32>
    %232 = tpu.concatenate %177, %195, %213, %231 in 1 : vector<10x8xf32>, vector<10x8xf32>, vector<10x8xf32>, vector<10x8xf32> -> vector<10x32xf32>
    %c96 = arith.constant 96 : index
    %c0_75 = arith.constant 0 : index
    %233 = vector.load %arg3[%c96, %c0_75] : memref<368x128xf32, #tpu.memory_space<vmem>>, vector<32x32xf32>
    %cst_76 = arith.constant dense<0.000000e+00> : vector<10x32xf32>
    %234 = tpu.matmul %232, %233, %cst_76 {dimension_numbers = #tpu.dot_dimension_numbers<[1], [0], [0], [1], [0, 0, 1, 1], [], []>} : vector<10x32xf32>, vector<32x32xf32>, vector<10x32xf32> -> vector<10x32xf32>
    %235 = arith.addf %99, %234 : vector<10x32xf32>
    %c11 = arith.constant 11 : index
    %c0_77 = arith.constant 0 : index
    %236 = vector.load %arg4[%c11, %c0_77] : memref<24x128xf32, #tpu.memory_space<vmem>>, vector<1x32xf32>
    %237 = vector.broadcast %236 : vector<1x32xf32> to vector<10x32xf32>
    %238 = arith.addf %235, %237 : vector<10x32xf32>
    %c12 = arith.constant 12 : index
    %c0_78 = arith.constant 0 : index
    %239 = vector.load %arg4[%c12, %c0_78] : memref<24x128xf32, #tpu.memory_space<vmem>>, vector<1x32xf32>
    %c13 = arith.constant 13 : index
    %c0_79 = arith.constant 0 : index
    %240 = vector.load %arg4[%c13, %c0_79] : memref<24x128xf32, #tpu.memory_space<vmem>>, vector<1x32xf32>
    %cst_80 = arith.constant dense<0.000000e+00> : vector<10xf32>
    %241 = vector.multi_reduction <add>, %238, %cst_80 [1] : vector<10x32xf32> to vector<10xf32>
    %242 = vector.shape_cast %241 : vector<10xf32> to vector<10x1xf32>
    %cst_81 = arith.constant 3.200000e+01 : f32
    %243 = vector.broadcast %cst_81 : f32 to vector<10x1xf32>
    %244 = arith.divf %242, %243 : vector<10x1xf32>
    %245 = vector.broadcast %244 : vector<10x1xf32> to vector<10x32xf32>
    %246 = arith.subf %238, %245 : vector<10x32xf32>
    %247 = arith.mulf %246, %246 : vector<10x32xf32>
    %cst_82 = arith.constant dense<0.000000e+00> : vector<10xf32>
    %248 = vector.multi_reduction <add>, %247, %cst_82 [1] : vector<10x32xf32> to vector<10xf32>
    %249 = vector.shape_cast %248 : vector<10xf32> to vector<10x1xf32>
    %cst_83 = arith.constant 3.200000e+01 : f32
    %250 = vector.broadcast %cst_83 : f32 to vector<10x1xf32>
    %251 = arith.divf %249, %250 : vector<10x1xf32>
    %252 = vector.broadcast %244 : vector<10x1xf32> to vector<10x32xf32>
    %253 = arith.subf %238, %252 : vector<10x32xf32>
    %cst_84 = arith.constant 9.99999974E-6 : f32
    %254 = vector.broadcast %cst_84 : f32 to vector<10x1xf32>
    %255 = arith.addf %251, %254 : vector<10x1xf32>
    %256 = math.rsqrt %255 : vector<10x1xf32>
    %257 = vector.broadcast %256 : vector<10x1xf32> to vector<10x32xf32>
    %258 = arith.mulf %253, %257 : vector<10x32xf32>
    %259 = vector.broadcast %239 : vector<1x32xf32> to vector<10x32xf32>
    %260 = arith.mulf %258, %259 : vector<10x32xf32>
    %261 = vector.broadcast %240 : vector<1x32xf32> to vector<10x32xf32>
    %262 = arith.addf %260, %261 : vector<10x32xf32>
    %c128 = arith.constant 128 : index
    %c0_85 = arith.constant 0 : index
    %263 = vector.load %arg3[%c128, %c0_85] : memref<368x128xf32, #tpu.memory_space<vmem>>, vector<32x128xf32>
    %cst_86 = arith.constant dense<0.000000e+00> : vector<10x128xf32>
    %264 = tpu.matmul %262, %263, %cst_86 {dimension_numbers = #tpu.dot_dimension_numbers<[1], [0], [0], [1], [0, 0, 1, 1], [], []>} : vector<10x32xf32>, vector<32x128xf32>, vector<10x128xf32> -> vector<10x128xf32>
    %c14 = arith.constant 14 : index
    %c0_87 = arith.constant 0 : index
    %265 = vector.load %arg4[%c14, %c0_87] : memref<24x128xf32, #tpu.memory_space<vmem>>, vector<1x128xf32>
    %266 = vector.broadcast %265 : vector<1x128xf32> to vector<10x128xf32>
    %267 = arith.addf %264, %266 : vector<10x128xf32>
    %268 = arith.mulf %267, %267 : vector<10x128xf32>
    %269 = arith.mulf %267, %268 : vector<10x128xf32>
    %cst_88 = arith.constant 4.471500e-02 : f32
    %270 = vector.broadcast %cst_88 : f32 to vector<10x128xf32>
    %271 = arith.mulf %270, %269 : vector<10x128xf32>
    %272 = arith.addf %267, %271 : vector<10x128xf32>
    %cst_89 = arith.constant 0.797884583 : f32
    %273 = vector.broadcast %cst_89 : f32 to vector<10x128xf32>
    %274 = arith.mulf %273, %272 : vector<10x128xf32>
    %275 = math.tanh %274 : vector<10x128xf32>
    %cst_90 = arith.constant 1.000000e+00 : f32
    %276 = vector.broadcast %cst_90 : f32 to vector<10x128xf32>
    %277 = arith.addf %276, %275 : vector<10x128xf32>
    %cst_91 = arith.constant 5.000000e-01 : f32
    %278 = vector.broadcast %cst_91 : f32 to vector<10x128xf32>
    %279 = arith.mulf %278, %277 : vector<10x128xf32>
    %280 = arith.mulf %267, %279 : vector<10x128xf32>
    %c160 = arith.constant 160 : index
    %c0_92 = arith.constant 0 : index
    %281 = vector.load %arg3[%c160, %c0_92] : memref<368x128xf32, #tpu.memory_space<vmem>>, vector<128x32xf32>
    %cst_93 = arith.constant dense<0.000000e+00> : vector<10x32xf32>
    %282 = tpu.matmul %280, %281, %cst_93 {dimension_numbers = #tpu.dot_dimension_numbers<[1], [0], [0], [1], [0, 0, 1, 1], [], []>} : vector<10x128xf32>, vector<128x32xf32>, vector<10x32xf32> -> vector<10x32xf32>
    %283 = arith.addf %238, %282 : vector<10x32xf32>
    %c15 = arith.constant 15 : index
    %c0_94 = arith.constant 0 : index
    %284 = vector.load %arg4[%c15, %c0_94] : memref<24x128xf32, #tpu.memory_space<vmem>>, vector<1x32xf32>
    %285 = vector.broadcast %284 : vector<1x32xf32> to vector<10x32xf32>
    %286 = arith.addf %283, %285 : vector<10x32xf32>
    %c288 = arith.constant 288 : index
    %c0_95 = arith.constant 0 : index
    %287 = vector.load %arg3[%c288, %c0_95] : memref<368x128xf32, #tpu.memory_space<vmem>>, vector<32x16xf32>
    %cst_96 = arith.constant dense<0.000000e+00> : vector<10x16xf32>
    %288 = tpu.matmul %286, %287, %cst_96 {dimension_numbers = #tpu.dot_dimension_numbers<[1], [0], [0], [1], [0, 0, 1, 1], [], []>} : vector<10x32xf32>, vector<32x16xf32>, vector<10x16xf32> -> vector<10x16xf32>
    %c16_97 = arith.constant 16 : index
    %c0_98 = arith.constant 0 : index
    %289 = vector.load %arg4[%c16_97, %c0_98] : memref<24x128xf32, #tpu.memory_space<vmem>>, vector<1x16xf32>
    %290 = vector.broadcast %289 : vector<1x16xf32> to vector<10x16xf32>
    %291 = arith.addf %288, %290 : vector<10x16xf32>
    %292 = math.tanh %291 : vector<10x16xf32>
    %c320 = arith.constant 320 : index
    %c0_99 = arith.constant 0 : index
    %293 = vector.load %arg3[%c320, %c0_99] : memref<368x128xf32, #tpu.memory_space<vmem>>, vector<16x1xf32>
    %cst_100 = arith.constant dense<0.000000e+00> : vector<10x1xf32>
    %294 = tpu.matmul %292, %293, %cst_100 {dimension_numbers = #tpu.dot_dimension_numbers<[1], [0], [0], [1], [0, 0, 1, 1], [], []>} : vector<10x16xf32>, vector<16x1xf32>, vector<10x1xf32> -> vector<10x1xf32>
    %c17 = arith.constant 17 : index
    %c0_101 = arith.constant 0 : index
    %295 = vector.load %arg4[%c17, %c0_101] : memref<24x128xf32, #tpu.memory_space<vmem>>, vector<1x1xf32>
    %296 = vector.broadcast %295 : vector<1x1xf32> to vector<10x1xf32>
    %297 = arith.addf %294, %296 : vector<10x1xf32>
    %298 = vector.extract_strided_slice %286 {offsets = [0, 0], sizes = [5, 32], strides = [1, 1]} : vector<10x32xf32> to vector<5x32xf32>
    %299 = vector.extract_strided_slice %297 {offsets = [0, 0], sizes = [5, 1], strides = [1, 1]} : vector<10x1xf32> to vector<5x1xf32>
    %cst_102 = arith.constant dense<0xFF800000> : vector<1xf32>
    %300 = vector.multi_reduction <maximumf>, %299, %cst_102 [0] : vector<5x1xf32> to vector<1xf32>
    %301 = vector.shape_cast %300 : vector<1xf32> to vector<1x1xf32>
    %302 = vector.broadcast %301 : vector<1x1xf32> to vector<5x1xf32>
    %303 = arith.subf %299, %302 : vector<5x1xf32>
    %304 = math.exp %303 : vector<5x1xf32>
    %cst_103 = arith.constant dense<0.000000e+00> : vector<1xf32>
    %305 = vector.multi_reduction <add>, %304, %cst_103 [0] : vector<5x1xf32> to vector<1xf32>
    %306 = vector.shape_cast %305 : vector<1xf32> to vector<1x1xf32>
    %307 = tpu.reciprocal %306 {approx = true} : vector<1x1xf32> -> vector<1x1xf32>
    %308 = vector.broadcast %307 : vector<1x1xf32> to vector<5x1xf32>
    %309 = arith.mulf %304, %308 : vector<5x1xf32>
    %310 = vector.broadcast %309 : vector<5x1xf32> to vector<5x32xf32>
    %311 = arith.mulf %310, %298 : vector<5x32xf32>
    %cst_104 = arith.constant dense<0.000000e+00> : vector<32xf32>
    %312 = vector.multi_reduction <add>, %311, %cst_104 [0] : vector<5x32xf32> to vector<32xf32>
    %313 = vector.shape_cast %312 : vector<32xf32> to vector<1x32xf32>
    %314 = vector.extract_strided_slice %286 {offsets = [5, 0], sizes = [5, 32], strides = [1, 1]} : vector<10x32xf32> to vector<5x32xf32>
    %315 = vector.extract_strided_slice %297 {offsets = [5, 0], sizes = [5, 1], strides = [1, 1]} : vector<10x1xf32> to vector<5x1xf32>
    %cst_105 = arith.constant dense<0xFF800000> : vector<1xf32>
    %316 = vector.multi_reduction <maximumf>, %315, %cst_105 [0] : vector<5x1xf32> to vector<1xf32>
    %317 = vector.shape_cast %316 : vector<1xf32> to vector<1x1xf32>
    %318 = vector.broadcast %317 : vector<1x1xf32> to vector<5x1xf32>
    %319 = arith.subf %315, %318 : vector<5x1xf32>
    %320 = math.exp %319 : vector<5x1xf32>
    %cst_106 = arith.constant dense<0.000000e+00> : vector<1xf32>
    %321 = vector.multi_reduction <add>, %320, %cst_106 [0] : vector<5x1xf32> to vector<1xf32>
    %322 = vector.shape_cast %321 : vector<1xf32> to vector<1x1xf32>
    %323 = tpu.reciprocal %322 {approx = true} : vector<1x1xf32> -> vector<1x1xf32>
    %324 = vector.broadcast %323 : vector<1x1xf32> to vector<5x1xf32>
    %325 = arith.mulf %320, %324 : vector<5x1xf32>
    %326 = vector.broadcast %325 : vector<5x1xf32> to vector<5x32xf32>
    %327 = arith.mulf %326, %314 : vector<5x32xf32>
    %cst_107 = arith.constant dense<0.000000e+00> : vector<32xf32>
    %328 = vector.multi_reduction <add>, %327, %cst_107 [0] : vector<5x32xf32> to vector<32xf32>
    %329 = vector.shape_cast %328 : vector<32xf32> to vector<1x32xf32>
    %330 = tpu.concatenate %313, %329 in 0 : vector<1x32xf32>, vector<1x32xf32> -> vector<2x32xf32>
    %c336 = arith.constant 336 : index
    %c0_108 = arith.constant 0 : index
    %331 = vector.load %arg3[%c336, %c0_108] : memref<368x128xf32, #tpu.memory_space<vmem>>, vector<32x3xf32>
    %cst_109 = arith.constant dense<0.000000e+00> : vector<2x3xf32>
    %332 = tpu.matmul %330, %331, %cst_109 {dimension_numbers = #tpu.dot_dimension_numbers<[1], [0], [0], [1], [0, 0, 1, 1], [], []>} : vector<2x32xf32>, vector<32x3xf32>, vector<2x3xf32> -> vector<2x3xf32>
    %c18 = arith.constant 18 : index
    %c0_110 = arith.constant 0 : index
    %333 = vector.load %arg4[%c18, %c0_110] : memref<24x128xf32, #tpu.memory_space<vmem>>, vector<1x3xf32>
    %334 = vector.broadcast %333 : vector<1x3xf32> to vector<2x3xf32>
    %335 = arith.addf %332, %334 : vector<2x3xf32>
    %c0_111 = arith.constant 0 : index
    %c0_112 = arith.constant 0 : index
    %336 = vector.load %arg5[%c0_111, %c0_112] : memref<2x3xf32, #tpu.memory_space<vmem>>, vector<2x3xf32>
    tpu.vector_store %arg5[%c0_111, %c0_112], %335 {strides = array<i32>} : memref<2x3xf32, #tpu.memory_space<vmem>>, vector<2x3xf32>,
    return
  }
  func.func @transform_0(%arg0: i32) -> (i32, i32) {
    %c0_i32 = arith.constant 0 : i32
    %c0_i32_0 = arith.constant 0 : i32
    %c0_i32_1 = arith.constant 0 : i32
    return %c0_i32, %c0_i32_0 : i32, i32
  }
  func.func @transform_1(%arg0: i32) -> (i32, i32) {
    %c0_i32 = arith.constant 0 : i32
    %c0_i32_0 = arith.constant 0 : i32
    %c0_i32_1 = arith.constant 0 : i32
    return %c0_i32, %c0_i32_0 : i32, i32
  }
  func.func @transform_2(%arg0: i32) -> (i32, i32) {
    %c0_i32 = arith.constant 0 : i32
    %c0_i32_0 = arith.constant 0 : i32
    %c0_i32_1 = arith.constant 0 : i32
    return %c0_i32, %c0_i32_0 : i32, i32
  }
  func.func @transform_3(%arg0: i32) -> (i32, i32) {
    %c0_i32 = arith.constant 0 : i32
    %c0_i32_0 = arith.constant 0 : i32
    %c0_i32_1 = arith.constant 0 : i32
    return %c0_i32, %c0_i32_0 : i32, i32
  }
  func.func @transform_4(%arg0: i32) -> (i32, i32) {
    %c0_i32 = arith.constant 0 : i32
    %c0_i32_0 = arith.constant 0 : i32
    %c0_i32_1 = arith.constant 0 : i32
    return %c0_i32, %c0_i32_0 : i32, i32
  }
}

</mosaic_0001>

<bundles_post_ra>
// kernel: ht_forward.1
= control target key start
LH: loop header
LB: loop body
LE: loop exit
PB: predicated region body
PF: predicated region fallthrough
CT: control target
= control target key end

     0   :  { %vm89_vm0 = vcmask 130048   ;;  %s14924_s0 = inlined_call_operand.vmem [shape: f32[1024,32], index: 0, kind: input, shape index: {}]   ;;  %s14925_s1 = inlined_call_operand.vmem [shape: f32[2,16], index: 1, kind: input, shape index: {}]   ;;  %s14926_s2 = inlined_call_operand.vmem [shape: f32[368,128], index: 2, kind: input, shape index: {}]   ;;  %s14927_s3 = inlined_call_operand.vmem [shape: f32[24,128], index: 3, kind: input, shape index: {}]   ;;  %s14928_s4 = inlined_call_operand.hbm [shape: f32[2,3], index: 4, kind: output, shape index: {}]  }
   0x1   :  { %v82_v0 = vld [vmem:[%s14926_s2] sm:$0xff]  ;;  %v83_v1 = vld [vmem:[%s14926_s2 + $0x8] sm:$0xff]  ;;  %v20_v5 = vld [vmem:[%s14924_s0 + $0x10] sm:$0xff] }
   0x2   :  { %v18_v2 = vld [vmem:[%s14924_s0] sm:$0xff]  ;;  %v9310_v3 = vpack.c.bf16 %v83_v1, %v82_v0  ;;  %v19_v4 = vld [vmem:[%s14924_s0 + $0x8] sm:$0xff]  ;;  %v21_v6 = vld [vmem:[%s14924_s0 + $0x18] sm:$0xff] }
   0x3   :  { %8758 = vmatprep.mubr.msk.f32.mxu0 %vm89_vm0, %v18_v2  ;;  %v22_v7 = vld [vmem:[%s14924_s0 + $0x20] sm:$0xff]  ;;  %v23_v8 = vld [vmem:[%s14924_s0 + $0x28] sm:$0xff]  ;;  %v24_v9 = vld [vmem:[%s14924_s0 + $0x30] sm:$0xff] }
   0x4   :  { %9311 = vmatprep.subr.bf16.mxu0 %v9310_v3  ;;  %9443 = vmatprep.subr.bf16.mxu1 %v9310_v3  ;;  %v25_v10 = vld [vmem:[%s14924_s0 + $0x38] sm:$0xff]  ;;  %v26_v11 = vld [vmem:[%s14924_s0 + $0x40] sm:$0xff]  ;;  %v27_v12 = vld [vmem:[%s14924_s0 + $0x48] sm:$0xff] }
   0x5   :  { %9313 = vmatpush3.bf16.msra.mxu0 %v9310_v3  ;;  %9444 = vmatpush3.bf16.msra.mxu1 %v9310_v3  ;;  %v28_v13 = vld [vmem:[%s14924_s0 + $0x50] sm:$0xff]  ;;  %v81_v15 = vld [vmem:[%s14924_s0 + $0x1f8] sm:$0xff] }
   0x6   :  { %v80_v14 = vld [vmem:[%s14924_s0 + $0x1f0] sm:$0xff] }
   0x7   :  { %8851 = vmatprep.mubr.msk.f32.mxu1 %vm89_vm0, %v80_v14 }
   0x8   :  { %8759 = vmatmul.mubr.msk.f32.vlgmr.msra.gmra.mrb[0].mxu0 %vm89_vm0, %v19_v4 }
   0x9   :  { %8761 = vmatprep.mubr.msk.f32.mxu0 %vm89_vm0, %v20_v5 }
   0xc   :  { %8762 = vmatmul.mubr.msk.f32.gmra.mrb[2].mxu0 %vm89_vm0, %v21_v6 }
   0xd   :  { %8764 = vmatprep.mubr.msk.f32.mxu0 %vm89_vm0, %v22_v7 }
  0x10   :  { %8765 = vmatmul.mubr.msk.f32.gmra.mrb[4].mxu0 %vm89_vm0, %v23_v8 }
  0x11   :  { %8767 = vmatprep.mubr.msk.f32.mxu0 %vm89_vm0, %v24_v9 }
  0x14   :  { %8768 = vmatmul.mubr.msk.f32.gmra.mrb[6].mxu0 %vm89_vm0, %v25_v10 }
  0x15   :  { %8770 = vmatprep.mubr.msk.f32.mxu0 %vm89_vm0, %v26_v11 }
  0x16   :  { %9 = vsyncpa [#allocation3], 0  ;;  %8852 = vmatmul.mubr.msk.f32.vlgmr.msra.gmra.mrb[0].mxu1 %vm89_vm0, %v81_v15  ;;  %v29_v16 = vld [vmem:[%s14924_s0 + $0x58] sm:$0xff]  ;;  %v30_v17 = vld [vmem:[%s14924_s0 + $0x60] sm:$0xff]  ;;  %s10108_s23 = smov 8   ;;  %vm987_vm1 = vcmask 64512  }
  0x17   :  { %v31_v18 = vld [vmem:[%s14924_s0 + $0x68] sm:$0xff]  ;;  %v32_v19 = vld [vmem:[%s14924_s0 + $0x70] sm:$0xff]  ;;  %v33_v20 = vld [vmem:[%s14924_s0 + $0x78] sm:$0xff]  ;;  %s10109_s26 = smov 120   ;;  %vm15178_vm2 = vmmov 0   ;;  %vm15180_vm3 = vcmask 261120  }
  0x18   :  { %8771 = vmatmul.mubr.msk.f32.gmra.mrb[8].mxu0 %vm89_vm0, %v27_v12  ;;  %v34_v21 = vld [vmem:[%s14924_s0 + $0x80] sm:$0xff]  ;;  %v35_v22 = vld [vmem:[%s14924_s0 + $0x88] sm:$0xff]  ;;  %v36_v23 = vld [vmem:[%s14924_s0 + $0x90] sm:$0xff]  ;;  %vm6336_vm4 = vcmask 1041409   ;;  %vm6338_vm5 = vcmask 1042434   ;;  %vm6340_vm6 = vcmask 1043459  }
  0x19   :  { %8773 = vmatprep.mubr.msk.f32.mxu0 %vm89_vm0, %v28_v13  ;;  %v37_v24 = vld [vmem:[%s14924_s0 + $0x98] sm:$0xff]  ;;  %v38_v25 = vld [vmem:[%s14924_s0 + $0xa0] sm:$0xff]  ;;  %v39_v26 = vld [vmem:[%s14924_s0 + $0xa8] sm:$0xff]  ;;  %vm6356_vm7 = vcmask 1043456   ;;  %vm6350_vm8 = vcmask 1046534   ;;  %vm6352_vm9 = vcmask 1047559  }
  0x1a   :  { %v40_v27 = vld [vmem:[%s14924_s0 + $0xb0] sm:$0xff]  ;;  %v41_v28 = vld [vmem:[%s14924_s0 + $0xb8] sm:$0xff]  ;;  %v42_v29 = vld [vmem:[%s14924_s0 + $0xc0] sm:$0xff]  ;;  %vm6358_vm10 = vcmask 1044480   ;;  %vm15177_vm11 = vcmask 1040384   ;;  %vm15179_vm12 = vcmask 254976  }
  0x1b   :  { %v43_v30 = vld [vmem:[%s14924_s0 + $0xc8] sm:$0xff]  ;;  %v44_v31 = vld [vmem:[%s14924_s0 + $0xd0] sm:$0xff]  ;;  %v45_v32 = vld [vmem:[%s14924_s0 + $0xd8] sm:$0xff]  ;;  %s10113_s28 = smov 96   ;;  %vm6653_vm14 = vcmask 1041408   ;;  %vm10115_vm15 = vmmov 1  }
  0x1c   :  { %8774 = vmatmul.mubr.msk.f32.gmra.mrb[10].mxu0 %vm89_vm0, %v29_v16  ;;  %v46_v33 = vld [vmem:[%s14924_s0 + $0xe0] sm:$0xff]  ;;  %v47_v34 = vld [vmem:[%s14924_s0 + $0xe8] sm:$0xff]  ;;  %v48_v35 = vld [vmem:[%s14924_s0 + $0xf0] sm:$0xff]  ;;  %s10118_s29 = smov 80   ;;  %s10119_s30 = smov 56  }
  0x1d   :  { %8776 = vmatprep.mubr.msk.f32.mxu0 %vm89_vm0, %v30_v17  ;;  %v49_v36 = vld [vmem:[%s14924_s0 + $0xf8] sm:$0xff]  ;;  %v50_v37 = vld [vmem:[%s14924_s0 + $0x100] sm:$0xff]  ;;  %v51_v38 = vld [vmem:[%s14924_s0 + $0x108] sm:$0xff]  ;;  %s10120_s5 = smov 112   ;;  %s10121_s6 = smov 72  }
  0x1e   :  { %v52_v39 = vld [vmem:[%s14924_s0 + $0x110] sm:$0xff]  ;;  %v53_v40 = vld [vmem:[%s14924_s0 + $0x118] sm:$0xff]  ;;  %v54_v41 = vld [vmem:[%s14924_s0 + $0x120] sm:$0xff]  ;;  %s10122_s7 = smov 104   ;;  %s10123_s8 = smov 48  }
  0x1f   :  { %v55_v42 = vld [vmem:[%s14924_s0 + $0x128] sm:$0xff]  ;;  %v56_v43 = vld [vmem:[%s14924_s0 + $0x130] sm:$0xff]  ;;  %v57_v44 = vld [vmem:[%s14924_s0 + $0x138] sm:$0xff]  ;;  %s10124_s9 = smov 40   ;;  %s10125_s10 = smov 16  }
  0x20   :  { %8777 = vmatmul.mubr.msk.f32.gmra.mrb[12].mxu0 %vm89_vm0, %v31_v18  ;;  %v58_v45 = vld [vmem:[%s14924_s0 + $0x140] sm:$0xff]  ;;  %v59_v46 = vld [vmem:[%s14924_s0 + $0x148] sm:$0xff]  ;;  %v60_v47 = vld [vmem:[%s14924_s0 + $0x150] sm:$0xff]  ;;  %s10126_s17 = smov 24  }
  0x21   :  { %8779 = vmatprep.mubr.msk.f32.mxu0 %vm89_vm0, %v32_v19  ;;  %v61_v48 = vld [vmem:[%s14924_s0 + $0x158] sm:$0xff]  ;;  %v62_v49 = vld [vmem:[%s14924_s0 + $0x160] sm:$0xff]  ;;  %v63_v50 = vld [vmem:[%s14924_s0 + $0x168] sm:$0xff] }
  0x22   :  { %v64_v51 = vld [vmem:[%s14924_s0 + $0x170] sm:$0xff]  ;;  %v65_v52 = vld [vmem:[%s14924_s0 + $0x178] sm:$0xff]  ;;  %v66_v53 = vld [vmem:[%s14924_s0 + $0x180] sm:$0xff] }
  0x23   :  { %v67_v54 = vld [vmem:[%s14924_s0 + $0x188] sm:$0xff]  ;;  %v68_v55 = vld [vmem:[%s14924_s0 + $0x190] sm:$0xff]  ;;  %v69_v56 = vld [vmem:[%s14924_s0 + $0x198] sm:$0xff] }
  0x24   :  { %8780 = vmatmul.mubr.msk.f32.gmra.mrb[14].mxu0 %vm89_vm0, %v33_v20  ;;  %v70_v57 = vld [vmem:[%s14924_s0 + $0x1a0] sm:$0xff]  ;;  %v71_v58 = vld [vmem:[%s14924_s0 + $0x1a8] sm:$0xff]  ;;  %v72_v59 = vld [vmem:[%s14924_s0 + $0x1b0] sm:$0xff] }
  0x25   :  { %8782 = vmatprep.mubr.msk.f32.mxu0 %vm89_vm0, %v34_v21  ;;  %v73_v60 = vld [vmem:[%s14924_s0 + $0x1b8] sm:$0xff]  ;;  %v74_v61 = vld [vmem:[%s14924_s0 + $0x1c0] sm:$0xff]  ;;  %v75_v62 = vld [vmem:[%s14924_s0 + $0x1c8] sm:$0xff] }
  0x26   :  { %v76_v63 = vld [vmem:[%s14924_s0 + $0x1d0] sm:$0xff]  ;;  %v77_v0 = vld [vmem:[%s14924_s0 + $0x1d8] sm:$0xff]  ;;  %v78_v1 = vld [vmem:[%s14924_s0 + $0x1e0] sm:$0xff] }
  0x27   :  { %v79_v2 = vld [vmem:[%s14924_s0 + $0x1e8] sm:$0xff]  ;;  %v1052_v3 = vld [vmem:[%s14926_s2 + $0x10] sm:$0xff]  ;;  %v1053_v4 = vld [vmem:[%s14926_s2 + $0x18] sm:$0xff] }
  0x28   :  { %8783 = vmatmul.mubr.msk.f32.gmra.mrb[16].mxu0 %vm89_vm0, %v35_v22  ;;  %v9314_v5 = vpack.c.bf16 %v1053_v4, %v1052_v3  ;;  %v10425_v6 = vld [vmem:[%s14927_s3] ss:$0 sm:$0xff]  ;;  %vm14630_vm13 = vmpackc.low %vm987_vm1, %vm987_vm1 }
  0x29   :  { %8785 = vmatprep.mubr.msk.f32.mxu0 %vm89_vm0, %v36_v23 }
  0x2a   :  { %9315 = vmatprep.subr.bf16.mxu1 %v9314_v5 }
  0x2b   :  { %9317 = vmatpush3.bf16.msra.mxu1 %v9314_v5 }
  0x2c   :  { %8786 = vmatmul.mubr.msk.f32.gmra.mrb[18].mxu0 %vm89_vm0, %v37_v24 }
  0x2d   :  { %8788 = vmatprep.mubr.msk.f32.mxu0 %vm89_vm0, %v38_v25 }
  0x30   :  { %8789 = vmatmul.mubr.msk.f32.gmra.mrb[20].mxu0 %vm89_vm0, %v39_v26 }
  0x31   :  { %8791 = vmatprep.mubr.msk.f32.mxu0 %vm89_vm0, %v40_v27 }
  0x34   :  { %8792 = vmatmul.mubr.msk.f32.gmra.mrb[22].mxu0 %vm89_vm0, %v41_v28 }
  0x35   :  { %8794 = vmatprep.mubr.msk.f32.mxu0 %vm89_vm0, %v42_v29 }
  0x38   :  { %8795 = vmatmul.mubr.msk.f32.gmra.mrb[24].mxu0 %vm89_vm0, %v43_v30 }
  0x39   :  { %8797 = vmatprep.mubr.msk.f32.mxu0 %vm89_vm0, %v44_v31 }
  0x3c   :  { %8798 = vmatmul.mubr.msk.f32.gmra.mrb[26].mxu0 %vm89_vm0, %v45_v32 }
  0x3d   :  { %8800 = vmatprep.mubr.msk.f32.mxu0 %vm89_vm0, %v46_v33 }
  0x40   :  { %8801 = vmatmul.mubr.msk.f32.gmra.mrb[28].mxu0 %vm89_vm0, %v47_v34 }
  0x41   :  { %8803 = vmatprep.mubr.msk.f32.mxu0 %vm89_vm0, %v48_v35 }
  0x44   :  { %8804 = vmatmul.mubr.msk.f32.gmra.mrb[30].mxu0 %vm89_vm0, %v49_v36 }
  0x45   :  { %8806 = vmatprep.mubr.msk.f32.mxu0 %vm89_vm0, %v50_v37 }
  0x48   :  { %8807 = vmatmul.mubr.msk.f32.gmra.mrb[32].mxu0 %vm89_vm0, %v51_v38 }
  0x49   :  { %8809 = vmatprep.mubr.msk.f32.mxu0 %vm89_vm0, %v52_v39 }
  0x4c   :  { %8810 = vmatmul.mubr.msk.f32.gmra.mrb[34].mxu0 %vm89_vm0, %v53_v40 }
  0x4d   :  { %8812 = vmatprep.mubr.msk.f32.mxu0 %vm89_vm0, %v54_v41 }
  0x50   :  { %8813 = vmatmul.mubr.msk.f32.gmra.mrb[36].mxu0 %vm89_vm0, %v55_v42 }
  0x51   :  { %8815 = vmatprep.mubr.msk.f32.mxu0 %vm89_vm0, %v56_v43 }
  0x54   :  { %8816 = vmatmul.mubr.msk.f32.gmra.mrb[38].mxu0 %vm89_vm0, %v57_v44 }
  0x55   :  { %8818 = vmatprep.mubr.msk.f32.mxu0 %vm89_vm0, %v58_v45 }
  0x58   :  { %8819 = vmatmul.mubr.msk.f32.gmra.mrb[40].mxu0 %vm89_vm0, %v59_v46 }
  0x59   :  { %8821 = vmatprep.mubr.msk.f32.mxu0 %vm89_vm0, %v60_v47 }
  0x5c   :  { %8822 = vmatmul.mubr.msk.f32.gmra.mrb[42].mxu0 %vm89_vm0, %v61_v48 }
  0x5d   :  { %8824 = vmatprep.mubr.msk.f32.mxu0 %vm89_vm0, %v62_v49 }
  0x60   :  { %8825 = vmatmul.mubr.msk.f32.gmra.mrb[44].mxu0 %vm89_vm0, %v63_v50 }
  0x61   :  { %8827 = vmatprep.mubr.msk.f32.mxu0 %vm89_vm0, %v64_v51 }
  0x64   :  { %8828 = vmatmul.mubr.msk.f32.gmra.mrb[46].mxu0 %vm89_vm0, %v65_v52 }
  0x65   :  { %8830 = vmatprep.mubr.msk.f32.mxu0 %vm89_vm0, %v66_v53 }
  0x68   :  { %8831 = vmatmul.mubr.msk.f32.gmra.mrb[48].mxu0 %vm89_vm0, %v67_v54 }
  0x69   :  { %8833 = vmatprep.mubr.msk.f32.mxu0 %vm89_vm0, %v68_v55 }
  0x6c   :  { %8834 = vmatmul.mubr.msk.f32.gmra.mrb[50].mxu0 %vm89_vm0, %v69_v56 }
  0x6d   :  { %8836 = vmatprep.mubr.msk.f32.mxu0 %vm89_vm0, %v70_v57 }
  0x70   :  { %8837 = vmatmul.mubr.msk.f32.gmra.mrb[52].mxu0 %vm89_vm0, %v71_v58 }
  0x71   :  { %8839 = vmatprep.mubr.msk.f32.mxu0 %vm89_vm0, %v72_v59 }
  0x74   :  { %8840 = vmatmul.mubr.msk.f32.gmra.mrb[54].mxu0 %vm89_vm0, %v73_v60 }
  0x75   :  { %8842 = vmatprep.mubr.msk.f32.mxu0 %vm89_vm0, %v74_v61 }
  0x78   :  { %8843 = vmatmul.mubr.msk.f32.gmra.mrb[56].mxu0 %vm89_vm0, %v75_v62 }
  0x79   :  { %8845 = vmatprep.mubr.msk.f32.mxu0 %vm89_vm0, %v76_v63 }
  0x7c   :  { %8846 = vmatmul.mubr.msk.f32.gmra.mrb[58].mxu0 %vm89_vm0, %v77_v0 }
  0x7d   :  { %8848 = vmatprep.mubr.msk.f32.mxu0 %vm89_vm0, %v78_v1 }
  0x80   :  { %8849 = vmatmul.mubr.msk.f32.gmra.mrb[60].mxu0 %vm89_vm0, %v79_v2 }
  0xdb   :  { %v8760_v7 = vpop.f32.mrb[0].mxu0 }
  0xdc   :  { %v348_v8 = vpop.f32.mrb[1].mxu0  ;;  %v10431_v10 = vadd.f32 %v8760_v7, %v10425_v6 }
  0xdd   :  { %v10428_v9 = vadd.f32 %v10425_v6, %v348_v8 }
  0xde   :  { %15182 = vst [vmem:[#allocation6_spill] sm:$0xff] %v10431_v10  ;;  %v668_v18 = vmul.f32 %v10431_v10, %v10431_v10 }
  0xdf   :  { %15181 = vst [vmem:[#allocation5_spill] sm:$0xff] %v10428_v9  ;;  %v8763_v11 = vpop.f32.mrb[2].mxu0  ;;  %v667_v12 = vmul.f32 %v10428_v9, %v10428_v9 }
  0xe0   :  { %v358_v13 = vpop.f32.mrb[3].mxu0  ;;  %v10440_v15 = vadd.f32 %v8763_v11, %v10425_v6 }
  0xe1   :  { %v10436_v14 = vadd.f32 %v10425_v6, %v358_v13  ;;  %795 = vrot.lane.b32.xlu0 %v667_v12, %s10108_s23 }
  0xe2   :  { %15184 = vst [vmem:[#allocation8_spill] sm:$0xff] %v10440_v15  ;;  %v670_v23 = vmul.f32 %v10440_v15, %v10440_v15 }
  0xe3   :  { %15183 = vst [vmem:[#allocation7_spill] sm:$0xff] %v10436_v14  ;;  %v8766_v16 = vpop.f32.mrb[4].mxu0  ;;  %v669_v17 = vmul.f32 %v10436_v14, %v10436_v14 }
  0xe4   :  { %v368_v19 = vpop.f32.mrb[5].mxu0  ;;  %v10447_v20 = vadd.f32 %v8766_v16, %v10425_v6 }
  0xe5   :  { %v10450_v21 = vadd.f32 %v10425_v6, %v368_v19  ;;  %799 = vrot.lane.b32.xlu1 %v669_v17, %s10108_s23  ;;  %797 = vrot.lane.b32.xlu0 %v668_v18, %s10108_s23 }
  0xe6   :  { %15185 = vst [vmem:[#allocation9_spill] sm:$0xff] %v10447_v20  ;;  %v672_v28 = vmul.f32 %v10447_v20, %v10447_v20 }
  0xe7   :  { %15186 = vst [vmem:[#allocation10_spill] sm:$0xff] %v10450_v21  ;;  %v8769_v22 = vpop.f32.mrb[6].mxu0  ;;  %v671_v24 = vmul.f32 %v10450_v21, %v10450_v21 }
  0xe8   :  { %v378_v25 = vpop.f32.mrb[7].mxu0  ;;  %v10459_v26 = vadd.f32 %v8769_v22, %v10425_v6 }
  0xe9   :  { %v10462_v27 = vadd.f32 %v10425_v6, %v378_v25  ;;  %801 = vrot.lane.b32.xlu1 %v670_v23, %s10108_s23  ;;  %803 = vrot.lane.b32.xlu0 %v671_v24, %s10108_s23  ;;  %v10470_v31 = vpop.f32.mrb[0].mxu1 }
  0xea   :  { %15187 = vst [vmem:[#allocation11_spill] sm:$0xff] %v10459_v26  ;;  %v10472_v33 = vpop.f32.mrb[1].mxu1  ;;  %v674_v36 = vmul.f32 %v10459_v26, %v10459_v26 }
  0xeb   :  { %15188 = vst [vmem:[#allocation12_spill] sm:$0xff] %v10462_v27  ;;  %v8772_v29 = vpop.f32.mrb[8].mxu0  ;;  %v673_v30 = vmul.f32 %v10462_v27, %v10462_v27 }
  0xec   :  { %v388_v32 = vpop.f32.mrb[9].mxu0  ;;  %v10475_v34 = vadd.f32 %v8772_v29, %v10425_v6 }
  0xed   :  { %v10478_v35 = vadd.f32 %v10425_v6, %v388_v32  ;;  %805 = vrot.lane.b32.xlu1 %v672_v28, %s10108_s23  ;;  %807 = vrot.lane.b32.xlu0 %v673_v30, %s10108_s23 }
  0xee   :  { %15189 = vst [vmem:[#allocation13_spill] sm:$0xff] %v10475_v34  ;;  %v676_v42 = vmul.f32 %v10475_v34, %v10475_v34 }
  0xef   :  { %15190 = vst [vmem:[#allocation14_spill] sm:$0xff] %v10478_v35  ;;  %v8775_v37 = vpop.f32.mrb[10].mxu0  ;;  %v675_v38 = vmul.f32 %v10478_v35, %v10478_v35 }
  0xf0   :  { %v398_v39 = vpop.f32.mrb[11].mxu0  ;;  %v10487_v40 = vadd.f32 %v8775_v37, %v10425_v6 }
  0xf1   :  { %v10490_v41 = vadd.f32 %v10425_v6, %v398_v39  ;;  %809 = vrot.lane.b32.xlu1 %v674_v36, %s10108_s23  ;;  %811 = vrot.lane.b32.xlu0 %v675_v38, %s10108_s23 }
  0xf2   :  { %15191 = vst [vmem:[#allocation15_spill] sm:$0xff] %v10487_v40  ;;  %v678_v48 = vmul.f32 %v10487_v40, %v10487_v40 }
  0xf3   :  { %15192 = vst [vmem:[#allocation16_spill] sm:$0xff] %v10490_v41  ;;  %v8778_v43 = vpop.f32.mrb[12].mxu0  ;;  %v677_v44 = vmul.f32 %v10490_v41, %v10490_v41 }
  0xf4   :  { %v408_v45 = vpop.f32.mrb[13].mxu0  ;;  %v10499_v46 = vadd.f32 %v8778_v43, %v10425_v6 }
  0xf5   :  { %v10502_v47 = vadd.f32 %v10425_v6, %v408_v45  ;;  %813 = vrot.lane.b32.xlu1 %v676_v42, %s10108_s23  ;;  %815 = vrot.lane.b32.xlu0 %v677_v44, %s10108_s23 }
  0xf6   :  { %15193 = vst [vmem:[#allocation17_spill] sm:$0xff] %v10499_v46  ;;  %v680_v54 = vmul.f32 %v10499_v46, %v10499_v46 }
  0xf7   :  { %15194 = vst [vmem:[#allocation18_spill] sm:$0xff] %v10502_v47  ;;  %v8781_v49 = vpop.f32.mrb[14].mxu0  ;;  %v679_v50 = vmul.f32 %v10502_v47, %v10502_v47 }
  0xf8   :  { %v418_v51 = vpop.f32.mrb[15].mxu0  ;;  %v10511_v52 = vadd.f32 %v8781_v49, %v10425_v6 }
  0xf9   :  { %v10514_v53 = vadd.f32 %v10425_v6, %v418_v51  ;;  %817 = vrot.lane.b32.xlu1 %v678_v48, %s10108_s23  ;;  %819 = vrot.lane.b32.xlu0 %v679_v50, %s10108_s23 }
  0xfa   :  { %15195 = vst [vmem:[#allocation19_spill] sm:$0xff] %v10511_v52  ;;  %v682_v60 = vmul.f32 %v10511_v52, %v10511_v52 }
  0xfb   :  { %15196 = vst [vmem:[#allocation20_spill] sm:$0xff] %v10514_v53  ;;  %v8784_v55 = vpop.f32.mrb[16].mxu0  ;;  %v681_v56 = vmul.f32 %v10514_v53, %v10514_v53 }
  0xfc   :  { %v428_v57 = vpop.f32.mrb[17].mxu0  ;;  %v10523_v58 = vadd.f32 %v8784_v55, %v10425_v6 }
  0xfd   :  { %v10526_v59 = vadd.f32 %v10425_v6, %v428_v57  ;;  %821 = vrot.lane.b32.xlu1 %v680_v54, %s10108_s23  ;;  %823 = vrot.lane.b32.xlu0 %v681_v56, %s10108_s23 }
  0xfe   :  { %15197 = vst [vmem:[#allocation21_spill] sm:$0xff] %v10523_v58  ;;  %v684_v2 = vmul.f32 %v10523_v58, %v10523_v58 }
  0xff   :  { %15198 = vst [vmem:[#allocation22_spill] sm:$0xff] %v10526_v59  ;;  %v8787_v61 = vpop.f32.mrb[18].mxu0  ;;  %v683_v62 = vmul.f32 %v10526_v59, %v10526_v59 }
 0x100   :  { %v438_v63 = vpop.f32.mrb[19].mxu0  ;;  %v10535_v0 = vadd.f32 %v8787_v61, %v10425_v6 }
 0x101   :  { %v10538_v1 = vadd.f32 %v10425_v6, %v438_v63  ;;  %825 = vrot.lane.b32.xlu1 %v682_v60, %s10108_s23  ;;  %827 = vrot.lane.b32.xlu0 %v683_v62, %s10108_s23 }
 0x102   :  { %15199 = vst [vmem:[#allocation23_spill] sm:$0xff] %v10535_v0  ;;  %v686_v11 = vmul.f32 %v10535_v0, %v10535_v0 }
 0x103   :  { %15200 = vst [vmem:[#allocation24_spill] sm:$0xff] %v10538_v1  ;;  %v8790_v3 = vpop.f32.mrb[20].mxu0  ;;  %v685_v4 = vmul.f32 %v10538_v1, %v10538_v1 }
 0x104   :  { %v448_v5 = vpop.f32.mrb[21].mxu0  ;;  %v10547_v7 = vadd.f32 %v8790_v3, %v10425_v6 }
 0x105   :  { %v10550_v8 = vadd.f32 %v10425_v6, %v448_v5  ;;  %829 = vrot.lane.b32.xlu1 %v684_v2, %s10108_s23  ;;  %831 = vrot.lane.b32.xlu0 %v685_v4, %s10108_s23 }
 0x106   :  { %15201 = vst [vmem:[#allocation25_spill] sm:$0xff] %v10547_v7  ;;  %v688_v19 = vmul.f32 %v10547_v7, %v10547_v7 }
 0x107   :  { %15202 = vst [vmem:[#allocation26_spill] sm:$0xff] %v10550_v8  ;;  %v8793_v12 = vpop.f32.mrb[22].mxu0  ;;  %v687_v13 = vmul.f32 %v10550_v8, %v10550_v8 }
 0x108   :  { %v458_v16 = vpop.f32.mrb[23].mxu0  ;;  %v10559_v17 = vadd.f32 %v8793_v12, %v10425_v6 }
 0x109   :  { %v10562_v18 = vadd.f32 %v10425_v6, %v458_v16  ;;  %833 = vrot.lane.b32.xlu1 %v686_v11, %s10108_s23  ;;  %835 = vrot.lane.b32.xlu0 %v687_v13, %s10108_s23 }
 0x10a   :  { %15203 = vst [vmem:[#allocation27_spill] sm:$0xff] %v10559_v17  ;;  %v690_v29 = vmul.f32 %v10559_v17, %v10559_v17 }
 0x10b   :  { %15204 = vst [vmem:[#allocation28_spill] sm:$0xff] %v10562_v18  ;;  %v8796_v22 = vpop.f32.mrb[24].mxu0  ;;  %v689_v23 = vmul.f32 %v10562_v18, %v10562_v18 }
 0x10c   :  { %v468_v24 = vpop.f32.mrb[25].mxu0  ;;  %v10571_v25 = vadd.f32 %v8796_v22, %v10425_v6 }
 0x10d   :  { %v10574_v28 = vadd.f32 %v10425_v6, %v468_v24  ;;  %837 = vrot.lane.b32.xlu1 %v688_v19, %s10108_s23  ;;  %839 = vrot.lane.b32.xlu0 %v689_v23, %s10108_s23 }
 0x10e   :  { %15205 = vst [vmem:[#allocation29_spill] sm:$0xff] %v10571_v25  ;;  %v692_v39 = vmul.f32 %v10571_v25, %v10571_v25 }
 0x10f   :  { %15206 = vst [vmem:[#allocation30_spill] sm:$0xff] %v10574_v28  ;;  %v8799_v30 = vpop.f32.mrb[26].mxu0  ;;  %v691_v32 = vmul.f32 %v10574_v28, %v10574_v28 }
 0x110   :  { %v478_v36 = vpop.f32.mrb[27].mxu0  ;;  %v10583_v37 = vadd.f32 %v8799_v30, %v10425_v6 }
 0x111   :  { %v10586_v38 = vadd.f32 %v10425_v6, %v478_v36  ;;  %841 = vrot.lane.b32.xlu1 %v690_v29, %s10108_s23  ;;  %843 = vrot.lane.b32.xlu0 %v691_v32, %s10108_s23 }
 0x112   :  { %15207 = vst [vmem:[#allocation31_spill] sm:$0xff] %v10583_v37  ;;  %v694_v49 = vmul.f32 %v10583_v37, %v10583_v37 }
 0x113   :  { %15208 = vst [vmem:[#allocation32_spill] sm:$0xff] %v10586_v38  ;;  %v8802_v42 = vpop.f32.mrb[28].mxu0  ;;  %v693_v43 = vmul.f32 %v10586_v38, %v10586_v38 }
 0x114   :  { %v488_v44 = vpop.f32.mrb[29].mxu0  ;;  %v10595_v45 = vadd.f32 %v8802_v42, %v10425_v6 }
 0x115   :  { %v10598_v48 = vadd.f32 %v10425_v6, %v488_v44  ;;  %845 = vrot.lane.b32.xlu1 %v692_v39, %s10108_s23  ;;  %847 = vrot.lane.b32.xlu0 %v693_v43, %s10108_s23 }
 0x116   :  { %15209 = vst [vmem:[#allocation33_spill] sm:$0xff] %v10595_v45  ;;  %v696_v57 = vmul.f32 %v10595_v45, %v10595_v45 }
 0x117   :  { %15210 = vst [vmem:[#allocation34_spill] sm:$0xff] %v10598_v48  ;;  %v8805_v50 = vpop.f32.mrb[30].mxu0  ;;  %v695_v51 = vmul.f32 %v10598_v48, %v10598_v48 }
 0x118   :  { %v498_v54 = vpop.f32.mrb[31].mxu0  ;;  %v10607_v55 = vadd.f32 %v8805_v50, %v10425_v6 }
 0x119   :  { %v10610_v56 = vadd.f32 %v10425_v6, %v498_v54  ;;  %849 = vrot.lane.b32.xlu1 %v694_v49, %s10108_s23  ;;  %851 = vrot.lane.b32.xlu0 %v695_v51, %s10108_s23 }
 0x11a   :  { %15211 = vst [vmem:[#allocation35_spill] sm:$0xff] %v10607_v55  ;;  %v698_v3 = vmul.f32 %v10607_v55, %v10607_v55 }
 0x11b   :  { %15212 = vst [vmem:[#allocation36_spill] sm:$0xff] %v10610_v56  ;;  %v8808_v60 = vpop.f32.mrb[32].mxu0  ;;  %v697_v61 = vmul.f32 %v10610_v56, %v10610_v56 }
 0x11c   :  { %v508_v62 = vpop.f32.mrb[33].mxu0  ;;  %v10619_v63 = vadd.f32 %v8808_v60, %v10425_v6 }
 0x11d   :  { %v10622_v2 = vadd.f32 %v10425_v6, %v508_v62  ;;  %853 = vrot.lane.b32.xlu1 %v696_v57, %s10108_s23  ;;  %855 = vrot.lane.b32.xlu0 %v697_v61, %s10108_s23 }
 0x11e   :  { %15213 = vst [vmem:[#allocation37_spill] sm:$0xff] %v10619_v63  ;;  %v700_v16 = vmul.f32 %v10619_v63, %v10619_v63 }
 0x11f   :  { %15214 = vst [vmem:[#allocation38_spill] sm:$0xff] %v10622_v2  ;;  %v8811_v4 = vpop.f32.mrb[34].mxu0  ;;  %v699_v5 = vmul.f32 %v10622_v2, %v10622_v2 }
 0x120   :  { %v518_v11 = vpop.f32.mrb[35].mxu0  ;;  %v10631_v12 = vadd.f32 %v8811_v4, %v10425_v6 }
 0x121   :  { %v10634_v13 = vadd.f32 %v10425_v6, %v518_v11  ;;  %857 = vrot.lane.b32.xlu1 %v698_v3, %s10108_s23  ;;  %859 = vrot.lane.b32.xlu0 %v699_v5, %s10108_s23 }
 0x122   :  { %15215 = vst [vmem:[#allocation39_spill] sm:$0xff] %v10631_v12  ;;  %v702_v30 = vmul.f32 %v10631_v12, %v10631_v12 }
 0x123   :  { %15216 = vst [vmem:[#allocation40_spill] sm:$0xff] %v10634_v13  ;;  %v8814_v19 = vpop.f32.mrb[36].mxu0  ;;  %v701_v22 = vmul.f32 %v10634_v13, %v10634_v13 }
 0x124   :  { %v528_v23 = vpop.f32.mrb[37].mxu0  ;;  %v10643_v24 = vadd.f32 %v8814_v19, %v10425_v6 }
 0x125   :  { %v10646_v29 = vadd.f32 %v10425_v6, %v528_v23  ;;  %861 = vrot.lane.b32.xlu1 %v700_v16, %s10108_s23  ;;  %863 = vrot.lane.b32.xlu0 %v701_v22, %s10108_s23 }
 0x126   :  { %15217 = vst [vmem:[#allocation41_spill] sm:$0xff] %v10643_v24  ;;  %v704_v44 = vmul.f32 %v10643_v24, %v10643_v24 }
 0x127   :  { %15218 = vst [vmem:[#allocation42_spill] sm:$0xff] %v10646_v29  ;;  %v8817_v32 = vpop.f32.mrb[38].mxu0  ;;  %v703_v36 = vmul.f32 %v10646_v29, %v10646_v29 }
 0x128   :  { %v538_v39 = vpop.f32.mrb[39].mxu0  ;;  %v10655_v42 = vadd.f32 %v8817_v32, %v10425_v6 }
 0x129   :  { %v10658_v43 = vadd.f32 %v10425_v6, %v538_v39  ;;  %865 = vrot.lane.b32.xlu1 %v702_v30, %s10108_s23  ;;  %867 = vrot.lane.b32.xlu0 %v703_v36, %s10108_s23 }
 0x12a   :  { %15219 = vst [vmem:[#allocation43_spill] sm:$0xff] %v10655_v42  ;;  %v706_v60 = vmul.f32 %v10655_v42, %v10655_v42 }
 0x12b   :  { %15220 = vst [vmem:[#allocation44_spill] sm:$0xff] %v10658_v43  ;;  %v8820_v49 = vpop.f32.mrb[40].mxu0  ;;  %v705_v50 = vmul.f32 %v10658_v43, %v10658_v43 }
 0x12c   :  { %v548_v51 = vpop.f32.mrb[41].mxu0  ;;  %v10667_v54 = vadd.f32 %v8820_v49, %v10425_v6 }
 0x12d   :  { %v10670_v57 = vadd.f32 %v10425_v6, %v548_v51  ;;  %869 = vrot.lane.b32.xlu1 %v704_v44, %s10108_s23  ;;  %871 = vrot.lane.b32.xlu0 %v705_v50, %s10108_s23 }
 0x12e   :  { %15221 = vst [vmem:[#allocation45_spill] sm:$0xff] %v10667_v54  ;;  %v708_v11 = vmul.f32 %v10667_v54, %v10667_v54 }
 0x12f   :  { %15222 = vst [vmem:[#allocation46_spill] sm:$0xff] %v10670_v57  ;;  %v8823_v61 = vpop.f32.mrb[42].mxu0  ;;  %v707_v62 = vmul.f32 %v10670_v57, %v10670_v57 }
 0x130   :  { %v558_v3 = vpop.f32.mrb[43].mxu0  ;;  %v10679_v4 = vadd.f32 %v8823_v61, %v10425_v6 }
 0x131   :  { %v10682_v5 = vadd.f32 %v10425_v6, %v558_v3  ;;  %873 = vrot.lane.b32.xlu1 %v706_v60, %s10108_s23  ;;  %875 = vrot.lane.b32.xlu0 %v707_v62, %s10108_s23 }
 0x132   :  { %15223 = vst [vmem:[#allocation47_spill] sm:$0xff] %v10679_v4  ;;  %v710_v32 = vmul.f32 %v10679_v4, %v10679_v4 }
 0x133   :  { %15224 = vst [vmem:[#allocation48_spill] sm:$0xff] %v10682_v5  ;;  %v8826_v16 = vpop.f32.mrb[44].mxu0  ;;  %v709_v19 = vmul.f32 %v10682_v5, %v10682_v5 }
 0x134   :  { %v568_v22 = vpop.f32.mrb[45].mxu0  ;;  %v10691_v23 = vadd.f32 %v8826_v16, %v10425_v6 }
 0x135   :  { %v10694_v30 = vadd.f32 %v10425_v6, %v568_v22  ;;  %877 = vrot.lane.b32.xlu1 %v708_v11, %s10108_s23  ;;  %879 = vrot.lane.b32.xlu0 %v709_v19, %s10108_s23 }
 0x136   :  { %15225 = vst [vmem:[#allocation49_spill] sm:$0xff] %v10691_v23  ;;  %v712_v51 = vmul.f32 %v10691_v23, %v10691_v23 }
 0x137   :  { %15226 = vst [vmem:[#allocation50_spill] sm:$0xff] %v10694_v30  ;;  %v8829_v36 = vpop.f32.mrb[46].mxu0  ;;  %v711_v39 = vmul.f32 %v10694_v30, %v10694_v30 }
 0x138   :  { %v578_v44 = vpop.f32.mrb[47].mxu0  ;;  %v10703_v49 = vadd.f32 %v8829_v36, %v10425_v6 }
 0x139   :  { %v10706_v50 = vadd.f32 %v10425_v6, %v578_v44  ;;  %881 = vrot.lane.b32.xlu1 %v710_v32, %s10108_s23  ;;  %883 = vrot.lane.b32.xlu0 %v711_v39, %s10108_s23 }
 0x13a   :  { %15227 = vst [vmem:[#allocation51_spill] sm:$0xff] %v10703_v49  ;;  %v714_v16 = vmul.f32 %v10703_v49, %v10703_v49 }
 0x13b   :  { %15228 = vst [vmem:[#allocation52_spill] sm:$0xff] %v10706_v50  ;;  %v8832_v60 = vpop.f32.mrb[48].mxu0  ;;  %v713_v61 = vmul.f32 %v10706_v50, %v10706_v50 }
 0x13c   :  { %v588_v62 = vpop.f32.mrb[49].mxu0  ;;  %v10715_v3 = vadd.f32 %v8832_v60, %v10425_v6 }
 0x13d   :  { %v10718_v11 = vadd.f32 %v10425_v6, %v588_v62  ;;  %885 = vrot.lane.b32.xlu1 %v712_v51, %s10108_s23  ;;  %887 = vrot.lane.b32.xlu0 %v713_v61, %s10108_s23 }
 0x13e   :  { %15229 = vst [vmem:[#allocation53_spill] sm:$0xff] %v10715_v3  ;;  %v716_v44 = vmul.f32 %v10715_v3, %v10715_v3 }
 0x13f   :  { %15230 = vst [vmem:[#allocation54_spill] sm:$0xff] %v10718_v11  ;;  %v8835_v19 = vpop.f32.mrb[50].mxu0  ;;  %v715_v22 = vmul.f32 %v10718_v11, %v10718_v11 }
 0x140   :  { %v598_v32 = vpop.f32.mrb[51].mxu0  ;;  %v10727_v36 = vadd.f32 %v8835_v19, %v10425_v6 }
 0x141   :  { %v10730_v39 = vadd.f32 %v10425_v6, %v598_v32  ;;  %889 = vrot.lane.b32.xlu1 %v714_v16, %s10108_s23  ;;  %891 = vrot.lane.b32.xlu0 %v715_v22, %s10108_s23 }
 0x142   :  { %15231 = vst [vmem:[#allocation55_spill] sm:$0xff] %v10727_v36  ;;  %v718_v16 = vmul.f32 %v10727_v36, %v10727_v36 }
 0x143   :  { %15232 = vst [vmem:[#allocation56_spill] sm:$0xff] %v10730_v39  ;;  %v8838_v51 = vpop.f32.mrb[52].mxu0  ;;  %v717_v60 = vmul.f32 %v10730_v39, %v10730_v39 }
 0x144   :  { %v608_v61 = vpop.f32.mrb[53].mxu0  ;;  %v10739_v62 = vadd.f32 %v8838_v51, %v10425_v6 }
 0x145   :  { %v10742_v19 = vadd.f32 %v10425_v6, %v608_v61  ;;  %893 = vrot.lane.b32.xlu1 %v716_v44, %s10108_s23  ;;  %895 = vrot.lane.b32.xlu0 %v717_v60, %s10108_s23 }
 0x146   :  { %15233 = vst [vmem:[#allocation57_spill] sm:$0xff] %v10739_v62  ;;  %v720_v44 = vmul.f32 %v10739_v62, %v10739_v62 }
 0x147   :  { %15234 = vst [vmem:[#allocation58_spill] sm:$0xff] %v10742_v19  ;;  %v8841_v22 = vpop.f32.mrb[54].mxu0  ;;  %v719_v32 = vmul.f32 %v10742_v19, %v10742_v19 }
 0x148   :  { %v618_v3 = vpop.f32.mrb[55].mxu0  ;;  %v10751_v39 = vadd.f32 %v8841_v22, %v10425_v6 }
 0x149   :  { %v10754_v51 = vadd.f32 %v10425_v6, %v618_v3  ;;  %897 = vrot.lane.b32.xlu1 %v718_v16, %s10108_s23  ;;  %899 = vrot.lane.b32.xlu0 %v719_v32, %s10108_s23 }
 0x14a   :  { %15235 = vst [vmem:[#allocation59_spill] sm:$0xff] %v10751_v39  ;;  %v722_v3 = vmul.f32 %v10751_v39, %v10751_v39 }
 0x14b   :  { %15236 = vst [vmem:[#allocation60_spill] sm:$0xff] %v10754_v51  ;;  %v8844_v60 = vpop.f32.mrb[56].mxu0  ;;  %v721_v61 = vmul.f32 %v10754_v51, %v10754_v51 }
 0x14c   :  { %v628_v36 = vpop.f32.mrb[57].mxu0  ;;  %v10763_v19 = vadd.f32 %v8844_v60, %v10425_v6 }
 0x14d   :  { %v10766_v22 = vadd.f32 %v10425_v6, %v628_v36  ;;  %901 = vrot.lane.b32.xlu1 %v720_v44, %s10108_s23  ;;  %903 = vrot.lane.b32.xlu0 %v721_v61, %s10108_s23 }
 0x14e   :  { %15237 = vst [vmem:[#allocation61_spill] sm:$0xff] %v10763_v19  ;;  %v724_v36 = vmul.f32 %v10763_v19, %v10763_v19 }
 0x14f   :  { %15238 = vst [vmem:[#allocation62_spill] sm:$0xff] %v10766_v22  ;;  %v8847_v16 = vpop.f32.mrb[58].mxu0  ;;  %v723_v32 = vmul.f32 %v10766_v22, %v10766_v22 }
 0x150   :  { %v638_v62 = vpop.f32.mrb[59].mxu0  ;;  %v10775_v51 = vadd.f32 %v8847_v16, %v10425_v6 }
 0x151   :  { %v10778_v60 = vadd.f32 %v10425_v6, %v638_v62  ;;  %905 = vrot.lane.b32.xlu1 %v722_v3, %s10108_s23  ;;  %907 = vrot.lane.b32.xlu0 %v723_v32, %s10108_s23  ;;  %v10790_v62 = vadd.f32 %v10425_v6, %v10472_v33 }
 0x152   :  { %15239 = vst [vmem:[#allocation63_spill] sm:$0xff] %v10775_v51 }
 0x153   :  { %15240 = vst [vmem:[#allocation64_spill] sm:$0xff] %v10778_v60  ;;  %v8850_v44 = vpop.f32.mrb[60].mxu0  ;;  %v796_v61 = vpop.permute.xlu0 %795  ;;  %v725_v22 = vmul.f32 %v10778_v60, %v10778_v60  ;;  %15241 = vst [vmem:[#allocation65_spill] sm:$0xff] %v10790_v62  ;;  %v726_v60 = vmul.f32 %v10775_v51, %v10775_v51 }
 0x154   :  { %v988_v16 = vsel %vm987_vm1, %v10428_v9, %v796_v61  ;;  %v648_v39 = vpop.f32.mrb[61].mxu0  ;;  %v10793_v3 = vadd.f32 %v8850_v44, %v10425_v6 }
 0x155   :  { %v10796_v32 = vadd.f32 %v10425_v6, %v648_v39  ;;  %909 = vrot.lane.b32.xlu1 %v724_v36, %s10108_s23  ;;  %911 = vrot.lane.b32.xlu0 %v725_v22, %s10108_s23  ;;  %v10811_v36 = vadd.f32 %v10470_v31, %v10425_v6 }
 0x156   :  { %15242 = vst [vmem:[#allocation66_spill] sm:$0xff] %v10793_v3  ;;  %8858 = vmatprep.mubr.msk.f32.mxu1 %vm89_vm0, %v988_v16  ;;  %v728_v22 = vmul.f32 %v10793_v3, %v10793_v3  ;;  %v729_v16 = vmul.f32 %v10790_v62, %v10790_v62 }
 0x157   :  { %15243 = vst [vmem:[#allocation67_spill] sm:$0xff] %v10796_v32  ;;  %v800_v61 = vpop.permute.xlu1 %799  ;;  %v798_v9 = vpop.permute.xlu0 %797  ;;  %v727_v33 = vmul.f32 %v10796_v32, %v10796_v32  ;;  %15244 = vst [vmem:[#allocation68_spill] sm:$0xff] %v10811_v36 }
 0x158   :  { %v990_v44 = vsel %vm987_vm1, %v10436_v14, %v800_v61  ;;  %v989_v39 = vsel %vm987_vm1, %v10431_v10, %v798_v9 }
 0x159   :  { %913 = vrot.lane.b32.xlu1 %v726_v60, %s10108_s23  ;;  %915 = vrot.lane.b32.xlu0 %v727_v33, %s10108_s23  ;;  %v730_v60 = vmul.f32 %v10811_v36, %v10811_v36 }
 0x15a   :  { %8859 = vmatmul.mubr.msk.f32.vlgmr.msra.gmra.mrb[2].mxu1 %vm89_vm0, %v989_v39 }
 0x15b   :  { %8861 = vmatprep.mubr.msk.f32.mxu1 %vm89_vm0, %v990_v44  ;;  %v802_v61 = vpop.permute.xlu1 %801  ;;  %v804_v9 = vpop.permute.xlu0 %803 }
 0x15c   :  { %v991_v6 = vsel %vm987_vm1, %v10440_v15, %v802_v61  ;;  %v992_v31 = vsel %vm987_vm1, %v10450_v21, %v804_v9 }
 0x15d   :  { %917 = vrot.lane.b32.xlu1 %v728_v22, %s10108_s23  ;;  %919 = vrot.lane.b32.xlu0 %v729_v16, %s10108_s23 }
 0x15e   :  { %8862 = vmatmul.mubr.msk.f32.gmra.mrb[4].mxu1 %vm89_vm0, %v991_v6 }
 0x15f   :  { %8864 = vmatprep.mubr.msk.f32.mxu1 %vm89_vm0, %v992_v31  ;;  %v806_v33 = vpop.permute.xlu1 %805  ;;  %v808_v44 = vpop.permute.xlu0 %807 }
 0x160   :  { %v993_v39 = vsel %vm987_vm1, %v10447_v20, %v806_v33  ;;  %v994_v61 = vsel %vm987_vm1, %v10462_v27, %v808_v44 }
 0x161   :  { %921 = vrot.lane.b32.xlu1 %v730_v60, %s10108_s23 }
 0x162   :  { %8865 = vmatmul.mubr.msk.f32.gmra.mrb[6].mxu1 %vm89_vm0, %v993_v39 }
 0x163   :  { %8867 = vmatprep.mubr.msk.f32.mxu1 %vm89_vm0, %v994_v61  ;;  %v810_v22 = vpop.permute.xlu1 %809  ;;  %v812_v16 = vpop.permute.xlu0 %811 }
 0x164   :  { %v995_v9 = vsel %vm987_vm1, %v10459_v26, %v810_v22  ;;  %v996_v6 = vsel %vm987_vm1, %v10478_v35, %v812_v16 }
 0x166   :  { %8868 = vmatmul.mubr.msk.f32.gmra.mrb[8].mxu1 %vm89_vm0, %v995_v9 }
 0x167   :  { %8870 = vmatprep.mubr.msk.f32.mxu1 %vm89_vm0, %v996_v6  ;;  %v814_v31 = vpop.permute.xlu1 %813  ;;  %v816_v33 = vpop.permute.xlu0 %815 }
 0x168   :  { %v997_v60 = vsel %vm987_vm1, %v10475_v34, %v814_v31  ;;  %v998_v44 = vsel %vm987_vm1, %v10490_v41, %v816_v33 }
 0x16a   :  { %8871 = vmatmul.mubr.msk.f32.gmra.mrb[10].mxu1 %vm89_vm0, %v997_v60 }
 0x16b   :  { %8873 = vmatprep.mubr.msk.f32.mxu1 %vm89_vm0, %v998_v44  ;;  %v818_v39 = vpop.permute.xlu1 %817  ;;  %v820_v61 = vpop.permute.xlu0 %819 }
 0x16c   :  { %v999_v22 = vsel %vm987_vm1, %v10487_v40, %v818_v39  ;;  %v1000_v16 = vsel %vm987_vm1, %v10502_v47, %v820_v61 }
 0x16e   :  { %8874 = vmatmul.mubr.msk.f32.gmra.mrb[12].mxu1 %vm89_vm0, %v999_v22 }
 0x16f   :  { %8876 = vmatprep.mubr.msk.f32.mxu1 %vm89_vm0, %v1000_v16  ;;  %v822_v9 = vpop.permute.xlu1 %821  ;;  %v824_v6 = vpop.permute.xlu0 %823 }
 0x170   :  { %v1001_v31 = vsel %vm987_vm1, %v10499_v46, %v822_v9  ;;  %v1002_v33 = vsel %vm987_vm1, %v10514_v53, %v824_v6 }
 0x172   :  { %8877 = vmatmul.mubr.msk.f32.gmra.mrb[14].mxu1 %vm89_vm0, %v1001_v31 }
 0x173   :  { %8879 = vmatprep.mubr.msk.f32.mxu1 %vm89_vm0, %v1002_v33  ;;  %v826_v60 = vpop.permute.xlu1 %825  ;;  %v828_v44 = vpop.permute.xlu0 %827 }
 0x174   :  { %v1003_v39 = vsel %vm987_vm1, %v10511_v52, %v826_v60  ;;  %v1004_v61 = vsel %vm987_vm1, %v10526_v59, %v828_v44 }
 0x176   :  { %8880 = vmatmul.mubr.msk.f32.gmra.mrb[16].mxu1 %vm89_vm0, %v1003_v39 }
 0x177   :  { %8882 = vmatprep.mubr.msk.f32.mxu1 %vm89_vm0, %v1004_v61  ;;  %v830_v22 = vpop.permute.xlu1 %829  ;;  %v832_v16 = vpop.permute.xlu0 %831 }
 0x178   :  { %v1005_v9 = vsel %vm987_vm1, %v10523_v58, %v830_v22  ;;  %v1006_v6 = vsel %vm987_vm1, %v10538_v1, %v832_v16 }
 0x17a   :  { %8883 = vmatmul.mubr.msk.f32.gmra.mrb[18].mxu1 %vm89_vm0, %v1005_v9 }
 0x17b   :  { %8885 = vmatprep.mubr.msk.f32.mxu1 %vm89_vm0, %v1006_v6  ;;  %v834_v31 = vpop.permute.xlu1 %833  ;;  %v836_v33 = vpop.permute.xlu0 %835 }
 0x17c   :  { %v1007_v60 = vsel %vm987_vm1, %v10535_v0, %v834_v31  ;;  %v1008_v44 = vsel %vm987_vm1, %v10550_v8, %v836_v33 }
 0x17e   :  { %8886 = vmatmul.mubr.msk.f32.gmra.mrb[20].mxu1 %vm89_vm0, %v1007_v60 }
 0x17f   :  { %8888 = vmatprep.mubr.msk.f32.mxu1 %vm89_vm0, %v1008_v44  ;;  %v838_v39 = vpop.permute.xlu1 %837  ;;  %v840_v61 = vpop.permute.xlu0 %839 }
 0x180   :  { %v1009_v22 = vsel %vm987_vm1, %v10547_v7, %v838_v39  ;;  %v1010_v16 = vsel %vm987_vm1, %v10562_v18, %v840_v61 }
 0x182   :  { %8889 = vmatmul.mubr.msk.f32.gmra.mrb[22].mxu1 %vm89_vm0, %v1009_v22 }
 0x183   :  { %8891 = vmatprep.mubr.msk.f32.mxu1 %vm89_vm0, %v1010_v16  ;;  %v842_v9 = vpop.permute.xlu1 %841  ;;  %v844_v6 = vpop.permute.xlu0 %843 }
 0x184   :  { %v1011_v31 = vsel %vm987_vm1, %v10559_v17, %v842_v9  ;;  %v1012_v33 = vsel %vm987_vm1, %v10574_v28, %v844_v6 }
 0x186   :  { %8892 = vmatmul.mubr.msk.f32.gmra.mrb[24].mxu1 %vm89_vm0, %v1011_v31 }
 0x187   :  { %8894 = vmatprep.mubr.msk.f32.mxu1 %vm89_vm0, %v1012_v33  ;;  %v846_v60 = vpop.permute.xlu1 %845  ;;  %v848_v44 = vpop.permute.xlu0 %847 }
 0x188   :  { %v1013_v39 = vsel %vm987_vm1, %v10571_v25, %v846_v60  ;;  %v1014_v61 = vsel %vm987_vm1, %v10586_v38, %v848_v44 }
 0x18a   :  { %8895 = vmatmul.mubr.msk.f32.gmra.mrb[26].mxu1 %vm89_vm0, %v1013_v39 }
 0x18b   :  { %8897 = vmatprep.mubr.msk.f32.mxu1 %vm89_vm0, %v1014_v61  ;;  %v850_v22 = vpop.permute.xlu1 %849  ;;  %v852_v16 = vpop.permute.xlu0 %851 }
 0x18c   :  { %v1015_v9 = vsel %vm987_vm1, %v10583_v37, %v850_v22  ;;  %v1016_v6 = vsel %vm987_vm1, %v10598_v48, %v852_v16 }
 0x18e   :  { %8898 = vmatmul.mubr.msk.f32.gmra.mrb[28].mxu1 %vm89_vm0, %v1015_v9 }
 0x18f   :  { %8900 = vmatprep.mubr.msk.f32.mxu1 %vm89_vm0, %v1016_v6  ;;  %v854_v31 = vpop.permute.xlu1 %853  ;;  %v856_v33 = vpop.permute.xlu0 %855 }
 0x190   :  { %v1017_v60 = vsel %vm987_vm1, %v10595_v45, %v854_v31  ;;  %v1018_v44 = vsel %vm987_vm1, %v10610_v56, %v856_v33 }
 0x192   :  { %8901 = vmatmul.mubr.msk.f32.gmra.mrb[30].mxu1 %vm89_vm0, %v1017_v60 }
 0x193   :  { %8903 = vmatprep.mubr.msk.f32.mxu1 %vm89_vm0, %v1018_v44  ;;  %v858_v39 = vpop.permute.xlu1 %857  ;;  %v860_v61 = vpop.permute.xlu0 %859 }
 0x194   :  { %v1019_v22 = vsel %vm987_vm1, %v10607_v55, %v858_v39  ;;  %v1020_v16 = vsel %vm987_vm1, %v10622_v2, %v860_v61 }
 0x196   :  { %8904 = vmatmul.mubr.msk.f32.gmra.mrb[32].mxu1 %vm89_vm0, %v1019_v22 }
 0x197   :  { %8906 = vmatprep.mubr.msk.f32.mxu1 %vm89_vm0, %v1020_v16  ;;  %v862_v9 = vpop.permute.xlu1 %861  ;;  %v864_v6 = vpop.permute.xlu0 %863 }
 0x198   :  { %v1021_v31 = vsel %vm987_vm1, %v10619_v63, %v862_v9  ;;  %v1022_v33 = vsel %vm987_vm1, %v10634_v13, %v864_v6 }
 0x19a   :  { %8907 = vmatmul.mubr.msk.f32.gmra.mrb[34].mxu1 %vm89_vm0, %v1021_v31 }
 0x19b   :  { %8909 = vmatprep.mubr.msk.f32.mxu1 %vm89_vm0, %v1022_v33  ;;  %v866_v60 = vpop.permute.xlu1 %865  ;;  %v868_v44 = vpop.permute.xlu0 %867 }
 0x19c   :  { %v1023_v39 = vsel %vm987_vm1, %v10631_v12, %v866_v60  ;;  %v1024_v61 = vsel %vm987_vm1, %v10646_v29, %v868_v44 }
 0x19e   :  { %8910 = vmatmul.mubr.msk.f32.gmra.mrb[36].mxu1 %vm89_vm0, %v1023_v39 }
 0x19f   :  { %8912 = vmatprep.mubr.msk.f32.mxu1 %vm89_vm0, %v1024_v61  ;;  %v870_v22 = vpop.permute.xlu1 %869  ;;  %v872_v16 = vpop.permute.xlu0 %871 }
 0x1a0   :  { %v1025_v9 = vsel %vm987_vm1, %v10643_v24, %v870_v22  ;;  %v1026_v6 = vsel %vm987_vm1, %v10658_v43, %v872_v16 }
 0x1a2   :  { %8913 = vmatmul.mubr.msk.f32.gmra.mrb[38].mxu1 %vm89_vm0, %v1025_v9 }
 0x1a3   :  { %8915 = vmatprep.mubr.msk.f32.mxu1 %vm89_vm0, %v1026_v6  ;;  %v874_v31 = vpop.permute.xlu1 %873  ;;  %v876_v33 = vpop.permute.xlu0 %875 }
 0x1a4   :  { %v1027_v60 = vsel %vm987_vm1, %v10655_v42, %v874_v31  ;;  %v1028_v44 = vsel %vm987_vm1, %v10670_v57, %v876_v33 }
 0x1a6   :  { %8916 = vmatmul.mubr.msk.f32.gmra.mrb[40].mxu1 %vm89_vm0, %v1027_v60 }
 0x1a7   :  { %8918 = vmatprep.mubr.msk.f32.mxu1 %vm89_vm0, %v1028_v44  ;;  %v878_v39 = vpop.permute.xlu1 %877  ;;  %v880_v61 = vpop.permute.xlu0 %879 }
 0x1a8   :  { %v1029_v22 = vsel %vm987_vm1, %v10667_v54, %v878_v39  ;;  %v1030_v16 = vsel %vm987_vm1, %v10682_v5, %v880_v61 }
 0x1aa   :  { %8919 = vmatmul.mubr.msk.f32.gmra.mrb[42].mxu1 %vm89_vm0, %v1029_v22 }
 0x1ab   :  { %8921 = vmatprep.mubr.msk.f32.mxu1 %vm89_vm0, %v1030_v16  ;;  %v882_v9 = vpop.permute.xlu1 %881  ;;  %v884_v6 = vpop.permute.xlu0 %883 }
 0x1ac   :  { %v1031_v31 = vsel %vm987_vm1, %v10679_v4, %v882_v9  ;;  %v1032_v33 = vsel %vm987_vm1, %v10694_v30, %v884_v6  ;;  %v3241_v4 = vld [vmem:[%s14926_s2 + $0x20] sm:$0xff] }
 0x1ad   :  { %8954 = vmatprep.subr.mxu0 %v3241_v4 }
 0x1ae   :  { %8922 = vmatmul.mubr.msk.f32.gmra.mrb[44].mxu1 %vm89_vm0, %v1031_v31  ;;  %8955 = vmatpush3.msra.mxu0 %v3241_v4 }
 0x1af   :  { %8924 = vmatprep.mubr.msk.f32.mxu1 %vm89_vm0, %v1032_v33  ;;  %v886_v60 = vpop.permute.xlu1 %885  ;;  %v888_v44 = vpop.permute.xlu0 %887 }
 0x1b0   :  { %v1033_v39 = vsel %vm987_vm1, %v10691_v23, %v886_v60  ;;  %v1034_v61 = vsel %vm987_vm1, %v10706_v50, %v888_v44  ;;  %v15245_v60 = vld [vmem:[#allocation53_spill] sm:$0xff] }
 0x1b2   :  { %8925 = vmatmul.mubr.msk.f32.gmra.mrb[46].mxu1 %vm89_vm0, %v1033_v39  ;;  %v15246_v39 = vld [vmem:[#allocation56_spill] sm:$0xff] }
 0x1b3   :  { %8927 = vmatprep.mubr.msk.f32.mxu1 %vm89_vm0, %v1034_v61  ;;  %v890_v22 = vpop.permute.xlu1 %889  ;;  %v892_v16 = vpop.permute.xlu0 %891 }
 0x1b4   :  { %v1035_v9 = vsel %vm987_vm1, %v10703_v49, %v890_v22  ;;  %v1036_v6 = vsel %vm987_vm1, %v10718_v11, %v892_v16  ;;  %v15247_v49 = vld [vmem:[#allocation55_spill] sm:$0xff] }
 0x1b6   :  { %8928 = vmatmul.mubr.msk.f32.gmra.mrb[48].mxu1 %vm89_vm0, %v1035_v9  ;;  %v15248_v9 = vld [vmem:[#allocation58_spill] sm:$0xff] }
 0x1b7   :  { %8930 = vmatprep.mubr.msk.f32.mxu1 %vm89_vm0, %v1036_v6  ;;  %v894_v31 = vpop.permute.xlu1 %893  ;;  %v896_v33 = vpop.permute.xlu0 %895 }
 0x1b8   :  { %v1037_v44 = vsel %vm987_vm1, %v15245_v60, %v894_v31  ;;  %v1038_v61 = vsel %vm987_vm1, %v15246_v39, %v896_v33  ;;  %v15249_v60 = vld [vmem:[#allocation57_spill] sm:$0xff] }
 0x1ba   :  { %8931 = vmatmul.mubr.msk.f32.gmra.mrb[50].mxu1 %vm89_vm0, %v1037_v44  ;;  %v15250_v44 = vld [vmem:[#allocation60_spill] sm:$0xff] }
 0x1bb   :  { %8933 = vmatprep.mubr.msk.f32.mxu1 %vm89_vm0, %v1038_v61  ;;  %v898_v22 = vpop.permute.xlu1 %897  ;;  %v900_v50 = vpop.permute.xlu0 %899 }
 0x1bc   :  { %v1039_v16 = vsel %vm987_vm1, %v15247_v49, %v898_v22  ;;  %v1040_v6 = vsel %vm987_vm1, %v15248_v9, %v900_v50  ;;  %v15251_v49 = vld [vmem:[#allocation59_spill] sm:$0xff] }
 0x1be   :  { %8934 = vmatmul.mubr.msk.f32.gmra.mrb[52].mxu1 %vm89_vm0, %v1039_v16  ;;  %v15252_v16 = vld [vmem:[#allocation62_spill] sm:$0xff] }
 0x1bf   :  { %8936 = vmatprep.mubr.msk.f32.mxu1 %vm89_vm0, %v1040_v6  ;;  %v902_v31 = vpop.permute.xlu1 %901  ;;  %v904_v11 = vpop.permute.xlu0 %903 }
 0x1c0   :  { %v1041_v33 = vsel %vm987_vm1, %v15249_v60, %v902_v31  ;;  %v1042_v61 = vsel %vm987_vm1, %v15250_v44, %v904_v11 }
 0x1c2   :  { %8937 = vmatmul.mubr.msk.f32.gmra.mrb[54].mxu1 %vm89_vm0, %v1041_v33  ;;  %v15253_v33 = vld [vmem:[#allocation64_spill] sm:$0xff] }
 0x1c3   :  { %8939 = vmatprep.mubr.msk.f32.mxu1 %vm89_vm0, %v1042_v61  ;;  %v906_v22 = vpop.permute.xlu1 %905  ;;  %v908_v39 = vpop.permute.xlu0 %907 }
 0x1c4   :  { %v1043_v50 = vsel %vm987_vm1, %v15251_v49, %v906_v22  ;;  %v1044_v6 = vsel %vm987_vm1, %v15252_v16, %v908_v39 }
 0x1c6   :  { %8940 = vmatmul.mubr.msk.f32.gmra.mrb[56].mxu1 %vm89_vm0, %v1043_v50 }
 0x1c7   :  { %8942 = vmatprep.mubr.msk.f32.mxu1 %vm89_vm0, %v1044_v6  ;;  %v910_v31 = vpop.permute.xlu1 %909  ;;  %v912_v9 = vpop.permute.xlu0 %911 }
 0x1c8   :  { %v1045_v11 = vsel %vm987_vm1, %v10763_v19, %v910_v31  ;;  %v1046_v61 = vsel %vm987_vm1, %v15253_v33, %v912_v9 }
 0x1ca   :  { %8943 = vmatmul.mubr.msk.f32.gmra.mrb[58].mxu1 %vm89_vm0, %v1045_v11 }
 0x1cb   :  { %8945 = vmatprep.mubr.msk.f32.mxu1 %vm89_vm0, %v1046_v61  ;;  %v914_v22 = vpop.permute.xlu1 %913  ;;  %v916_v44 = vpop.permute.xlu0 %915 }
 0x1cc   :  { %v1047_v39 = vsel %vm987_vm1, %v10775_v51, %v914_v22  ;;  %v1048_v50 = vsel %vm987_vm1, %v10796_v32, %v916_v44 }
 0x1ce   :  { %8946 = vmatmul.mubr.msk.f32.gmra.mrb[60].mxu1 %vm89_vm0, %v1047_v39 }
 0x1cf   :  { %8948 = vmatprep.mubr.msk.f32.mxu1 %vm89_vm0, %v1048_v50  ;;  %v918_v6 = vpop.permute.xlu1 %917  ;;  %v920_v31 = vpop.permute.xlu0 %919 }
 0x1d0   :  { %v1049_v9 = vsel %vm987_vm1, %v10793_v3, %v918_v6  ;;  %v1050_v11 = vsel %vm987_vm1, %v10790_v62, %v920_v31 }
 0x1d2   :  { %8949 = vmatmul.mubr.msk.f32.gmra.mrb[62].mxu1 %vm89_vm0, %v1049_v9 }
 0x1d3   :  { %8951 = vmatprep.mubr.msk.f32.mxu1 %vm89_vm0, %v1050_v11  ;;  %v922_v61 = vpop.permute.xlu1 %921 }
 0x1d4   :  { %v1051_v44 = vsel %vm987_vm1, %v10811_v36, %v922_v61 }
 0x1d6   :  { %8952 = vmatmul.mubr.msk.f32.gmra.mrb[64].mxu1 %vm89_vm0, %v1051_v44 }
 0x22d   :  { %v11009_v22 = vpop.f32.mrb[2].mxu1 }
 0x22e   :  { %v1632_v39 = vmul.f32 %v11009_v22, %v11009_v22  ;;  %v11013_v50 = vpop.f32.mrb[3].mxu1 }
 0x22f   :  { %v1631_v6 = vmul.f32 %v11013_v50, %v11013_v50 }
 0x230   :  { %1761 = vrot.lane.b32.xlu1 %v1632_v39, %s10108_s23 }
 0x231   :  { %1759 = vrot.lane.b32.xlu0 %v1631_v6, %s10108_s23  ;;  %v11019_v31 = vpop.f32.mrb[4].mxu1 }
 0x232   :  { %15254 = vst [vmem:[#allocation69_spill] sm:$0xff] %v11019_v31  ;;  %v1634_v9 = vmul.f32 %v11019_v31, %v11019_v31  ;;  %v11023_v11 = vpop.f32.mrb[5].mxu1 }
 0x233   :  { %15255 = vst [vmem:[#allocation70_spill] sm:$0xff] %v11023_v11  ;;  %v1633_v61 = vmul.f32 %v11023_v11, %v11023_v11 }
 0x234   :  { %1765 = vrot.lane.b32.xlu1 %v1634_v9, %s10108_s23 }
 0x235   :  { %1763 = vrot.lane.b32.xlu0 %v1633_v61, %s10108_s23  ;;  %v11029_v44 = vpop.f32.mrb[6].mxu1 }
 0x236   :  { %15256 = vst [vmem:[#allocation71_spill] sm:$0xff] %v11029_v44  ;;  %v1636_v39 = vmul.f32 %v11029_v44, %v11029_v44  ;;  %v11033_v6 = vpop.f32.mrb[7].mxu1 }
 0x237   :  { %15257 = vst [vmem:[#allocation72_spill] sm:$0xff] %v11033_v6  ;;  %v1635_v62 = vmul.f32 %v11033_v6, %v11033_v6 }
 0x238   :  { %1769 = vrot.lane.b32.xlu1 %v1636_v39, %s10108_s23 }
 0x239   :  { %1767 = vrot.lane.b32.xlu0 %v1635_v62, %s10108_s23  ;;  %v11039_v36 = vpop.f32.mrb[8].mxu1 }
 0x23a   :  { %v1638_v9 = vmul.f32 %v11039_v36, %v11039_v36  ;;  %v11043_v61 = vpop.f32.mrb[9].mxu1 }
 0x23b   :  { %v1637_v32 = vmul.f32 %v11043_v61, %v11043_v61 }
 0x23c   :  { %1773 = vrot.lane.b32.xlu1 %v1638_v9, %s10108_s23 }
 0x23d   :  { %1771 = vrot.lane.b32.xlu0 %v1637_v32, %s10108_s23  ;;  %v11049_v3 = vpop.f32.mrb[10].mxu1 }
 0x23e   :  { %15258 = vst [vmem:[#allocation73_spill] sm:$0xff] %v11049_v3  ;;  %v1640_v39 = vmul.f32 %v11049_v3, %v11049_v3  ;;  %v11053_v62 = vpop.f32.mrb[11].mxu1 }
 0x23f   :  { %v1639_v33 = vmul.f32 %v11053_v62, %v11053_v62 }
 0x240   :  { %1777 = vrot.lane.b32.xlu1 %v1640_v39, %s10108_s23 }
 0x241   :  { %1775 = vrot.lane.b32.xlu0 %v1639_v33, %s10108_s23  ;;  %v11059_v51 = vpop.f32.mrb[12].mxu1 }
 0x242   :  { %15259 = vst [vmem:[#allocation74_spill] sm:$0xff] %v11059_v51  ;;  %v1642_v9 = vmul.f32 %v11059_v51, %v11059_v51  ;;  %v11063_v32 = vpop.f32.mrb[13].mxu1 }
 0x243   :  { %15260 = vst [vmem:[#allocation75_spill] sm:$0xff] %v11063_v32  ;;  %v1641_v16 = vmul.f32 %v11063_v32, %v11063_v32 }
 0x244   :  { %1781 = vrot.lane.b32.xlu1 %v1642_v9, %s10108_s23 }
 0x245   :  { %1779 = vrot.lane.b32.xlu0 %v1641_v16, %s10108_s23  ;;  %v11069_v19 = vpop.f32.mrb[14].mxu1 }
 0x246   :  { %15261 = vst [vmem:[#allocation76_spill] sm:$0xff] %v11069_v19  ;;  %v1644_v39 = vmul.f32 %v11069_v19, %v11069_v19  ;;  %v11073_v33 = vpop.f32.mrb[15].mxu1 }
 0x247   :  { %15262 = vst [vmem:[#allocation77_spill] sm:$0xff] %v11073_v33  ;;  %v1643_v49 = vmul.f32 %v11073_v33, %v11073_v33 }
 0x248   :  { %1785 = vrot.lane.b32.xlu1 %v1644_v39, %s10108_s23 }
 0x249   :  { %1783 = vrot.lane.b32.xlu0 %v1643_v49, %s10108_s23  ;;  %v11079_v60 = vpop.f32.mrb[16].mxu1 }
 0x24a   :  { %15263 = vst [vmem:[#allocation78_spill] sm:$0xff] %v11079_v60  ;;  %v1646_v9 = vmul.f32 %v11079_v60, %v11079_v60  ;;  %v11083_v16 = vpop.f32.mrb[17].mxu1 }
 0x24b   :  { %15264 = vst [vmem:[#allocation79_spill] sm:$0xff] %v11083_v16  ;;  %v1645_v30 = vmul.f32 %v11083_v16, %v11083_v16 }
 0x24c   :  { %1789 = vrot.lane.b32.xlu1 %v1646_v9, %s10108_s23 }
 0x24d   :  { %1787 = vrot.lane.b32.xlu0 %v1645_v30, %s10108_s23  ;;  %v11089_v23 = vpop.f32.mrb[18].mxu1 }
 0x24e   :  { %v1648_v39 = vmul.f32 %v11089_v23, %v11089_v23  ;;  %v11093_v49 = vpop.f32.mrb[19].mxu1 }
 0x24f   :  { %15265 = vst [vmem:[#allocation80_spill] sm:$0xff] %v11093_v49  ;;  %v1647_v5 = vmul.f32 %v11093_v49, %v11093_v49 }
 0x250   :  { %1793 = vrot.lane.b32.xlu1 %v1648_v39, %s10108_s23 }
 0x251   :  { %1791 = vrot.lane.b32.xlu0 %v1647_v5, %s10108_s23  ;;  %v11102_v30 = vpop.f32.mrb[20].mxu1 }
 0x252   :  { %15266 = vst [vmem:[#allocation81_spill] sm:$0xff] %v11102_v30  ;;  %v1650_v9 = vmul.f32 %v11102_v30, %v11102_v30  ;;  %v11106_v57 = vpop.f32.mrb[21].mxu1 }
 0x253   :  { %v1649_v54 = vmul.f32 %v11106_v57, %v11106_v57 }
 0x254   :  { %1797 = vrot.lane.b32.xlu1 %v1650_v9, %s10108_s23 }
 0x255   :  { %1795 = vrot.lane.b32.xlu0 %v1649_v54, %s10108_s23  ;;  %v11112_v43 = vpop.f32.mrb[22].mxu1 }
 0x256   :  { %15267 = vst [vmem:[#allocation82_spill] sm:$0xff] %v11112_v43  ;;  %v1652_v5 = vmul.f32 %v11112_v43, %v11112_v43  ;;  %v11116_v39 = vpop.f32.mrb[23].mxu1 }
 0x257   :  { %15268 = vst [vmem:[#allocation83_spill] sm:$0xff] %v11116_v39  ;;  %v1651_v4 = vmul.f32 %v11116_v39, %v11116_v39 }
 0x258   :  { %1801 = vrot.lane.b32.xlu1 %v1652_v5, %s10108_s23 }
 0x259   :  { %1799 = vrot.lane.b32.xlu0 %v1651_v4, %s10108_s23  ;;  %v11122_v42 = vpop.f32.mrb[24].mxu1 }
 0x25a   :  { %15269 = vst [vmem:[#allocation84_spill] sm:$0xff] %v11122_v42  ;;  %v1654_v9 = vmul.f32 %v11122_v42, %v11122_v42  ;;  %v11126_v54 = vpop.f32.mrb[25].mxu1 }
 0x25b   :  { %15270 = vst [vmem:[#allocation85_spill] sm:$0xff] %v11126_v54  ;;  %v1653_v29 = vmul.f32 %v11126_v54, %v11126_v54 }
 0x25c   :  { %1805 = vrot.lane.b32.xlu1 %v1654_v9, %s10108_s23 }
 0x25d   :  { %1803 = vrot.lane.b32.xlu0 %v1653_v29, %s10108_s23  ;;  %v11132_v24 = vpop.f32.mrb[26].mxu1 }
 0x25e   :  { %15271 = vst [vmem:[#allocation86_spill] sm:$0xff] %v11132_v24  ;;  %v1656_v5 = vmul.f32 %v11132_v24, %v11132_v24  ;;  %v11136_v4 = vpop.f32.mrb[27].mxu1 }
 0x25f   :  { %15272 = vst [vmem:[#allocation87_spill] sm:$0xff] %v11136_v4  ;;  %v1655_v13 = vmul.f32 %v11136_v4, %v11136_v4 }
 0x260   :  { %1809 = vrot.lane.b32.xlu1 %v1656_v5, %s10108_s23 }
 0x261   :  { %1807 = vrot.lane.b32.xlu0 %v1655_v13, %s10108_s23  ;;  %v11142_v12 = vpop.f32.mrb[28].mxu1 }
 0x262   :  { %v1658_v9 = vmul.f32 %v11142_v12, %v11142_v12  ;;  %v11146_v29 = vpop.f32.mrb[29].mxu1 }
 0x263   :  { %15273 = vst [vmem:[#allocation88_spill] sm:$0xff] %v11146_v29  ;;  %v1657_v2 = vmul.f32 %v11146_v29, %v11146_v29 }
 0x264   :  { %1813 = vrot.lane.b32.xlu1 %v1658_v9, %s10108_s23 }
 0x265   :  { %1811 = vrot.lane.b32.xlu0 %v1657_v2, %s10108_s23  ;;  %v11152_v63 = vpop.f32.mrb[30].mxu1 }
 0x266   :  { %15274 = vst [vmem:[#allocation89_spill] sm:$0xff] %v11152_v63  ;;  %v1660_v5 = vmul.f32 %v11152_v63, %v11152_v63  ;;  %v11156_v13 = vpop.f32.mrb[31].mxu1 }
 0x267   :  { %v1659_v56 = vmul.f32 %v11156_v13, %v11156_v13 }
 0x268   :  { %1817 = vrot.lane.b32.xlu1 %v1660_v5, %s10108_s23 }
 0x269   :  { %1815 = vrot.lane.b32.xlu0 %v1659_v56, %s10108_s23  ;;  %v11162_v55 = vpop.f32.mrb[32].mxu1 }
 0x26a   :  { %v1662_v9 = vmul.f32 %v11162_v55, %v11162_v55  ;;  %v11166_v2 = vpop.f32.mrb[33].mxu1 }
 0x26b   :  { %15275 = vst [vmem:[#allocation90_spill] sm:$0xff] %v11166_v2  ;;  %v1661_v48 = vmul.f32 %v11166_v2, %v11166_v2 }
 0x26c   :  { %1821 = vrot.lane.b32.xlu1 %v1662_v9, %s10108_s23 }
 0x26d   :  { %1819 = vrot.lane.b32.xlu0 %v1661_v48, %s10108_s23  ;;  %v11172_v45 = vpop.f32.mrb[34].mxu1 }
 0x26e   :  { %v1664_v5 = vmul.f32 %v11172_v45, %v11172_v45  ;;  %v11176_v56 = vpop.f32.mrb[35].mxu1 }
 0x26f   :  { %15276 = vst [vmem:[#allocation91_spill] sm:$0xff] %v11176_v56  ;;  %v1663_v38 = vmul.f32 %v11176_v56, %v11176_v56 }
 0x270   :  { %1825 = vrot.lane.b32.xlu1 %v1664_v5, %s10108_s23 }
 0x271   :  { %1823 = vrot.lane.b32.xlu0 %v1663_v38, %s10108_s23  ;;  %v11182_v37 = vpop.f32.mrb[36].mxu1 }
 0x272   :  { %15277 = vst [vmem:[#allocation92_spill] sm:$0xff] %v11182_v37  ;;  %v1666_v9 = vmul.f32 %v11182_v37, %v11182_v37  ;;  %v11186_v48 = vpop.f32.mrb[37].mxu1 }
 0x273   :  { %15278 = vst [vmem:[#allocation93_spill] sm:$0xff] %v11186_v48  ;;  %v1665_v28 = vmul.f32 %v11186_v48, %v11186_v48 }
 0x274   :  { %1829 = vrot.lane.b32.xlu1 %v1666_v9, %s10108_s23 }
 0x275   :  { %1827 = vrot.lane.b32.xlu0 %v1665_v28, %s10108_s23  ;;  %v11192_v25 = vpop.f32.mrb[38].mxu1 }
 0x276   :  { %15279 = vst [vmem:[#allocation94_spill] sm:$0xff] %v11192_v25  ;;  %v1668_v5 = vmul.f32 %v11192_v25, %v11192_v25  ;;  %v11196_v38 = vpop.f32.mrb[39].mxu1 }
 0x277   :  { %15280 = vst [vmem:[#allocation95_spill] sm:$0xff] %v11196_v38  ;;  %v1667_v18 = vmul.f32 %v11196_v38, %v11196_v38 }
 0x278   :  { %1833 = vrot.lane.b32.xlu1 %v1668_v5, %s10108_s23 }
 0x279   :  { %1831 = vrot.lane.b32.xlu0 %v1667_v18, %s10108_s23  ;;  %v11202_v17 = vpop.f32.mrb[40].mxu1 }
 0x27a   :  { %15281 = vst [vmem:[#allocation96_spill] sm:$0xff] %v11202_v17  ;;  %v1670_v9 = vmul.f32 %v11202_v17, %v11202_v17  ;;  %v11206_v28 = vpop.f32.mrb[41].mxu1 }
 0x27b   :  { %15282 = vst [vmem:[#allocation97_spill] sm:$0xff] %v11206_v28  ;;  %v1669_v8 = vmul.f32 %v11206_v28, %v11206_v28 }
 0x27c   :  { %1837 = vrot.lane.b32.xlu1 %v1670_v9, %s10108_s23 }
 0x27d   :  { %1835 = vrot.lane.b32.xlu0 %v1669_v8, %s10108_s23  ;;  %v11212_v7 = vpop.f32.mrb[42].mxu1 }
 0x27e   :  { %15283 = vst [vmem:[#allocation98_spill] sm:$0xff] %v11212_v7  ;;  %v1672_v5 = vmul.f32 %v11212_v7, %v11212_v7  ;;  %v11216_v18 = vpop.f32.mrb[43].mxu1 }
 0x27f   :  { %15284 = vst [vmem:[#allocation99_spill] sm:$0xff] %v11216_v18  ;;  %v1671_v1 = vmul.f32 %v11216_v18, %v11216_v18 }
 0x280   :  { %1841 = vrot.lane.b32.xlu1 %v1672_v5, %s10108_s23 }
 0x281   :  { %1839 = vrot.lane.b32.xlu0 %v1671_v1, %s10108_s23  ;;  %v11222_v0 = vpop.f32.mrb[44].mxu1 }
 0x282   :  { %15285 = vst [vmem:[#allocation100_spill] sm:$0xff] %v11222_v0  ;;  %v1674_v9 = vmul.f32 %v11222_v0, %v11222_v0  ;;  %v11226_v8 = vpop.f32.mrb[45].mxu1 }
 0x283   :  { %15286 = vst [vmem:[#allocation101_spill] sm:$0xff] %v11226_v8  ;;  %v1673_v59 = vmul.f32 %v11226_v8, %v11226_v8 }
 0x284   :  { %1845 = vrot.lane.b32.xlu1 %v1674_v9, %s10108_s23 }
 0x285   :  { %1843 = vrot.lane.b32.xlu0 %v1673_v59, %s10108_s23  ;;  %v11232_v58 = vpop.f32.mrb[46].mxu1 }
 0x286   :  { %15287 = vst [vmem:[#allocation102_spill] sm:$0xff] %v11232_v58  ;;  %v1676_v5 = vmul.f32 %v11232_v58, %v11232_v58  ;;  %v11236_v1 = vpop.f32.mrb[47].mxu1 }
 0x287   :  { %15288 = vst [vmem:[#allocation103_spill] sm:$0xff] %v11236_v1  ;;  %v1675_v53 = vmul.f32 %v11236_v1, %v11236_v1 }
 0x288   :  { %1849 = vrot.lane.b32.xlu1 %v1676_v5, %s10108_s23 }
 0x289   :  { %1847 = vrot.lane.b32.xlu0 %v1675_v53, %s10108_s23  ;;  %v11242_v52 = vpop.f32.mrb[48].mxu1 }
 0x28a   :  { %15289 = vst [vmem:[#allocation104_spill] sm:$0xff] %v11242_v52  ;;  %v1678_v9 = vmul.f32 %v11242_v52, %v11242_v52  ;;  %v11246_v59 = vpop.f32.mrb[49].mxu1 }
 0x28b   :  { %15290 = vst [vmem:[#allocation105_spill] sm:$0xff] %v11246_v59  ;;  %v1677_v47 = vmul.f32 %v11246_v59, %v11246_v59 }
 0x28c   :  { %1853 = vrot.lane.b32.xlu1 %v1678_v9, %s10108_s23 }
 0x28d   :  { %1851 = vrot.lane.b32.xlu0 %v1677_v47, %s10108_s23  ;;  %v11252_v46 = vpop.f32.mrb[50].mxu1 }
 0x28e   :  { %15291 = vst [vmem:[#allocation106_spill] sm:$0xff] %v11252_v46  ;;  %v1680_v5 = vmul.f32 %v11252_v46, %v11252_v46  ;;  %v11256_v53 = vpop.f32.mrb[51].mxu1 }
 0x28f   :  { %15292 = vst [vmem:[#allocation107_spill] sm:$0xff] %v11256_v53  ;;  %v1679_v41 = vmul.f32 %v11256_v53, %v11256_v53 }
 0x290   :  { %1857 = vrot.lane.b32.xlu1 %v1680_v5, %s10108_s23 }
 0x291   :  { %1855 = vrot.lane.b32.xlu0 %v1679_v41, %s10108_s23  ;;  %v11262_v40 = vpop.f32.mrb[52].mxu1 }
 0x292   :  { %15293 = vst [vmem:[#allocation108_spill] sm:$0xff] %v11262_v40  ;;  %v1682_v9 = vmul.f32 %v11262_v40, %v11262_v40  ;;  %v11266_v47 = vpop.f32.mrb[53].mxu1 }
 0x293   :  { %15294 = vst [vmem:[#allocation109_spill] sm:$0xff] %v11266_v47  ;;  %v1681_v35 = vmul.f32 %v11266_v47, %v11266_v47 }
 0x294   :  { %1861 = vrot.lane.b32.xlu1 %v1682_v9, %s10108_s23 }
 0x295   :  { %1859 = vrot.lane.b32.xlu0 %v1681_v35, %s10108_s23  ;;  %v11272_v34 = vpop.f32.mrb[54].mxu1 }
 0x296   :  { %15295 = vst [vmem:[#allocation110_spill] sm:$0xff] %v11272_v34  ;;  %v1684_v5 = vmul.f32 %v11272_v34, %v11272_v34  ;;  %v11276_v41 = vpop.f32.mrb[55].mxu1 }
 0x297   :  { %15296 = vst [vmem:[#allocation111_spill] sm:$0xff] %v11276_v41  ;;  %v1683_v27 = vmul.f32 %v11276_v41, %v11276_v41 }
 0x298   :  { %1865 = vrot.lane.b32.xlu1 %v1684_v5, %s10108_s23 }
 0x299   :  { %1863 = vrot.lane.b32.xlu0 %v1683_v27, %s10108_s23  ;;  %v11282_v26 = vpop.f32.mrb[56].mxu1 }
 0x29a   :  { %15297 = vst [vmem:[#allocation112_spill] sm:$0xff] %v11282_v26  ;;  %v1686_v9 = vmul.f32 %v11282_v26, %v11282_v26  ;;  %v11286_v35 = vpop.f32.mrb[57].mxu1 }
 0x29b   :  { %15298 = vst [vmem:[#allocation113_spill] sm:$0xff] %v11286_v35  ;;  %v1685_v21 = vmul.f32 %v11286_v35, %v11286_v35 }
 0x29c   :  { %1869 = vrot.lane.b32.xlu1 %v1686_v9, %s10108_s23 }
 0x29d   :  { %1867 = vrot.lane.b32.xlu0 %v1685_v21, %s10108_s23  ;;  %v11292_v20 = vpop.f32.mrb[58].mxu1 }
 0x29e   :  { %15299 = vst [vmem:[#allocation114_spill] sm:$0xff] %v11292_v20  ;;  %v1688_v5 = vmul.f32 %v11292_v20, %v11292_v20  ;;  %v11296_v27 = vpop.f32.mrb[59].mxu1 }
 0x29f   :  { %15300 = vst [vmem:[#allocation115_spill] sm:$0xff] %v11296_v27  ;;  %v1687_v14 = vmul.f32 %v11296_v27, %v11296_v27 }
 0x2a0   :  { %1873 = vrot.lane.b32.xlu1 %v1688_v5, %s10108_s23 }
 0x2a1   :  { %1871 = vrot.lane.b32.xlu0 %v1687_v14, %s10108_s23  ;;  %v11302_v15 = vpop.f32.mrb[60].mxu1 }
 0x2a2   :  { %15301 = vst [vmem:[#allocation116_spill] sm:$0xff] %v11302_v15  ;;  %v1690_v9 = vmul.f32 %v11302_v15, %v11302_v15  ;;  %v1762_v21 = vpop.permute.xlu1 %1761  ;;  %v11306_v10 = vpop.f32.mrb[61].mxu1 }
 0x2a3   :  { %15302 = vst [vmem:[#allocation117_spill] sm:$0xff] %v11306_v10  ;;  %v1952_v35 = vsub.f32 %v11009_v22, %v1762_v21  ;;  %v1689_v20 = vmul.f32 %v11306_v10, %v11306_v10  ;;  %v1760_v26 = vpop.permute.xlu0 %1759 }
 0x2a4   :  { %v1951_v27 = vsub.f32 %v11013_v50, %v1760_v26  ;;  %1877 = vrot.lane.b32.xlu1 %v1690_v9, %s10108_s23 }
 0x2a5   :  { %v2080_v5 = vadd.f32 1e-06, %v1952_v35  ;;  %1875 = vrot.lane.b32.xlu0 %v1689_v20, %s10108_s23  ;;  %v11314_v14 = vpop.f32.mrb[62].mxu1 }
 0x2a6   :  { %15303 = vst [vmem:[#allocation118_spill] sm:$0xff] %v11314_v14  ;;  %v2079_v41 = vadd.f32 1e-06, %v1951_v27  ;;  %v1692_v15 = vmul.f32 %v11314_v14, %v11314_v14  ;;  %v1766_v34 = vpop.permute.xlu1 %1765  ;;  %v11318_v47 = vpop.f32.mrb[63].mxu1 }
 0x2a7   :  { %15304 = vst [vmem:[#allocation119_spill] sm:$0xff] %v11318_v47  ;;  %9508 = vrsqrt.f32 %v2080_v5  ;;  %v1954_v21 = vsub.f32 %v11019_v31, %v1766_v34  ;;  %v1691_v26 = vmul.f32 %v11318_v47, %v11318_v47  ;;  %v1764_v10 = vpop.permute.xlu0 %1763 }
 0x2a8   :  { %9510 = vrsqrt.f32 %v2079_v41  ;;  %v1953_v35 = vsub.f32 %v11023_v11, %v1764_v10  ;;  %1881 = vrot.lane.b32.xlu1 %v1692_v15, %s10108_s23 }
 0x2a9   :  { %v2082_v20 = vadd.f32 1e-06, %v1954_v21  ;;  %1879 = vrot.lane.b32.xlu0 %v1691_v26, %s10108_s23  ;;  %v11326_v27 = vpop.f32.mrb[64].mxu1 }
 0x2aa   :  { %15305 = vst [vmem:[#allocation120_spill] sm:$0xff] %v11326_v27  ;;  %v2081_v9 = vadd.f32 1e-06, %v1953_v35  ;;  %v1694_v5 = vmul.f32 %v11326_v27, %v11326_v27  ;;  %v1770_v14 = vpop.permute.xlu1 %1769  ;;  %v11330_v34 = vpop.f32.mrb[65].mxu1 }
 0x2ab   :  { %15306 = vst [vmem:[#allocation121_spill] sm:$0xff] %v11330_v34  ;;  %9512 = vrsqrt.f32 %v2082_v20  ;;  %v1956_v47 = vsub.f32 %v11029_v44, %v1770_v14  ;;  %v1693_v10 = vmul.f32 %v11330_v34, %v11330_v34  ;;  %v1768_v41 = vpop.permute.xlu0 %1767 }
 0x2ac   :  { %9514 = vrsqrt.f32 %v2081_v9  ;;  %v1955_v15 = vsub.f32 %v11033_v6, %v1768_v41  ;;  %1885 = vrot.lane.b32.xlu1 %v1694_v5, %s10108_s23  ;;  %v15341_v6 = vld [vmem:[#allocation25_spill] sm:$0xff] }
 0x2ad   :  { %v2084_v21 = vadd.f32 1e-06, %v1956_v47  ;;  %1883 = vrot.lane.b32.xlu0 %v1693_v10, %s10108_s23 }
 0x2ae   :  { %v2083_v26 = vadd.f32 1e-06, %v1955_v15  ;;  %v1774_v35 = vpop.permute.xlu1 %1773 }
 0x2af   :  { %9516 = vrsqrt.f32 %v2084_v21  ;;  %v1958_v27 = vsub.f32 %v11039_v36, %v1774_v35  ;;  %v1772_v20 = vpop.permute.xlu0 %1771 }
 0x2b0   :  { %9518 = vrsqrt.f32 %v2083_v26  ;;  %v1957_v14 = vsub.f32 %v11043_v61, %v1772_v20 }
 0x2b1   :  { %v9509_v44 = vpop.eup %9508  ;;  %v2086_v34 = vadd.f32 1e-06, %v1958_v27 }
 0x2b2   :  { %v9511_v11 = vpop.eup %9510  ;;  %v2085_v9 = vadd.f32 1e-06, %v1957_v14  ;;  %v1778_v31 = vpop.permute.xlu1 %1777  ;;  %2273 = vrot.lane.b32.xlu1 %v9509_v44, %s10109_s26 }
 0x2b3   :  { %9520 = vrsqrt.f32 %v2086_v34  ;;  %v1960_v47 = vsub.f32 %v11049_v3, %v1778_v31  ;;  %2271 = vrot.lane.b32.xlu0 %v9511_v11, %s10109_s26  ;;  %v1776_v5 = vpop.permute.xlu0 %1775  ;;  %v15333_v3 = vld [vmem:[#allocation118_spill] sm:$0xff] }
 0x2b4   :  { %9522 = vrsqrt.f32 %v2085_v9  ;;  %v1959_v10 = vsub.f32 %v11053_v62, %v1776_v5 }
 0x2b5   :  { %v9513_v41 = vpop.eup %9512  ;;  %v2088_v15 = vadd.f32 1e-06, %v1960_v47 }
 0x2b6   :  { %v9515_v21 = vpop.eup %9514  ;;  %v2087_v26 = vadd.f32 1e-06, %v1959_v10  ;;  %v1782_v27 = vpop.permute.xlu1 %1781  ;;  %2277 = vrot.lane.b32.xlu1 %v9513_v41, %s10109_s26 }
 0x2b7   :  { %9524 = vrsqrt.f32 %v2088_v15  ;;  %v1962_v35 = vsub.f32 %v11059_v51, %v1782_v27  ;;  %2275 = vrot.lane.b32.xlu0 %v9515_v21, %s10109_s26  ;;  %v1780_v44 = vpop.permute.xlu0 %1779  ;;  %v15340_v51 = vld [vmem:[#allocation24_spill] sm:$0xff] }
 0x2b8   :  { %9526 = vrsqrt.f32 %v2087_v26  ;;  %v1961_v31 = vsub.f32 %v11063_v32, %v1780_v44 }
 0x2b9   :  { %v9517_v11 = vpop.eup %9516  ;;  %v2090_v34 = vadd.f32 1e-06, %v1962_v35 }
 0x2ba   :  { %v9519_v20 = vpop.eup %9518  ;;  %v2089_v14 = vadd.f32 1e-06, %v1961_v31  ;;  %v1786_v9 = vpop.permute.xlu1 %1785  ;;  %2281 = vrot.lane.b32.xlu1 %v9517_v11, %s10109_s26 }
 0x2bb   :  { %9528 = vrsqrt.f32 %v2090_v34  ;;  %v1964_v47 = vsub.f32 %v11069_v19, %v1786_v9  ;;  %2279 = vrot.lane.b32.xlu0 %v9519_v20, %s10109_s26  ;;  %v1784_v5 = vpop.permute.xlu0 %1783 }
 0x2bc   :  { %9530 = vrsqrt.f32 %v2089_v14  ;;  %v1963_v10 = vsub.f32 %v11073_v33, %v1784_v5 }
 0x2bd   :  { %v9521_v41 = vpop.eup %9520  ;;  %v2092_v15 = vadd.f32 1e-06, %v1964_v47 }
 0x2be   :  { %v9523_v21 = vpop.eup %9522  ;;  %v2091_v26 = vadd.f32 1e-06, %v1963_v10  ;;  %v1790_v27 = vpop.permute.xlu1 %1789  ;;  %2285 = vrot.lane.b32.xlu1 %v9521_v41, %s10109_s26 }
 0x2bf   :  { %9532 = vrsqrt.f32 %v2092_v15  ;;  %v1966_v35 = vsub.f32 %v11079_v60, %v1790_v27  ;;  %2283 = vrot.lane.b32.xlu0 %v9523_v21, %s10109_s26  ;;  %v1788_v44 = vpop.permute.xlu0 %1787 }
 0x2c0   :  { %9534 = vrsqrt.f32 %v2091_v26  ;;  %v1965_v31 = vsub.f32 %v11083_v16, %v1788_v44  ;;  %v15353_v16 = vld [vmem:[#allocation35_spill] sm:$0xff] }
 0x2c1   :  { %v9525_v11 = vpop.eup %9524  ;;  %v2094_v34 = vadd.f32 1e-06, %v1966_v35 }
 0x2c2   :  { %v9527_v20 = vpop.eup %9526  ;;  %v2093_v14 = vadd.f32 1e-06, %v1965_v31  ;;  %v1794_v9 = vpop.permute.xlu1 %1793  ;;  %2289 = vrot.lane.b32.xlu1 %v9525_v11, %s10109_s26 }
 0x2c3   :  { %9536 = vrsqrt.f32 %v2094_v34  ;;  %v1968_v47 = vsub.f32 %v11089_v23, %v1794_v9  ;;  %2287 = vrot.lane.b32.xlu0 %v9527_v20, %s10109_s26  ;;  %v1792_v5 = vpop.permute.xlu0 %1791 }
 0x2c4   :  { %9538 = vrsqrt.f32 %v2093_v14  ;;  %v1967_v10 = vsub.f32 %v11093_v49, %v1792_v5  ;;  %v15349_v49 = vld [vmem:[#allocation31_spill] sm:$0xff] }
 0x2c5   :  { %v9529_v41 = vpop.eup %9528  ;;  %v2096_v15 = vadd.f32 1e-06, %v1968_v47 }
 0x2c6   :  { %v9531_v21 = vpop.eup %9530  ;;  %v2095_v26 = vadd.f32 1e-06, %v1967_v10  ;;  %v1798_v27 = vpop.permute.xlu1 %1797  ;;  %2293 = vrot.lane.b32.xlu1 %v9529_v41, %s10109_s26 }
 0x2c7   :  { %9540 = vrsqrt.f32 %v2096_v15  ;;  %v1970_v35 = vsub.f32 %v11102_v30, %v1798_v27  ;;  %2291 = vrot.lane.b32.xlu0 %v9531_v21, %s10109_s26  ;;  %v1796_v44 = vpop.permute.xlu0 %1795  ;;  %v15345_v30 = vld [vmem:[#allocation120_spill] sm:$0xff] }
 0x2c8   :  { %9542 = vrsqrt.f32 %v2095_v26  ;;  %v1969_v31 = vsub.f32 %v11106_v57, %v1796_v44 }
 0x2c9   :  { %v9533_v11 = vpop.eup %9532  ;;  %v2098_v34 = vadd.f32 1e-06, %v1970_v35 }
 0x2ca   :  { %v9535_v20 = vpop.eup %9534  ;;  %v2097_v14 = vadd.f32 1e-06, %v1969_v31  ;;  %v1802_v9 = vpop.permute.xlu1 %1801  ;;  %2297 = vrot.lane.b32.xlu1 %v9533_v11, %s10109_s26 }
 0x2cb   :  { %9544 = vrsqrt.f32 %v2098_v34  ;;  %v1972_v47 = vsub.f32 %v11112_v43, %v1802_v9  ;;  %2295 = vrot.lane.b32.xlu0 %v9535_v20, %s10109_s26  ;;  %v1800_v5 = vpop.permute.xlu0 %1799  ;;  %v15352_v43 = vld [vmem:[#allocation34_spill] sm:$0xff] }
 0x2cc   :  { %9546 = vrsqrt.f32 %v2097_v14  ;;  %v1971_v10 = vsub.f32 %v11116_v39, %v1800_v5 }
 0x2cd   :  { %v9537_v41 = vpop.eup %9536  ;;  %v2100_v15 = vadd.f32 1e-06, %v1972_v47 }
 0x2ce   :  { %v9539_v21 = vpop.eup %9538  ;;  %v2099_v26 = vadd.f32 1e-06, %v1971_v10  ;;  %v1806_v27 = vpop.permute.xlu1 %1805  ;;  %2301 = vrot.lane.b32.xlu1 %v9537_v41, %s10109_s26 }
 0x2cf   :  { %9548 = vrsqrt.f32 %v2100_v15  ;;  %v1974_v35 = vsub.f32 %v11122_v42, %v1806_v27  ;;  %2299 = vrot.lane.b32.xlu0 %v9539_v21, %s10109_s26  ;;  %v1804_v44 = vpop.permute.xlu0 %1803  ;;  %v15355_v42 = vld [vmem:[#allocation37_spill] sm:$0xff] }
 0x2d0   :  { %9550 = vrsqrt.f32 %v2099_v26  ;;  %v1973_v31 = vsub.f32 %v11126_v54, %v1804_v44 }
 0x2d1   :  { %v9541_v11 = vpop.eup %9540  ;;  %v2102_v34 = vadd.f32 1e-06, %v1974_v35 }
 0x2d2   :  { %v9543_v20 = vpop.eup %9542  ;;  %v2101_v14 = vadd.f32 1e-06, %v1973_v31  ;;  %v1810_v9 = vpop.permute.xlu1 %1809  ;;  %2305 = vrot.lane.b32.xlu1 %v9541_v11, %s10109_s26 }
 0x2d3   :  { %9552 = vrsqrt.f32 %v2102_v34  ;;  %v1976_v47 = vsub.f32 %v11132_v24, %v1810_v9  ;;  %2303 = vrot.lane.b32.xlu0 %v9543_v20, %s10109_s26  ;;  %v1808_v5 = vpop.permute.xlu0 %1807  ;;  %v11553_v24 = vld [vmem:[%s14927_s3 + $0x2] ss:$0 sm:$0xff] }
 0x2d4   :  { %9554 = vrsqrt.f32 %v2101_v14  ;;  %v1975_v10 = vsub.f32 %v11136_v4, %v1808_v5 }
 0x2d5   :  { %v9545_v41 = vpop.eup %9544  ;;  %v2104_v15 = vadd.f32 1e-06, %v1976_v47 }
 0x2d6   :  { %v9547_v21 = vpop.eup %9546  ;;  %v2103_v26 = vadd.f32 1e-06, %v1975_v10  ;;  %v1814_v27 = vpop.permute.xlu1 %1813  ;;  %2309 = vrot.lane.b32.xlu1 %v9545_v41, %s10109_s26 }
 0x2d7   :  { %9556 = vrsqrt.f32 %v2104_v15  ;;  %v1978_v35 = vsub.f32 %v11142_v12, %v1814_v27  ;;  %2307 = vrot.lane.b32.xlu0 %v9547_v21, %s10109_s26  ;;  %v1812_v44 = vpop.permute.xlu0 %1811 }
 0x2d8   :  { %9558 = vrsqrt.f32 %v2103_v26  ;;  %v1977_v31 = vsub.f32 %v11146_v29, %v1812_v44  ;;  %v15356_v29 = vld [vmem:[#allocation38_spill] sm:$0xff] }
 0x2d9   :  { %v9549_v11 = vpop.eup %9548  ;;  %v2106_v34 = vadd.f32 1e-06, %v1978_v35 }
 0x2da   :  { %v9551_v20 = vpop.eup %9550  ;;  %v2105_v14 = vadd.f32 1e-06, %v1977_v31  ;;  %v1818_v9 = vpop.permute.xlu1 %1817  ;;  %2313 = vrot.lane.b32.xlu1 %v9549_v11, %s10109_s26 }
 0x2db   :  { %9560 = vrsqrt.f32 %v2106_v34  ;;  %v1980_v47 = vsub.f32 %v11152_v63, %v1818_v9  ;;  %2311 = vrot.lane.b32.xlu0 %v9551_v20, %s10109_s26  ;;  %v1816_v5 = vpop.permute.xlu0 %1815 }
 0x2dc   :  { %9562 = vrsqrt.f32 %v2105_v14  ;;  %v1979_v10 = vsub.f32 %v11156_v13, %v1816_v5 }
 0x2dd   :  { %v9553_v41 = vpop.eup %9552  ;;  %v2108_v15 = vadd.f32 1e-06, %v1980_v47 }
 0x2de   :  { %v9555_v21 = vpop.eup %9554  ;;  %v2107_v26 = vadd.f32 1e-06, %v1979_v10  ;;  %v1822_v27 = vpop.permute.xlu1 %1821  ;;  %2317 = vrot.lane.b32.xlu1 %v9553_v41, %s10109_s26 }
 0x2df   :  { %9564 = vrsqrt.f32 %v2108_v15  ;;  %v1982_v35 = vsub.f32 %v11162_v55, %v1822_v27  ;;  %2315 = vrot.lane.b32.xlu0 %v9555_v21, %s10109_s26  ;;  %v1820_v44 = vpop.permute.xlu0 %1819 }
 0x2e0   :  { %9566 = vrsqrt.f32 %v2107_v26  ;;  %v1981_v31 = vsub.f32 %v11166_v2, %v1820_v44 }
 0x2e1   :  { %v9557_v11 = vpop.eup %9556  ;;  %v2110_v34 = vadd.f32 1e-06, %v1982_v35 }
 0x2e2   :  { %v9559_v20 = vpop.eup %9558  ;;  %v2109_v14 = vadd.f32 1e-06, %v1981_v31  ;;  %v1826_v9 = vpop.permute.xlu1 %1825  ;;  %2321 = vrot.lane.b32.xlu1 %v9557_v11, %s10109_s26 }
 0x2e3   :  { %9568 = vrsqrt.f32 %v2110_v34  ;;  %v1984_v47 = vsub.f32 %v11172_v45, %v1826_v9  ;;  %2319 = vrot.lane.b32.xlu0 %v9559_v20, %s10109_s26  ;;  %v1824_v5 = vpop.permute.xlu0 %1823 }
 0x2e4   :  { %9570 = vrsqrt.f32 %v2109_v14  ;;  %v1983_v10 = vsub.f32 %v11176_v56, %v1824_v5 }
 0x2e5   :  { %v9561_v41 = vpop.eup %9560  ;;  %v2112_v15 = vadd.f32 1e-06, %v1984_v47 }
 0x2e6   :  { %v9563_v21 = vpop.eup %9562  ;;  %v2111_v26 = vadd.f32 1e-06, %v1983_v10  ;;  %v1830_v27 = vpop.permute.xlu1 %1829  ;;  %2325 = vrot.lane.b32.xlu1 %v9561_v41, %s10109_s26 }
 0x2e7   :  { %9572 = vrsqrt.f32 %v2112_v15  ;;  %v1986_v35 = vsub.f32 %v11182_v37, %v1830_v27  ;;  %2323 = vrot.lane.b32.xlu0 %v9563_v21, %s10109_s26  ;;  %v1828_v44 = vpop.permute.xlu0 %1827 }
 0x2e8   :  { %9574 = vrsqrt.f32 %v2111_v26  ;;  %v1985_v31 = vsub.f32 %v11186_v48, %v1828_v44 }
 0x2e9   :  { %v9565_v11 = vpop.eup %9564  ;;  %v2114_v34 = vadd.f32 1e-06, %v1986_v35 }
 0x2ea   :  { %v9567_v20 = vpop.eup %9566  ;;  %v2113_v14 = vadd.f32 1e-06, %v1985_v31  ;;  %v1834_v9 = vpop.permute.xlu1 %1833  ;;  %2329 = vrot.lane.b32.xlu1 %v9565_v11, %s10109_s26 }
 0x2eb   :  { %9576 = vrsqrt.f32 %v2114_v34  ;;  %v1988_v47 = vsub.f32 %v11192_v25, %v1834_v9  ;;  %2327 = vrot.lane.b32.xlu0 %v9567_v20, %s10109_s26  ;;  %v1832_v5 = vpop.permute.xlu0 %1831  ;;  %v15403_v25 = vld [vmem:[#allocation71_spill] sm:$0xff] }
 0x2ec   :  { %9578 = vrsqrt.f32 %v2113_v14  ;;  %v1987_v10 = vsub.f32 %v11196_v38, %v1832_v5 }
 0x2ed   :  { %v9569_v41 = vpop.eup %9568  ;;  %v2116_v15 = vadd.f32 1e-06, %v1988_v47 }
 0x2ee   :  { %v9571_v21 = vpop.eup %9570  ;;  %v2115_v26 = vadd.f32 1e-06, %v1987_v10  ;;  %v1838_v27 = vpop.permute.xlu1 %1837  ;;  %2333 = vrot.lane.b32.xlu1 %v9569_v41, %s10109_s26 }
 0x2ef   :  { %9580 = vrsqrt.f32 %v2116_v15  ;;  %v1990_v35 = vsub.f32 %v11202_v17, %v1838_v27  ;;  %2331 = vrot.lane.b32.xlu0 %v9571_v21, %s10109_s26  ;;  %v1836_v44 = vpop.permute.xlu0 %1835 }
 0x2f0   :  { %9582 = vrsqrt.f32 %v2115_v26  ;;  %v1989_v31 = vsub.f32 %v11206_v28, %v1836_v44 }
 0x2f1   :  { %v9573_v11 = vpop.eup %9572  ;;  %v2118_v34 = vadd.f32 1e-06, %v1990_v35 }
 0x2f2   :  { %v9575_v20 = vpop.eup %9574  ;;  %v2117_v14 = vadd.f32 1e-06, %v1989_v31  ;;  %v1842_v9 = vpop.permute.xlu1 %1841  ;;  %2337 = vrot.lane.b32.xlu1 %v9573_v11, %s10109_s26 }
 0x2f3   :  { %9584 = vrsqrt.f32 %v2118_v34  ;;  %v1992_v47 = vsub.f32 %v11212_v7, %v1842_v9  ;;  %2335 = vrot.lane.b32.xlu0 %v9575_v20, %s10109_s26  ;;  %v1840_v5 = vpop.permute.xlu0 %1839  ;;  %v15385_v7 = vld [vmem:[#allocation69_spill] sm:$0xff] }
 0x2f4   :  { %9586 = vrsqrt.f32 %v2117_v14  ;;  %v1991_v10 = vsub.f32 %v11216_v18, %v1840_v5  ;;  %v15433_v18 = vld [vmem:[#allocation79_spill] sm:$0xff] }
 0x2f5   :  { %v9577_v41 = vpop.eup %9576  ;;  %v2120_v15 = vadd.f32 1e-06, %v1992_v47 }
 0x2f6   :  { %v9579_v21 = vpop.eup %9578  ;;  %v2119_v26 = vadd.f32 1e-06, %v1991_v10  ;;  %v1846_v27 = vpop.permute.xlu1 %1845  ;;  %2341 = vrot.lane.b32.xlu1 %v9577_v41, %s10109_s26 }
 0x2f7   :  { %9588 = vrsqrt.f32 %v2120_v15  ;;  %v1994_v35 = vsub.f32 %v11222_v0, %v1846_v27  ;;  %2339 = vrot.lane.b32.xlu0 %v9579_v21, %s10109_s26  ;;  %v1844_v44 = vpop.permute.xlu0 %1843 }
 0x2f8   :  { %9590 = vrsqrt.f32 %v2119_v26  ;;  %v1993_v31 = vsub.f32 %v11226_v8, %v1844_v44 }
 0x2f9   :  { %v9581_v11 = vpop.eup %9580  ;;  %v2122_v34 = vadd.f32 1e-06, %v1994_v35 }
 0x2fa   :  { %v9583_v20 = vpop.eup %9582  ;;  %v2121_v14 = vadd.f32 1e-06, %v1993_v31  ;;  %v1850_v9 = vpop.permute.xlu1 %1849  ;;  %2345 = vrot.lane.b32.xlu1 %v9581_v11, %s10109_s26 }
 0x2fb   :  { %9592 = vrsqrt.f32 %v2122_v34  ;;  %v1996_v47 = vsub.f32 %v11232_v58, %v1850_v9  ;;  %2343 = vrot.lane.b32.xlu0 %v9583_v20, %s10109_s26  ;;  %v1848_v5 = vpop.permute.xlu0 %1847 }
 0x2fc   :  { %9594 = vrsqrt.f32 %v2121_v14  ;;  %v1995_v10 = vsub.f32 %v11236_v1, %v1848_v5 }
 0x2fd   :  { %v9585_v41 = vpop.eup %9584  ;;  %v2124_v15 = vadd.f32 1e-06, %v1996_v47 }
 0x2fe   :  { %v9587_v21 = vpop.eup %9586  ;;  %v2123_v26 = vadd.f32 1e-06, %v1995_v10  ;;  %v1854_v27 = vpop.permute.xlu1 %1853  ;;  %2349 = vrot.lane.b32.xlu1 %v9585_v41, %s10109_s26 }
 0x2ff   :  { %9596 = vrsqrt.f32 %v2124_v15  ;;  %v1998_v35 = vsub.f32 %v11242_v52, %v1854_v27  ;;  %2347 = vrot.lane.b32.xlu0 %v9587_v21, %s10109_s26  ;;  %v1852_v44 = vpop.permute.xlu0 %1851  ;;  %v15328_v52 = vld [vmem:[#allocation14_spill] sm:$0xff] }
 0x300   :  { %9598 = vrsqrt.f32 %v2123_v26  ;;  %v1997_v31 = vsub.f32 %v11246_v59, %v1852_v44  ;;  %v15322_v59 = vld [vmem:[#allocation9_spill] sm:$0xff] }
 0x301   :  { %v9589_v11 = vpop.eup %9588  ;;  %v2126_v34 = vadd.f32 1e-06, %v1998_v35 }
 0x302   :  { %v9591_v20 = vpop.eup %9590  ;;  %v2125_v14 = vadd.f32 1e-06, %v1997_v31  ;;  %v1858_v9 = vpop.permute.xlu1 %1857  ;;  %2353 = vrot.lane.b32.xlu1 %v9589_v11, %s10109_s26  ;;  %v15307_v31 = vld [vmem:[#allocation109_spill] sm:$0xff] }
 0x303   :  { %9600 = vrsqrt.f32 %v2126_v34  ;;  %v2000_v47 = vsub.f32 %v11252_v46, %v1858_v9  ;;  %2351 = vrot.lane.b32.xlu0 %v9591_v20, %s10109_s26  ;;  %v1856_v5 = vpop.permute.xlu0 %1855  ;;  %v15331_v46 = vld [vmem:[#allocation17_spill] sm:$0xff] }
 0x304   :  { %9602 = vrsqrt.f32 %v2125_v14  ;;  %v1999_v10 = vsub.f32 %v11256_v53, %v1856_v5 }
 0x305   :  { %v9593_v41 = vpop.eup %9592  ;;  %v2128_v15 = vadd.f32 1e-06, %v2000_v47  ;;  %v15308_v47 = vld [vmem:[#allocation110_spill] sm:$0xff] }
 0x306   :  { %v9595_v21 = vpop.eup %9594  ;;  %v2127_v26 = vadd.f32 1e-06, %v1999_v10  ;;  %v1862_v27 = vpop.permute.xlu1 %1861  ;;  %2357 = vrot.lane.b32.xlu1 %v9593_v41, %s10109_s26 }
 0x307   :  { %9604 = vrsqrt.f32 %v2128_v15  ;;  %v2002_v35 = vsub.f32 %v11262_v40, %v1862_v27  ;;  %2355 = vrot.lane.b32.xlu0 %v9595_v21, %s10109_s26  ;;  %v1860_v44 = vpop.permute.xlu0 %1859  ;;  %v15309_v15 = vld [vmem:[#allocation111_spill] sm:$0xff] }
 0x308   :  { %9606 = vrsqrt.f32 %v2127_v26  ;;  %v2001_v11 = vsub.f32 %v15307_v31, %v1860_v44 }
 0x309   :  { %v9597_v34 = vpop.eup %9596  ;;  %v2130_v20 = vadd.f32 1e-06, %v2002_v35  ;;  %v15310_v35 = vld [vmem:[#allocation112_spill] sm:$0xff] }
 0x30a   :  { %v9599_v14 = vpop.eup %9598  ;;  %v2129_v9 = vadd.f32 1e-06, %v2001_v11  ;;  %v1866_v5 = vpop.permute.xlu1 %1865  ;;  %2361 = vrot.lane.b32.xlu1 %v9597_v34, %s10109_s26 }
 0x30b   :  { %9608 = vrsqrt.f32 %v2130_v20  ;;  %v2004_v10 = vsub.f32 %v15308_v47, %v1866_v5  ;;  %2359 = vrot.lane.b32.xlu0 %v9599_v14, %s10109_s26  ;;  %v1864_v41 = vpop.permute.xlu0 %1863  ;;  %v15311_v20 = vld [vmem:[#allocation113_spill] sm:$0xff] }
 0x30c   :  { %9610 = vrsqrt.f32 %v2129_v9  ;;  %v2003_v21 = vsub.f32 %v15309_v15, %v1864_v41 }
 0x30d   :  { %v9601_v27 = vpop.eup %9600  ;;  %v2132_v26 = vadd.f32 1e-06, %v2004_v10  ;;  %v15312_v10 = vld [vmem:[#allocation114_spill] sm:$0xff] }
 0x30e   :  { %v9603_v40 = vpop.eup %9602  ;;  %v2131_v44 = vadd.f32 1e-06, %v2003_v21  ;;  %v1870_v31 = vpop.permute.xlu1 %1869  ;;  %2365 = vrot.lane.b32.xlu1 %v9601_v27, %s10109_s26 }
 0x30f   :  { %9612 = vrsqrt.f32 %v2132_v26  ;;  %v2006_v11 = vsub.f32 %v15310_v35, %v1870_v31  ;;  %2363 = vrot.lane.b32.xlu0 %v9603_v40, %s10109_s26  ;;  %v1868_v34 = vpop.permute.xlu0 %1867  ;;  %v15313_v31 = vld [vmem:[#allocation115_spill] sm:$0xff] }
 0x310   :  { %9614 = vrsqrt.f32 %v2131_v44  ;;  %v2005_v14 = vsub.f32 %v15311_v20, %v1868_v34  ;;  %v15314_v34 = vld [vmem:[#allocation6_spill] sm:$0xff]  ;;  %v15329_v20 = vld [vmem:[#allocation15_spill] sm:$0xff] }
 0x311   :  { %v9605_v5 = vpop.eup %9604  ;;  %v2134_v9 = vadd.f32 1e-06, %v2006_v11  ;;  %v15364_v2 = vsub.f32 %v15314_v34, %v11009_v22 }
 0x312   :  { %v9607_v47 = vpop.eup %9606  ;;  %v2133_v41 = vadd.f32 1e-06, %v2005_v14  ;;  %v1874_v15 = vpop.permute.xlu1 %1873  ;;  %2369 = vrot.lane.b32.xlu1 %v9605_v5, %s10109_s26  ;;  %v15315_v14 = vld [vmem:[#allocation5_spill] sm:$0xff] }
 0x313   :  { %9616 = vrsqrt.f32 %v2134_v9  ;;  %v2008_v21 = vsub.f32 %v15312_v10, %v1874_v15  ;;  %2367 = vrot.lane.b32.xlu0 %v9607_v47, %s10109_s26  ;;  %v1872_v27 = vpop.permute.xlu0 %1871  ;;  %v15317_v9 = vld [vmem:[#allocation8_spill] sm:$0xff]  ;;  %v15325_v47 = vld [vmem:[#allocation11_spill] sm:$0xff]  ;;  %v15337_v15 = vld [vmem:[#allocation21_spill] sm:$0xff]  ;;  %v15368_v22 = vsub.f32 %v15315_v14, %v11013_v50 }
 0x314   :  { %9618 = vrsqrt.f32 %v2133_v41  ;;  %v2007_v40 = vsub.f32 %v15313_v31, %v1872_v27  ;;  %v15319_v41 = vld [vmem:[#allocation7_spill] sm:$0xff]  ;;  %v15320_v27 = vld [vmem:[#allocation116_spill] sm:$0xff] }
 0x315   :  { %v9609_v26 = vpop.eup %9608  ;;  %v2136_v44 = vadd.f32 1e-06, %v2008_v21 }
 0x316   :  { %v9611_v35 = vpop.eup %9610  ;;  %v2135_v53 = vadd.f32 1e-06, %v2007_v40  ;;  %v1878_v5 = vpop.permute.xlu1 %1877  ;;  %2373 = vrot.lane.b32.xlu1 %v9609_v26, %s10109_s26  ;;  %v15324_v26 = vld [vmem:[#allocation117_spill] sm:$0xff] }
 0x317   :  { %9620 = vrsqrt.f32 %v2136_v44  ;;  %v2010_v21 = vsub.f32 %v15320_v27, %v1878_v5  ;;  %2371 = vrot.lane.b32.xlu0 %v9611_v35, %s10109_s26  ;;  %v1876_v31 = vpop.permute.xlu0 %1875  ;;  %v15326_v44 = vld [vmem:[#allocation12_spill] sm:$0xff] }
 0x318   :  { %9622 = vrsqrt.f32 %v2135_v53  ;;  %v2009_v1 = vsub.f32 %v15324_v26, %v1876_v31  ;;  %v15334_v53 = vld [vmem:[#allocation19_spill] sm:$0xff] }
 0x319   :  { %v9613_v58 = vpop.eup %9612  ;;  %v2138_v27 = vadd.f32 1e-06, %v2010_v21  ;;  %v15343_v21 = vld [vmem:[#allocation27_spill] sm:$0xff] }
 0x31a   :  { %v9615_v10 = vpop.eup %9614  ;;  %v2137_v40 = vadd.f32 1e-06, %v2009_v1  ;;  %v1882_v26 = vpop.permute.xlu1 %1881  ;;  %2377 = vrot.lane.b32.xlu1 %v9613_v58, %s10109_s26  ;;  %v15336_v58 = vld [vmem:[#allocation119_spill] sm:$0xff] }
 0x31b   :  { %9624 = vrsqrt.f32 %v2138_v27  ;;  %v2012_v5 = vsub.f32 %v15333_v3, %v1882_v26  ;;  %2375 = vrot.lane.b32.xlu0 %v9615_v10, %s10109_s26  ;;  %v1880_v11 = vpop.permute.xlu0 %1879  ;;  %v15338_v27 = vld [vmem:[#allocation22_spill] sm:$0xff] }
 0x31c   :  { %9626 = vrsqrt.f32 %v2137_v40  ;;  %v2011_v32 = vsub.f32 %v15336_v58, %v1880_v11  ;;  %v15346_v40 = vld [vmem:[#allocation29_spill] sm:$0xff] }
 0x31d   :  { %v9617_v31 = vpop.eup %9616  ;;  %v2140_v33 = vadd.f32 1e-06, %v2012_v5 }
 0x31e   :  { %v9619_v35 = vpop.eup %9618  ;;  %v2139_v1 = vadd.f32 1e-06, %v2011_v32  ;;  %2381 = vrot.lane.b32.xlu1 %v9617_v31, %s10109_s26  ;;  %v1886_v19 = vpop.permute.xlu1 %1885  ;;  %v15348_v31 = vld [vmem:[#allocation121_spill] sm:$0xff] }
 0x31f   :  { %9628 = vrsqrt.f32 %v2140_v33  ;;  %v2014_v26 = vsub.f32 %v15345_v30, %v1886_v19  ;;  %2379 = vrot.lane.b32.xlu0 %v9619_v35, %s10109_s26  ;;  %v1884_v60 = vpop.permute.xlu0 %1883  ;;  %v15350_v33 = vld [vmem:[#allocation32_spill] sm:$0xff]  ;;  %v15351_v19 = vld [vmem:[#allocation33_spill] sm:$0xff]  ;;  %v15422_v30 = vld [vmem:[#allocation75_spill] sm:$0xff] }
 0x320   :  { %9630 = vrsqrt.f32 %v2139_v1  ;;  %v2013_v39 = vsub.f32 %v15348_v31, %v1884_v60  ;;  %v15354_v60 = vld [vmem:[#allocation36_spill] sm:$0xff]  ;;  %v15391_v1 = vld [vmem:[#allocation70_spill] sm:$0xff] }
 0x321   :  { %v9621_v11 = vpop.eup %9620  ;;  %v2142_v54 = vadd.f32 1e-06, %v2014_v26  ;;  %v11533_v35 = vld [vmem:[%s14927_s3 + $0x1] ss:$0 sm:$0xff]  ;;  %v15392_v0 = vsub.f32 %v15319_v41, %v15391_v1 }
 0x322   :  { %v9623_v10 = vpop.eup %9622  ;;  %v2141_v32 = vadd.f32 1e-06, %v2013_v39  ;;  %2385 = vrot.lane.b32.xlu1 %v9621_v11, %s10109_s26 }
 0x323   :  { %9632 = vrsqrt.f32 %v2142_v54  ;;  %2383 = vrot.lane.b32.xlu0 %v9623_v10, %s10109_s26  ;;  %v15386_v10 = vsub.f32 %v15317_v9, %v15385_v7  ;;  %v15432_v7 = vld [vmem:[#allocation20_spill] sm:$0xff] }
 0x324   :  { %9634 = vrsqrt.f32 %v2141_v32  ;;  %v2274_v5 = vpop.permute.xlu1 %2273  ;;  %v15434_v28 = vsub.f32 %v15432_v7, %v15433_v18 }
 0x325   :  { %v9625_v63 = vpop.eup %9624  ;;  %v2464_v32 = vmul.f32 %v2274_v5, %v15364_v2  ;;  %v2272_v38 = vpop.permute.xlu0 %2271 }
 0x326   :  { %v9627_v11 = vpop.eup %9626  ;;  %v2463_v2 = vmul.f32 %v2272_v38, %v15368_v22  ;;  %2389 = vrot.lane.b32.xlu1 %v9625_v63, %s10109_s26 }
 0x327   :  { %v2533_v8 = vmul.f32 %v11533_v35, %v2464_v32  ;;  %2387 = vrot.lane.b32.xlu0 %v9627_v11, %s10109_s26  ;;  %v15407_v32 = vld [vmem:[#allocation10_spill] sm:$0xff] }
 0x328   :  { %v2532_v4 = vmul.f32 %v11533_v35, %v2463_v2  ;;  %v2278_v34 = vpop.permute.xlu1 %2277 }
 0x329   :  { %v9629_v26 = vpop.eup %9628  ;;  %v11579_v11 = vadd.f32 %v11553_v24, %v2533_v8  ;;  %v2466_v14 = vmul.f32 %v2278_v34, %v15386_v10  ;;  %v2276_v50 = vpop.permute.xlu0 %2275  ;;  %v15408_v10 = vld [vmem:[#allocation72_spill] sm:$0xff] }
 0x32a   :  { %v9631_v38 = vpop.eup %9630  ;;  %v11589_v17 = vadd.f32 %v11553_v24, %v2532_v4  ;;  %v2465_v8 = vmul.f32 %v2276_v50, %v15392_v0  ;;  %2393 = vrot.lane.b32.xlu1 %v9629_v26, %s10109_s26  ;;  %v15404_v4 = vsub.f32 %v15322_v59, %v15403_v25 }
 0x32b   :  { %v2666_v2 = vmul.f32 %v11579_v11, %v11579_v11  ;;  %v2535_v5 = vmul.f32 %v11533_v35, %v2466_v14  ;;  %2391 = vrot.lane.b32.xlu0 %v9631_v38, %s10109_s26 }
 0x32c   :  { %v2665_v26 = vmul.f32 %v11589_v17, %v11589_v17  ;;  %v2534_v50 = vmul.f32 %v11533_v35, %v2465_v8  ;;  %v2282_v9 = vpop.permute.xlu1 %2281 }
 0x32d   :  { %v9633_v39 = vpop.eup %9632  ;;  %v2730_v14 = vmul.f32 %v2666_v2, %v11579_v11  ;;  %v11614_v38 = vadd.f32 %v11553_v24, %v2535_v5  ;;  %v2468_v22 = vmul.f32 %v2282_v9, %v15404_v4  ;;  %v2280_v1 = vpop.permute.xlu0 %2279  ;;  %v15409_v2 = vsub.f32 %v15407_v32, %v15408_v10 }
 0x32e   :  { %v9635_v41 = vpop.eup %9634  ;;  %v2729_v8 = vmul.f32 %v2665_v26, %v11589_v17  ;;  %v11623_v63 = vadd.f32 %v11553_v24, %v2534_v50  ;;  %2397 = vrot.lane.b32.xlu1 %v9633_v39, %s10109_s26 }
 0x32f   :  { %v2467_v34 = vmul.f32 %v2280_v1, %v15409_v2  ;;  %v2794_v59 = vmul.f32 0.044715, %v2730_v14  ;;  %v2668_v9 = vmul.f32 %v11614_v38, %v11614_v38  ;;  %v2537_v4 = vmul.f32 %v11533_v35, %v2468_v22  ;;  %2395 = vrot.lane.b32.xlu0 %v9635_v41, %s10109_s26 }
 0x330   :  { %v2793_v48 = vmul.f32 0.044715, %v2729_v8  ;;  %v2667_v32 = vmul.f32 %v11623_v63, %v11623_v63  ;;  %v2286_v10 = vpop.permute.xlu1 %2285  ;;  %v15412_v22 = vsub.f32 %v15325_v47, %v11039_v36 }
 0x331   :  { %v2536_v39 = vmul.f32 %v11533_v35, %v2467_v34  ;;  %v2858_v1 = vadd.f32 %v2794_v59, %v11579_v11  ;;  %v2732_v14 = vmul.f32 %v2668_v9, %v11614_v38  ;;  %v11643_v2 = vadd.f32 %v11553_v24, %v2537_v4  ;;  %v2284_v25 = vpop.permute.xlu0 %2283 }
 0x332   :  { %v2470_v41 = vmul.f32 %v2286_v10, %v15412_v22  ;;  %v2731_v8 = vmul.f32 %v2667_v32, %v11623_v63  ;;  %v15413_v34 = vsub.f32 %v15326_v44, %v11043_v61  ;;  %v2857_v59 = vadd.f32 %v2793_v48, %v11589_v17 }
 0x333   :  { %v11650_v50 = vadd.f32 %v11553_v24, %v2536_v39  ;;  %v2922_v9 = vmul.f32 0.7978846, %v2858_v1  ;;  %v2796_v26 = vmul.f32 0.044715, %v2732_v14  ;;  %v2670_v4 = vmul.f32 %v11643_v2, %v11643_v2  ;;  %v15416_v1 = vld [vmem:[#allocation73_spill] sm:$0xff] }
 0x334   :  { %v2469_v58 = vmul.f32 %v2284_v25, %v15413_v34  ;;  %v2539_v36 = vmul.f32 %v11533_v35, %v2470_v41  ;;  %v2795_v47 = vmul.f32 0.044715, %v2731_v8  ;;  %v2290_v10 = vpop.permute.xlu1 %2289  ;;  %v2921_v22 = vmul.f32 0.7978846, %v2857_v59  ;;  %v15415_v25 = vld [vmem:[#allocation13_spill] sm:$0xff] }
 0x335   :  { %v2669_v32 = vmul.f32 %v11650_v50, %v11650_v50  ;;  %9636 = vtanh.f32 %v2922_v9  ;;  %v15417_v14 = vsub.f32 %v15415_v25, %v15416_v1  ;;  %v2288_v41 = vpop.permute.xlu0 %2287  ;;  %v2734_v9 = vmul.f32 %v2670_v4, %v11643_v2 }
 0x336   :  { %v2538_v39 = vmul.f32 %v11533_v35, %v2469_v58  ;;  %v11665_v48 = vadd.f32 %v11553_v24, %v2539_v36  ;;  %v15418_v58 = vsub.f32 %v15328_v52, %v11053_v62  ;;  %9638 = vtanh.f32 %v2921_v22  ;;  %v15419_v22 = vld [vmem:[#allocation74_spill] sm:$0xff] }
 0x337   :  { %v2472_v34 = vmul.f32 %v2290_v10, %v15417_v14  ;;  %v2733_v8 = vmul.f32 %v2669_v32, %v11650_v50  ;;  %v2859_v10 = vadd.f32 %v2795_v47, %v11623_v63  ;;  %v2860_v52 = vadd.f32 %v2796_v26, %v11614_v38 }
 0x338   :  { %v11672_v3 = vadd.f32 %v11553_v24, %v2538_v39  ;;  %v2471_v59 = vmul.f32 %v2288_v41, %v15418_v58  ;;  %v2672_v36 = vmul.f32 %v11665_v48, %v11665_v48  ;;  %v2294_v1 = vpop.permute.xlu1 %2293  ;;  %v15420_v14 = vsub.f32 %v15329_v20, %v15419_v22 }
 0x339   :  { %v2541_v44 = vmul.f32 %v11533_v35, %v2472_v34  ;;  %v2797_v25 = vmul.f32 0.044715, %v2733_v8  ;;  %v2292_v41 = vpop.permute.xlu0 %2291  ;;  %v2923_v47 = vmul.f32 0.7978846, %v2859_v10  ;;  %v2924_v5 = vmul.f32 0.7978846, %v2860_v52 }
 0x33a   :  { %v2671_v32 = vmul.f32 %v11672_v3, %v11672_v3  ;;  %v2540_v39 = vmul.f32 %v11533_v35, %v2471_v59  ;;  %v2736_v62 = vmul.f32 %v2672_v36, %v11665_v48  ;;  %v2474_v34 = vmul.f32 %v2294_v1, %v15420_v14  ;;  %v15421_v59 = vld [vmem:[#allocation16_spill] sm:$0xff] }
 0x33b   :  { %v11688_v4 = vadd.f32 %v11553_v24, %v2541_v44  ;;  %v15423_v61 = vsub.f32 %v15421_v59, %v15422_v30  ;;  %v2798_v36 = vmul.f32 0.044715, %v2734_v9  ;;  %9640 = vtanh.f32 %v2923_v47  ;;  %v15425_v52 = vld [vmem:[#allocation76_spill] sm:$0xff]  ;;  %v15427_v59 = vld [vmem:[#allocation18_spill] sm:$0xff] }
 0x33c   :  { %v2735_v8 = vmul.f32 %v2671_v32, %v11672_v3  ;;  %v11695_v58 = vadd.f32 %v11553_v24, %v2540_v39  ;;  %v2543_v0 = vmul.f32 %v11533_v35, %v2474_v34  ;;  %v2298_v1 = vpop.permute.xlu1 %2297  ;;  %9642 = vtanh.f32 %v2924_v5 }
 0x33d   :  { %v2473_v26 = vmul.f32 %v2292_v41, %v15423_v61  ;;  %v2674_v44 = vmul.f32 %v11688_v4, %v11688_v4  ;;  %v11708_v30 = vmul.f32 0.044715, %v2736_v62  ;;  %v15426_v22 = vsub.f32 %v15331_v46, %v15425_v52  ;;  %v2296_v34 = vpop.permute.xlu0 %2295 }
 0x33e   :  { %v2673_v32 = vmul.f32 %v11695_v58, %v11695_v58  ;;  %v11712_v9 = vadd.f32 %v11553_v24, %v2543_v0  ;;  %v11717_v41 = vmul.f32 0.044715, %v2735_v8  ;;  %v2861_v10 = vadd.f32 %v2797_v25, %v11650_v50 }
 0x33f   :  { %v2542_v39 = vmul.f32 %v11533_v35, %v2473_v26  ;;  %v2738_v61 = vmul.f32 %v2674_v44, %v11688_v4  ;;  %v2476_v14 = vmul.f32 %v2298_v1, %v15426_v22  ;;  %v15428_v26 = vld [vmem:[#allocation77_spill] sm:$0xff]  ;;  %v9637_v44 = vpop.eup %9636  ;;  %v11731_v8 = vadd.f32 %v2798_v36, %v11643_v2 }
 0x340   :  { %v15429_v5 = vsub.f32 %v15427_v59, %v15428_v26  ;;  %v2737_v0 = vmul.f32 %v2673_v32, %v11695_v58  ;;  %v2676_v31 = vmul.f32 %v11712_v9, %v11712_v9  ;;  %v9639_v1 = vpop.eup %9638  ;;  %v2925_v37 = vmul.f32 0.7978846, %v2861_v10 }
 0x341   :  { %v11720_v47 = vadd.f32 %v11553_v24, %v2542_v39  ;;  %v2545_v46 = vmul.f32 %v11533_v35, %v2476_v14  ;;  %v3050_v39 = vadd.f32 1.0, %v9637_v44  ;;  %v11733_v52 = vmul.f32 0.044715, %v2738_v61  ;;  %v15430_v14 = vld [vmem:[#allocation78_spill] sm:$0xff] }
 0x342   :  { %v2475_v62 = vmul.f32 %v2296_v34, %v15429_v5  ;;  %v2302_v34 = vpop.permute.xlu1 %2301  ;;  %v2740_v32 = vmul.f32 %v2676_v31, %v11712_v9  ;;  %v15431_v26 = vsub.f32 %v15334_v53, %v15430_v14  ;;  %v2300_v5 = vpop.permute.xlu0 %2299  ;;  %v3049_v20 = vadd.f32 1.0, %v9639_v1 }
 0x343   :  { %v2675_v22 = vmul.f32 %v11720_v47, %v11720_v47  ;;  %v11740_v59 = vadd.f32 %v11553_v24, %v2545_v46  ;;  %v3114_v44 = vmul.f32 0.5, %v3050_v39  ;;  %9644 = vtanh.f32 %v2925_v37  ;;  %v15444_v37 = vld [vmem:[#allocation26_spill] sm:$0xff] }
 0x344   :  { %v2544_v25 = vmul.f32 %v11533_v35, %v2475_v62  ;;  %v2478_v36 = vmul.f32 %v2302_v34, %v15431_v26  ;;  %v2477_v62 = vmul.f32 %v2300_v5, %v15434_v28  ;;  %v3113_v53 = vmul.f32 0.5, %v3049_v20  ;;  %v15436_v5 = vld [vmem:[#allocation80_spill] sm:$0xff] }
 0x345   :  { %v2739_v31 = vmul.f32 %v2675_v22, %v11720_v47  ;;  %v2678_v46 = vmul.f32 %v11740_v59, %v11740_v59  ;;  %v11755_v34 = vmul.f32 0.044715, %v2737_v0  ;;  %v11757_v1 = vmul.f32 0.044715, %v2740_v32  ;;  %v9641_v28 = vpop.eup %9640 }
 0x346   :  { %v11746_v61 = vadd.f32 %v11553_v24, %v2544_v25  ;;  %v2547_v54 = vmul.f32 %v11533_v35, %v2478_v36  ;;  %v2546_v25 = vmul.f32 %v11533_v35, %v2477_v62  ;;  %v2306_v18 = vpop.permute.xlu1 %2305  ;;  %v15435_v22 = vsub.f32 %v15337_v15, %v11089_v23  ;;  %v2304_v0 = vpop.permute.xlu0 %2303 }
 0x347   :  { %v2742_v7 = vmul.f32 %v2678_v46, %v11740_v59  ;;  %v3177_v32 = vmul.f32 %v3113_v53, %v11589_v17  ;;  %v9643_v14 = vpop.eup %9642  ;;  %v3178_v26 = vmul.f32 %v3114_v44, %v11579_v11  ;;  %v15437_v62 = vsub.f32 %v15338_v27, %v15436_v5 }
 0x348   :  { %v2677_v39 = vmul.f32 %v11746_v61, %v11746_v61  ;;  %v11764_v10 = vadd.f32 %v11553_v24, %v2547_v54  ;;  %v2480_v20 = vmul.f32 %v2306_v18, %v15435_v22  ;;  %v11772_v36 = vadd.f32 %v11553_v24, %v2546_v25  ;;  %v15439_v22 = vld [vmem:[#allocation81_spill] sm:$0xff] }
 0x349   :  { %v2479_v46 = vmul.f32 %v2304_v0, %v15437_v62  ;;  %v3051_v56 = vadd.f32 1.0, %v9641_v28  ;;  %v11777_v54 = vmul.f32 0.044715, %v2739_v31  ;;  %8956 = vmatprep.mubr.msk.f32.mxu0 %vm987_vm1, %v3177_v32  ;;  %v3052_v17 = vadd.f32 1.0, %v9643_v14  ;;  %v15438_v28 = vld [vmem:[#allocation23_spill] sm:$0xff] }
 0x34a   :  { %v2680_v23 = vmul.f32 %v11764_v10, %v11764_v10  ;;  %v2549_v15 = vmul.f32 %v11533_v35, %v2480_v20  ;;  %v2741_v11 = vmul.f32 %v2677_v39, %v11746_v61  ;;  %v2679_v44 = vmul.f32 %v11772_v36, %v11772_v36  ;;  %v2310_v27 = vpop.permute.xlu1 %2309  ;;  %8957 = vmatmul.mubr.msk.f32.vlgmr.msra.gmra.mrb[62].mxu0 %vm987_vm1, %v3178_v26  ;;  %v2308_v32 = vpop.permute.xlu0 %2307 }
 0x34b   :  { %v2548_v53 = vmul.f32 %v11533_v35, %v2479_v46  ;;  %v3115_v31 = vmul.f32 0.5, %v3051_v56  ;;  %v11788_v25 = vmul.f32 0.044715, %v2742_v7  ;;  %v15440_v20 = vsub.f32 %v15438_v28, %v15439_v22 }
 0x34c   :  { %v11791_v18 = vadd.f32 %v11553_v24, %v2549_v15  ;;  %v3116_v39 = vmul.f32 0.5, %v3052_v17  ;;  %v2744_v14 = vmul.f32 %v2680_v23, %v11764_v10  ;;  %v15441_v26 = vsub.f32 %v15340_v51, %v11106_v57 }
 0x34d   :  { %v2482_v0 = vmul.f32 %v2310_v27, %v15440_v20  ;;  %v11798_v5 = vadd.f32 %v11553_v24, %v2548_v53  ;;  %v3179_v7 = vmul.f32 %v3115_v31, %v11623_v63  ;;  %v2743_v62 = vmul.f32 %v2679_v44, %v11772_v36  ;;  %v15442_v44 = vld [vmem:[#allocation82_spill] sm:$0xff] }
 0x34e   :  { %v2481_v56 = vmul.f32 %v2308_v32, %v15441_v26  ;;  %v2682_v46 = vmul.f32 %v11791_v18, %v11791_v18  ;;  %v3180_v17 = vmul.f32 %v3116_v39, %v11614_v38  ;;  %v11809_v27 = vmul.f32 0.044715, %v2741_v11  ;;  %v2314_v57 = vpop.permute.xlu1 %2313  ;;  %v2312_v11 = vpop.permute.xlu0 %2311 }
 0x34f   :  { %v2551_v15 = vmul.f32 %v11533_v35, %v2482_v0  ;;  %v2681_v23 = vmul.f32 %v11798_v5, %v11798_v5  ;;  %8959 = vmatprep.mubr.msk.f32.mxu0 %vm987_vm1, %v3179_v7  ;;  %v15443_v31 = vsub.f32 %v15341_v6, %v15442_v44  ;;  %v2926_v28 = vmul.f32 0.7978846, %v11731_v8  ;;  %v15445_v0 = vld [vmem:[#allocation83_spill] sm:$0xff] }
 0x350   :  { %v2550_v53 = vmul.f32 %v11533_v35, %v2481_v56  ;;  %v2746_v51 = vmul.f32 %v2682_v46, %v11791_v18  ;;  %8960 = vmatmul.mubr.msk.f32.gmra.mrb[64].mxu0 %vm987_vm1, %v3180_v17  ;;  %v11824_v22 = vmul.f32 0.044715, %v2744_v14  ;;  %v15446_v32 = vsub.f32 %v15444_v37, %v15445_v0  ;;  %v15451_v37 = vld [vmem:[#allocation85_spill] sm:$0xff] }
 0x351   :  { %v11817_v63 = vadd.f32 %v11553_v24, %v2551_v15  ;;  %v2484_v38 = vmul.f32 %v2314_v57, %v15443_v31  ;;  %v2863_v26 = vadd.f32 %v11717_v41, %v11672_v3  ;;  %v11834_v56 = vmul.f32 0.044715, %v2743_v62  ;;  %v15448_v62 = vld [vmem:[#allocation84_spill] sm:$0xff] }
 0x352   :  { %v11827_v20 = vadd.f32 %v11553_v24, %v2550_v53  ;;  %v2483_v39 = vmul.f32 %v2312_v11, %v15446_v32  ;;  %9646 = vtanh.f32 %v2926_v28  ;;  %v2745_v8 = vmul.f32 %v2681_v23, %v11798_v5  ;;  %v2318_v15 = vpop.permute.xlu1 %2317  ;;  %v2316_v31 = vpop.permute.xlu0 %2315  ;;  %v15450_v28 = vld [vmem:[#allocation28_spill] sm:$0xff] }
 0x353   :  { %v2684_v6 = vmul.f32 %v11817_v63, %v11817_v63  ;;  %v2553_v7 = vmul.f32 %v11533_v35, %v2484_v38  ;;  %v2927_v17 = vmul.f32 0.7978846, %v2863_v26  ;;  %v11843_v53 = vmul.f32 0.044715, %v2746_v51 }
 0x354   :  { %v2683_v14 = vmul.f32 %v11827_v20, %v11827_v20  ;;  %v2552_v46 = vmul.f32 %v11533_v35, %v2483_v39  ;;  %v15449_v57 = vsub.f32 %v15343_v21, %v15448_v62  ;;  %v2864_v23 = vadd.f32 %v11708_v30, %v11665_v48  ;;  %v15454_v62 = vld [vmem:[#allocation86_spill] sm:$0xff] }
 0x355   :  { %v11846_v41 = vadd.f32 %v11553_v24, %v2553_v7  ;;  %v2748_v38 = vmul.f32 %v2684_v6, %v11817_v63  ;;  %v15452_v51 = vsub.f32 %v15450_v28, %v15451_v37  ;;  %9648 = vtanh.f32 %v2927_v17  ;;  %v15456_v37 = vld [vmem:[#allocation30_spill] sm:$0xff] }
 0x356   :  { %v2486_v44 = vmul.f32 %v2318_v15, %v15449_v57  ;;  %v11855_v11 = vadd.f32 %v11553_v24, %v2552_v46  ;;  %v2747_v32 = vmul.f32 %v2683_v14, %v11827_v20  ;;  %v2928_v26 = vmul.f32 0.7978846, %v2864_v23  ;;  %v2322_v46 = vpop.permute.xlu1 %2321 }
 0x357   :  { %15447 = vst [vmem:[#allocation6_spill] sm:$0xff] %v11846_v41  ;;  %v2485_v0 = vmul.f32 %v2316_v31, %v15452_v51  ;;  %v2686_v21 = vmul.f32 %v11846_v41, %v11846_v41  ;;  %v11864_v7 = vmul.f32 0.044715, %v2745_v8  ;;  %v2865_v15 = vadd.f32 %v11755_v34, %v11695_v58  ;;  %v2320_v8 = vpop.permute.xlu0 %2319  ;;  %v9645_v31 = vpop.eup %9644  ;;  %v15457_v51 = vld [vmem:[#allocation87_spill] sm:$0xff] }
 0x358   :  { %v2555_v39 = vmul.f32 %v11533_v35, %v2486_v44  ;;  %v2685_v30 = vmul.f32 %v11855_v11, %v11855_v11  ;;  %v15455_v57 = vsub.f32 %v15346_v40, %v15454_v62  ;;  %9650 = vtanh.f32 %v2928_v26 }
 0x359   :  { %v2554_v6 = vmul.f32 %v11533_v35, %v2485_v0  ;;  %v2750_v17 = vmul.f32 %v2686_v21, %v11846_v41  ;;  %v11878_v23 = vmul.f32 0.044715, %v2748_v38  ;;  %v15458_v34 = vsub.f32 %v15456_v37, %v15457_v51 }
 0x35a   :  { %v11873_v14 = vadd.f32 %v11553_v24, %v2555_v39  ;;  %v2488_v44 = vmul.f32 %v2322_v46, %v15455_v57  ;;  %v2929_v21 = vmul.f32 0.7978846, %v2865_v15  ;;  %v11886_v41 = vmul.f32 0.044715, %v2747_v32  ;;  %v2326_v62 = vpop.permute.xlu1 %2325 }
 0x35b   :  { %v11881_v28 = vadd.f32 %v11553_v24, %v2554_v6  ;;  %v2487_v0 = vmul.f32 %v2320_v8, %v15458_v34  ;;  %v3053_v39 = vadd.f32 1.0, %v9645_v31  ;;  %v2749_v46 = vmul.f32 %v2685_v30, %v11855_v11  ;;  %v2324_v37 = vpop.permute.xlu0 %2323 }
 0x35c   :  { %15453 = vst [vmem:[#allocation5_spill] sm:$0xff] %v11873_v14  ;;  %v2688_v40 = vmul.f32 %v11873_v14, %v11873_v14  ;;  %v2557_v26 = vmul.f32 %v11533_v35, %v2488_v44  ;;  %9652 = vtanh.f32 %v2929_v21  ;;  %v9647_v57 = vpop.eup %9646  ;;  %v11895_v8 = vmul.f32 0.044715, %v2750_v17 }
 0x35d   :  { %v2687_v38 = vmul.f32 %v11881_v28, %v11881_v28  ;;  %v2556_v6 = vmul.f32 %v11533_v35, %v2487_v0  ;;  %v3117_v32 = vmul.f32 0.5, %v3053_v39  ;;  %v15460_v31 = vsub.f32 %v15349_v49, %v11142_v12 }
 0x35e   :  { %v11898_v15 = vadd.f32 %v11553_v24, %v2557_v26  ;;  %v2752_v30 = vmul.f32 %v2688_v40, %v11873_v14  ;;  %v3054_v51 = vadd.f32 1.0, %v9647_v57  ;;  %v2866_v0 = vadd.f32 %v11733_v52, %v11688_v4  ;;  %v2330_v57 = vpop.permute.xlu1 %2329 }
 0x35f   :  { %v2490_v44 = vmul.f32 %v2326_v62, %v15460_v31  ;;  %v11905_v34 = vadd.f32 %v11553_v24, %v2556_v6  ;;  %v3181_v17 = vmul.f32 %v3117_v32, %v11650_v50  ;;  %v2751_v21 = vmul.f32 %v2687_v38, %v11881_v28  ;;  %v9649_v49 = vpop.eup %9648  ;;  %v15461_v32 = vld [vmem:[#allocation88_spill] sm:$0xff] }
 0x360   :  { %15459 = vst [vmem:[#allocation8_spill] sm:$0xff] %v11898_v15  ;;  %v2690_v39 = vmul.f32 %v11898_v15, %v11898_v15  ;;  %v11914_v26 = vmul.f32 0.044715, %v2749_v46  ;;  %v3118_v40 = vmul.f32 0.5, %v3054_v51  ;;  %v2930_v62 = vmul.f32 0.7978846, %v2866_v0  ;;  %v2328_v46 = vpop.permute.xlu0 %2327 }
 0x361   :  { %v2559_v12 = vmul.f32 %v11533_v35, %v2490_v44  ;;  %v2689_v6 = vmul.f32 %v11905_v34, %v11905_v34  ;;  %8962 = vmatprep.mubr.msk.f32.mxu0 %vm987_vm1, %v3181_v17  ;;  %v3055_v52 = vadd.f32 1.0, %v9649_v49  ;;  %v15462_v31 = vsub.f32 %v15350_v33, %v15461_v32 }
 0x362   :  { %v2754_v50 = vmul.f32 %v2690_v39, %v11898_v15  ;;  %v11926_v14 = vmul.f32 0.044715, %v2752_v30  ;;  %v3182_v51 = vmul.f32 %v3118_v40, %v11643_v2  ;;  %9654 = vtanh.f32 %v2930_v62  ;;  %v9651_v17 = vpop.eup %9650  ;;  %v15463_v2 = vld [vmem:[#allocation89_spill] sm:$0xff] }
 0x363   :  { %v11921_v38 = vadd.f32 %v11553_v24, %v2559_v12  ;;  %v2489_v44 = vmul.f32 %v2324_v37, %v15462_v31  ;;  %v2867_v0 = vadd.f32 %v11777_v54, %v11720_v47  ;;  %v11931_v49 = vmul.f32 0.044715, %v2751_v21  ;;  %v2334_v31 = vpop.permute.xlu1 %2333 }
 0x364   :  { %v3119_v39 = vmul.f32 0.5, %v3055_v52  ;;  %8963 = vmatmul.mubr.msk.f32.gmra.mrb[66].mxu0 %vm987_vm1, %v3182_v51  ;;  %v3056_v33 = vadd.f32 1.0, %v9651_v17  ;;  %v2753_v37 = vmul.f32 %v2689_v6, %v11905_v34  ;;  %v15464_v40 = vsub.f32 %v15351_v19, %v15463_v2 }
 0x365   :  { %v2692_v12 = vmul.f32 %v11921_v38, %v11921_v38  ;;  %v2558_v15 = vmul.f32 %v11533_v35, %v2489_v44  ;;  %v2931_v30 = vmul.f32 0.7978846, %v2867_v0  ;;  %v11942_v21 = vmul.f32 0.044715, %v2754_v50 }
 0x366   :  { %v2492_v62 = vmul.f32 %v2330_v57, %v15464_v40  ;;  %v3183_v54 = vmul.f32 %v3119_v39, %v11672_v3  ;;  %v2868_v32 = vadd.f32 %v11757_v1, %v11712_v9  ;;  %v9653_v44 = vpop.eup %9652  ;;  %v3120_v51 = vmul.f32 0.5, %v3056_v33  ;;  %v2332_v1 = vpop.permute.xlu0 %2331 }
 0x367   :  { %v11945_v52 = vadd.f32 %v11553_v24, %v2558_v15  ;;  %9656 = vtanh.f32 %v2931_v30  ;;  %v15465_v19 = vsub.f32 %v15352_v43, %v11156_v13  ;;  %v3057_v3 = vadd.f32 1.0, %v9653_v44  ;;  %v2338_v44 = vpop.permute.xlu1 %2337 }
 0x368   :  { %v2561_v6 = vmul.f32 %v11533_v35, %v2492_v62  ;;  %8965 = vmatprep.mubr.msk.f32.mxu0 %vm987_vm1, %v3183_v54  ;;  %v2756_v50 = vmul.f32 %v2692_v12, %v11921_v38  ;;  %v2932_v0 = vmul.f32 0.7978846, %v2868_v32  ;;  %v3184_v17 = vmul.f32 %v3120_v51, %v11665_v48 }
 0x369   :  { %v2491_v57 = vmul.f32 %v2328_v46, %v15465_v19  ;;  %v2691_v15 = vmul.f32 %v11945_v52, %v11945_v52  ;;  %v2869_v43 = vadd.f32 %v11809_v27, %v11746_v61  ;;  %v3121_v13 = vmul.f32 0.5, %v3057_v3 }
 0x36a   :  { %v11959_v39 = vadd.f32 %v11553_v24, %v2561_v6  ;;  %9658 = vtanh.f32 %v2932_v0  ;;  %v15466_v12 = vsub.f32 %v15353_v16, %v11162_v55  ;;  %8966 = vmatmul.mubr.msk.f32.gmra.mrb[68].mxu0 %vm987_vm1, %v3184_v17  ;;  %v2870_v27 = vadd.f32 %v11788_v25, %v11740_v59  ;;  %v15467_v55 = vld [vmem:[#allocation90_spill] sm:$0xff]  ;;  %v2336_v3 = vpop.permute.xlu0 %2335 }
 0x36b   :  { %v2560_v33 = vmul.f32 %v11533_v35, %v2491_v57  ;;  %v2755_v46 = vmul.f32 %v2691_v15, %v11945_v52  ;;  %v2933_v40 = vmul.f32 0.7978846, %v2869_v43  ;;  %v11976_v62 = vmul.f32 0.044715, %v2753_v37 }
 0x36c   :  { %v2494_v30 = vmul.f32 %v2334_v31, %v15466_v12  ;;  %v2694_v48 = vmul.f32 %v11959_v39, %v11959_v39  ;;  %v3185_v54 = vmul.f32 %v3121_v13, %v11695_v58  ;;  %v15468_v16 = vsub.f32 %v15354_v60, %v15467_v55  ;;  %v9655_v51 = vpop.eup %9654  ;;  %v2342_v55 = vpop.permute.xlu1 %2341 }
 0x36d   :  { %v11972_v2 = vadd.f32 %v11553_v24, %v2560_v33  ;;  %v11983_v6 = vmul.f32 0.044715, %v2756_v50  ;;  %9660 = vtanh.f32 %v2933_v40  ;;  %v2934_v57 = vmul.f32 0.7978846, %v2870_v27 }
 0x36e   :  { %v2563_v32 = vmul.f32 %v11533_v35, %v2494_v30  ;;  %v2493_v31 = vmul.f32 %v2332_v1, %v15468_v16  ;;  %8968 = vmatprep.mubr.msk.f32.mxu0 %vm987_vm1, %v3185_v54  ;;  %v3058_v25 = vadd.f32 1.0, %v9655_v51  ;;  %v2871_v60 = vadd.f32 %v11834_v56, %v11772_v36 }
 0x36f   :  { %v2693_v19 = vmul.f32 %v11972_v2, %v11972_v2  ;;  %v11994_v15 = vmul.f32 0.044715, %v2755_v46  ;;  %v2758_v50 = vmul.f32 %v2694_v48, %v11959_v39  ;;  %9662 = vtanh.f32 %v2934_v57  ;;  %v15470_v48 = vld [vmem:[#allocation91_spill] sm:$0xff]  ;;  %v2340_v57 = vpop.permute.xlu0 %2339 }
 0x370   :  { %v11989_v58 = vadd.f32 %v11553_v24, %v2563_v32  ;;  %v2562_v37 = vmul.f32 %v11533_v35, %v2493_v31  ;;  %v15469_v0 = vsub.f32 %v15355_v42, %v11172_v45  ;;  %v3122_v17 = vmul.f32 0.5, %v3058_v25 }
 0x371   :  { %v2935_v13 = vmul.f32 0.7978846, %v2871_v60  ;;  %v9657_v12 = vpop.eup %9656  ;;  %v2757_v56 = vmul.f32 %v2693_v19, %v11972_v2  ;;  %v2872_v30 = vadd.f32 %v11824_v22, %v11764_v10  ;;  %v15471_v45 = vsub.f32 %v15356_v29, %v15470_v48 }
 0x372   :  { %v2496_v1 = vmul.f32 %v2338_v44, %v15469_v0  ;;  %v2696_v33 = vmul.f32 %v11989_v58, %v11989_v58  ;;  %v12003_v43 = vadd.f32 %v11553_v24, %v2562_v37  ;;  %v3186_v40 = vmul.f32 %v3122_v17, %v11688_v4  ;;  %v15473_v17 = vld [vmem:[#allocation92_spill] sm:$0xff] }
 0x373   :  { %v2495_v42 = vmul.f32 %v2336_v3, %v15471_v45  ;;  %v3059_v27 = vadd.f32 1.0, %v9657_v12  ;;  %9664 = vtanh.f32 %v2935_v13  ;;  %v2936_v31 = vmul.f32 0.7978846, %v2872_v30  ;;  %v15475_v45 = vld [vmem:[#allocation40_spill] sm:$0xff] }
 0x374   :  { %v2565_v46 = vmul.f32 %v11533_v35, %v2496_v1  ;;  %v2760_v54 = vmul.f32 %v2696_v33, %v11989_v58  ;;  %v2695_v32 = vmul.f32 %v12003_v43, %v12003_v43  ;;  %v9659_v44 = vpop.eup %9658  ;;  %8969 = vmatmul.mubr.msk.f32.gmra.mrb[70].mxu0 %vm987_vm1, %v3186_v40  ;;  %v12021_v51 = vmul.f32 0.044715, %v2758_v50  ;;  %v15472_v1 = vld [vmem:[#allocation39_spill] sm:$0xff] }
 0x375   :  { %v2564_v22 = vmul.f32 %v11533_v35, %v2495_v42  ;;  %v3123_v29 = vmul.f32 0.5, %v3059_v27  ;;  %v2873_v19 = vadd.f32 %v11864_v7, %v11798_v5  ;;  %v3060_v25 = vadd.f32 1.0, %v9659_v44  ;;  %v15476_v42 = vld [vmem:[#allocation93_spill] sm:$0xff] }
 0x376   :  { %v12017_v16 = vadd.f32 %v11553_v24, %v2565_v46  ;;  %v2759_v4 = vmul.f32 %v2695_v32, %v12003_v43  ;;  %9666 = vtanh.f32 %v2936_v31  ;;  %v12032_v0 = vmul.f32 0.044715, %v2757_v56  ;;  %v2346_v32 = vpop.permute.xlu1 %2345 }
 0x377   :  { %v12029_v60 = vadd.f32 %v11553_v24, %v2564_v22  ;;  %v3187_v3 = vmul.f32 %v3123_v29, %v11720_v47  ;;  %v2937_v50 = vmul.f32 0.7978846, %v2873_v19  ;;  %v15474_v33 = vsub.f32 %v15472_v1, %v15473_v17  ;;  %v9661_v12 = vpop.eup %9660 }
 0x378   :  { %v2698_v37 = vmul.f32 %v12017_v16, %v12017_v16  ;;  %v3124_v7 = vmul.f32 0.5, %v3060_v25  ;;  %v12037_v46 = vmul.f32 0.044715, %v2760_v54  ;;  %v2874_v48 = vadd.f32 %v11843_v53, %v11791_v18 }
 0x379   :  { %v2498_v13 = vmul.f32 %v2342_v55, %v15474_v33  ;;  %v2697_v30 = vmul.f32 %v12029_v60, %v12029_v60  ;;  %8971 = vmatprep.mubr.msk.f32.mxu0 %vm987_vm1, %v3187_v3  ;;  %v3061_v47 = vadd.f32 1.0, %v9661_v12  ;;  %9668 = vtanh.f32 %v2937_v50  ;;  %v9663_v55 = vpop.eup %9662  ;;  %v2344_v3 = vpop.permute.xlu0 %2343  ;;  %v15479_v50 = vld [vmem:[#allocation94_spill] sm:$0xff] }
 0x37a   :  { %v15477_v40 = vsub.f32 %v15475_v45, %v15476_v42  ;;  %v3188_v54 = vmul.f32 %v3124_v7, %v11712_v9  ;;  %v12049_v31 = vmul.f32 0.044715, %v2759_v4  ;;  %v2762_v22 = vmul.f32 %v2698_v37, %v12017_v16  ;;  %v15478_v4 = vld [vmem:[#allocation41_spill] sm:$0xff] }
 0x37b   :  { %v2567_v56 = vmul.f32 %v11533_v35, %v2498_v13  ;;  %v2938_v44 = vmul.f32 0.7978846, %v2874_v48  ;;  %v3125_v53 = vmul.f32 0.5, %v3061_v47  ;;  %v3062_v29 = vadd.f32 1.0, %v9663_v55  ;;  %v15481_v47 = vld [vmem:[#allocation42_spill] sm:$0xff]  ;;  %v2350_v55 = vpop.permute.xlu1 %2349 }
 0x37c   :  { %v2497_v27 = vmul.f32 %v2340_v57, %v15477_v40  ;;  %8972 = vmatmul.mubr.msk.f32.gmra.mrb[72].mxu0 %vm987_vm1, %v3188_v54  ;;  %v2761_v57 = vmul.f32 %v2697_v30, %v12029_v60  ;;  %v2875_v9 = vadd.f32 %v11886_v41, %v11827_v20  ;;  %v15480_v37 = vsub.f32 %v15478_v4, %v15479_v50 }
 0x37d   :  { %v12053_v19 = vadd.f32 %v11553_v24, %v2567_v56  ;;  %9670 = vtanh.f32 %v2938_v44  ;;  %v3189_v17 = vmul.f32 %v3125_v53, %v11746_v61  ;;  %v3126_v33 = vmul.f32 0.5, %v3062_v29  ;;  %v9665_v7 = vpop.eup %9664  ;;  %v15482_v56 = vld [vmem:[#allocation95_spill] sm:$0xff] }
 0x37e   :  { %v2566_v25 = vmul.f32 %v11533_v35, %v2497_v27  ;;  %v2500_v1 = vmul.f32 %v2346_v32, %v15480_v37  ;;  %v2939_v48 = vmul.f32 0.7978846, %v2875_v9  ;;  %v2876_v41 = vadd.f32 %v11878_v23, %v11817_v63  ;;  %v2348_v9 = vpop.permute.xlu0 %2347 }
 0x37f   :  { %v2700_v13 = vmul.f32 %v12053_v19, %v12053_v19  ;;  %v15483_v45 = vsub.f32 %v15481_v47, %v15482_v56  ;;  %8974 = vmatprep.mubr.msk.f32.mxu0 %vm987_vm1, %v3189_v17  ;;  %v3190_v61 = vmul.f32 %v3126_v33, %v11740_v59  ;;  %v3063_v40 = vadd.f32 1.0, %v9665_v7  ;;  %v15485_v7 = vld [vmem:[#allocation96_spill] sm:$0xff] }
 0x380   :  { %v12067_v12 = vadd.f32 %v11553_v24, %v2566_v25  ;;  %v2569_v30 = vmul.f32 %v11533_v35, %v2500_v1  ;;  %v9667_v54 = vpop.eup %9666  ;;  %9672 = vtanh.f32 %v2939_v48  ;;  %v2940_v23 = vmul.f32 0.7978846, %v2876_v41 }
 0x381   :  { %v2499_v42 = vmul.f32 %v2344_v3, %v15483_v45  ;;  %v2764_v27 = vmul.f32 %v2700_v13, %v12053_v19  ;;  %8975 = vmatmul.mubr.msk.f32.gmra.mrb[74].mxu0 %vm987_vm1, %v3190_v61  ;;  %v3127_v29 = vmul.f32 0.5, %v3063_v40  ;;  %v12085_v25 = vmul.f32 0.044715, %v2762_v22  ;;  %v15484_v13 = vld [vmem:[#allocation43_spill] sm:$0xff]  ;;  %v15488_v61 = vld [vmem:[#allocation44_spill] sm:$0xff]  ;;  %v15489_v40 = vld [vmem:[#allocation97_spill] sm:$0xff] }
 0x382   :  { %v2699_v32 = vmul.f32 %v12067_v12, %v12067_v12  ;;  %v12081_v44 = vadd.f32 %v11553_v24, %v2569_v30  ;;  %v3064_v59 = vadd.f32 1.0, %v9667_v54  ;;  %9674 = vtanh.f32 %v2940_v23  ;;  %v2354_v54 = vpop.permute.xlu1 %2353 }
 0x383   :  { %v2568_v53 = vmul.f32 %v11533_v35, %v2499_v42  ;;  %v2877_v37 = vadd.f32 %v11914_v26, %v11855_v11  ;;  %v9669_v1 = vpop.eup %9668  ;;  %v3191_v17 = vmul.f32 %v3127_v29, %v11772_v36  ;;  %v12096_v22 = vmul.f32 0.044715, %v2761_v57  ;;  %v15487_v42 = vld [vmem:[#allocation6_spill] sm:$0xff] }
 0x384   :  { %v2763_v3 = vmul.f32 %v2699_v32, %v12067_v12  ;;  %v2702_v4 = vmul.f32 %v12081_v44, %v12081_v44  ;;  %v3128_v33 = vmul.f32 0.5, %v3064_v59  ;;  %v15486_v48 = vsub.f32 %v15484_v13, %v15485_v7 }
 0x385   :  { %v12091_v50 = vadd.f32 %v11553_v24, %v2568_v53  ;;  %v3065_v41 = vadd.f32 1.0, %v9669_v1  ;;  %v12101_v47 = vmul.f32 0.044715, %v2764_v27  ;;  %v2941_v45 = vmul.f32 0.7978846, %v2877_v37  ;;  %8977 = vmatprep.mubr.msk.f32.mxu0 %vm987_vm1, %v3191_v17  ;;  %v2352_v1 = vpop.permute.xlu0 %2351 }
 0x386   :  { %v2502_v30 = vmul.f32 %v2350_v55, %v15486_v48  ;;  %v3192_v26 = vmul.f32 %v3128_v33, %v11764_v10  ;;  %v2878_v57 = vadd.f32 %v11895_v8, %v15487_v42  ;;  %v15490_v32 = vsub.f32 %v15488_v61, %v15489_v40  ;;  %v15491_v33 = vld [vmem:[#allocation45_spill] sm:$0xff] }
 0x387   :  { %v2701_v56 = vmul.f32 %v12091_v50, %v12091_v50  ;;  %v9671_v27 = vpop.eup %9670  ;;  %v3129_v23 = vmul.f32 0.5, %v3065_v41  ;;  %v12113_v53 = vmul.f32 0.044715, %v2763_v3  ;;  %v2766_v29 = vmul.f32 %v2702_v4, %v12081_v44  ;;  %v15492_v4 = vld [vmem:[#allocation98_spill] sm:$0xff] }
 0x388   :  { %v2571_v36 = vmul.f32 %v11533_v35, %v2502_v30  ;;  %v2501_v55 = vmul.f32 %v2348_v9, %v15490_v32  ;;  %9676 = vtanh.f32 %v2941_v45  ;;  %8978 = vmatmul.mubr.msk.f32.gmra.mrb[76].mxu0 %vm987_vm1, %v3192_v26  ;;  %v3066_v10 = vadd.f32 1.0, %v9671_v27  ;;  %v15494_v26 = vld [vmem:[#allocation5_spill] sm:$0xff] }
 0x389   :  { %v2942_v37 = vmul.f32 0.7978846, %v2878_v57  ;;  %v3193_v9 = vmul.f32 %v3129_v23, %v11798_v5  ;;  %v2765_v17 = vmul.f32 %v2701_v56, %v12091_v50  ;;  %v2879_v3 = vadd.f32 %v11931_v49, %v11881_v28  ;;  %v15496_v57 = vld [vmem:[#allocation99_spill] sm:$0xff]  ;;  %v2358_v23 = vpop.permute.xlu1 %2357 }
 0x38a   :  { %v12118_v59 = vadd.f32 %v11553_v24, %v2571_v36  ;;  %v2570_v8 = vmul.f32 %v11533_v35, %v2501_v55  ;;  %v15493_v13 = vsub.f32 %v15491_v33, %v15492_v4  ;;  %v3130_v48 = vmul.f32 0.5, %v3066_v10  ;;  %v9673_v45 = vpop.eup %9672  ;;  %v15495_v36 = vld [vmem:[#allocation46_spill] sm:$0xff]  ;;  %v2356_v33 = vpop.permute.xlu0 %2355 }
 0x38b   :  { %9678 = vtanh.f32 %v2942_v37  ;;  %8980 = vmatprep.mubr.msk.f32.mxu0 %vm987_vm1, %v3193_v9  ;;  %v2943_v5 = vmul.f32 0.7978846, %v2879_v3  ;;  %v2880_v49 = vadd.f32 %v11926_v14, %v15494_v26  ;;  %v15497_v61 = vsub.f32 %v15495_v36, %v15496_v57 }
 0x38c   :  { %v2504_v7 = vmul.f32 %v2354_v54, %v15493_v13  ;;  %v2704_v30 = vmul.f32 %v12118_v59, %v12118_v59  ;;  %v12131_v41 = vadd.f32 %v11553_v24, %v2570_v8  ;;  %v3194_v32 = vmul.f32 %v3130_v48, %v11791_v18  ;;  %v9675_v10 = vpop.eup %9674 }
 0x38d   :  { %v2503_v40 = vmul.f32 %v2352_v1, %v15497_v61  ;;  %v3067_v55 = vadd.f32 1.0, %v9673_v45  ;;  %9680 = vtanh.f32 %v2943_v5  ;;  %v2944_v8 = vmul.f32 0.7978846, %v2880_v49  ;;  %v15499_v5 = vld [vmem:[#allocation100_spill] sm:$0xff] }
 0x38e   :  { %v2573_v56 = vmul.f32 %v11533_v35, %v2504_v7  ;;  %v2768_v54 = vmul.f32 %v2704_v30, %v12118_v59  ;;  %v2703_v27 = vmul.f32 %v12131_v41, %v12131_v41  ;;  %8981 = vmatmul.mubr.msk.f32.gmra.mrb[78].mxu0 %vm987_vm1, %v3194_v32  ;;  %v12149_v9 = vmul.f32 0.044715, %v2766_v29  ;;  %v15498_v29 = vld [vmem:[#allocation47_spill] sm:$0xff]  ;;  %v15501_v32 = vld [vmem:[#allocation8_spill] sm:$0xff] }
 0x38f   :  { %v2572_v14 = vmul.f32 %v11533_v35, %v2503_v40  ;;  %v3131_v1 = vmul.f32 0.5, %v3067_v55  ;;  %v3068_v18 = vadd.f32 1.0, %v9675_v10  ;;  %9682 = vtanh.f32 %v2944_v8  ;;  %v15503_v10 = vld [vmem:[#allocation101_spill] sm:$0xff] }
 0x390   :  { %v12145_v37 = vadd.f32 %v11553_v24, %v2573_v56  ;;  %v2767_v3 = vmul.f32 %v2703_v27, %v12131_v41  ;;  %v2881_v7 = vadd.f32 %v11976_v62, %v11905_v34  ;;  %v12160_v45 = vmul.f32 0.044715, %v2765_v17  ;;  %v15502_v27 = vld [vmem:[#allocation48_spill] sm:$0xff] }
 0x391   :  { %v12155_v13 = vadd.f32 %v11553_v24, %v2572_v14  ;;  %v3195_v48 = vmul.f32 %v3131_v1, %v11827_v20  ;;  %v3132_v30 = vmul.f32 0.5, %v3068_v18  ;;  %v15500_v56 = vsub.f32 %v15498_v29, %v15499_v5  ;;  %v15505_v29 = vld [vmem:[#allocation49_spill] sm:$0xff]  ;;  %v15506_v5 = vld [vmem:[#allocation102_spill] sm:$0xff] }
 0x392   :  { %v2706_v4 = vmul.f32 %v12145_v37, %v12145_v37  ;;  %v9677_v36 = vpop.eup %9676  ;;  %v12165_v57 = vmul.f32 0.044715, %v2768_v54  ;;  %v2945_v40 = vmul.f32 0.7978846, %v2881_v7  ;;  %v2882_v55 = vadd.f32 %v11942_v21, %v15501_v32  ;;  %v2362_v54 = vpop.permute.xlu1 %2361 }
 0x393   :  { %v2506_v49 = vmul.f32 %v2358_v23, %v15500_v56  ;;  %v2705_v61 = vmul.f32 %v12155_v13, %v12155_v13  ;;  %8983 = vmatprep.mubr.msk.f32.mxu0 %vm987_vm1, %v3195_v48  ;;  %v3196_v20 = vmul.f32 %v3132_v30, %v11817_v63  ;;  %v3069_v62 = vadd.f32 1.0, %v9677_v36 }
 0x394   :  { %v15504_v23 = vsub.f32 %v15502_v27, %v15503_v10  ;;  %v12177_v14 = vmul.f32 0.044715, %v2767_v3  ;;  %v2770_v1 = vmul.f32 %v2706_v4, %v12145_v37  ;;  %9684 = vtanh.f32 %v2945_v40  ;;  %v2360_v4 = vpop.permute.xlu0 %2359  ;;  %v12202_v40 = vld [vmem:[%s14927_s3 + $0x2] ss:$0 sm:$0xff]  ;;  %v15509_v27 = vld [vmem:[#allocation103_spill] sm:$0xff] }
 0x395   :  { %v2575_v17 = vmul.f32 %v11533_v35, %v2506_v49  ;;  %v2946_v18 = vmul.f32 0.7978846, %v2882_v55  ;;  %v9679_v7 = vpop.eup %9678  ;;  %8984 = vmatmul.mubr.msk.f32.gmra.mrb[80].mxu0 %vm987_vm1, %v3196_v20  ;;  %v3133_v21 = vmul.f32 0.5, %v3069_v62  ;;  %v12187_v35 = vld [vmem:[%s14927_s3 + $0x1] ss:$0 sm:$0xff]  ;;  %v2883_v3 = vadd.f32 %v11994_v15, %v11945_v52 }
 0x396   :  { %v2505_v8 = vmul.f32 %v2356_v33, %v15504_v23  ;;  %v3070_v48 = vadd.f32 1.0, %v9679_v7  ;;  %v2769_v30 = vmul.f32 %v2705_v61, %v12155_v13  ;;  %v15507_v56 = vsub.f32 %v15505_v29, %v15506_v5  ;;  %v2366_v7 = vpop.permute.xlu1 %2365 }
 0x397   :  { %v12182_v63 = vadd.f32 %v11553_v24, %v2575_v17  ;;  %9686 = vtanh.f32 %v2946_v18  ;;  %v3197_v49 = vmul.f32 %v3133_v21, %v11855_v11  ;;  %v2947_v55 = vmul.f32 0.7978846, %v2883_v3  ;;  %v9681_v61 = vpop.eup %9680  ;;  %v15508_v11 = vld [vmem:[#allocation50_spill] sm:$0xff] }
 0x398   :  { %v2574_v33 = vmul.f32 %v12187_v35, %v2505_v8  ;;  %v2508_v24 = vmul.f32 %v2362_v54, %v15507_v56  ;;  %v3134_v20 = vmul.f32 0.5, %v3070_v48  ;;  %v2884_v17 = vadd.f32 %v11983_v6, %v11921_v38 }
 0x399   :  { %v2708_v36 = vmul.f32 %v12182_v63, %v12182_v63  ;;  %v15510_v10 = vsub.f32 %v15508_v11, %v15509_v27  ;;  %8986 = vmatprep.mubr.msk.f32.mxu0 %vm987_vm1, %v3197_v49  ;;  %v3071_v8 = vadd.f32 1.0, %v9681_v61  ;;  %9688 = vtanh.f32 %v2947_v55  ;;  %v9683_v21 = vpop.eup %9682 }
 0x39a   :  { %v12205_v15 = vadd.f32 %v12202_v40, %v2574_v33  ;;  %v2577_v62 = vmul.f32 %v12187_v35, %v2508_v24  ;;  %v3198_v33 = vmul.f32 %v3134_v20, %v15487_v42  ;;  %v2948_v6 = vmul.f32 0.7978846, %v2884_v17  ;;  %v2364_v24 = vpop.permute.xlu0 %2363  ;;  %v15511_v20 = vld [vmem:[#allocation51_spill] sm:$0xff] }
 0x39b   :  { %v2507_v23 = vmul.f32 %v2360_v4, %v15510_v10  ;;  %v2772_v54 = vmul.f32 %v2708_v36, %v12182_v63  ;;  %v3135_v4 = vmul.f32 0.5, %v3071_v8  ;;  %v12222_v29 = vmul.f32 0.044715, %v2770_v1 }
 0x39c   :  { %v2707_v18 = vmul.f32 %v12205_v15, %v12205_v15  ;;  %v12219_v3 = vadd.f32 %v12202_v40, %v2577_v62  ;;  %v3072_v5 = vadd.f32 1.0, %v9683_v21  ;;  %8987 = vmatmul.mubr.msk.f32.gmra.mrb[82].mxu0 %vm987_vm1, %v3198_v33  ;;  %9690 = vtanh.f32 %v2948_v6  ;;  %v15512_v62 = vld [vmem:[#allocation104_spill] sm:$0xff]  ;;  %v15515_v33 = vld [vmem:[#allocation105_spill] sm:$0xff] }
 0x39d   :  { %v2576_v48 = vmul.f32 %v12187_v35, %v2507_v23  ;;  %v2885_v36 = vadd.f32 %v12032_v0, %v11972_v2  ;;  %v3199_v55 = vmul.f32 %v3135_v4, %v11881_v28  ;;  %v12234_v61 = vmul.f32 0.044715, %v2769_v30  ;;  %v15514_v21 = vld [vmem:[#allocation52_spill] sm:$0xff] }
 0x39e   :  { %v2771_v56 = vmul.f32 %v2707_v18, %v12205_v15  ;;  %v2710_v49 = vmul.f32 %v12219_v3, %v12219_v3  ;;  %v3136_v1 = vmul.f32 0.5, %v3072_v5  ;;  %v15513_v17 = vsub.f32 %v15511_v20, %v15512_v62  ;;  %v9685_v27 = vpop.eup %9684  ;;  %v2368_v20 = vpop.permute.xlu0 %2367  ;;  %v15517_v62 = vld [vmem:[#allocation53_spill] sm:$0xff] }
 0x39f   :  { %v12229_v42 = vadd.f32 %v12202_v40, %v2576_v48  ;;  %v12239_v10 = vmul.f32 0.044715, %v2772_v54  ;;  %v2949_v8 = vmul.f32 0.7978846, %v2885_v36  ;;  %v2886_v18 = vadd.f32 %v12021_v51, %v11959_v39  ;;  %8989 = vmatprep.mubr.msk.f32.mxu0 %vm987_vm1, %v3199_v55  ;;  %v2370_v54 = vpop.permute.xlu1 %2369 }
 0x3a0   :  { %v2510_v11 = vmul.f32 %v2366_v7, %v15513_v17  ;;  %v3200_v28 = vmul.f32 %v3136_v1, %v15494_v26  ;;  %v3073_v0 = vadd.f32 1.0, %v9685_v27  ;;  %v15516_v7 = vsub.f32 %v15514_v21, %v15515_v33 }
 0x3a1   :  { %v2709_v23 = vmul.f32 %v12229_v42, %v12229_v42  ;;  %v9687_v48 = vpop.eup %9686  ;;  %v12251_v4 = vmul.f32 0.044715, %v2771_v56  ;;  %v2774_v5 = vmul.f32 %v2710_v49, %v12219_v3  ;;  %9692 = vtanh.f32 %v2949_v8  ;;  %v15518_v49 = vld [vmem:[#allocation106_spill] sm:$0xff] }
 0x3a2   :  { %v2579_v30 = vmul.f32 %v12187_v35, %v2510_v11  ;;  %v2509_v6 = vmul.f32 %v2364_v24, %v15516_v7  ;;  %v2950_v36 = vmul.f32 0.7978846, %v2886_v18  ;;  %8990 = vmatmul.mubr.msk.f32.gmra.mrb[84].mxu0 %vm987_vm1, %v3200_v28  ;;  %v3137_v51 = vmul.f32 0.5, %v3073_v0 }
 0x3a3   :  { %v3074_v55 = vadd.f32 1.0, %v9687_v48  ;;  %v2773_v24 = vmul.f32 %v2709_v23, %v12229_v42  ;;  %v2887_v56 = vadd.f32 %v12049_v31, %v12003_v43  ;;  %v15519_v17 = vsub.f32 %v15517_v62, %v15518_v49  ;;  %v9689_v27 = vpop.eup %9688 }
 0x3a4   :  { %v12256_v26 = vadd.f32 %v12202_v40, %v2579_v30  ;;  %v2578_v1 = vmul.f32 %v12187_v35, %v2509_v6  ;;  %9694 = vtanh.f32 %v2950_v36  ;;  %v3201_v8 = vmul.f32 %v3137_v51, %v11905_v34  ;;  %v15520_v6 = vld [vmem:[#allocation54_spill] sm:$0xff]  ;;  %v2374_v51 = vpop.permute.xlu1 %2373 }
 0x3a5   :  { %v2512_v11 = vmul.f32 %v2370_v54, %v15519_v17  ;;  %v3138_v18 = vmul.f32 0.5, %v3074_v55  ;;  %v3075_v30 = vadd.f32 1.0, %v9689_v27  ;;  %v2951_v23 = vmul.f32 0.7978846, %v2887_v56  ;;  %v15521_v54 = vld [vmem:[#allocation107_spill] sm:$0xff] }
 0x3a6   :  { %v2712_v28 = vmul.f32 %v12256_v26, %v12256_v26  ;;  %v12269_v0 = vadd.f32 %v12202_v40, %v2578_v1  ;;  %v2888_v31 = vadd.f32 %v12037_v46, %v11989_v58  ;;  %8992 = vmatprep.mubr.msk.f32.mxu0 %vm987_vm1, %v3201_v8  ;;  %v15522_v48 = vsub.f32 %v15520_v6, %v15521_v54  ;;  %v9691_v55 = vpop.eup %9690  ;;  %v15527_v6 = vld [vmem:[#allocation109_spill] sm:$0xff] }
 0x3a7   :  { %v2581_v21 = vmul.f32 %v12187_v35, %v2512_v11  ;;  %v3202_v33 = vmul.f32 %v3138_v18, %v15501_v32  ;;  %v3139_v1 = vmul.f32 0.5, %v3075_v30  ;;  %9696 = vtanh.f32 %v2951_v23  ;;  %v2372_v11 = vpop.permute.xlu0 %2371  ;;  %v15524_v30 = vld [vmem:[#allocation108_spill] sm:$0xff] }
 0x3a8   :  { %v2776_v34 = vmul.f32 %v2712_v28, %v12256_v26  ;;  %v2711_v7 = vmul.f32 %v12269_v0, %v12269_v0  ;;  %v2511_v36 = vmul.f32 %v2368_v20, %v15522_v48  ;;  %v2952_v46 = vmul.f32 0.7978846, %v2888_v31 }
 0x3a9   :  { %v12283_v56 = vadd.f32 %v12202_v40, %v2581_v21  ;;  %8993 = vmatmul.mubr.msk.f32.gmra.mrb[86].mxu0 %vm987_vm1, %v3202_v33  ;;  %v12286_v32 = vmul.f32 0.044715, %v2774_v5  ;;  %v3076_v62 = vadd.f32 1.0, %v9691_v55  ;;  %v12288_v49 = vmul.f32 0.044715, %v2773_v24  ;;  %v15523_v24 = vld [vmem:[#allocation55_spill] sm:$0xff] }
 0x3aa   :  { %v2580_v17 = vmul.f32 %v12187_v35, %v2511_v36  ;;  %v3203_v20 = vmul.f32 %v3139_v1, %v11945_v52  ;;  %v2775_v27 = vmul.f32 %v2711_v7, %v12269_v0  ;;  %9698 = vtanh.f32 %v2952_v46  ;;  %v15526_v7 = vld [vmem:[#allocation56_spill] sm:$0xff]  ;;  %v2378_v46 = vpop.permute.xlu1 %2377 }
 0x3ab   :  { %v2889_v8 = vadd.f32 %v12096_v22, %v12029_v60  ;;  %v3140_v18 = vmul.f32 0.5, %v3076_v62  ;;  %v2714_v28 = vmul.f32 %v12283_v56, %v12283_v56  ;;  %v15525_v23 = vsub.f32 %v15523_v24, %v15524_v30  ;;  %v9693_v31 = vpop.eup %9692  ;;  %v15529_v30 = vld [vmem:[#allocation57_spill] sm:$0xff] }
 0x3ac   :  { %v12298_v5 = vadd.f32 %v12202_v40, %v2580_v17  ;;  %8995 = vmatprep.mubr.msk.f32.mxu0 %vm987_vm1, %v3203_v20  ;;  %v12304_v52 = vmul.f32 0.044715, %v2776_v34  ;;  %v2890_v22 = vadd.f32 %v12085_v25, %v12017_v16  ;;  %v15528_v54 = vsub.f32 %v15526_v7, %v15527_v6 }
 0x3ad   :  { %v2514_v21 = vmul.f32 %v2374_v51, %v15525_v23  ;;  %v2953_v33 = vmul.f32 0.7978846, %v2889_v8  ;;  %v3204_v36 = vmul.f32 %v3140_v18, %v11921_v38  ;;  %v3077_v55 = vadd.f32 1.0, %v9693_v31  ;;  %v2376_v18 = vpop.permute.xlu0 %2375  ;;  %v15530_v23 = vld [vmem:[#allocation110_spill] sm:$0xff] }
 0x3ae   :  { %v2513_v48 = vmul.f32 %v2372_v11, %v15528_v54  ;;  %v2713_v1 = vmul.f32 %v12298_v5, %v12298_v5  ;;  %v9695_v62 = vpop.eup %9694  ;;  %v12315_v34 = vmul.f32 0.044715, %v2775_v27  ;;  %v2954_v17 = vmul.f32 0.7978846, %v2890_v22 }
 0x3af   :  { %v2583_v51 = vmul.f32 %v12187_v35, %v2514_v21  ;;  %9700 = vtanh.f32 %v2953_v33  ;;  %8996 = vmatmul.mubr.msk.f32.gmra.mrb[88].mxu0 %vm987_vm1, %v3204_v36  ;;  %v3141_v20 = vmul.f32 0.5, %v3077_v55  ;;  %v3078_v11 = vadd.f32 1.0, %v9695_v62 }
 0x3b0   :  { %v2582_v25 = vmul.f32 %v12187_v35, %v2513_v48  ;;  %v2778_v38 = vmul.f32 %v2714_v28, %v12283_v56  ;;  %9702 = vtanh.f32 %v2954_v17  ;;  %v2891_v27 = vadd.f32 %v12113_v53, %v12067_v12 }
 0x3b1   :  { %v12321_v8 = vadd.f32 %v12202_v40, %v2583_v51  ;;  %v15531_v21 = vsub.f32 %v15529_v30, %v15530_v23  ;;  %v3205_v33 = vmul.f32 %v3141_v20, %v11972_v2  ;;  %v3142_v22 = vmul.f32 0.5, %v3078_v11  ;;  %v9697_v6 = vpop.eup %9696 }
 0x3b2   :  { %v12324_v24 = vadd.f32 %v12202_v40, %v2582_v25  ;;  %v2777_v28 = vmul.f32 %v2713_v1, %v12298_v5  ;;  %v2955_v48 = vmul.f32 0.7978846, %v2891_v27  ;;  %v2892_v53 = vadd.f32 %v12101_v47, %v12053_v19  ;;  %v15532_v1 = vld [vmem:[#allocation58_spill] sm:$0xff]  ;;  %v2382_v25 = vpop.permute.xlu1 %2381 }
 0x3b3   :  { %v2516_v31 = vmul.f32 %v2378_v46, %v15531_v21  ;;  %v2716_v7 = vmul.f32 %v12321_v8, %v12321_v8  ;;  %8998 = vmatprep.mubr.msk.f32.mxu0 %vm987_vm1, %v3205_v33  ;;  %v3206_v2 = vmul.f32 %v3142_v22, %v11959_v39  ;;  %v3079_v55 = vadd.f32 1.0, %v9697_v6  ;;  %v15533_v46 = vld [vmem:[#allocation111_spill] sm:$0xff]  ;;  %v2380_v21 = vpop.permute.xlu0 %2379 }
 0x3b4   :  { %v2715_v54 = vmul.f32 %v12324_v24, %v12324_v24  ;;  %v12342_v51 = vmul.f32 0.044715, %v2778_v38  ;;  %v15534_v62 = vsub.f32 %v15532_v1, %v15533_v46  ;;  %v9699_v20 = vpop.eup %9698  ;;  %9704 = vtanh.f32 %v2955_v48  ;;  %v15536_v48 = vld [vmem:[#allocation112_spill] sm:$0xff] }
 0x3b5   :  { %v2585_v36 = vmul.f32 %v12187_v35, %v2516_v31  ;;  %v2780_v11 = vmul.f32 %v2716_v7, %v12321_v8  ;;  %v2956_v47 = vmul.f32 0.7978846, %v2892_v53  ;;  %8999 = vmatmul.mubr.msk.f32.gmra.mrb[90].mxu0 %vm987_vm1, %v3206_v2  ;;  %v3143_v30 = vmul.f32 0.5, %v3079_v55  ;;  %v15538_v46 = vld [vmem:[#allocation60_spill] sm:$0xff] }
 0x3b6   :  { %v2515_v17 = vmul.f32 %v2376_v18, %v15534_v62  ;;  %v3080_v39 = vadd.f32 1.0, %v9699_v20  ;;  %v12352_v23 = vmul.f32 0.044715, %v2777_v28  ;;  %v2779_v18 = vmul.f32 %v2715_v54, %v12324_v24  ;;  %v15535_v28 = vld [vmem:[#allocation59_spill] sm:$0xff]  ;;  %v15539_v62 = vld [vmem:[#allocation113_spill] sm:$0xff] }
 0x3b7   :  { %v12349_v27 = vadd.f32 %v12202_v40, %v2585_v36  ;;  %9706 = vtanh.f32 %v2956_v47  ;;  %v2893_v33 = vadd.f32 %v12160_v45, %v12091_v50  ;;  %v3207_v22 = vmul.f32 %v3143_v30, %v12003_v43 }
 0x3b8   :  { %v2584_v38 = vmul.f32 %v12187_v35, %v2515_v17  ;;  %v3144_v7 = vmul.f32 0.5, %v3080_v39  ;;  %v15537_v36 = vsub.f32 %v15535_v28, %v15536_v48  ;;  %v12367_v55 = vmul.f32 0.044715, %v2780_v11  ;;  %v2386_v11 = vpop.permute.xlu1 %2385  ;;  %v15541_v48 = vld [vmem:[#allocation61_spill] sm:$0xff] }
 0x3b9   :  { %v2718_v31 = vmul.f32 %v12349_v27, %v12349_v27  ;;  %v9701_v2 = vpop.eup %9700  ;;  %v2957_v54 = vmul.f32 0.7978846, %v2893_v33  ;;  %v2894_v1 = vadd.f32 %v12149_v9, %v12081_v44  ;;  %v15540_v45 = vsub.f32 %v15538_v46, %v15539_v62  ;;  %9001 = vmatprep.mubr.msk.f32.mxu0 %vm987_vm1, %v3207_v22 }
 0x3ba   :  { %v12362_v6 = vadd.f32 %v12202_v40, %v2584_v38  ;;  %v2518_v53 = vmul.f32 %v2382_v25, %v15537_v36  ;;  %v3208_v43 = vmul.f32 %v3144_v7, %v11989_v58  ;;  %v3081_v20 = vadd.f32 1.0, %v9701_v2  ;;  %v9703_v30 = vpop.eup %9702  ;;  %v2384_v7 = vpop.permute.xlu0 %2383  ;;  %v15542_v36 = vld [vmem:[#allocation114_spill] sm:$0xff] }
 0x3bb   :  { %v2517_v17 = vmul.f32 %v2380_v21, %v15540_v45  ;;  %v12379_v39 = vmul.f32 0.044715, %v2779_v18  ;;  %9708 = vtanh.f32 %v2957_v54  ;;  %v2958_v9 = vmul.f32 0.7978846, %v2894_v1 }
 0x3bc   :  { %v2717_v47 = vmul.f32 %v12362_v6, %v12362_v6  ;;  %v2587_v25 = vmul.f32 %v12187_v35, %v2518_v53  ;;  %9002 = vmatmul.mubr.msk.f32.gmra.mrb[92].mxu0 %vm987_vm1, %v3208_v43  ;;  %v3145_v21 = vmul.f32 0.5, %v3081_v20  ;;  %v3082_v33 = vadd.f32 1.0, %v9703_v30 }
 0x3bd   :  { %v2586_v38 = vmul.f32 %v12187_v35, %v2517_v17  ;;  %v2782_v58 = vmul.f32 %v2718_v31, %v12349_v27  ;;  %9710 = vtanh.f32 %v2958_v9  ;;  %v2895_v18 = vadd.f32 %v12177_v14, %v12131_v41 }
 0x3be   :  { %v12385_v22 = vadd.f32 %v12202_v40, %v2587_v25  ;;  %v15543_v53 = vsub.f32 %v15541_v48, %v15542_v36  ;;  %v3209_v54 = vmul.f32 %v3145_v21, %v12029_v60  ;;  %v3146_v1 = vmul.f32 0.5, %v3082_v33  ;;  %v9705_v62 = vpop.eup %9704 }
 0x3bf   :  { %v12388_v28 = vadd.f32 %v12202_v40, %v2586_v38  ;;  %v2781_v31 = vmul.f32 %v2717_v47, %v12362_v6  ;;  %v2959_v17 = vmul.f32 0.7978846, %v2895_v18  ;;  %v2896_v14 = vadd.f32 %v12165_v57, %v12118_v59  ;;  %v15544_v47 = vld [vmem:[#allocation62_spill] sm:$0xff]  ;;  %v2390_v38 = vpop.permute.xlu1 %2389 }
 0x3c0   :  { %v2520_v2 = vmul.f32 %v2386_v11, %v15543_v53  ;;  %v2720_v46 = vmul.f32 %v12385_v22, %v12385_v22  ;;  %9004 = vmatprep.mubr.msk.f32.mxu0 %vm987_vm1, %v3209_v54  ;;  %v3210_v60 = vmul.f32 %v3146_v1, %v12017_v16  ;;  %v3083_v20 = vadd.f32 1.0, %v9705_v62  ;;  %v15545_v11 = vld [vmem:[#allocation115_spill] sm:$0xff]  ;;  %v2388_v53 = vpop.permute.xlu0 %2387 }
 0x3c1   :  { %v2719_v45 = vmul.f32 %v12388_v28, %v12388_v28  ;;  %v12406_v25 = vmul.f32 0.044715, %v2782_v58  ;;  %v15546_v30 = vsub.f32 %v15544_v47, %v15545_v11  ;;  %v9707_v21 = vpop.eup %9706  ;;  %9712 = vtanh.f32 %v2959_v17  ;;  %v15548_v17 = vld [vmem:[#allocation116_spill] sm:$0xff] }
 0x3c2   :  { %v2589_v43 = vmul.f32 %v12187_v35, %v2520_v2  ;;  %v2784_v33 = vmul.f32 %v2720_v46, %v12385_v22  ;;  %v2960_v57 = vmul.f32 0.7978846, %v2896_v14  ;;  %9005 = vmatmul.mubr.msk.f32.gmra.mrb[94].mxu0 %vm987_vm1, %v3210_v60  ;;  %v3147_v48 = vmul.f32 0.5, %v3083_v20  ;;  %v15550_v11 = vld [vmem:[#allocation64_spill] sm:$0xff] }
 0x3c3   :  { %v2519_v9 = vmul.f32 %v2384_v7, %v15546_v30  ;;  %v3084_v16 = vadd.f32 1.0, %v9707_v21  ;;  %v12416_v36 = vmul.f32 0.044715, %v2781_v31  ;;  %v2783_v7 = vmul.f32 %v2719_v45, %v12388_v28  ;;  %v15547_v31 = vld [vmem:[#allocation63_spill] sm:$0xff]  ;;  %v15551_v30 = vld [vmem:[#allocation117_spill] sm:$0xff] }
 0x3c4   :  { %v12413_v18 = vadd.f32 %v12202_v40, %v2589_v43  ;;  %9714 = vtanh.f32 %v2960_v57  ;;  %v2897_v54 = vadd.f32 %v12234_v61, %v12155_v13  ;;  %v3211_v1 = vmul.f32 %v3147_v48, %v12067_v12 }
 0x3c5   :  { %v2588_v58 = vmul.f32 %v12187_v35, %v2519_v9  ;;  %v3148_v46 = vmul.f32 0.5, %v3084_v16  ;;  %v15549_v43 = vsub.f32 %v15547_v31, %v15548_v17  ;;  %v9709_v60 = vpop.eup %9708  ;;  %v12431_v20 = vmul.f32 0.044715, %v2784_v33  ;;  %v2394_v33 = vpop.permute.xlu1 %2393  ;;  %v15553_v17 = vld [vmem:[#allocation66_spill] sm:$0xff] }
 0x3c6   :  { %v2722_v2 = vmul.f32 %v12413_v18, %v12413_v18  ;;  %v2961_v45 = vmul.f32 0.7978846, %v2897_v54  ;;  %v2898_v47 = vadd.f32 %v12222_v29, %v12145_v37  ;;  %v15552_v61 = vsub.f32 %v15550_v11, %v15551_v30  ;;  %9007 = vmatprep.mubr.msk.f32.mxu0 %vm987_vm1, %v3211_v1 }
 0x3c7   :  { %v12426_v62 = vadd.f32 %v12202_v40, %v2588_v58  ;;  %v2522_v14 = vmul.f32 %v2390_v38, %v15549_v43  ;;  %v3212_v12 = vmul.f32 %v3148_v46, %v12053_v19  ;;  %v3085_v21 = vadd.f32 1.0, %v9709_v60  ;;  %v9711_v48 = vpop.eup %9710  ;;  %v2392_v46 = vpop.permute.xlu0 %2391  ;;  %v15554_v43 = vld [vmem:[#allocation118_spill] sm:$0xff] }
 0x3c8   :  { %v2521_v9 = vmul.f32 %v2388_v53, %v15552_v61  ;;  %v12443_v16 = vmul.f32 0.044715, %v2783_v7  ;;  %9716 = vtanh.f32 %v2961_v45  ;;  %v2962_v29 = vmul.f32 0.7978846, %v2898_v47 }
 0x3c9   :  { %v2721_v57 = vmul.f32 %v12426_v62, %v12426_v62  ;;  %v2591_v38 = vmul.f32 %v12187_v35, %v2522_v14  ;;  %9008 = vmatmul.mubr.msk.f32.gmra.mrb[96].mxu0 %vm987_vm1, %v3212_v12  ;;  %v3149_v53 = vmul.f32 0.5, %v3085_v21  ;;  %v3086_v54 = vadd.f32 1.0, %v9711_v48 }
 0x3ca   :  { %v2590_v58 = vmul.f32 %v12187_v35, %v2521_v9  ;;  %v2786_v19 = vmul.f32 %v2722_v2, %v12413_v18  ;;  %9718 = vtanh.f32 %v2962_v29  ;;  %v2899_v7 = vadd.f32 %v12251_v4, %v12205_v15 }
 0x3cb   :  { %v12449_v1 = vadd.f32 %v12202_v40, %v2591_v38  ;;  %v15555_v14 = vsub.f32 %v15553_v17, %v15554_v43  ;;  %v3213_v45 = vmul.f32 %v3149_v53, %v12091_v50  ;;  %v3150_v47 = vmul.f32 0.5, %v3086_v54  ;;  %v9713_v30 = vpop.eup %9712 }
 0x3cc   :  { %v12452_v31 = vadd.f32 %v12202_v40, %v2590_v58  ;;  %v2785_v2 = vmul.f32 %v2721_v57, %v12426_v62  ;;  %v2963_v9 = vmul.f32 0.7978846, %v2899_v7  ;;  %v2900_v4 = vadd.f32 %v12239_v10, %v12182_v63  ;;  %v15556_v57 = vld [vmem:[#allocation67_spill] sm:$0xff]  ;;  %v2398_v10 = vpop.permute.xlu1 %2397 }
 0x3cd   :  { %v2524_v60 = vmul.f32 %v2394_v33, %v15555_v14  ;;  %v2724_v11 = vmul.f32 %v12449_v1, %v12449_v1  ;;  %9010 = vmatprep.mubr.msk.f32.mxu0 %vm987_vm1, %v3213_v45  ;;  %v3214_v50 = vmul.f32 %v3150_v47, %v12081_v44  ;;  %v3087_v21 = vadd.f32 1.0, %v9713_v30  ;;  %v15557_v33 = vld [vmem:[#allocation119_spill] sm:$0xff]  ;;  %v2396_v14 = vpop.permute.xlu0 %2395 }
 0x3ce   :  { %v2723_v61 = vmul.f32 %v12452_v31, %v12452_v31  ;;  %v12470_v38 = vmul.f32 0.044715, %v2786_v19  ;;  %v15558_v48 = vsub.f32 %v15556_v57, %v15557_v33  ;;  %v9715_v58 = vpop.eup %9714  ;;  %9720 = vtanh.f32 %v2963_v9  ;;  %v15560_v9 = vld [vmem:[#allocation120_spill] sm:$0xff]  ;;  %v15562_v33 = vld [vmem:[#allocation65_spill] sm:$0xff] }
 0x3cf   :  { %v2593_v12 = vmul.f32 %v12187_v35, %v2524_v60  ;;  %v2788_v53 = vmul.f32 %v2724_v11, %v12449_v1  ;;  %v2964_v7 = vmul.f32 0.7978846, %v2900_v4  ;;  %9011 = vmatmul.mubr.msk.f32.gmra.mrb[98].mxu0 %vm987_vm1, %v3214_v50  ;;  %v3151_v17 = vmul.f32 0.5, %v3087_v21 }
 0x3d0   :  { %v2523_v29 = vmul.f32 %v2392_v46, %v15558_v48  ;;  %v3088_v44 = vadd.f32 1.0, %v9715_v58  ;;  %v12480_v43 = vmul.f32 0.044715, %v2785_v2  ;;  %v2787_v46 = vmul.f32 %v2723_v61, %v12452_v31  ;;  %v15559_v2 = vld [vmem:[#allocation68_spill] sm:$0xff]  ;;  %v15563_v48 = vld [vmem:[#allocation121_spill] sm:$0xff] }
 0x3d1   :  { %v12477_v54 = vadd.f32 %v12202_v40, %v2593_v12  ;;  %9722 = vtanh.f32 %v2964_v7  ;;  %v2901_v45 = vadd.f32 %v12288_v49, %v12229_v42  ;;  %v3215_v47 = vmul.f32 %v3151_v17, %v12131_v41 }
 0x3d2   :  { %v2592_v19 = vmul.f32 %v12187_v35, %v2523_v29  ;;  %v3152_v11 = vmul.f32 0.5, %v3088_v44  ;;  %v15561_v12 = vsub.f32 %v15559_v2, %v15560_v9  ;;  %v9717_v50 = vpop.eup %9716  ;;  %v12495_v21 = vmul.f32 0.044715, %v2788_v53 }
 0x3d3   :  { %v2726_v60 = vmul.f32 %v12477_v54, %v12477_v54  ;;  %v2965_v61 = vmul.f32 0.7978846, %v2901_v45  ;;  %v2902_v57 = vadd.f32 %v12286_v32, %v12219_v3  ;;  %v15564_v49 = vsub.f32 %v15562_v33, %v15563_v48  ;;  %9013 = vmatprep.mubr.msk.f32.mxu0 %vm987_vm1, %v3215_v47 }
 0x3d4   :  { %v12490_v30 = vadd.f32 %v12202_v40, %v2592_v19  ;;  %v2526_v4 = vmul.f32 %v2398_v10, %v15561_v12  ;;  %v3216_v41 = vmul.f32 %v3152_v11, %v12118_v59  ;;  %v3089_v58 = vadd.f32 1.0, %v9717_v50  ;;  %v9719_v53 = vpop.eup %9718 }
 0x3d5   :  { %v2525_v29 = vmul.f32 %v2396_v14, %v15564_v49  ;;  %v2790_v17 = vmul.f32 %v2726_v60, %v12477_v54  ;;  %9724 = vtanh.f32 %v2965_v61  ;;  %v2966_v44 = vmul.f32 0.7978846, %v2902_v57 }
 0x3d6   :  { %v2725_v7 = vmul.f32 %v12490_v30, %v12490_v30  ;;  %v2595_v10 = vmul.f32 %v12187_v35, %v2526_v4  ;;  %9014 = vmatmul.mubr.msk.f32.gmra.mrb[100].mxu0 %vm987_vm1, %v3216_v41  ;;  %v3153_v19 = vmul.f32 0.5, %v3089_v58  ;;  %v3090_v14 = vadd.f32 1.0, %v9719_v53 }
 0x3d7   :  { %v2594_v32 = vmul.f32 %v12187_v35, %v2525_v29  ;;  %9726 = vtanh.f32 %v2966_v44  ;;  %v2903_v60 = vadd.f32 %v12315_v34, %v12269_v0  ;;  %v2904_v11 = vadd.f32 %v12304_v52, %v12256_v26 }
 0x3d8   :  { %v2789_v45 = vmul.f32 %v2725_v7, %v12490_v30  ;;  %v12512_v59 = vadd.f32 %v12202_v40, %v2595_v10  ;;  %v3217_v35 = vmul.f32 %v3153_v19, %v12155_v13  ;;  %v3154_v2 = vmul.f32 0.5, %v3090_v14  ;;  %v9721_v4 = vpop.eup %9720 }
 0x3d9   :  { %v12515_v47 = vadd.f32 %v12202_v40, %v2594_v32  ;;  %v2851_v9 = vmul.f32 0.044715, %v2787_v46  ;;  %v2967_v61 = vmul.f32 0.7978846, %v2903_v60  ;;  %v2968_v40 = vmul.f32 0.7978846, %v2904_v11 }
 0x3da   :  { %v2728_v12 = vmul.f32 %v12512_v59, %v12512_v59  ;;  %v2905_v57 = vadd.f32 %v12352_v23, %v12298_v5  ;;  %9016 = vmatprep.mubr.msk.f32.mxu0 %vm987_vm1, %v3217_v35  ;;  %v3218_v52 = vmul.f32 %v3154_v2, %v12145_v37  ;;  %v3091_v34 = vadd.f32 1.0, %v9721_v4 }
 0x3db   :  { %v2727_v50 = vmul.f32 %v12515_v47, %v12515_v47  ;;  %v12530_v13 = vmul.f32 0.044715, %v2790_v17  ;;  %v2906_v46 = vadd.f32 %v12342_v51, %v12283_v56  ;;  %v9723_v33 = vpop.eup %9722  ;;  %v2853_v48 = vmul.f32 0.044715, %v2789_v45 }
 0x3dc   :  { %9728 = vtanh.f32 %v2967_v61  ;;  %v2969_v49 = vmul.f32 0.7978846, %v2905_v57  ;;  %v2907_v29 = vadd.f32 %v12379_v39, %v12324_v24  ;;  %9017 = vmatmul.mubr.msk.f32.gmra.mrb[102].mxu0 %vm987_vm1, %v3218_v52  ;;  %v3155_v23 = vmul.f32 0.5, %v3091_v34 }
 0x3dd   :  { %v3092_v41 = vadd.f32 1.0, %v9723_v33  ;;  %v2792_v58 = vmul.f32 %v2728_v12, %v12512_v59  ;;  %9730 = vtanh.f32 %v2968_v40  ;;  %v2791_v37 = vmul.f32 %v2727_v50, %v12515_v47 }
 0x3de   :  { %9732 = vtanh.f32 %v2969_v49  ;;  %v2970_v7 = vmul.f32 0.7978846, %v2906_v46  ;;  %v2971_v10 = vmul.f32 0.7978846, %v2907_v29  ;;  %v3219_v51 = vmul.f32 %v3155_v23, %v12205_v15 }
 0x3df   :  { %v3156_v53 = vmul.f32 0.5, %v3092_v41  ;;  %v2908_v17 = vadd.f32 %v12367_v55, %v12321_v8  ;;  %v2909_v39 = vadd.f32 %v12416_v36, %v12362_v6  ;;  %v9725_v44 = vpop.eup %9724  ;;  %v2910_v32 = vadd.f32 %v12406_v25, %v12349_v27 }
 0x3e0   :  { %9734 = vtanh.f32 %v2970_v7  ;;  %v2911_v19 = vadd.f32 %v12443_v16, %v12388_v28  ;;  %v2912_v14 = vadd.f32 %v12431_v20, %v12385_v22  ;;  %9019 = vmatprep.mubr.msk.f32.mxu0 %vm987_vm1, %v3219_v51  ;;  %v3093_v45 = vadd.f32 1.0, %v9725_v44 }
 0x3e1   :  { %v3220_v15 = vmul.f32 %v3156_v53, %v12182_v63  ;;  %9736 = vtanh.f32 %v2971_v10  ;;  %v2972_v55 = vmul.f32 0.7978846, %v2908_v17  ;;  %v9727_v60 = vpop.eup %9726  ;;  %v2973_v36 = vmul.f32 0.7978846, %v2909_v39 }
 0x3e2   :  { %v2974_v11 = vmul.f32 0.7978846, %v2910_v32  ;;  %v2975_v35 = vmul.f32 0.7978846, %v2911_v19  ;;  %v2913_v25 = vadd.f32 %v12480_v43, %v12426_v62  ;;  %v3157_v16 = vmul.f32 0.5, %v3093_v45 }
 0x3e3   :  { %9020 = vmatmul.mubr.msk.f32.gmra.mrb[104].mxu0 %vm987_vm1, %v3220_v15  ;;  %v3094_v2 = vadd.f32 1.0, %v9727_v60  ;;  %9738 = vtanh.f32 %v2972_v55  ;;  %v2976_v20 = vmul.f32 0.7978846, %v2912_v14  ;;  %v2914_v63 = vadd.f32 %v12470_v38, %v12413_v18 }
 0x3e4   :  { %9740 = vtanh.f32 %v2973_v36  ;;  %v2977_v12 = vmul.f32 0.7978846, %v2913_v25  ;;  %v2915_v4 = vadd.f32 %v2851_v9, %v12452_v31  ;;  %v3221_v50 = vmul.f32 %v3157_v16, %v12229_v42 }
 0x3e5   :  { %v3158_v61 = vmul.f32 0.5, %v3094_v2  ;;  %9742 = vtanh.f32 %v2974_v11  ;;  %v2916_v43 = vadd.f32 %v12495_v21, %v12449_v1  ;;  %v2855_v57 = vmul.f32 0.044715, %v2791_v37 }
 0x3e6   :  { %v9729_v40 = vpop.eup %9728  ;;  %9744 = vtanh.f32 %v2975_v35  ;;  %v2979_v52 = vmul.f32 0.7978846, %v2915_v4  ;;  %v2917_v34 = vadd.f32 %v2853_v48, %v12490_v30  ;;  %9022 = vmatprep.mubr.msk.f32.mxu0 %vm987_vm1, %v3221_v50  ;;  %v2978_v9 = vmul.f32 0.7978846, %v2914_v63 }
 0x3e7   :  { %v9731_v46 = vpop.eup %9730  ;;  %v3222_v38 = vmul.f32 %v3158_v61, %v12219_v3  ;;  %v3095_v33 = vadd.f32 1.0, %v9729_v40  ;;  %9746 = vtanh.f32 %v2976_v20  ;;  %v2856_v49 = vmul.f32 0.044715, %v2792_v58 }
 0x3e8   :  { %v9733_v42 = vpop.eup %9732  ;;  %v3096_v29 = vadd.f32 1.0, %v9731_v46  ;;  %9748 = vtanh.f32 %v2977_v12  ;;  %v2980_v41 = vmul.f32 0.7978846, %v2916_v43  ;;  %v2918_v48 = vadd.f32 %v12530_v13, %v12477_v54 }
 0x3e9   :  { %9023 = vmatmul.mubr.msk.f32.gmra.mrb[106].mxu0 %vm987_vm1, %v3222_v38  ;;  %v3159_v21 = vmul.f32 0.5, %v3095_v33  ;;  %v3097_v23 = vadd.f32 1.0, %v9733_v42  ;;  %9750 = vtanh.f32 %v2979_v52  ;;  %v2981_v10 = vmul.f32 0.7978846, %v2917_v34 }
 0x3ea   :  { %v9735_v37 = vpop.eup %9734  ;;  %v3160_v7 = vmul.f32 0.5, %v3096_v29  ;;  %v2919_v3 = vadd.f32 %v2855_v57, %v12515_v47  ;;  %9752 = vtanh.f32 %v2978_v9  ;;  %v2982_v14 = vmul.f32 0.7978846, %v2918_v48 }
 0x3eb   :  { %v9737_v51 = vpop.eup %9736  ;;  %v3223_v53 = vmul.f32 %v3159_v21, %v12269_v0  ;;  %v3161_v58 = vmul.f32 0.5, %v3097_v23  ;;  %v3098_v17 = vadd.f32 1.0, %v9735_v37  ;;  %9754 = vtanh.f32 %v2981_v10 }
 0x3ec   :  { %v3224_v39 = vmul.f32 %v3160_v7, %v12256_v26  ;;  %v3099_v44 = vadd.f32 1.0, %v9737_v51  ;;  %v2983_v0 = vmul.f32 0.7978846, %v2919_v3  ;;  %9756 = vtanh.f32 %v2980_v41 }
 0x3ed   :  { %v9739_v32 = vpop.eup %9738  ;;  %9025 = vmatprep.mubr.msk.f32.mxu0 %vm987_vm1, %v3223_v53  ;;  %v3225_v13 = vmul.f32 %v3161_v58, %v12298_v5  ;;  %v3162_v19 = vmul.f32 0.5, %v3098_v17  ;;  %v2920_v26 = vadd.f32 %v2856_v49, %v12512_v59  ;;  %9758 = vtanh.f32 %v2982_v14 }
 0x3ee   :  { %v9741_v15 = vpop.eup %9740  ;;  %9026 = vmatmul.mubr.msk.f32.gmra.mrb[108].mxu0 %vm987_vm1, %v3224_v39  ;;  %v3163_v45 = vmul.f32 0.5, %v3099_v44  ;;  %v3100_v55 = vadd.f32 1.0, %v9739_v32  ;;  %9760 = vtanh.f32 %v2983_v0 }
 0x3ef   :  { %v9743_v60 = vpop.eup %9742  ;;  %9028 = vmatprep.mubr.msk.f32.mxu0 %vm987_vm1, %v3225_v13  ;;  %v3101_v36 = vadd.f32 1.0, %v9741_v15  ;;  %v3226_v35 = vmul.f32 %v3162_v19, %v12283_v56  ;;  %v2984_v43 = vmul.f32 0.7978846, %v2920_v26 }
 0x3f0   :  { %v9745_v11 = vpop.eup %9744  ;;  %v3227_v5 = vmul.f32 %v3163_v45, %v12324_v24  ;;  %v3164_v25 = vmul.f32 0.5, %v3100_v55  ;;  %v3102_v16 = vadd.f32 1.0, %v9743_v60 }
 0x3f1   :  { %v9747_v2 = vpop.eup %9746  ;;  %v3165_v20 = vmul.f32 0.5, %v3101_v36  ;;  %v3103_v12 = vadd.f32 1.0, %v9745_v11  ;;  %9762 = vtanh.f32 %v2984_v43 }
 0x3f2   :  { %v9749_v63 = vpop.eup %9748  ;;  %9029 = vmatmul.mubr.msk.f32.gmra.mrb[110].mxu0 %vm987_vm1, %v3226_v35  ;;  %v3228_v24 = vmul.f32 %v3164_v25, %v12321_v8  ;;  %v3166_v40 = vmul.f32 0.5, %v3102_v16  ;;  %v3104_v57 = vadd.f32 1.0, %v9747_v2 }
 0x3f3   :  { %9031 = vmatprep.mubr.msk.f32.mxu0 %vm987_vm1, %v3227_v5  ;;  %v3229_v4 = vmul.f32 %v3165_v20, %v12362_v6  ;;  %v3167_v50 = vmul.f32 0.5, %v3103_v12  ;;  %v3105_v61 = vadd.f32 1.0, %v9749_v63  ;;  %v9751_v56 = vpop.eup %9750 }
 0x3f4   :  { %v9753_v52 = vpop.eup %9752  ;;  %v3107_v38 = vadd.f32 1.0, %v9751_v56  ;;  %v3230_v6 = vmul.f32 %v3166_v40, %v12349_v27  ;;  %v3168_v9 = vmul.f32 0.5, %v3104_v57 }
 0x3f5   :  { %v3231_v34 = vmul.f32 %v3167_v50, %v12388_v28  ;;  %v3169_v46 = vmul.f32 0.5, %v3105_v61  ;;  %v9755_v33 = vpop.eup %9754  ;;  %v3106_v42 = vadd.f32 1.0, %v9753_v52 }
 0x3f6   :  { %9032 = vmatmul.mubr.msk.f32.gmra.mrb[112].mxu0 %vm987_vm1, %v3228_v24  ;;  %v9757_v49 = vpop.eup %9756  ;;  %v3171_v21 = vmul.f32 0.5, %v3107_v38  ;;  %v3109_v23 = vadd.f32 1.0, %v9755_v33  ;;  %v3232_v28 = vmul.f32 %v3168_v9, %v12385_v22 }
 0x3f7   :  { %9034 = vmatprep.mubr.msk.f32.mxu0 %vm987_vm1, %v3229_v4  ;;  %v9759_v8 = vpop.eup %9758  ;;  %v3233_v29 = vmul.f32 %v3169_v46, %v12426_v62  ;;  %v3170_v48 = vmul.f32 0.5, %v3106_v42  ;;  %v3108_v37 = vadd.f32 1.0, %v9757_v49 }
 0x3f8   :  { %v9761_v41 = vpop.eup %9760  ;;  %v3235_v27 = vmul.f32 %v3171_v21, %v12452_v31  ;;  %v3173_v7 = vmul.f32 0.5, %v3109_v23  ;;  %v3110_v53 = vadd.f32 1.0, %v9759_v8 }
 0x3f9   :  { %v3111_v10 = vadd.f32 1.0, %v9761_v41  ;;  %v3234_v3 = vmul.f32 %v3170_v48, %v12413_v18  ;;  %v3172_v51 = vmul.f32 0.5, %v3108_v37 }
 0x3fa   :  { %9035 = vmatmul.mubr.msk.f32.gmra.mrb[114].mxu0 %vm987_vm1, %v3230_v6  ;;  %v3237_v22 = vmul.f32 %v3173_v7, %v12490_v30  ;;  %v3174_v39 = vmul.f32 0.5, %v3110_v53 }
 0x3fb   :  { %9037 = vmatprep.mubr.msk.f32.mxu0 %vm987_vm1, %v3231_v34  ;;  %v9763_v62 = vpop.eup %9762  ;;  %v3175_v58 = vmul.f32 0.5, %v3111_v10  ;;  %v3236_v17 = vmul.f32 %v3172_v51, %v12449_v1  ;;  %v12608_v1 = vld [vmem:[%s14927_s3 + $0x3] ss:$0 sm:$0xff] }
 0x3fc   :  { %v3112_v44 = vadd.f32 1.0, %v9763_v62  ;;  %v3238_v31 = vmul.f32 %v3174_v39, %v12477_v54 }
 0x3fd   :  { %v3239_v18 = vmul.f32 %v3175_v58, %v12515_v47 }
 0x3fe   :  { %9038 = vmatmul.mubr.msk.f32.gmra.mrb[116].mxu0 %vm987_vm1, %v3232_v28  ;;  %v3176_v32 = vmul.f32 0.5, %v3112_v44 }
 0x3ff   :  { %9040 = vmatprep.mubr.msk.f32.mxu0 %vm987_vm1, %v3233_v29 }
 0x400   :  { %v3240_v30 = vmul.f32 %v3176_v32, %v12512_v59 }
 0x402   :  { %9041 = vmatmul.mubr.msk.f32.gmra.mrb[118].mxu0 %vm987_vm1, %v3234_v3 }
 0x403   :  { %9043 = vmatprep.mubr.msk.f32.mxu0 %vm987_vm1, %v3235_v27 }
 0x406   :  { %9044 = vmatmul.mubr.msk.f32.gmra.mrb[120].mxu0 %vm987_vm1, %v3236_v17 }
 0x407   :  { %9046 = vmatprep.mubr.msk.f32.mxu0 %vm987_vm1, %v3237_v22 }
 0x40a   :  { %9047 = vmatmul.mubr.msk.f32.gmra.mrb[122].mxu0 %vm987_vm1, %v3238_v31 }
 0x40b   :  { %9049 = vmatprep.mubr.msk.f32.mxu0 %vm987_vm1, %v3239_v18 }
 0x40e   :  { %9050 = vmatmul.mubr.msk.f32.gmra.mrb[124].mxu0 %vm987_vm1, %v3240_v30 }
 0x41d   :  { %v8958_v13 = vpop.f32.mrb[62].mxu0 }
 0x41e   :  { %v12611_v19 = vadd.f32 %v8958_v13, %v12608_v1  ;;  %v3505_v47 = vpop.f32.mrb[63].mxu0 }
 0x41f   :  { %v12614_v54 = vadd.f32 %v12608_v1, %v3505_v47 }
 0x420   :  { %v3829_v14 = vsel %vm987_vm1, %v12611_v19, 0.0 }
 0x421   :  { %3830 = vadd.xlane.f32.xlu1 %v3829_v14  ;;  %v3826_v59 = vsel %vm987_vm1, %v12614_v54, 0.0 }
 0x422   :  { %3827 = vadd.xlane.f32.xlu0 %v3826_v59 }
 0x423   :  { %v8961_v15 = vpop.f32.mrb[64].mxu0 }
 0x424   :  { %v12621_v45 = vadd.f32 %v8961_v15, %v12608_v1  ;;  %v3515_v55 = vpop.f32.mrb[65].mxu0 }
 0x425   :  { %v12624_v0 = vadd.f32 %v12608_v1, %v3515_v55 }
 0x426   :  { %v3835_v60 = vsel %vm987_vm1, %v12621_v45, 0.0 }
 0x427   :  { %3836 = vadd.xlane.f32.xlu0 %v3835_v60  ;;  %v3832_v36 = vsel %vm987_vm1, %v12624_v0, 0.0 }
 0x42b   :  { %3833 = vadd.xlane.f32.xlu0 %v3832_v36 }
 0x437   :  { %v8964_v26 = vpop.f32.mrb[66].mxu0 }
 0x438   :  { %v12631_v11 = vadd.f32 %v8964_v26, %v12608_v1  ;;  %v3525_v35 = vpop.f32.mrb[67].mxu0 }
 0x439   :  { %v12634_v5 = vadd.f32 %v12608_v1, %v3525_v35 }
 0x43a   :  { %v3841_v25 = vsel %vm987_vm1, %v12631_v11, 0.0 }
 0x43b   :  { %v3838_v16 = vsel %vm987_vm1, %v12634_v5, 0.0  ;;  %3842 = vadd.xlane.f32.xlu0 %v3841_v25 }
 0x43c   :  { %3839 = vadd.xlane.f32.xlu1 %v3838_v16 }
 0x43d   :  { %v8967_v2 = vpop.f32.mrb[68].mxu0 }
 0x43e   :  { %v12641_v20 = vadd.f32 %v8967_v2, %v12608_v1  ;;  %v3535_v12 = vpop.f32.mrb[69].mxu0 }
 0x43f   :  { %v12644_v63 = vadd.f32 %v12608_v1, %v3535_v12 }
 0x440   :  { %v3847_v4 = vsel %vm987_vm1, %v12641_v20, 0.0 }
 0x441   :  { %v3844_v50 = vsel %vm987_vm1, %v12644_v63, 0.0  ;;  %3848 = vadd.xlane.f32.xlu0 %v3847_v4 }
 0x442   :  { %3845 = vadd.xlane.f32.xlu1 %v3844_v50 }
 0x447   :  { %v8970_v61 = vpop.f32.mrb[70].mxu0 }
 0x448   :  { %v12651_v43 = vadd.f32 %v8970_v61, %v12608_v1  ;;  %v3545_v56 = vpop.f32.mrb[71].mxu0 }
 0x449   :  { %v12654_v24 = vadd.f32 %v12608_v1, %v3545_v56 }
 0x44a   :  { %v3853_v40 = vsel %vm987_vm1, %v12651_v43, 0.0 }
 0x44b   :  { %v3850_v57 = vsel %vm987_vm1, %v12654_v24, 0.0  ;;  %3854 = vadd.xlane.f32.xlu0 %v3853_v40 }
 0x44c   :  { %3851 = vadd.xlane.f32.xlu1 %v3850_v57 }
 0x44f   :  { %v8973_v52 = vpop.f32.mrb[72].mxu0 }
 0x450   :  { %v12661_v34 = vadd.f32 %v8973_v52, %v12608_v1  ;;  %v3555_v46 = vpop.f32.mrb[73].mxu0 }
 0x451   :  { %v12664_v38 = vadd.f32 %v12608_v1, %v3555_v46 }
 0x452   :  { %v3859_v33 = vsel %vm987_vm1, %v12661_v34, 0.0 }
 0x453   :  { %v3856_v6 = vsel %vm987_vm1, %v12664_v38, 0.0  ;;  %3860 = vadd.xlane.f32.xlu0 %v3859_v33 }
 0x454   :  { %v8976_v9 = vpop.f32.mrb[74].mxu0  ;;  %3857 = vadd.xlane.f32.xlu1 %v3856_v6 }
 0x455   :  { %v12671_v42 = vadd.f32 %v8976_v9, %v12608_v1  ;;  %v3565_v49 = vpop.f32.mrb[75].mxu0 }
 0x456   :  { %v12674_v8 = vadd.f32 %v12608_v1, %v3565_v49 }
 0x457   :  { %v3865_v29 = vsel %vm987_vm1, %v12671_v42, 0.0 }
 0x458   :  { %v3862_v21 = vsel %vm987_vm1, %v12674_v8, 0.0  ;;  %3866 = vadd.xlane.f32.xlu0 %v3865_v29 }
 0x459   :  { %3863 = vadd.xlane.f32.xlu1 %v3862_v21 }
 0x45b   :  { %v8979_v23 = vpop.f32.mrb[76].mxu0 }
 0x45c   :  { %v12681_v41 = vadd.f32 %v8979_v23, %v12608_v1  ;;  %v3575_v28 = vpop.f32.mrb[77].mxu0 }
 0x45d   :  { %v12684_v48 = vadd.f32 %v12608_v1, %v3575_v28 }
 0x45e   :  { %v3871_v37 = vsel %vm987_vm1, %v12681_v41, 0.0 }
 0x45f   :  { %v3868_v27 = vsel %vm987_vm1, %v12684_v48, 0.0  ;;  %3872 = vadd.xlane.f32.xlu0 %v3871_v37 }
 0x460   :  { %3869 = vadd.xlane.f32.xlu1 %v3868_v27 }
 0x461   :  { %v8982_v7 = vpop.f32.mrb[78].mxu0 }
 0x462   :  { %v12691_v10 = vadd.f32 %v8982_v7, %v12608_v1  ;;  %v3585_v3 = vpop.f32.mrb[79].mxu0 }
 0x463   :  { %v12694_v51 = vadd.f32 %v12608_v1, %v3585_v3 }
 0x464   :  { %v3877_v53 = vsel %vm987_vm1, %v12691_v10, 0.0 }
 0x465   :  { %v3874_v62 = vsel %vm987_vm1, %v12694_v51, 0.0  ;;  %3878 = vadd.xlane.f32.xlu0 %v3877_v53 }
 0x466   :  { %3875 = vadd.xlane.f32.xlu1 %v3874_v62 }
 0x468   :  { %v8985_v22 = vpop.f32.mrb[80].mxu0 }
 0x469   :  { %v12701_v58 = vadd.f32 %v8985_v22, %v12608_v1  ;;  %v3595_v17 = vpop.f32.mrb[81].mxu0 }
 0x46a   :  { %v12704_v39 = vadd.f32 %v12608_v1, %v3595_v17 }
 0x46b   :  { %v3883_v44 = vsel %vm987_vm1, %v12701_v58, 0.0 }
 0x46c   :  { %v3880_v18 = vsel %vm987_vm1, %v12704_v39, 0.0  ;;  %3884 = vadd.xlane.f32.xlu0 %v3883_v44 }
 0x46d   :  { %3881 = vadd.xlane.f32.xlu1 %v3880_v18 }
 0x46f   :  { %v8988_v31 = vpop.f32.mrb[82].mxu0 }
 0x470   :  { %v12711_v32 = vadd.f32 %v8988_v31, %v12608_v1  ;;  %v3605_v30 = vpop.f32.mrb[83].mxu0 }
 0x471   :  { %v12714_v13 = vadd.f32 %v12608_v1, %v3605_v30 }
 0x472   :  { %v3889_v47 = vsel %vm987_vm1, %v12711_v32, 0.0 }
 0x473   :  { %v3886_v14 = vsel %vm987_vm1, %v12714_v13, 0.0  ;;  %3890 = vadd.xlane.f32.xlu0 %v3889_v47 }
 0x474   :  { %3887 = vadd.xlane.f32.xlu1 %v3886_v14 }
 0x475   :  { %v8991_v59 = vpop.f32.mrb[84].mxu0 }
 0x476   :  { %v12721_v15 = vadd.f32 %v8991_v59, %v12608_v1  ;;  %v3615_v55 = vpop.f32.mrb[85].mxu0 }
 0x477   :  { %v12724_v60 = vadd.f32 %v12608_v1, %v3615_v55 }
 0x478   :  { %v3895_v36 = vsel %vm987_vm1, %v12721_v15, 0.0 }
 0x479   :  { %v3892_v26 = vsel %vm987_vm1, %v12724_v60, 0.0  ;;  %3896 = vadd.xlane.f32.xlu0 %v3895_v36 }
 0x47a   :  { %3893 = vadd.xlane.f32.xlu1 %v3892_v26 }
 0x47c   :  { %v8994_v35 = vpop.f32.mrb[86].mxu0 }
 0x47d   :  { %v12731_v25 = vadd.f32 %v8994_v35, %v12608_v1  ;;  %v3625_v16 = vpop.f32.mrb[87].mxu0 }
 0x47e   :  { %v12734_v2 = vadd.f32 %v12608_v1, %v3625_v16 }
 0x47f   :  { %v3901_v12 = vsel %vm987_vm1, %v12731_v25, 0.0 }
 0x480   :  { %v3898_v4 = vsel %vm987_vm1, %v12734_v2, 0.0  ;;  %3902 = vadd.xlane.f32.xlu0 %v3901_v12 }
 0x481   :  { %3899 = vadd.xlane.f32.xlu1 %v3898_v4 }
 0x482   :  { %v8997_v50 = vpop.f32.mrb[88].mxu0 }
 0x483   :  { %v12741_v61 = vadd.f32 %v8997_v50, %v12608_v1  ;;  %v3635_v56 = vpop.f32.mrb[89].mxu0 }
 0x484   :  { %v12744_v40 = vadd.f32 %v12608_v1, %v3635_v56 }
 0x485   :  { %v3907_v57 = vsel %vm987_vm1, %v12741_v61, 0.0 }
 0x486   :  { %v3904_v52 = vsel %vm987_vm1, %v12744_v40, 0.0  ;;  %3908 = vadd.xlane.f32.xlu0 %v3907_v57 }
 0x487   :  { %3905 = vadd.xlane.f32.xlu1 %v3904_v52 }
 0x488   :  { %v9000_v46 = vpop.f32.mrb[90].mxu0 }
 0x489   :  { %v12751_v33 = vadd.f32 %v9000_v46, %v12608_v1  ;;  %v3645_v6 = vpop.f32.mrb[91].mxu0 }
 0x48a   :  { %v12754_v9 = vadd.f32 %v12608_v1, %v3645_v6 }
 0x48b   :  { %v3913_v49 = vsel %vm987_vm1, %v12751_v33, 0.0 }
 0x48c   :  { %v3910_v29 = vsel %vm987_vm1, %v12754_v9, 0.0  ;;  %3914 = vadd.xlane.f32.xlu0 %v3913_v49 }
 0x48d   :  { %3911 = vadd.xlane.f32.xlu1 %v3910_v29 }
 0x48f   :  { %v9003_v21 = vpop.f32.mrb[92].mxu0 }
 0x490   :  { %v12761_v23 = vadd.f32 %v9003_v21, %v12608_v1  ;;  %v3655_v28 = vpop.f32.mrb[93].mxu0 }
 0x491   :  { %v12764_v37 = vadd.f32 %v12608_v1, %v3655_v28 }
 0x492   :  { %v3919_v27 = vsel %vm987_vm1, %v12761_v23, 0.0 }
 0x493   :  { %v3916_v7 = vsel %vm987_vm1, %v12764_v37, 0.0  ;;  %3920 = vadd.xlane.f32.xlu0 %v3919_v27 }
 0x494   :  { %3917 = vadd.xlane.f32.xlu1 %v3916_v7 }
 0x495   :  { %v9006_v3 = vpop.f32.mrb[94].mxu0 }
 0x496   :  { %v12771_v53 = vadd.f32 %v9006_v3, %v12608_v1  ;;  %v3665_v62 = vpop.f32.mrb[95].mxu0 }
 0x497   :  { %v12774_v22 = vadd.f32 %v12608_v1, %v3665_v62 }
 0x498   :  { %v3925_v17 = vsel %vm987_vm1, %v12771_v53, 0.0 }
 0x499   :  { %v3922_v44 = vsel %vm987_vm1, %v12774_v22, 0.0  ;;  %3926 = vadd.xlane.f32.xlu0 %v3925_v17 }
 0x49a   :  { %3923 = vadd.xlane.f32.xlu1 %v3922_v44 }
 0x49c   :  { %v9009_v18 = vpop.f32.mrb[96].mxu0 }
 0x49d   :  { %v12781_v31 = vadd.f32 %v9009_v18, %v12608_v1  ;;  %v3675_v30 = vpop.f32.mrb[97].mxu0 }
 0x49e   :  { %v12784_v47 = vadd.f32 %v12608_v1, %v3675_v30 }
 0x49f   :  { %v3931_v14 = vsel %vm987_vm1, %v12781_v31, 0.0 }
 0x4a0   :  { %v3928_v59 = vsel %vm987_vm1, %v12784_v47, 0.0  ;;  %3932 = vadd.xlane.f32.xlu0 %v3931_v14 }
 0x4a1   :  { %3929 = vadd.xlane.f32.xlu1 %v3928_v59 }
 0x4a2   :  { %v9012_v55 = vpop.f32.mrb[98].mxu0 }
 0x4a3   :  { %v12791_v36 = vadd.f32 %v9012_v55, %v12608_v1  ;;  %v3685_v26 = vpop.f32.mrb[99].mxu0 }
 0x4a4   :  { %v12794_v35 = vadd.f32 %v12608_v1, %v3685_v26 }
 0x4a5   :  { %v3937_v16 = vsel %vm987_vm1, %v12791_v36, 0.0 }
 0x4a6   :  { %v3934_v12 = vsel %vm987_vm1, %v12794_v35, 0.0  ;;  %3938 = vadd.xlane.f32.xlu0 %v3937_v16 }
 0x4a7   :  { %3935 = vadd.xlane.f32.xlu1 %v3934_v12 }
 0x4a9   :  { %v9015_v4 = vpop.f32.mrb[100].mxu0 }
 0x4aa   :  { %v12801_v50 = vadd.f32 %v9015_v4, %v12608_v1  ;;  %v3695_v56 = vpop.f32.mrb[101].mxu0 }
 0x4ab   :  { %v12804_v57 = vadd.f32 %v12608_v1, %v3695_v56 }
 0x4ac   :  { %v3943_v52 = vsel %vm987_vm1, %v12801_v50, 0.0 }
 0x4ad   :  { %v3940_v46 = vsel %vm987_vm1, %v12804_v57, 0.0  ;;  %3944 = vadd.xlane.f32.xlu0 %v3943_v52 }
 0x4ae   :  { %3941 = vadd.xlane.f32.xlu1 %v3940_v46  ;;  %v3831_v17 = vpop.xlane.xlu1 %3830 }
 0x4af   :  { %v9018_v6 = vpop.f32.mrb[102].mxu0  ;;  %v4020_v30 = vmul.f32 0.125, %v3831_v17  ;;  %v3828_v14 = vpop.xlane.xlu0 %3827 }
 0x4b0   :  { %v12811_v49 = vadd.f32 %v9018_v6, %v12608_v1  ;;  %v3705_v29 = vpop.f32.mrb[103].mxu0  ;;  %v4019_v55 = vmul.f32 0.125, %v3828_v14 }
 0x4b1   :  { %v12814_v21 = vadd.f32 %v12608_v1, %v3705_v29  ;;  %v12829_v16 = vsub.f32 %v12611_v19, %v4020_v30 }
 0x4b2   :  { %v3949_v28 = vsel %vm987_vm1, %v12811_v49, 0.0  ;;  %v12832_v12 = vsub.f32 %v12614_v54, %v4019_v55 }
 0x4b3   :  { %3950 = vadd.xlane.f32.xlu0 %v3949_v28  ;;  %v3946_v62 = vsel %vm987_vm1, %v12814_v21, 0.0  ;;  %v4148_v46 = vmul.f32 %v12829_v16, %v12829_v16 }
 0x4b4   :  { %15565 = vst [vmem:[#allocation7_spill] sm:$0xff] %v12832_v12  ;;  %v3837_v52 = vpop.xlane.xlu0 %3836  ;;  %v4147_v19 = vmul.f32 %v12832_v12, %v12832_v12 }
 0x4b5   :  { %v4022_v6 = vmul.f32 0.125, %v3837_v52  ;;  %v4214_v28 = vsel %vm987_vm1, %v4148_v46, 0.0 }
 0x4b6   :  { %v9021_v27 = vpop.f32.mrb[104].mxu0  ;;  %4215 = vadd.xlane.f32.xlu1 %v4214_v28  ;;  %v4211_v14 = vsel %vm987_vm1, %v4147_v19, 0.0 }
 0x4b7   :  { %v12819_v7 = vadd.f32 %v9021_v27, %v12608_v1  ;;  %v3715_v3 = vpop.f32.mrb[105].mxu0  ;;  %3947 = vadd.xlane.f32.xlu0 %v3946_v62  ;;  %v12845_v27 = vsub.f32 %v12621_v45, %v4022_v6 }
 0x4b8   :  { %v12824_v44 = vadd.f32 %v12608_v1, %v3715_v3  ;;  %v3834_v17 = vpop.xlane.xlu0 %3833 }
 0x4b9   :  { %v3955_v18 = vsel %vm987_vm1, %v12819_v7, 0.0  ;;  %15566 = vst [vmem:[#allocation9_spill] sm:$0xff] %v12845_v27 }
 0x4ba   :  { %v3952_v56 = vsel %vm987_vm1, %v12824_v44, 0.0  ;;  %4212 = vadd.xlane.f32.xlu1 %v4211_v14 }
 0x4bb   :  { %3956 = vadd.xlane.f32.xlu0 %v3955_v18  ;;  %v4021_v18 = vmul.f32 0.125, %v3834_v17 }
 0x4bc   :  { %v9024_v59 = vpop.f32.mrb[106].mxu0 }
 0x4bd   :  { %v3725_v26 = vpop.f32.mrb[107].mxu0  ;;  %v12835_v4 = vadd.f32 %v9024_v59, %v12608_v1  ;;  %v4150_v59 = vmul.f32 %v12845_v27, %v12845_v27  ;;  %v12856_v45 = vsub.f32 %v12624_v0, %v4021_v18 }
 0x4be   :  { %v12848_v3 = vadd.f32 %v12608_v1, %v3725_v26 }
 0x4bf   :  { %3953 = vadd.xlane.f32.xlu0 %v3952_v56  ;;  %v3961_v62 = vsel %vm987_vm1, %v12835_v4, 0.0  ;;  %15567 = vst [vmem:[#allocation11_spill] sm:$0xff] %v12856_v45  ;;  %v4220_v46 = vsel %vm987_vm1, %v4150_v59, 0.0  ;;  %v4149_v6 = vmul.f32 %v12856_v45, %v12856_v45 }
 0x4c0   :  { %v3958_v56 = vsel %vm987_vm1, %v12848_v3, 0.0  ;;  %4221 = vadd.xlane.f32.xlu1 %v4220_v46 }
 0x4c1   :  { %v9027_v29 = vpop.f32.mrb[108].mxu0 }
 0x4c2   :  { %v3735_v54 = vpop.f32.mrb[109].mxu0  ;;  %v12859_v26 = vadd.f32 %v9027_v29, %v12608_v1 }
 0x4c3   :  { %3962 = vadd.xlane.f32.xlu0 %v3961_v62  ;;  %v12867_v19 = vadd.f32 %v12608_v1, %v3735_v54  ;;  %v4217_v62 = vsel %vm987_vm1, %v4149_v6, 0.0 }
 0x4c4   :  { %v3967_v0 = vsel %vm987_vm1, %v12859_v26, 0.0  ;;  %4218 = vadd.xlane.f32.xlu1 %v4217_v62 }
 0x4c5   :  { %v9030_v30 = vpop.f32.mrb[110].mxu0  ;;  %15568 = vst [vmem:[#allocation12_spill] sm:$0xff] %v12867_v19  ;;  %v3964_v14 = vsel %vm987_vm1, %v12867_v19, 0.0 }
 0x4c6   :  { %v3745_v55 = vpop.f32.mrb[111].mxu0  ;;  %v12873_v18 = vadd.f32 %v9030_v30, %v12608_v1 }
 0x4c7   :  { %3959 = vadd.xlane.f32.xlu0 %v3958_v56  ;;  %v12880_v46 = vadd.f32 %v12608_v1, %v3745_v55 }
 0x4c8   :  { %15569 = vst [vmem:[#allocation14_spill] sm:$0xff] %v12873_v18  ;;  %v3843_v54 = vpop.xlane.xlu0 %3842 }
 0x4c9   :  { %v9033_v52 = vpop.f32.mrb[112].mxu0  ;;  %15570 = vst [vmem:[#allocation15_spill] sm:$0xff] %v12880_v46  ;;  %v3840_v6 = vpop.xlane.xlu1 %3839  ;;  %v4024_v45 = vmul.f32 0.125, %v3843_v54 }
 0x4ca   :  { %v3755_v28 = vpop.f32.mrb[113].mxu0  ;;  %v4023_v62 = vmul.f32 0.125, %v3840_v6  ;;  %v12895_v55 = vadd.f32 %v9033_v52, %v12608_v1 }
 0x4cb   :  { %3968 = vadd.xlane.f32.xlu0 %v3967_v0  ;;  %v3973_v0 = vsel %vm987_vm1, %v12873_v18, 0.0  ;;  %v12887_v27 = vsub.f32 %v12631_v11, %v4024_v45  ;;  %v3970_v18 = vsel %vm987_vm1, %v12880_v46, 0.0  ;;  %v12909_v46 = vadd.f32 %v12608_v1, %v3755_v28 }
 0x4cc   :  { %v12892_v12 = vsub.f32 %v12634_v5, %v4023_v62  ;;  %15573 = vst [vmem:[#allocation21_spill] sm:$0xff] %v12895_v55 }
 0x4cd   :  { %v9036_v29 = vpop.f32.mrb[114].mxu0  ;;  %15571 = vst [vmem:[#allocation17_spill] sm:$0xff] %v12887_v27  ;;  %v4152_v54 = vmul.f32 %v12887_v27, %v12887_v27  ;;  %15574 = vst [vmem:[#allocation22_spill] sm:$0xff] %v12909_v46 }
 0x4ce   :  { %v3765_v17 = vpop.f32.mrb[115].mxu0  ;;  %15572 = vst [vmem:[#allocation19_spill] sm:$0xff] %v12892_v12  ;;  %v4151_v5 = vmul.f32 %v12892_v12, %v12892_v12  ;;  %v12927_v28 = vadd.f32 %v9036_v29, %v12608_v1 }
 0x4cf   :  { %3965 = vadd.xlane.f32.xlu0 %v3964_v14  ;;  %v3846_v11 = vpop.xlane.xlu1 %3845  ;;  %v4226_v19 = vsel %vm987_vm1, %v4152_v54, 0.0 }
 0x4d0   :  { %v4025_v52 = vmul.f32 0.125, %v3846_v11  ;;  %4227 = vadd.xlane.f32.xlu1 %v4226_v19  ;;  %v4223_v12 = vsel %vm987_vm1, %v4151_v5, 0.0  ;;  %v3985_v29 = vsel %vm987_vm1, %v12927_v28, 0.0 }
 0x4d1   :  { %v9039_v59 = vpop.f32.mrb[116].mxu0 }
 0x4d2   :  { %v12877_v56 = vpop.f32.mrb[117].mxu0  ;;  %v12919_v54 = vsub.f32 %v12644_v63, %v4025_v52 }
 0x4d3   :  { %3974 = vadd.xlane.f32.xlu0 %v3973_v0  ;;  %v3849_v0 = vpop.xlane.xlu0 %3848 }
 0x4d4   :  { %v4026_v45 = vmul.f32 0.125, %v3849_v0  ;;  %15576 = vst [vmem:[#allocation25_spill] sm:$0xff] %v12919_v54  ;;  %4224 = vadd.xlane.f32.xlu1 %v4223_v12  ;;  %v4153_v5 = vmul.f32 %v12919_v54, %v12919_v54  ;;  %v12939_v12 = vadd.f32 %v12608_v1, %v3765_v17  ;;  %v12953_v17 = vadd.f32 %v9039_v59, %v12608_v1 }
 0x4d5   :  { %v12884_v30 = vpop.f32.mrb[118].mxu0  ;;  %v12965_v59 = vadd.f32 %v12608_v1, %v12877_v56 }
 0x4d6   :  { %v12889_v14 = vpop.f32.mrb[119].mxu0  ;;  %v12914_v27 = vsub.f32 %v12641_v20, %v4026_v45  ;;  %v3976_v20 = vsel %vm987_vm1, %v12909_v46, 0.0  ;;  %v4229_v54 = vsel %vm987_vm1, %v4153_v5, 0.0  ;;  %v12980_v56 = vadd.f32 %v12884_v30, %v12608_v1 }
 0x4d7   :  { %3971 = vadd.xlane.f32.xlu0 %v3970_v18  ;;  %v3979_v18 = vsel %vm987_vm1, %v12895_v55, 0.0 }
 0x4d8   :  { %15575 = vst [vmem:[#allocation24_spill] sm:$0xff] %v12914_v27  ;;  %v4154_v19 = vmul.f32 %v12914_v27, %v12914_v27  ;;  %v3997_v30 = vsel %vm987_vm1, %v12980_v56, 0.0 }
 0x4d9   :  { %v12901_v6 = vpop.f32.mrb[120].mxu0  ;;  %v3852_v27 = vpop.xlane.xlu1 %3851 }
 0x4da   :  { %v12906_v62 = vpop.f32.mrb[121].mxu0  ;;  %v4232_v63 = vsel %vm987_vm1, %v4154_v19, 0.0 }
 0x4db   :  { %3980 = vadd.xlane.f32.xlu0 %v3979_v18  ;;  %v3855_v18 = vpop.xlane.xlu0 %3854  ;;  %4233 = vadd.xlane.f32.xlu1 %v4232_v63  ;;  %v3982_v63 = vsel %vm987_vm1, %v12939_v12, 0.0 }
 0x4dc   :  { %v4028_v55 = vmul.f32 0.125, %v3855_v18 }
 0x4dd   :  { %v12916_v0 = vpop.f32.mrb[122].mxu0 }
 0x4de   :  { %v12924_v11 = vpop.f32.mrb[123].mxu0  ;;  %v12944_v46 = vsub.f32 %v12651_v43, %v4028_v55  ;;  %v5371_v43 = vld [vmem:[%s14926_s2 + $0x28] sm:$0xff] }
 0x4df   :  { %3977 = vadd.xlane.f32.xlu0 %v3976_v20  ;;  %v4027_v20 = vmul.f32 0.125, %v3852_v27  ;;  %4230 = vadd.xlane.f32.xlu1 %v4229_v54 }
 0x4e0   :  { %v4156_v18 = vmul.f32 %v12944_v46, %v12944_v46  ;;  %v3861_v27 = vpop.xlane.xlu0 %3860  ;;  %9052 = vmatprep.subr.mxu1 %v5371_v43 }
 0x4e1   :  { %v12931_v45 = vpop.f32.mrb[124].mxu0  ;;  %v12947_v19 = vsub.f32 %v12654_v24, %v4027_v20  ;;  %v3858_v24 = vpop.xlane.xlu1 %3857  ;;  %v4030_v55 = vmul.f32 0.125, %v3861_v27  ;;  %9053 = vmatpush3.msra.mxu1 %v5371_v43  ;;  %v3991_v20 = vsel %vm987_vm1, %v12953_v17, 0.0 }
 0x4e2   :  { %v12936_v52 = vpop.f32.mrb[125].mxu0  ;;  %v4238_v5 = vsel %vm987_vm1, %v4156_v18, 0.0 }
 0x4e3   :  { %3986 = vadd.xlane.f32.xlu0 %v3985_v29  ;;  %15577 = vst [vmem:[#allocation27_spill] sm:$0xff] %v12947_v19  ;;  %v4155_v54 = vmul.f32 %v12947_v19, %v12947_v19  ;;  %v4029_v29 = vmul.f32 0.125, %v3858_v24  ;;  %4239 = vadd.xlane.f32.xlu1 %v4238_v5 }
 0x4e5   :  { %v12973_v18 = vsub.f32 %v12664_v38, %v4029_v29  ;;  %v3867_v27 = vpop.xlane.xlu0 %3866  ;;  %v4235_v19 = vsel %vm987_vm1, %v4155_v54, 0.0 }
 0x4e6   :  { %v3864_v24 = vpop.xlane.xlu1 %3863  ;;  %v4032_v5 = vmul.f32 0.125, %v3867_v27 }
 0x4e7   :  { %3983 = vadd.xlane.f32.xlu0 %v3982_v63  ;;  %v12970_v63 = vsub.f32 %v12661_v34, %v4030_v55  ;;  %4236 = vadd.xlane.f32.xlu1 %v4235_v19  ;;  %v3988_v34 = vsel %vm987_vm1, %v12965_v59, 0.0  ;;  %v4031_v55 = vmul.f32 0.125, %v3864_v24  ;;  %v4157_v29 = vmul.f32 %v12973_v18, %v12973_v18 }
 0x4e8   :  { %v12985_v38 = vsub.f32 %v12671_v42, %v4032_v5  ;;  %v12992_v19 = vadd.f32 %v12608_v1, %v12889_v14  ;;  %v13004_v14 = vadd.f32 %v12901_v6, %v12608_v1 }
 0x4e9   :  { %v4158_v43 = vmul.f32 %v12970_v63, %v12970_v63  ;;  %v12997_v27 = vsub.f32 %v12674_v8, %v4031_v55 }
 0x4ea   :  { %v4160_v5 = vmul.f32 %v12985_v38, %v12985_v38  ;;  %v4003_v6 = vsel %vm987_vm1, %v13004_v14, 0.0 }
 0x4eb   :  { %3992 = vadd.xlane.f32.xlu0 %v3991_v20  ;;  %v4244_v54 = vsel %vm987_vm1, %v4158_v43, 0.0  ;;  %15578 = vst [vmem:[#allocation29_spill] sm:$0xff] %v12997_v27  ;;  %v4241_v43 = vsel %vm987_vm1, %v4157_v29, 0.0  ;;  %v4159_v29 = vmul.f32 %v12997_v27, %v12997_v27 }
 0x4ec   :  { %4245 = vadd.xlane.f32.xlu1 %v4244_v54  ;;  %v3873_v20 = vpop.xlane.xlu0 %3872  ;;  %v4250_v55 = vsel %vm987_vm1, %v4160_v5, 0.0 }
 0x4ed   :  { %v3870_v42 = vpop.xlane.xlu1 %3869  ;;  %v4034_v24 = vmul.f32 0.125, %v3873_v20  ;;  %v13016_v20 = vadd.f32 %v12608_v1, %v12906_v62 }
 0x4ee   :  { %v4033_v54 = vmul.f32 0.125, %v3870_v42 }
 0x4ef   :  { %3989 = vadd.xlane.f32.xlu0 %v3988_v34  ;;  %v3994_v34 = vsel %vm987_vm1, %v12992_v19, 0.0  ;;  %v13009_v8 = vsub.f32 %v12681_v41, %v4034_v24  ;;  %v4247_v24 = vsel %vm987_vm1, %v4159_v29, 0.0  ;;  %v4000_v62 = vsel %vm987_vm1, %v13016_v20, 0.0 }
 0x4f0   :  { %4242 = vadd.xlane.f32.xlu1 %v4241_v43  ;;  %v13021_v42 = vsub.f32 %v12684_v48, %v4033_v54 }
 0x4f1   :  { %v4162_v5 = vmul.f32 %v13009_v8, %v13009_v8 }
 0x4f2   :  { %v4161_v29 = vmul.f32 %v13021_v42, %v13021_v42 }
 0x4f3   :  { %3998 = vadd.xlane.f32.xlu0 %v3997_v30  ;;  %v3879_v30 = vpop.xlane.xlu0 %3878  ;;  %v3876_v43 = vpop.xlane.xlu1 %3875  ;;  %v4256_v54 = vsel %vm987_vm1, %v4162_v5, 0.0 }
 0x4f4   :  { %4251 = vadd.xlane.f32.xlu1 %v4250_v55  ;;  %v4036_v41 = vmul.f32 0.125, %v3879_v30 }
 0x4f6   :  { %v13033_v48 = vsub.f32 %v12691_v10, %v4036_v41  ;;  %v4253_v10 = vsel %vm987_vm1, %v4161_v29, 0.0  ;;  %v13064_v29 = vadd.f32 %v12608_v1, %v12936_v52 }
 0x4f7   :  { %3995 = vadd.xlane.f32.xlu0 %v3994_v34  ;;  %v13028_v34 = vadd.f32 %v12916_v0, %v12608_v1  ;;  %v13040_v0 = vadd.f32 %v12608_v1, %v12924_v11 }
 0x4f8   :  { %4248 = vadd.xlane.f32.xlu1 %v4247_v24  ;;  %v4164_v41 = vmul.f32 %v13033_v48, %v13033_v48 }
 0x4f9   :  { %v3885_v55 = vpop.xlane.xlu0 %3884  ;;  %v4009_v30 = vsel %vm987_vm1, %v13028_v34, 0.0  ;;  %v4006_v11 = vsel %vm987_vm1, %v13040_v0, 0.0 }
 0x4fa   :  { %v3882_v27 = vpop.xlane.xlu1 %3881  ;;  %v4038_v24 = vmul.f32 0.125, %v3885_v55  ;;  %v4262_v55 = vsel %vm987_vm1, %v4164_v41, 0.0 }
 0x4fb   :  { %4004 = vadd.xlane.f32.xlu0 %v4003_v6  ;;  %v4035_v6 = vmul.f32 0.125, %v3876_v43 }
 0x4fc   :  { %4257 = vadd.xlane.f32.xlu1 %v4256_v54 }
 0x4fd   :  { %v13045_v43 = vsub.f32 %v12694_v51, %v4035_v6  ;;  %v13057_v51 = vsub.f32 %v12701_v58, %v4038_v24 }
 0x4ff   :  { %4001 = vadd.xlane.f32.xlu0 %v4000_v62  ;;  %15579 = vst [vmem:[#allocation31_spill] sm:$0xff] %v13045_v43  ;;  %v13052_v62 = vadd.f32 %v12931_v45, %v12608_v1  ;;  %v4163_v6 = vmul.f32 %v13045_v43, %v13045_v43  ;;  %v4166_v41 = vmul.f32 %v13057_v51, %v13057_v51  ;;  %v4012_v1 = vsel %vm987_vm1, %v13064_v29, 0.0 }
 0x500   :  { %v3891_v5 = vpop.xlane.xlu0 %3890  ;;  %4254 = vadd.xlane.f32.xlu1 %v4253_v10 }
 0x501   :  { %v3888_v54 = vpop.xlane.xlu1 %3887  ;;  %v4015_v45 = vsel %vm987_vm1, %v13052_v62, 0.0  ;;  %v4040_v58 = vmul.f32 0.125, %v3891_v5  ;;  %v4259_v24 = vsel %vm987_vm1, %v4163_v6, 0.0  ;;  %v4268_v43 = vsel %vm987_vm1, %v4166_v41, 0.0 }
 0x502   :  { %v4039_v52 = vmul.f32 0.125, %v3888_v54 }
 0x503   :  { %4010 = vadd.xlane.f32.xlu0 %v4009_v30  ;;  %v4037_v30 = vmul.f32 0.125, %v3882_v27 }
 0x504   :  { %4263 = vadd.xlane.f32.xlu1 %v4262_v55  ;;  %v13077_v55 = vsub.f32 %v12711_v32, %v4040_v58 }
 0x505   :  { %v13069_v27 = vsub.f32 %v12704_v39, %v4037_v30 }
 0x506   :  { %v3897_v10 = vpop.xlane.xlu0 %3896  ;;  %v4168_v32 = vmul.f32 %v13077_v55, %v13077_v55 }
 0x507   :  { %4007 = vadd.xlane.f32.xlu0 %v4006_v11  ;;  %v3894_v11 = vpop.xlane.xlu1 %3893  ;;  %15580 = vst [vmem:[#allocation32_spill] sm:$0xff] %v13069_v27  ;;  %v4165_v39 = vmul.f32 %v13069_v27, %v13069_v27 }
 0x508   :  { %4260 = vadd.xlane.f32.xlu1 %v4259_v24  ;;  %v13086_v24 = vsub.f32 %v12714_v13, %v4039_v52  ;;  %v4274_v13 = vsel %vm987_vm1, %v4168_v32, 0.0 }
 0x509   :  { %v4265_v54 = vsel %vm987_vm1, %v4165_v39, 0.0 }
 0x50b   :  { %4016 = vadd.xlane.f32.xlu0 %v4015_v45 }
 0x50c   :  { %4269 = vadd.xlane.f32.xlu1 %v4268_v43 }
 0x50d   :  { %v3903_v45 = vpop.xlane.xlu0 %3902 }
 0x50e   :  { %v3900_v5 = vpop.xlane.xlu1 %3899  ;;  %v4044_v30 = vmul.f32 0.125, %v3903_v45 }
 0x50f   :  { %4013 = vadd.xlane.f32.xlu0 %v4012_v1  ;;  %v4042_v1 = vmul.f32 0.125, %v3897_v10  ;;  %v4167_v10 = vmul.f32 %v13086_v24, %v13086_v24 }
 0x510   :  { %v13083_v6 = vsub.f32 %v12731_v25, %v4044_v30  ;;  %4266 = vadd.xlane.f32.xlu1 %v4265_v54  ;;  %v4041_v25 = vmul.f32 0.125, %v3894_v11  ;;  %v4043_v11 = vmul.f32 0.125, %v3900_v5 }
 0x511   :  { %v13095_v30 = vsub.f32 %v12721_v15, %v4042_v1  ;;  %v4271_v15 = vsel %vm987_vm1, %v4167_v10, 0.0 }
 0x512   :  { %v4172_v58 = vmul.f32 %v13083_v6, %v13083_v6  ;;  %v13106_v54 = vsub.f32 %v12724_v60, %v4041_v25 }
 0x513   :  { %v3909_v41 = vpop.xlane.xlu0 %3908  ;;  %v4170_v1 = vmul.f32 %v13095_v30, %v13095_v30 }
 0x514   :  { %v3906_v27 = vpop.xlane.xlu1 %3905  ;;  %v4046_v45 = vmul.f32 0.125, %v3909_v41  ;;  %v4286_v43 = vsel %vm987_vm1, %v4172_v58, 0.0  ;;  %4275 = vadd.xlane.f32.xlu1 %v4274_v13  ;;  %v4169_v25 = vmul.f32 %v13106_v54, %v13106_v54 }
 0x515   :  { %4287 = vadd.xlane.f32.xlu0 %v4286_v43  ;;  %v4045_v60 = vmul.f32 0.125, %v3906_v27  ;;  %v4280_v5 = vsel %vm987_vm1, %v4170_v1, 0.0 }
 0x516   :  { %v13101_v52 = vsub.f32 %v12741_v61, %v4046_v45  ;;  %v13116_v45 = vsub.f32 %v12734_v2, %v4043_v11  ;;  %v4277_v27 = vsel %vm987_vm1, %v4169_v25, 0.0 }
 0x518   :  { %v4174_v39 = vmul.f32 %v13101_v52, %v13101_v52  ;;  %4272 = vadd.xlane.f32.xlu1 %v4271_v15  ;;  %v4171_v11 = vmul.f32 %v13116_v45, %v13116_v45 }
 0x519   :  { %v3915_v58 = vpop.xlane.xlu0 %3914 }
 0x51a   :  { %v3912_v32 = vpop.xlane.xlu1 %3911  ;;  %v4048_v41 = vmul.f32 0.125, %v3915_v58  ;;  %v4292_v43 = vsel %vm987_vm1, %v4174_v39, 0.0 }
 0x51b   :  { %4293 = vadd.xlane.f32.xlu0 %v4292_v43  ;;  %v4047_v2 = vmul.f32 0.125, %v3912_v32  ;;  %v4283_v32 = vsel %vm987_vm1, %v4171_v11, 0.0 }
 0x51c   :  { %v13113_v61 = vsub.f32 %v12751_v33, %v4048_v41  ;;  %4281 = vadd.xlane.f32.xlu1 %v4280_v5  ;;  %v13125_v33 = vsub.f32 %v12744_v40, %v4045_v60 }
 0x51d   :  { %v13136_v43 = vsub.f32 %v12754_v9, %v4047_v2 }
 0x51e   :  { %v4176_v13 = vmul.f32 %v13113_v61, %v13113_v61  ;;  %v4173_v60 = vmul.f32 %v13125_v33, %v13125_v33 }
 0x520   :  { %v3921_v10 = vpop.xlane.xlu0 %3920  ;;  %v4298_v15 = vsel %vm987_vm1, %v4176_v13, 0.0  ;;  %4278 = vadd.xlane.f32.xlu1 %v4277_v27 }
 0x521   :  { %v3918_v39 = vpop.xlane.xlu1 %3917  ;;  %v4050_v58 = vmul.f32 0.125, %v3921_v10  ;;  %4299 = vadd.xlane.f32.xlu0 %v4298_v15  ;;  %v4175_v15 = vmul.f32 %v13136_v43, %v13136_v43 }
 0x522   :  { %v4049_v5 = vmul.f32 0.125, %v3918_v39  ;;  %v4289_v39 = vsel %vm987_vm1, %v4173_v60, 0.0 }
 0x523   :  { %v13131_v1 = vsub.f32 %v12761_v23, %v4050_v58 }
 0x524   :  { %4284 = vadd.xlane.f32.xlu1 %v4283_v32  ;;  %v13146_v58 = vsub.f32 %v12764_v37, %v4049_v5  ;;  %v4295_v5 = vsel %vm987_vm1, %v4175_v15, 0.0 }
 0x525   :  { %v4178_v41 = vmul.f32 %v13131_v1, %v13131_v1 }
 0x526   :  { %v3927_v40 = vpop.xlane.xlu0 %3926  ;;  %v4177_v32 = vmul.f32 %v13146_v58, %v13146_v58 }
 0x527   :  { %v3924_v25 = vpop.xlane.xlu1 %3923  ;;  %v4052_v13 = vmul.f32 0.125, %v3927_v40  ;;  %v4304_v10 = vsel %vm987_vm1, %v4178_v41, 0.0 }
 0x528   :  { %4305 = vadd.xlane.f32.xlu0 %v4304_v10  ;;  %v4051_v9 = vmul.f32 0.125, %v3924_v25  ;;  %4290 = vadd.xlane.f32.xlu1 %v4289_v39 }
 0x529   :  { %v13143_v23 = vsub.f32 %v12771_v53, %v4052_v13 }
 0x52a   :  { %v13155_v53 = vsub.f32 %v12774_v22, %v4051_v9  ;;  %v4301_v22 = vsel %vm987_vm1, %v4177_v32, 0.0 }
 0x52b   :  { %v4180_v2 = vmul.f32 %v13143_v23, %v13143_v23 }
 0x52c   :  { %4296 = vadd.xlane.f32.xlu1 %v4295_v5  ;;  %v4179_v9 = vmul.f32 %v13155_v53, %v13155_v53 }
 0x52d   :  { %v3933_v27 = vpop.xlane.xlu0 %3932  ;;  %v4310_v40 = vsel %vm987_vm1, %v4180_v2, 0.0 }
 0x52e   :  { %v3930_v11 = vpop.xlane.xlu1 %3929  ;;  %v4054_v41 = vmul.f32 0.125, %v3933_v27  ;;  %4311 = vadd.xlane.f32.xlu0 %v4310_v40 }
 0x52f   :  { %v4053_v37 = vmul.f32 0.125, %v3930_v11 }
 0x530   :  { %v13161_v60 = vsub.f32 %v12781_v31, %v4054_v41  ;;  %4302 = vadd.xlane.f32.xlu1 %v4301_v22 }
 0x531   :  { %v13166_v13 = vsub.f32 %v12784_v47, %v4053_v37  ;;  %v4307_v47 = vsel %vm987_vm1, %v4179_v9, 0.0 }
 0x532   :  { %v4182_v25 = vmul.f32 %v13161_v60, %v13161_v60 }
 0x533   :  { %v3939_v10 = vpop.xlane.xlu0 %3938  ;;  %v4181_v41 = vmul.f32 %v13166_v13, %v13166_v13 }
 0x534   :  { %v3936_v39 = vpop.xlane.xlu1 %3935  ;;  %v4056_v15 = vmul.f32 0.125, %v3939_v10  ;;  %v4316_v2 = vsel %vm987_vm1, %v4182_v25, 0.0  ;;  %4308 = vadd.xlane.f32.xlu1 %v4307_v47 }
 0x535   :  { %v4055_v31 = vmul.f32 0.125, %v3936_v39  ;;  %4317 = vadd.xlane.f32.xlu0 %v4316_v2 }
 0x536   :  { %v13173_v27 = vsub.f32 %v12791_v36, %v4056_v15  ;;  %v4313_v36 = vsel %vm987_vm1, %v4181_v41, 0.0 }
 0x537   :  { %v13176_v11 = vsub.f32 %v12794_v35, %v4055_v31 }
 0x538   :  { %v4184_v40 = vmul.f32 %v13173_v27, %v13173_v27  ;;  %4314 = vadd.xlane.f32.xlu1 %v4313_v36 }
 0x539   :  { %v4183_v35 = vmul.f32 %v13176_v11, %v13176_v11 }
 0x53a   :  { %v3945_v37 = vpop.xlane.xlu0 %3944  ;;  %v4322_v25 = vsel %vm987_vm1, %v4184_v40, 0.0 }
 0x53b   :  { %v3942_v5 = vpop.xlane.xlu1 %3941  ;;  %v4058_v32 = vmul.f32 0.125, %v3945_v37  ;;  %4323 = vadd.xlane.f32.xlu0 %v4322_v25  ;;  %v4319_v2 = vsel %vm987_vm1, %v4183_v35, 0.0 }
 0x53c   :  { %v4057_v10 = vmul.f32 0.125, %v3942_v5  ;;  %4320 = vadd.xlane.f32.xlu1 %v4319_v2 }
 0x53d   :  { %v13188_v22 = vsub.f32 %v12801_v50, %v4058_v32 }
 0x53e   :  { %v13191_v9 = vsub.f32 %v12804_v57, %v4057_v10 }
 0x53f   :  { %15581 = vst [vmem:[#allocation33_spill] sm:$0xff] %v13188_v22  ;;  %v4186_v39 = vmul.f32 %v13188_v22, %v13188_v22 }
 0x540   :  { %15582 = vst [vmem:[#allocation34_spill] sm:$0xff] %v13191_v9  ;;  %v3951_v15 = vpop.xlane.xlu0 %3950  ;;  %v4185_v31 = vmul.f32 %v13191_v9, %v13191_v9 }
 0x541   :  { %v4060_v47 = vmul.f32 0.125, %v3951_v15  ;;  %v4328_v41 = vsel %vm987_vm1, %v4186_v39, 0.0 }
 0x542   :  { %4329 = vadd.xlane.f32.xlu0 %v4328_v41  ;;  %v4325_v57 = vsel %vm987_vm1, %v4185_v31, 0.0 }
 0x543   :  { %v13200_v50 = vsub.f32 %v12811_v49, %v4060_v47  ;;  %4326 = vadd.xlane.f32.xlu1 %v4325_v57  ;;  %v4216_v31 = vpop.xlane.xlu1 %4215 }
 0x544   :  { %v3948_v40 = vpop.xlane.xlu0 %3947 }
 0x545   :  { %15583 = vst [vmem:[#allocation35_spill] sm:$0xff] %v13200_v50  ;;  %v4059_v37 = vmul.f32 0.125, %v3948_v40  ;;  %v4188_v5 = vmul.f32 %v13200_v50, %v13200_v50  ;;  %v4404_v40 = vmul.f32 0.125, %v4216_v31 }
 0x547   :  { %v13206_v32 = vsub.f32 %v12814_v21, %v4059_v37  ;;  %v4334_v25 = vsel %vm987_vm1, %v4188_v5, 0.0  ;;  %v4468_v5 = vadd.f32 1e-06, %v4404_v40 }
 0x548   :  { %4335 = vadd.xlane.f32.xlu0 %v4334_v25  ;;  %v3957_v10 = vpop.xlane.xlu0 %3956  ;;  %v4213_v25 = vpop.xlane.xlu1 %4212 }
 0x549   :  { %15584 = vst [vmem:[#allocation36_spill] sm:$0xff] %v13206_v32  ;;  %v4062_v36 = vmul.f32 0.125, %v3957_v10  ;;  %v4187_v49 = vmul.f32 %v13206_v32, %v13206_v32  ;;  %9764 = vrsqrt.f32 %v4468_v5 }
 0x54b   :  { %v13212_v35 = vsub.f32 %v12819_v7, %v4062_v36  ;;  %v4331_v39 = vsel %vm987_vm1, %v4187_v49, 0.0  ;;  %v4403_v49 = vmul.f32 0.125, %v4213_v25 }
 0x54c   :  { %v3954_v15 = vpop.xlane.xlu0 %3953  ;;  %4332 = vadd.xlane.f32.xlu1 %v4331_v39 }
 0x54d   :  { %15585 = vst [vmem:[#allocation37_spill] sm:$0xff] %v13212_v35  ;;  %v4061_v2 = vmul.f32 0.125, %v3954_v15  ;;  %v4190_v21 = vmul.f32 %v13212_v35, %v13212_v35  ;;  %v15598_v35 = vld [vmem:[#allocation11_spill] sm:$0xff] }
 0x54f   :  { %v13218_v47 = vsub.f32 %v12824_v44, %v4061_v2  ;;  %v4340_v41 = vsel %vm987_vm1, %v4190_v21, 0.0  ;;  %v4467_v2 = vadd.f32 1e-06, %v4403_v49  ;;  %v4222_v21 = vpop.xlane.xlu1 %4221 }
 0x550   :  { %4341 = vadd.xlane.f32.xlu0 %v4340_v41  ;;  %v3963_v57 = vpop.xlane.xlu0 %3962 }
 0x551   :  { %15586 = vst [vmem:[#allocation38_spill] sm:$0xff] %v13218_v47  ;;  %v4064_v37 = vmul.f32 0.125, %v3963_v57  ;;  %v4189_v7 = vmul.f32 %v13218_v47, %v13218_v47  ;;  %9766 = vrsqrt.f32 %v4467_v2  ;;  %v13244_v2 = vld [vmem:[%s14927_s3 + $0x4] ss:$0 sm:$0xff] }
 0x553   :  { %v13224_v10 = vsub.f32 %v12835_v4, %v4064_v37  ;;  %v4337_v36 = vsel %vm987_vm1, %v4189_v7, 0.0  ;;  %v4406_v4 = vmul.f32 0.125, %v4222_v21  ;;  %v4219_v5 = vpop.xlane.xlu1 %4218 }
 0x554   :  { %v3960_v44 = vpop.xlane.xlu0 %3959  ;;  %4338 = vadd.xlane.f32.xlu1 %v4337_v36 }
 0x555   :  { %15587 = vst [vmem:[#allocation69_spill] sm:$0xff] %v13224_v10  ;;  %v4063_v39 = vmul.f32 0.125, %v3960_v44  ;;  %v4192_v15 = vmul.f32 %v13224_v10, %v13224_v10  ;;  %v4470_v7 = vadd.f32 1e-06, %v4406_v4  ;;  %v9765_v44 = vpop.eup %9764 }
 0x557   :  { %v13230_v31 = vsub.f32 %v12848_v3, %v4063_v39  ;;  %v4346_v41 = vsel %vm987_vm1, %v4192_v15, 0.0  ;;  %9768 = vrsqrt.f32 %v4470_v7  ;;  %v4405_v3 = vmul.f32 0.125, %v4219_v5 }
 0x558   :  { %4347 = vadd.xlane.f32.xlu0 %v4346_v41  ;;  %v3969_v40 = vpop.xlane.xlu0 %3968  ;;  %v15590_v41 = vld [vmem:[#allocation12_spill] sm:$0xff] }
 0x559   :  { %15588 = vst [vmem:[#allocation70_spill] sm:$0xff] %v13230_v31  ;;  %v4066_v57 = vmul.f32 0.125, %v3969_v40  ;;  %v4191_v37 = vmul.f32 %v13230_v31, %v13230_v31  ;;  %v4469_v21 = vadd.f32 1e-06, %v4405_v3 }
 0x55b   :  { %v13236_v25 = vsub.f32 %v12859_v26, %v4066_v57  ;;  %v4343_v36 = vsel %vm987_vm1, %v4191_v37, 0.0  ;;  %v4596_v26 = vmul.f32 %v9765_v44, %v12829_v16  ;;  %v13254_v57 = vld [vmem:[%s14927_s3 + $0x5] ss:$0 sm:$0xff]  ;;  %9770 = vrsqrt.f32 %v4469_v21  ;;  %v9767_v5 = vpop.eup %9766 }
 0x55c   :  { %v3966_v49 = vpop.xlane.xlu0 %3965  ;;  %4344 = vadd.xlane.f32.xlu1 %v4343_v36 }
 0x55d   :  { %15589 = vst [vmem:[#allocation71_spill] sm:$0xff] %v13236_v25  ;;  %v4065_v39 = vmul.f32 0.125, %v3966_v49  ;;  %v4194_v15 = vmul.f32 %v13236_v25, %v13236_v25  ;;  %v4664_v7 = vmul.f32 %v13244_v2, %v4596_v26  ;;  %v15592_v49 = vld [vmem:[#allocation7_spill] sm:$0xff] }
 0x55e   :  { %v4595_v44 = vmul.f32 %v9767_v5, %v15592_v49  ;;  %v15595_v5 = vld [vmem:[#allocation9_spill] sm:$0xff] }
 0x55f   :  { %v13248_v4 = vsub.f32 %v15590_v41, %v4065_v39  ;;  %v4352_v40 = vsel %vm987_vm1, %v4194_v15, 0.0  ;;  %v13260_v3 = vadd.f32 %v13254_v57, %v4664_v7  ;;  %v15593_v39 = vld [vmem:[#allocation14_spill] sm:$0xff] }
 0x560   :  { %4353 = vadd.xlane.f32.xlu0 %v4352_v40  ;;  %v3975_v37 = vpop.xlane.xlu0 %3974  ;;  %v4663_v40 = vmul.f32 %v13244_v2, %v4595_v44 }
 0x561   :  { %15591 = vst [vmem:[#allocation10_spill] sm:$0xff] %v13248_v4  ;;  %v4068_v36 = vmul.f32 0.125, %v3975_v37  ;;  %v4193_v16 = vmul.f32 %v13248_v4, %v13248_v4  ;;  %v4796_v26 = vmul.f32 %v13260_v3, %v13260_v3  ;;  %v9769_v37 = vpop.eup %9768 }
 0x562   :  { %v4598_v49 = vmul.f32 %v9769_v37, %v15595_v5 }
 0x563   :  { %v13264_v15 = vsub.f32 %v15593_v39, %v4068_v36  ;;  %v4349_v41 = vsel %vm987_vm1, %v4193_v16, 0.0  ;;  %v4860_v4 = vmul.f32 %v4796_v26, %v13260_v3  ;;  %v4228_v36 = vpop.xlane.xlu1 %4227  ;;  %v13275_v39 = vadd.f32 %v13254_v57, %v4663_v40  ;;  %v15596_v16 = vld [vmem:[#allocation15_spill] sm:$0xff] }
 0x564   :  { %v3972_v21 = vpop.xlane.xlu0 %3971  ;;  %4350 = vadd.xlane.f32.xlu1 %v4349_v41  ;;  %v4408_v10 = vmul.f32 0.125, %v4228_v36 }
 0x565   :  { %15594 = vst [vmem:[#allocation72_spill] sm:$0xff] %v13264_v15  ;;  %v4067_v25 = vmul.f32 0.125, %v3972_v21  ;;  %v4196_v7 = vmul.f32 %v13264_v15, %v13264_v15  ;;  %v4666_v21 = vmul.f32 %v13244_v2, %v4598_v49  ;;  %v4795_v15 = vmul.f32 %v13275_v39, %v13275_v39  ;;  %v9771_v47 = vpop.eup %9770  ;;  %v15599_v49 = vld [vmem:[#allocation21_spill] sm:$0xff] }
 0x566   :  { %v4924_v26 = vmul.f32 0.044715, %v4860_v4  ;;  %v4472_v5 = vadd.f32 1e-06, %v4408_v10 }
 0x567   :  { %v13278_v41 = vsub.f32 %v15596_v16, %v4067_v25  ;;  %v4358_v31 = vsel %vm987_vm1, %v4196_v7, 0.0  ;;  %v4597_v25 = vmul.f32 %v9771_v47, %v15598_v35  ;;  %v4225_v16 = vpop.xlane.xlu1 %4224  ;;  %v4859_v7 = vmul.f32 %v4795_v15, %v13275_v39 }
 0x568   :  { %4359 = vadd.xlane.f32.xlu0 %v4358_v31  ;;  %v3981_v44 = vpop.xlane.xlu0 %3980  ;;  %v4988_v31 = vadd.f32 %v4924_v26, %v13260_v3  ;;  %v13290_v36 = vadd.f32 %v13254_v57, %v4666_v21  ;;  %9772 = vrsqrt.f32 %v4472_v5 }
 0x569   :  { %15597 = vst [vmem:[#allocation13_spill] sm:$0xff] %v13278_v41  ;;  %v4070_v37 = vmul.f32 0.125, %v3981_v44  ;;  %v4195_v40 = vmul.f32 %v13278_v41, %v13278_v41  ;;  %v4407_v44 = vmul.f32 0.125, %v4225_v16  ;;  %v4665_v10 = vmul.f32 %v13244_v2, %v4597_v25  ;;  %v15601_v25 = vld [vmem:[#allocation22_spill] sm:$0xff] }
 0x56a   :  { %v4923_v35 = vmul.f32 0.044715, %v4859_v7  ;;  %v5052_v47 = vmul.f32 0.7978846, %v4988_v31  ;;  %v4798_v15 = vmul.f32 %v13290_v36, %v13290_v36 }
 0x56b   :  { %v13293_v32 = vsub.f32 %v15599_v49, %v4070_v37  ;;  %v4355_v4 = vsel %vm987_vm1, %v4195_v40, 0.0  ;;  %v4471_v41 = vadd.f32 1e-06, %v4407_v44  ;;  %v4234_v37 = vpop.xlane.xlu1 %4233  ;;  %v13303_v40 = vadd.f32 %v13254_v57, %v4665_v10 }
 0x56c   :  { %v3978_v50 = vpop.xlane.xlu0 %3977  ;;  %4356 = vadd.xlane.f32.xlu1 %v4355_v4  ;;  %v4987_v49 = vadd.f32 %v4923_v35, %v13275_v39  ;;  %9774 = vtanh.f32 %v5052_v47  ;;  %v4862_v5 = vmul.f32 %v4798_v15, %v13290_v36 }
 0x56d   :  { %15600 = vst [vmem:[#allocation73_spill] sm:$0xff] %v13293_v32  ;;  %v4069_v26 = vmul.f32 0.125, %v3978_v50  ;;  %v4198_v21 = vmul.f32 %v13293_v32, %v13293_v32  ;;  %9776 = vrsqrt.f32 %v4471_v41  ;;  %v4410_v50 = vmul.f32 0.125, %v4234_v37 }
 0x56e   :  { %v5051_v4 = vmul.f32 0.7978846, %v4987_v49  ;;  %v4797_v44 = vmul.f32 %v13303_v40, %v13303_v40  ;;  %v4926_v35 = vmul.f32 0.044715, %v4862_v5 }
 0x56f   :  { %v13307_v16 = vsub.f32 %v15601_v25, %v4069_v26  ;;  %v4364_v7 = vsel %vm987_vm1, %v4198_v21, 0.0  ;;  %v4474_v32 = vadd.f32 1e-06, %v4410_v50  ;;  %v4231_v15 = vpop.xlane.xlu1 %4230 }
 0x570   :  { %4365 = vadd.xlane.f32.xlu0 %v4364_v7  ;;  %v3987_v31 = vpop.xlane.xlu0 %3986  ;;  %9778 = vtanh.f32 %v5051_v4  ;;  %v4861_v26 = vmul.f32 %v4797_v44, %v13303_v40  ;;  %v4990_v21 = vadd.f32 %v4926_v35, %v13290_v36  ;;  %v4409_v49 = vmul.f32 0.125, %v4231_v15  ;;  %v15604_v44 = vld [vmem:[#allocation17_spill] sm:$0xff] }
 0x571   :  { %15602 = vst [vmem:[#allocation74_spill] sm:$0xff] %v13307_v16  ;;  %v4072_v47 = vmul.f32 0.125, %v3987_v31  ;;  %v4197_v10 = vmul.f32 %v13307_v16, %v13307_v16  ;;  %9780 = vrsqrt.f32 %v4474_v32 }
 0x572   :  { %v4925_v5 = vmul.f32 0.044715, %v4861_v26  ;;  %v5054_v7 = vmul.f32 0.7978846, %v4990_v21  ;;  %v9773_v31 = vpop.eup %9772  ;;  %v4473_v4 = vadd.f32 1e-06, %v4409_v49 }
 0x573   :  { %v13317_v41 = vsub.f32 %v12927_v28, %v4072_v47  ;;  %v4361_v37 = vsel %vm987_vm1, %v4197_v10, 0.0  ;;  %v4600_v9 = vmul.f32 %v9773_v31, %v15604_v44  ;;  %v4240_v35 = vpop.xlane.xlu1 %4239  ;;  %v15606_v44 = vld [vmem:[#allocation19_spill] sm:$0xff] }
 0x574   :  { %v3984_v25 = vpop.xlane.xlu0 %3983  ;;  %4362 = vadd.xlane.f32.xlu1 %v4361_v37  ;;  %v4989_v28 = vadd.f32 %v4925_v5, %v13303_v40  ;;  %9782 = vtanh.f32 %v5054_v7  ;;  %v4412_v10 = vmul.f32 0.125, %v4240_v35 }
 0x575   :  { %15603 = vst [vmem:[#allocation16_spill] sm:$0xff] %v13317_v41  ;;  %v4071_v16 = vmul.f32 0.125, %v3984_v25  ;;  %v4200_v50 = vmul.f32 %v13317_v41, %v13317_v41  ;;  %9784 = vrsqrt.f32 %v4473_v4  ;;  %v4668_v21 = vmul.f32 %v13244_v2, %v4600_v9 }
 0x576   :  { %v9775_v15 = vpop.eup %9774  ;;  %v5053_v37 = vmul.f32 0.7978846, %v4989_v28  ;;  %v4476_v5 = vadd.f32 1e-06, %v4412_v10 }
 0x577   :  { %v13325_v47 = vsub.f32 %v12939_v12, %v4071_v16  ;;  %v4370_v32 = vsel %vm987_vm1, %v4200_v50, 0.0  ;;  %v9777_v49 = vpop.eup %9776  ;;  %v5180_v7 = vadd.f32 1.0, %v9775_v15  ;;  %v4237_v16 = vpop.xlane.xlu1 %4236  ;;  %v13333_v50 = vadd.f32 %v13254_v57, %v4668_v21 }
 0x578   :  { %4371 = vadd.xlane.f32.xlu0 %v4370_v32  ;;  %v3993_v26 = vpop.xlane.xlu0 %3992  ;;  %v4599_v12 = vmul.f32 %v9777_v49, %v15606_v44  ;;  %9786 = vtanh.f32 %v5053_v37  ;;  %v4411_v35 = vmul.f32 0.125, %v4237_v16  ;;  %v15608_v44 = vld [vmem:[#allocation24_spill] sm:$0xff] }
 0x579   :  { %15605 = vst [vmem:[#allocation75_spill] sm:$0xff] %v13325_v47  ;;  %v4074_v25 = vmul.f32 0.125, %v3993_v26  ;;  %v4199_v31 = vmul.f32 %v13325_v47, %v13325_v47  ;;  %9788 = vrsqrt.f32 %v4476_v5  ;;  %v5244_v15 = vmul.f32 0.5, %v5180_v7 }
 0x57a   :  { %v9779_v28 = vpop.eup %9778  ;;  %v4667_v10 = vmul.f32 %v13244_v2, %v4599_v12  ;;  %v4800_v26 = vmul.f32 %v13333_v50, %v13333_v50 }
 0x57b   :  { %v13336_v4 = vsub.f32 %v12953_v17, %v4074_v25  ;;  %v4367_v9 = vsel %vm987_vm1, %v4199_v31, 0.0  ;;  %v9781_v37 = vpop.eup %9780  ;;  %v4475_v17 = vadd.f32 1e-06, %v4411_v35  ;;  %v5179_v25 = vadd.f32 1.0, %v9779_v28  ;;  %v4246_v5 = vpop.xlane.xlu1 %4245 }
 0x57c   :  { %v3990_v32 = vpop.xlane.xlu0 %3989  ;;  %4368 = vadd.xlane.f32.xlu1 %v4367_v9  ;;  %v4602_v31 = vmul.f32 %v9781_v37, %v15608_v44  ;;  %v5308_v16 = vmul.f32 %v5244_v15, %v13260_v3  ;;  %v13347_v9 = vadd.f32 %v13254_v57, %v4667_v10  ;;  %v4864_v7 = vmul.f32 %v4800_v26, %v13333_v50 }
 0x57d   :  { %15607 = vst [vmem:[#allocation76_spill] sm:$0xff] %v13336_v4  ;;  %v4073_v49 = vmul.f32 0.125, %v3990_v32  ;;  %v4202_v21 = vmul.f32 %v13336_v4, %v13336_v4  ;;  %9790 = vrsqrt.f32 %v4475_v17  ;;  %v4414_v47 = vmul.f32 0.125, %v4246_v5 }
 0x57e   :  { %v9783_v4 = vpop.eup %9782  ;;  %v4670_v28 = vmul.f32 %v13244_v2, %v4602_v31  ;;  %v5243_v37 = vmul.f32 0.5, %v5179_v25  ;;  %v4799_v3 = vmul.f32 %v13347_v9, %v13347_v9  ;;  %v4928_v10 = vmul.f32 0.044715, %v4864_v7 }
 0x57f   :  { %v13351_v12 = vsub.f32 %v12965_v59, %v4073_v49  ;;  %v4376_v32 = vsel %vm987_vm1, %v4202_v21, 0.0  ;;  %v9785_v15 = vpop.eup %9784  ;;  %v4478_v26 = vadd.f32 1e-06, %v4414_v47  ;;  %v5182_v49 = vadd.f32 1.0, %v9783_v4  ;;  %v15610_v21 = vld [vmem:[#allocation25_spill] sm:$0xff]  ;;  %v4243_v5 = vpop.xlane.xlu1 %4242 }
 0x580   :  { %4377 = vadd.xlane.f32.xlu0 %v4376_v32  ;;  %v3999_v35 = vpop.xlane.xlu0 %3998  ;;  %v4601_v17 = vmul.f32 %v9785_v15, %v15610_v21  ;;  %v5307_v32 = vmul.f32 %v5243_v37, %v13275_v39  ;;  %v4863_v41 = vmul.f32 %v4799_v3, %v13347_v9  ;;  %v4992_v25 = vadd.f32 %v4928_v10, %v13333_v50 }
 0x581   :  { %15609 = vst [vmem:[#allocation18_spill] sm:$0xff] %v13351_v12  ;;  %v4076_v44 = vmul.f32 0.125, %v3999_v35  ;;  %v4201_v59 = vmul.f32 %v13351_v12, %v13351_v12  ;;  %9792 = vrsqrt.f32 %v4478_v26  ;;  %v4413_v35 = vmul.f32 0.125, %v4243_v5 }
 0x582   :  { %v9787_v22 = vpop.eup %9786  ;;  %v4669_v47 = vmul.f32 %v13244_v2, %v4601_v17  ;;  %9054 = vmatprep.mubr.msk.f32.mxu1 %vm987_vm1, %v5307_v32  ;;  %v5246_v4 = vmul.f32 0.5, %v5182_v49  ;;  %v4927_v39 = vmul.f32 0.044715, %v4863_v41  ;;  %v5056_v37 = vmul.f32 0.7978846, %v4992_v25 }
 0x583   :  { %v13364_v31 = vsub.f32 %v12980_v56, %v4076_v44  ;;  %v4373_v7 = vsel %vm987_vm1, %v4201_v59, 0.0  ;;  %v9789_v3 = vpop.eup %9788  ;;  %v4477_v10 = vadd.f32 1e-06, %v4413_v35  ;;  %9055 = vmatmul.mubr.msk.f32.vlgmr.msra.gmra.mrb[66].mxu1 %vm987_vm1, %v5308_v16  ;;  %v5181_v44 = vadd.f32 1.0, %v9787_v22  ;;  %v4252_v26 = vpop.xlane.xlu1 %4251 }
 0x584   :  { %v3996_v12 = vpop.xlane.xlu0 %3995  ;;  %4374 = vadd.xlane.f32.xlu1 %v4373_v7  ;;  %v4604_v59 = vmul.f32 %v9789_v3, %v12944_v46  ;;  %v5310_v21 = vmul.f32 %v5246_v4, %v13290_v36  ;;  %v4991_v17 = vadd.f32 %v4927_v39, %v13347_v9  ;;  %9794 = vtanh.f32 %v5056_v37  ;;  %v15611_v4 = vld [vmem:[#allocation27_spill] sm:$0xff] }
 0x585   :  { %v4075_v15 = vmul.f32 0.125, %v3996_v12  ;;  %v4204_v56 = vmul.f32 %v13364_v31, %v13364_v31  ;;  %9796 = vrsqrt.f32 %v4477_v10  ;;  %v4416_v49 = vmul.f32 0.125, %v4252_v26 }
 0x586   :  { %v4672_v16 = vmul.f32 %v13244_v2, %v4604_v59  ;;  %v5245_v22 = vmul.f32 0.5, %v5181_v44  ;;  %v5055_v32 = vmul.f32 0.7978846, %v4991_v17  ;;  %v13381_v46 = vadd.f32 %v13254_v57, %v4669_v47 }
 0x587   :  { %v13376_v41 = vsub.f32 %v12992_v19, %v4075_v15  ;;  %v4382_v12 = vsel %vm987_vm1, %v4204_v56, 0.0  ;;  %v9791_v36 = vpop.eup %9790  ;;  %v4480_v19 = vadd.f32 1e-06, %v4416_v49  ;;  %v13386_v35 = vadd.f32 %v13254_v57, %v4670_v28  ;;  %v4249_v37 = vpop.xlane.xlu1 %4248 }
 0x588   :  { %4383 = vadd.xlane.f32.xlu0 %v4382_v12  ;;  %v4005_v5 = vpop.xlane.xlu0 %4004  ;;  %v4603_v39 = vmul.f32 %v9791_v36, %v15611_v4  ;;  %v5309_v3 = vmul.f32 %v5245_v22, %v13303_v40  ;;  %9798 = vtanh.f32 %v5055_v32  ;;  %v4801_v15 = vmul.f32 %v13381_v46, %v13381_v46 }
 0x589   :  { %v4078_v25 = vmul.f32 0.125, %v4005_v5  ;;  %v4203_v7 = vmul.f32 %v13376_v41, %v13376_v41  ;;  %9800 = vrsqrt.f32 %v4480_v19  ;;  %v4415_v10 = vmul.f32 0.125, %v4249_v37 }
 0x58a   :  { %v4671_v28 = vmul.f32 %v13244_v2, %v4603_v39  ;;  %9057 = vmatprep.mubr.msk.f32.mxu1 %vm987_vm1, %v5309_v3  ;;  %v4865_v59 = vmul.f32 %v4801_v15, %v13381_v46  ;;  %v4802_v40 = vmul.f32 %v13386_v35, %v13386_v35  ;;  %v13405_v49 = vadd.f32 %v13254_v57, %v4672_v16 }
 0x58b   :  { %v13393_v47 = vsub.f32 %v13004_v14, %v4078_v25  ;;  %v4379_v56 = vsel %vm987_vm1, %v4203_v7, 0.0  ;;  %v9793_v26 = vpop.eup %9792  ;;  %v4479_v12 = vadd.f32 1e-06, %v4415_v10  ;;  %9058 = vmatmul.mubr.msk.f32.gmra.mrb[68].mxu1 %vm987_vm1, %v5310_v21  ;;  %v10110_v5 = vmov 0.0|0.0   ;;  %v4258_v32 = vpop.xlane.xlu1 %4257 }
 0x58c   :  { %v4002_v44 = vpop.xlane.xlu0 %4001  ;;  %4380 = vadd.xlane.f32.xlu1 %v4379_v56  ;;  %9318 = vmatprep.subr.bf16.mxu0 %v10110_v5  ;;  %v4606_v22 = vmul.f32 %v9793_v26, %v12970_v63  ;;  %v4929_v36 = vmul.f32 0.044715, %v4865_v59  ;;  %v4866_v25 = vmul.f32 %v4802_v40, %v13386_v35  ;;  %v13411_v7 = vadd.f32 %v13254_v57, %v4671_v28 }
 0x58d   :  { %v4077_v17 = vmul.f32 0.125, %v4002_v44  ;;  %v4206_v14 = vmul.f32 %v13393_v47, %v13393_v47  ;;  %9802 = vrsqrt.f32 %v4479_v12  ;;  %v4418_v16 = vmul.f32 0.125, %v4258_v32 }
 0x58e   :  { %v9795_v4 = vpop.eup %9794  ;;  %v13418_v37 = vmul.f32 %v13244_v2, %v4606_v22  ;;  %v4993_v63 = vadd.f32 %v4929_v36, %v13381_v46  ;;  %v4930_v3 = vmul.f32 0.044715, %v4866_v25  ;;  %v4803_v15 = vmul.f32 %v13411_v7, %v13411_v7 }
 0x58f   :  { %v13414_v19 = vsub.f32 %v13016_v20, %v4077_v17  ;;  %v4388_v21 = vsel %vm987_vm1, %v4206_v14, 0.0  ;;  %v9797_v56 = vpop.eup %9796  ;;  %v4482_v44 = vadd.f32 1e-06, %v4418_v16  ;;  %v5184_v28 = vadd.f32 1.0, %v9795_v4  ;;  %v4255_v40 = vpop.xlane.xlu1 %4254 }
 0x590   :  { %4389 = vadd.xlane.f32.xlu0 %v4388_v21  ;;  %v4011_v39 = vpop.xlane.xlu0 %4010  ;;  %v4605_v59 = vmul.f32 %v9797_v56, %v12973_v18  ;;  %v5057_v26 = vmul.f32 0.7978846, %v4993_v63  ;;  %v4994_v17 = vadd.f32 %v4930_v3, %v13386_v35  ;;  %v4867_v14 = vmul.f32 %v4803_v15, %v13411_v7 }
 0x591   :  { %v4080_v10 = vmul.f32 0.125, %v4011_v39  ;;  %v4205_v20 = vmul.f32 %v13414_v19, %v13414_v19  ;;  %9804 = vrsqrt.f32 %v4482_v44  ;;  %v4417_v32 = vmul.f32 0.125, %v4255_v40 }
 0x592   :  { %v9799_v36 = vpop.eup %9798  ;;  %v4673_v21 = vmul.f32 %v13244_v2, %v4605_v59  ;;  %v5248_v16 = vmul.f32 0.5, %v5184_v28  ;;  %9806 = vtanh.f32 %v5057_v26  ;;  %v5058_v18 = vmul.f32 0.7978846, %v4994_v17 }
 0x593   :  { %v13429_v12 = vsub.f32 %v13028_v34, %v4080_v10  ;;  %v4385_v22 = vsel %vm987_vm1, %v4205_v20, 0.0  ;;  %v9801_v4 = vpop.eup %9800  ;;  %v4481_v3 = vadd.f32 1e-06, %v4417_v32  ;;  %v5183_v34 = vadd.f32 1.0, %v9799_v36  ;;  %v4264_v56 = vpop.xlane.xlu1 %4263 }
 0x594   :  { %v4008_v25 = vpop.xlane.xlu0 %4007  ;;  %4386 = vadd.xlane.f32.xlu1 %v4385_v22  ;;  %v4608_v15 = vmul.f32 %v9801_v4, %v12985_v38  ;;  %v5312_v10 = vmul.f32 %v5248_v16, %v13333_v50  ;;  %9808 = vtanh.f32 %v5058_v18  ;;  %v4931_v20 = vmul.f32 0.044715, %v4867_v14 }
 0x595   :  { %v4079_v39 = vmul.f32 0.125, %v4008_v25  ;;  %v4208_v63 = vmul.f32 %v13429_v12, %v13429_v12  ;;  %9810 = vrsqrt.f32 %v4481_v3  ;;  %v4420_v59 = vmul.f32 0.125, %v4264_v56  ;;  %v15612_v25 = vld [vmem:[#allocation29_spill] sm:$0xff] }
 0x596   :  { %v13442_v26 = vmul.f32 %v13244_v2, %v4608_v15  ;;  %v5247_v17 = vmul.f32 0.5, %v5183_v34  ;;  %v4995_v38 = vadd.f32 %v4931_v20, %v13411_v7  ;;  %v4804_v50 = vmul.f32 %v13405_v49, %v13405_v49 }
 0x597   :  { %v13438_v44 = vsub.f32 %v13040_v0, %v4079_v39  ;;  %v4394_v28 = vsel %vm987_vm1, %v4208_v63, 0.0  ;;  %v9803_v22 = vpop.eup %9802  ;;  %v4484_v32 = vadd.f32 1e-06, %v4420_v59  ;;  %v13450_v36 = vadd.f32 %v13254_v57, %v4673_v21  ;;  %v4261_v18 = vpop.xlane.xlu1 %4260 }
 0x598   :  { %4395 = vadd.xlane.f32.xlu0 %v4394_v28  ;;  %v4017_v40 = vpop.xlane.xlu0 %4016  ;;  %v4607_v16 = vmul.f32 %v9803_v22, %v15612_v25  ;;  %v5311_v4 = vmul.f32 %v5247_v17, %v13347_v9  ;;  %v5059_v39 = vmul.f32 0.7978846, %v4995_v38  ;;  %v4868_v63 = vmul.f32 %v4804_v50, %v13405_v49 }
 0x599   :  { %v4082_v14 = vmul.f32 0.125, %v4017_v40  ;;  %v4207_v0 = vmul.f32 %v13438_v44, %v13438_v44  ;;  %9812 = vrsqrt.f32 %v4484_v32  ;;  %v4419_v15 = vmul.f32 0.125, %v4261_v18 }
 0x59a   :  { %v4675_v21 = vmul.f32 %v13244_v2, %v4607_v16  ;;  %9060 = vmatprep.mubr.msk.f32.mxu1 %vm987_vm1, %v5311_v4  ;;  %9814 = vtanh.f32 %v5059_v39  ;;  %v4932_v20 = vmul.f32 0.044715, %v4868_v63  ;;  %v4805_v9 = vmul.f32 %v13450_v36, %v13450_v36 }
 0x59b   :  { %v13456_v3 = vsub.f32 %v13052_v62, %v4082_v14  ;;  %v4391_v34 = vsel %vm987_vm1, %v4207_v0, 0.0  ;;  %v9805_v28 = vpop.eup %9804  ;;  %v4483_v40 = vadd.f32 1e-06, %v4419_v15  ;;  %9061 = vmatmul.mubr.msk.f32.gmra.mrb[70].mxu1 %vm987_vm1, %v5312_v10  ;;  %v13468_v17 = vadd.f32 %v13254_v57, %v13418_v37  ;;  %v4270_v22 = vpop.xlane.xlu1 %4269 }
 0x59c   :  { %4392 = vadd.xlane.f32.xlu1 %v4391_v34  ;;  %v4014_v56 = vpop.xlane.xlu0 %4013  ;;  %v9807_v38 = vpop.eup %9806  ;;  %v4610_v50 = vmul.f32 %v9805_v28, %v13009_v8  ;;  %v4996_v14 = vadd.f32 %v4932_v20, %v13405_v49  ;;  %v4869_v0 = vmul.f32 %v4805_v9, %v13450_v36  ;;  %v13474_v32 = vadd.f32 %v13254_v57, %v4675_v21 }
 0x59d   :  { %v4081_v59 = vmul.f32 0.125, %v4014_v56  ;;  %v4210_v62 = vmul.f32 %v13456_v3, %v13456_v3  ;;  %9816 = vrsqrt.f32 %v4483_v40  ;;  %v4422_v16 = vmul.f32 0.125, %v4270_v22 }
 0x59e   :  { %v9809_v37 = vpop.eup %9808  ;;  %v13481_v18 = vmul.f32 %v13244_v2, %v4610_v50  ;;  %v5185_v8 = vadd.f32 1.0, %v9807_v38  ;;  %v5060_v4 = vmul.f32 0.7978846, %v4996_v14  ;;  %v4933_v39 = vmul.f32 0.044715, %v4869_v0 }
 0x59f   :  { %v13477_v25 = vsub.f32 %v13064_v29, %v4081_v59  ;;  %v4400_v10 = vsel %vm987_vm1, %v4210_v62, 0.0  ;;  %v9811_v63 = vpop.eup %9810  ;;  %v4486_v15 = vadd.f32 1e-06, %v4422_v16  ;;  %v5186_v56 = vadd.f32 1.0, %v9809_v37  ;;  %v4267_v20 = vpop.xlane.xlu1 %4266 }
 0x5a0   :  { %4401 = vadd.xlane.f32.xlu0 %v4400_v10  ;;  %v4806_v29 = vmul.f32 %v13468_v17, %v13468_v17  ;;  %v4609_v21 = vmul.f32 %v9811_v63, %v13021_v42  ;;  %v5249_v9 = vmul.f32 0.5, %v5185_v8  ;;  %9818 = vtanh.f32 %v5060_v4 }
 0x5a1   :  { %v4209_v34 = vmul.f32 %v13477_v25, %v13477_v25  ;;  %v4997_v28 = vadd.f32 %v4933_v39, %v13450_v36  ;;  %9820 = vrsqrt.f32 %v4486_v15  ;;  %v4421_v62 = vmul.f32 0.125, %v4267_v20 }
 0x5a2   :  { %v5250_v40 = vmul.f32 0.5, %v5186_v56  ;;  %v4677_v38 = vmul.f32 %v13244_v2, %v4609_v21  ;;  %v5313_v50 = vmul.f32 %v5249_v9, %v13381_v46  ;;  %v4870_v14 = vmul.f32 %v4806_v29, %v13468_v17  ;;  %v4288_v42 = vpop.xlane.xlu0 %4287 }
 0x5a3   :  { %v4397_v59 = vsel %vm987_vm1, %v4209_v34, 0.0  ;;  %v5061_v22 = vmul.f32 0.7978846, %v4997_v28  ;;  %v9813_v0 = vpop.eup %9812  ;;  %v4485_v10 = vadd.f32 1e-06, %v4421_v62  ;;  %v4807_v37 = vmul.f32 %v13474_v32, %v13474_v32  ;;  %v4276_v46 = vpop.xlane.xlu1 %4275 }
 0x5a4   :  { %4398 = vadd.xlane.f32.xlu1 %v4397_v59  ;;  %v5314_v16 = vmul.f32 %v5250_v40, %v13386_v35  ;;  %v13498_v8 = vadd.f32 %v13254_v57, %v13442_v26  ;;  %v9815_v4 = vpop.eup %9814  ;;  %v4428_v39 = vmul.f32 0.125, %v4288_v42  ;;  %v4612_v63 = vmul.f32 %v9813_v0, %v13033_v48  ;;  %9063 = vmatprep.mubr.msk.f32.mxu1 %vm987_vm1, %v5313_v50  ;;  %v15613_v40 = vld [vmem:[#allocation31_spill] sm:$0xff] }
 0x5a5   :  { %9822 = vtanh.f32 %v5061_v22  ;;  %v4934_v34 = vmul.f32 0.044715, %v4870_v14  ;;  %v4424_v35 = vmul.f32 0.125, %v4276_v46  ;;  %v5187_v15 = vadd.f32 1.0, %v9815_v4 }
 0x5a6   :  { %9824 = vrsqrt.f32 %v4485_v10  ;;  %9064 = vmatmul.mubr.msk.f32.gmra.mrb[72].mxu1 %vm987_vm1, %v5314_v16  ;;  %v4871_v56 = vmul.f32 %v4807_v37, %v13474_v32  ;;  %v4492_v29 = vadd.f32 1e-06, %v4428_v39  ;;  %v13505_v26 = vmul.f32 %v13244_v2, %v4612_v63 }
 0x5a7   :  { %v4998_v21 = vadd.f32 %v4934_v34, %v13468_v17  ;;  %v4808_v48 = vmul.f32 %v13498_v8, %v13498_v8  ;;  %v9817_v20 = vpop.eup %9816  ;;  %v4488_v9 = vadd.f32 1e-06, %v4424_v35  ;;  %v5251_v28 = vmul.f32 0.5, %v5187_v15  ;;  %v4273_v22 = vpop.xlane.xlu1 %4272 }
 0x5a8   :  { %v4935_v59 = vmul.f32 0.044715, %v4871_v56  ;;  %v13511_v62 = vadd.f32 %v13254_v57, %v4677_v38  ;;  %9826 = vrsqrt.f32 %v4492_v29  ;;  %v4611_v50 = vmul.f32 %v9817_v20, %v15613_v40  ;;  %v4294_v42 = vpop.xlane.xlu0 %4293 }
 0x5a9   :  { %v5062_v14 = vmul.f32 0.7978846, %v4998_v21  ;;  %v4872_v0 = vmul.f32 %v4808_v48, %v13498_v8  ;;  %9828 = vrsqrt.f32 %v4488_v9  ;;  %v4423_v10 = vmul.f32 0.125, %v4273_v22 }
 0x5aa   :  { %v5315_v16 = vmul.f32 %v5251_v28, %v13411_v7  ;;  %v4999_v37 = vadd.f32 %v4935_v59, %v13474_v32  ;;  %v9819_v4 = vpop.eup %9818  ;;  %v4430_v39 = vmul.f32 0.125, %v4294_v42  ;;  %v4679_v63 = vmul.f32 %v13244_v2, %v4611_v50 }
 0x5ab   :  { %9830 = vtanh.f32 %v5062_v14  ;;  %v4936_v38 = vmul.f32 0.044715, %v4872_v0  ;;  %v9821_v46 = vpop.eup %9820  ;;  %v4487_v34 = vadd.f32 1e-06, %v4423_v10  ;;  %v5188_v35 = vadd.f32 1.0, %v9819_v4  ;;  %v4282_v21 = vpop.xlane.xlu1 %4281 }
 0x5ac   :  { %9066 = vmatprep.mubr.msk.f32.mxu1 %vm987_vm1, %v5315_v16  ;;  %v5063_v15 = vmul.f32 0.7978846, %v4999_v37  ;;  %v4809_v56 = vmul.f32 %v13511_v62, %v13511_v62  ;;  %v4494_v29 = vadd.f32 1e-06, %v4430_v39  ;;  %v4614_v7 = vmul.f32 %v9821_v46, %v13057_v51  ;;  %v6252_v16 = vld [vmem:[%s14926_s2 + $0x30] sm:$0xff]  ;;  %v6253_v37 = vld [vmem:[%s14926_s2 + $0x38] sm:$0xff] }
 0x5ad   :  { %v5000_v48 = vadd.f32 %v4936_v38, %v13498_v8  ;;  %v13525_v20 = vadd.f32 %v13254_v57, %v13481_v18  ;;  %9832 = vrsqrt.f32 %v4487_v34  ;;  %v5252_v9 = vmul.f32 0.5, %v5188_v35  ;;  %v15614_v39 = vld [vmem:[#allocation32_spill] sm:$0xff] }
 0x5ae   :  { %v4426_v28 = vmul.f32 0.125, %v4282_v21  ;;  %v4873_v59 = vmul.f32 %v4809_v56, %v13511_v62  ;;  %9834 = vrsqrt.f32 %v4494_v29  ;;  %v13529_v50 = vmul.f32 %v13244_v2, %v4614_v7  ;;  %v4300_v0 = vpop.xlane.xlu0 %4299 }
 0x5af   :  { %v9823_v40 = vpop.eup %9822  ;;  %v5064_v22 = vmul.f32 0.7978846, %v5000_v48  ;;  %v4810_v51 = vmul.f32 %v13525_v20, %v13525_v20  ;;  %v5316_v42 = vmul.f32 %v5252_v9, %v13405_v49  ;;  %9836 = vtanh.f32 %v5063_v15  ;;  %v4279_v46 = vpop.xlane.xlu1 %4278 }
 0x5b0   :  { %v9825_v14 = vpop.eup %9824  ;;  %v4490_v18 = vadd.f32 1e-06, %v4426_v28  ;;  %v5189_v10 = vadd.f32 1.0, %v9823_v40  ;;  %v4432_v4 = vmul.f32 0.125, %v4300_v0  ;;  %v4937_v34 = vmul.f32 0.044715, %v4873_v59 }
 0x5b1   :  { %v4613_v38 = vmul.f32 %v9825_v14, %v15614_v39  ;;  %9838 = vtanh.f32 %v5064_v22  ;;  %9067 = vmatmul.mubr.msk.f32.gmra.mrb[74].mxu1 %vm987_vm1, %v5316_v42  ;;  %v4425_v49 = vmul.f32 0.125, %v4279_v46  ;;  %v4874_v15 = vmul.f32 %v4810_v51, %v13525_v20 }
 0x5b2   :  { %9840 = vrsqrt.f32 %v4490_v18  ;;  %v5253_v35 = vmul.f32 0.5, %v5189_v10  ;;  %v9827_v56 = vpop.eup %9826  ;;  %v4496_v29 = vadd.f32 1e-06, %v4432_v4  ;;  %v5001_v21 = vadd.f32 %v4937_v34, %v13511_v62 }
 0x5b3   :  { %v4681_v7 = vmul.f32 %v13244_v2, %v4613_v38  ;;  %v9319_v48 = vpack.c.bf16 %v6253_v37, %v6252_v16  ;;  %v9829_v9 = vpop.eup %9828  ;;  %v4620_v28 = vmul.f32 %v9827_v56, %v13083_v6  ;;  %v4489_v40 = vadd.f32 1e-06, %v4425_v49  ;;  %v4285_v42 = vpop.xlane.xlu1 %4284 }
 0x5b4   :  { %v5317_v59 = vmul.f32 %v5253_v35, %v13450_v36  ;;  %v4938_v22 = vmul.f32 0.044715, %v4874_v15  ;;  %9842 = vrsqrt.f32 %v4496_v29  ;;  %v4616_v0 = vmul.f32 %v9829_v9, %v13077_v55 }
 0x5b5   :  { %v9831_v14 = vpop.eup %9830  ;;  %v5065_v51 = vmul.f32 0.7978846, %v5001_v21  ;;  %9320 = vmatpush3.bf16.msra.mxu0 %v9319_v48  ;;  %v13549_v18 = vadd.f32 %v13254_v57, %v4679_v63  ;;  %v13552_v10 = vmul.f32 %v13244_v2, %v4620_v28  ;;  %v4306_v16 = vpop.xlane.xlu0 %4305  ;;  %9844 = vrsqrt.f32 %v4489_v40 }
 0x5b6   :  { %9069 = vmatprep.mubr.msk.f32.mxu1 %vm987_vm1, %v5317_v59  ;;  %v5190_v6 = vadd.f32 1.0, %v9831_v14  ;;  %v4427_v36 = vmul.f32 0.125, %v4285_v42  ;;  %v4434_v37 = vmul.f32 0.125, %v4306_v16  ;;  %v13556_v4 = vmul.f32 %v13244_v2, %v4616_v0 }
 0x5b7   :  { %9846 = vtanh.f32 %v5065_v51  ;;  %v5002_v55 = vadd.f32 %v4938_v22, %v13525_v20  ;;  %v9833_v39 = vpop.eup %9832  ;;  %v4811_v46 = vmul.f32 %v13549_v18, %v13549_v18  ;;  %v13563_v34 = vadd.f32 %v13254_v57, %v13505_v26  ;;  %v4291_v56 = vpop.xlane.xlu1 %4290 }
 0x5b8   :  { %v5254_v38 = vmul.f32 0.5, %v5190_v6  ;;  %v4491_v63 = vadd.f32 1e-06, %v4427_v36  ;;  %v9835_v49 = vpop.eup %9834  ;;  %v4498_v35 = vadd.f32 1e-06, %v4434_v37  ;;  %v4615_v15 = vmul.f32 %v9833_v39, %v13086_v24 }
 0x5b9   :  { %v5066_v29 = vmul.f32 0.7978846, %v5002_v55  ;;  %v13567_v21 = vadd.f32 %v13254_v57, %v4681_v7  ;;  %v9837_v48 = vpop.eup %9836  ;;  %v4622_v9 = vmul.f32 %v9835_v49, %v13101_v52  ;;  %v4429_v40 = vmul.f32 0.125, %v4291_v56 }
 0x5ba   :  { %v5318_v28 = vmul.f32 %v5254_v38, %v13468_v17  ;;  %9848 = vrsqrt.f32 %v4491_v63  ;;  %v4683_v26 = vmul.f32 %v13244_v2, %v4615_v15  ;;  %v5191_v22 = vadd.f32 1.0, %v9837_v48 }
 0x5bb   :  { %v9839_v59 = vpop.eup %9838  ;;  %9850 = vrsqrt.f32 %v4498_v35  ;;  %v4875_v14 = vmul.f32 %v4811_v46, %v13549_v18  ;;  %v13574_v0 = vmul.f32 %v13244_v2, %v4622_v9  ;;  %v4312_v7 = vpop.xlane.xlu0 %4311  ;;  %v4493_v42 = vadd.f32 1e-06, %v4429_v40 }
 0x5bc   :  { %v9841_v24 = vpop.eup %9840  ;;  %9070 = vmatmul.mubr.msk.f32.gmra.mrb[76].mxu1 %vm987_vm1, %v5318_v28  ;;  %v5192_v52 = vadd.f32 1.0, %v9839_v59  ;;  %9852 = vtanh.f32 %v5066_v29  ;;  %v4436_v17 = vmul.f32 0.125, %v4312_v7  ;;  %v5255_v16 = vmul.f32 0.5, %v5191_v22  ;;  %v4297_v6 = vpop.xlane.xlu1 %4296 }
 0x5bd   :  { %v4618_v51 = vmul.f32 %v9841_v24, %v13095_v30  ;;  %v4939_v36 = vmul.f32 0.044715, %v4875_v14  ;;  %9854 = vrsqrt.f32 %v4493_v42  ;;  %v4431_v55 = vmul.f32 0.125, %v4297_v6 }
 0x5be   :  { %v5256_v37 = vmul.f32 0.5, %v5192_v52  ;;  %v4812_v39 = vmul.f32 %v13563_v34, %v13563_v34  ;;  %v9843_v38 = vpop.eup %9842  ;;  %v4500_v63 = vadd.f32 1e-06, %v4436_v17  ;;  %v5319_v49 = vmul.f32 %v5255_v16, %v13474_v32 }
 0x5bf   :  { %v13581_v46 = vmul.f32 %v13244_v2, %v4618_v51  ;;  %v5003_v35 = vadd.f32 %v4939_v36, %v13549_v18  ;;  %v9845_v15 = vpop.eup %9844  ;;  %v4624_v30 = vmul.f32 %v9843_v38, %v13113_v61  ;;  %v4495_v29 = vadd.f32 1e-06, %v4431_v55 }
 0x5c0   :  { %v5320_v56 = vmul.f32 %v5256_v37, %v13498_v8  ;;  %v4876_v48 = vmul.f32 %v4812_v39, %v13563_v34  ;;  %9856 = vrsqrt.f32 %v4500_v63  ;;  %v4617_v28 = vmul.f32 %v9845_v15, %v13106_v54  ;;  %9072 = vmatprep.mubr.msk.f32.mxu1 %vm987_vm1, %v5319_v49  ;;  %v4303_v40 = vpop.xlane.xlu1 %4302 }
 0x5c1   :  { %v9847_v9 = vpop.eup %9846  ;;  %v5067_v59 = vmul.f32 0.7978846, %v5003_v35  ;;  %v4813_v32 = vmul.f32 %v13567_v21, %v13567_v21  ;;  %v13593_v22 = vmul.f32 %v13244_v2, %v4624_v30  ;;  %9858 = vrsqrt.f32 %v4495_v29 }
 0x5c2   :  { %v4318_v61 = vpop.xlane.xlu0 %4317  ;;  %9073 = vmatmul.mubr.msk.f32.gmra.mrb[78].mxu1 %vm987_vm1, %v5320_v56  ;;  %v4433_v8 = vmul.f32 0.125, %v4303_v40  ;;  %v5193_v14 = vadd.f32 1.0, %v9847_v9  ;;  %v13597_v7 = vmul.f32 %v13244_v2, %v4617_v28  ;;  %v4940_v54 = vmul.f32 0.044715, %v4876_v48 }
 0x5c3   :  { %v4438_v24 = vmul.f32 0.125, %v4318_v61  ;;  %9860 = vtanh.f32 %v5067_v59  ;;  %v4877_v51 = vmul.f32 %v4813_v32, %v13567_v21  ;;  %v13602_v16 = vadd.f32 %v13254_v57, %v13529_v50  ;;  %v13614_v50 = vld [vmem:[%s14927_s3 + $0x4] ss:$0 sm:$0xff] }
 0x5c4   :  { %v9849_v42 = vpop.eup %9848  ;;  %v4497_v52 = vadd.f32 1e-06, %v4433_v8  ;;  %v5257_v17 = vmul.f32 0.5, %v5193_v14  ;;  %v4309_v55 = vpop.xlane.xlu1 %4308  ;;  %v5004_v39 = vadd.f32 %v4940_v54, %v13563_v34  ;;  %v13607_v2 = vadd.f32 %v13254_v57, %v4683_v26 }
 0x5c5   :  { %v9851_v6 = vpop.eup %9850  ;;  %v4502_v36 = vadd.f32 1e-06, %v4438_v24  ;;  %v4619_v37 = vmul.f32 %v9849_v42, %v13116_v45  ;;  %v4435_v35 = vmul.f32 0.125, %v4309_v55  ;;  %v4941_v56 = vmul.f32 0.044715, %v4877_v51 }
 0x5c6   :  { %v9853_v38 = vpop.eup %9852  ;;  %v4626_v63 = vmul.f32 %v9851_v6, %v13131_v1  ;;  %9862 = vrsqrt.f32 %v4497_v52  ;;  %v5321_v49 = vmul.f32 %v5257_v17, %v13511_v62  ;;  %v5068_v30 = vmul.f32 0.7978846, %v5004_v39 }
 0x5c7   :  { %9864 = vrsqrt.f32 %v4502_v36  ;;  %v13617_v45 = vmul.f32 %v13614_v50, %v4619_v37  ;;  %v5194_v15 = vadd.f32 1.0, %v9853_v38  ;;  %v9855_v57 = vpop.eup %9854  ;;  %v4499_v62 = vadd.f32 1e-06, %v4435_v35 }
 0x5c8   :  { %v13620_v26 = vmul.f32 %v13614_v50, %v4626_v63  ;;  %v4324_v1 = vpop.xlane.xlu0 %4323  ;;  %9075 = vmatprep.mubr.msk.f32.mxu1 %vm987_vm1, %v5321_v49  ;;  %v4814_v29 = vmul.f32 %v13602_v16, %v13602_v16  ;;  %v4621_v9 = vmul.f32 %v9855_v57, %v13125_v33  ;;  %v4315_v40 = vpop.xlane.xlu1 %4314  ;;  %9866 = vtanh.f32 %v5068_v30 }
 0x5c9   :  { %v4440_v48 = vmul.f32 0.125, %v4324_v1  ;;  %v5258_v28 = vmul.f32 0.5, %v5194_v15  ;;  %9868 = vrsqrt.f32 %v4499_v62  ;;  %v4437_v59 = vmul.f32 0.125, %v4315_v40 }
 0x5ca   :  { %v5005_v32 = vadd.f32 %v4941_v56, %v13567_v21  ;;  %v4878_v61 = vmul.f32 %v4814_v29, %v13602_v16  ;;  %v9857_v8 = vpop.eup %9856  ;;  %v13629_v24 = vmul.f32 %v13614_v50, %v4621_v9  ;;  %v4815_v42 = vmul.f32 %v13607_v2, %v13607_v2 }
 0x5cb   :  { %v4504_v14 = vadd.f32 1e-06, %v4440_v48  ;;  %v5322_v54 = vmul.f32 %v5258_v28, %v13525_v20  ;;  %v9859_v33 = vpop.eup %9858  ;;  %v4628_v52 = vmul.f32 %v9857_v8, %v13143_v23  ;;  %v4501_v17 = vadd.f32 1e-06, %v4437_v59  ;;  %v13641_v20 = vld [vmem:[%s14927_s3 + $0x5] ss:$0 sm:$0xff] }
 0x5cc   :  { %v5069_v51 = vmul.f32 0.7978846, %v5005_v32  ;;  %v4942_v6 = vmul.f32 0.044715, %v4878_v61  ;;  %v4623_v37 = vmul.f32 %v9859_v33, %v13136_v43  ;;  %v4321_v55 = vpop.xlane.xlu1 %4320  ;;  %v4879_v39 = vmul.f32 %v4815_v42, %v13607_v2 }
 0x5cd   :  { %v9861_v36 = vpop.eup %9860  ;;  %9870 = vrsqrt.f32 %v4504_v14  ;;  %9076 = vmatmul.mubr.msk.f32.gmra.mrb[80].mxu1 %vm987_vm1, %v5322_v54  ;;  %v13645_v23 = vadd.f32 %v13641_v20, %v13556_v4  ;;  %v13648_v38 = vmul.f32 %v13614_v50, %v4628_v52  ;;  %v4439_v49 = vmul.f32 0.125, %v4321_v55 }
 0x5ce   :  { %9872 = vrsqrt.f32 %v4501_v17  ;;  %v5195_v43 = vadd.f32 1.0, %v9861_v36  ;;  %v13651_v15 = vmul.f32 %v13614_v50, %v4623_v37  ;;  %v5006_v30 = vadd.f32 %v4942_v6, %v13602_v16 }
 0x5cf   :  { %v4330_v63 = vpop.xlane.xlu0 %4329  ;;  %9874 = vtanh.f32 %v5069_v51  ;;  %v4503_v62 = vadd.f32 1e-06, %v4439_v49  ;;  %v4943_v56 = vmul.f32 0.044715, %v4879_v39  ;;  %v4816_v4 = vmul.f32 %v13645_v23, %v13645_v23 }
 0x5d0   :  { %v4442_v35 = vmul.f32 0.125, %v4330_v63  ;;  %v9863_v57 = vpop.eup %9862  ;;  %v5259_v1 = vmul.f32 0.5, %v5195_v43  ;;  %v4327_v28 = vpop.xlane.xlu1 %4326  ;;  %v5070_v40 = vmul.f32 0.7978846, %v5006_v30  ;;  %v13659_v59 = vadd.f32 %v13641_v20, %v13597_v7 }
 0x5d1   :  { %v9865_v29 = vpop.eup %9864  ;;  %v4625_v9 = vmul.f32 %v9863_v57, %v13146_v58  ;;  %9876 = vrsqrt.f32 %v4503_v62  ;;  %v4441_v8 = vmul.f32 0.125, %v4327_v28  ;;  %v5007_v42 = vadd.f32 %v4943_v56, %v13607_v2 }
 0x5d2   :  { %v4506_v48 = vadd.f32 1e-06, %v4442_v35  ;;  %v4630_v32 = vmul.f32 %v9865_v29, %v13161_v60  ;;  %v5323_v61 = vmul.f32 %v5259_v1, %v13549_v18  ;;  %v9867_v14 = vpop.eup %9866  ;;  %v4880_v58 = vmul.f32 %v4816_v4, %v13645_v23 }
 0x5d3   :  { %v13664_v54 = vmul.f32 %v13614_v50, %v4625_v9  ;;  %v9869_v33 = vpop.eup %9868  ;;  %v5196_v60 = vadd.f32 1.0, %v9867_v14  ;;  %v4505_v18 = vadd.f32 1e-06, %v4441_v8  ;;  %v5071_v6 = vmul.f32 0.7978846, %v5007_v42 }
 0x5d4   :  { %9878 = vrsqrt.f32 %v4506_v48  ;;  %v13669_v52 = vmul.f32 %v13614_v50, %v4630_v32  ;;  %9078 = vmatprep.mubr.msk.f32.mxu1 %vm987_vm1, %v5323_v61  ;;  %v4627_v51 = vmul.f32 %v9869_v33, %v13155_v53  ;;  %v4944_v36 = vmul.f32 0.044715, %v4880_v58 }
 0x5d5   :  { %v4336_v7 = vpop.xlane.xlu0 %4335  ;;  %9880 = vtanh.f32 %v5070_v40  ;;  %v5260_v37 = vmul.f32 0.5, %v5196_v60  ;;  %v4817_v55 = vmul.f32 %v13659_v59, %v13659_v59  ;;  %v13677_v39 = vadd.f32 %v13641_v20, %v13581_v46 }
 0x5d6   :  { %v4444_v17 = vmul.f32 0.125, %v4336_v7  ;;  %9882 = vrsqrt.f32 %v4505_v18  ;;  %v13680_v49 = vmul.f32 %v13614_v50, %v4627_v51  ;;  %v5008_v35 = vadd.f32 %v4944_v36, %v13645_v23  ;;  %v15615_v51 = vld [vmem:[#allocation33_spill] sm:$0xff] }
 0x5d7   :  { %v9871_v63 = vpop.eup %9870  ;;  %9884 = vtanh.f32 %v5071_v6  ;;  %v5324_v57 = vmul.f32 %v5260_v37, %v13563_v34  ;;  %v4881_v62 = vmul.f32 %v4817_v55, %v13659_v59  ;;  %v4818_v46 = vmul.f32 %v13677_v39, %v13677_v39 }
 0x5d8   :  { %v4508_v43 = vadd.f32 1e-06, %v4444_v17  ;;  %v9873_v53 = vpop.eup %9872  ;;  %v4632_v30 = vmul.f32 %v9871_v63, %v13173_v27  ;;  %v5072_v48 = vmul.f32 0.7978846, %v5008_v35  ;;  %v13699_v61 = vadd.f32 %v13641_v20, %v13617_v45 }
 0x5d9   :  { %v4333_v1 = vpop.xlane.xlu1 %4332  ;;  %v9875_v56 = vpop.eup %9874  ;;  %v4629_v4 = vmul.f32 %v9873_v53, %v13166_v13  ;;  %9079 = vmatmul.mubr.msk.f32.gmra.mrb[82].mxu1 %vm987_vm1, %v5324_v57  ;;  %v4945_v28 = vmul.f32 0.044715, %v4881_v62  ;;  %v4882_v34 = vmul.f32 %v4818_v46, %v13677_v39  ;;  %v13704_v33 = vadd.f32 %v13641_v20, %v13552_v10  ;;  %v15616_v62 = vld [vmem:[#allocation34_spill] sm:$0xff] }
 0x5da   :  { %9886 = vrsqrt.f32 %v4508_v43  ;;  %v4443_v29 = vmul.f32 0.125, %v4333_v1  ;;  %v13690_v9 = vmul.f32 %v13614_v50, %v4632_v30  ;;  %v5197_v27 = vadd.f32 1.0, %v9875_v56 }
 0x5db   :  { %v13695_v40 = vmul.f32 %v13614_v50, %v4629_v4  ;;  %9888 = vtanh.f32 %v5072_v48  ;;  %v9877_v13 = vpop.eup %9876  ;;  %v5009_v42 = vadd.f32 %v4945_v28, %v13659_v59  ;;  %v4946_v58 = vmul.f32 0.044715, %v4882_v34 }
 0x5dc   :  { %v4507_v32 = vadd.f32 1e-06, %v4443_v29  ;;  %v5261_v14 = vmul.f32 0.5, %v5197_v27  ;;  %v4631_v18 = vmul.f32 %v9877_v13, %v13176_v11  ;;  %v4819_v17 = vmul.f32 %v13699_v61, %v13699_v61 }
 0x5dd   :  { %v4342_v8 = vpop.xlane.xlu0 %4341  ;;  %v5073_v37 = vmul.f32 0.7978846, %v5009_v42  ;;  %v5010_v55 = vadd.f32 %v4946_v58, %v13677_v39 }
 0x5de   :  { %v9879_v7 = vpop.eup %9878  ;;  %v4446_v60 = vmul.f32 0.125, %v4342_v8  ;;  %9890 = vrsqrt.f32 %v4507_v32  ;;  %v5325_v36 = vmul.f32 %v5261_v14, %v13567_v21  ;;  %v13713_v10 = vmul.f32 %v13614_v50, %v4631_v18  ;;  %v15617_v14 = vld [vmem:[#allocation35_spill] sm:$0xff] }
 0x5df   :  { %v9881_v45 = vpop.eup %9880  ;;  %v4634_v6 = vmul.f32 %v9879_v7, %v15615_v51  ;;  %v4883_v35 = vmul.f32 %v4819_v17, %v13699_v61  ;;  %9892 = vtanh.f32 %v5073_v37  ;;  %v5074_v57 = vmul.f32 0.7978846, %v5010_v55 }
 0x5e0   :  { %v4510_v63 = vadd.f32 1e-06, %v4446_v60  ;;  %v5198_v43 = vadd.f32 1.0, %v9881_v45  ;;  %v9883_v11 = vpop.eup %9882  ;;  %9081 = vmatprep.mubr.msk.f32.mxu1 %vm987_vm1, %v5325_v36  ;;  %v4820_v21 = vmul.f32 %v13704_v33, %v13704_v33  ;;  %v13730_v8 = vadd.f32 %v13641_v20, %v13629_v24 }
 0x5e1   :  { %v13717_v53 = vmul.f32 %v13614_v50, %v4634_v6  ;;  %v4339_v30 = vpop.xlane.xlu1 %4338  ;;  %v9885_v1 = vpop.eup %9884  ;;  %v4633_v46 = vmul.f32 %v9883_v11, %v15616_v62  ;;  %v4947_v48 = vmul.f32 0.044715, %v4883_v35  ;;  %v13739_v51 = vadd.f32 %v13641_v20, %v13574_v0 }
 0x5e2   :  { %9894 = vrsqrt.f32 %v4510_v63  ;;  %v5262_v56 = vmul.f32 0.5, %v5198_v43  ;;  %v4445_v4 = vmul.f32 0.125, %v4339_v30  ;;  %v5199_v29 = vadd.f32 1.0, %v9885_v1  ;;  %v15618_v30 = vld [vmem:[#allocation36_spill] sm:$0xff] }
 0x5e3   :  { %9896 = vtanh.f32 %v5074_v57  ;;  %v4884_v27 = vmul.f32 %v4820_v21, %v13704_v33  ;;  %v13725_v34 = vmul.f32 %v13614_v50, %v4633_v46  ;;  %v5011_v60 = vadd.f32 %v4947_v48, %v13699_v61 }
 0x5e4   :  { %v9887_v28 = vpop.eup %9886  ;;  %v5326_v32 = vmul.f32 %v5262_v56, %v13602_v16  ;;  %v4509_v13 = vadd.f32 1e-06, %v4445_v4  ;;  %v5263_v7 = vmul.f32 0.5, %v5199_v29  ;;  %v4821_v16 = vmul.f32 %v13730_v8, %v13730_v8 }
 0x5e5   :  { %v4636_v42 = vmul.f32 %v9887_v28, %v15617_v14  ;;  %v4348_v58 = vpop.xlane.xlu0 %4347  ;;  %v4948_v18 = vmul.f32 0.044715, %v4884_v27  ;;  %v9889_v17 = vpop.eup %9888  ;;  %v5075_v37 = vmul.f32 0.7978846, %v5011_v60  ;;  %v4822_v11 = vmul.f32 %v13739_v51, %v13739_v51 }
 0x5e6   :  { %v4448_v45 = vmul.f32 0.125, %v4348_v58  ;;  %9082 = vmatmul.mubr.msk.f32.gmra.mrb[84].mxu1 %vm987_vm1, %v5326_v32  ;;  %9898 = vrsqrt.f32 %v4509_v13  ;;  %v5327_v6 = vmul.f32 %v5263_v7, %v13607_v2  ;;  %v5200_v36 = vadd.f32 1.0, %v9889_v17 }
 0x5e7   :  { %v13742_v24 = vmul.f32 %v13614_v50, %v4636_v42  ;;  %v5012_v43 = vadd.f32 %v4948_v18, %v13704_v33  ;;  %v4885_v35 = vmul.f32 %v4821_v16, %v13730_v8  ;;  %9900 = vtanh.f32 %v5075_v37  ;;  %v15619_v42 = vld [vmem:[#allocation37_spill] sm:$0xff] }
 0x5e8   :  { %v9891_v55 = vpop.eup %9890  ;;  %v4512_v63 = vadd.f32 1e-06, %v4448_v45  ;;  %9084 = vmatprep.mubr.msk.f32.mxu1 %vm987_vm1, %v5327_v6  ;;  %v5264_v0 = vmul.f32 0.5, %v5200_v36  ;;  %v13753_v2 = vadd.f32 %v13641_v20, %v13651_v15  ;;  %v4886_v48 = vmul.f32 %v4822_v11, %v13739_v51 }
 0x5e9   :  { %v4635_v57 = vmul.f32 %v9891_v55, %v15618_v30  ;;  %v4345_v21 = vpop.xlane.xlu1 %4344  ;;  %v5076_v62 = vmul.f32 0.7978846, %v5012_v43  ;;  %v4949_v46 = vmul.f32 0.044715, %v4885_v35  ;;  %v9893_v56 = vpop.eup %9892  ;;  %v13768_v18 = vadd.f32 %v13641_v20, %v13593_v22  ;;  %v15620_v30 = vld [vmem:[#allocation38_spill] sm:$0xff] }
 0x5ea   :  { %9902 = vrsqrt.f32 %v4512_v63  ;;  %v4447_v1 = vmul.f32 0.125, %v4345_v21  ;;  %v5328_v29 = vmul.f32 %v5264_v0, %v13645_v23  ;;  %v4823_v27 = vmul.f32 %v13753_v2, %v13753_v2 }
 0x5eb   :  { %v13756_v4 = vmul.f32 %v13614_v50, %v4635_v57  ;;  %v5201_v13 = vadd.f32 1.0, %v9893_v56  ;;  %9904 = vtanh.f32 %v5076_v62  ;;  %v5013_v15 = vadd.f32 %v4949_v46, %v13730_v8 }
 0x5ec   :  { %v9895_v28 = vpop.eup %9894  ;;  %v4511_v32 = vadd.f32 1e-06, %v4447_v1  ;;  %9085 = vmatmul.mubr.msk.f32.gmra.mrb[86].mxu1 %vm987_vm1, %v5328_v29  ;;  %v4950_v60 = vmul.f32 0.044715, %v4886_v48  ;;  %v4887_v23 = vmul.f32 %v4823_v27, %v13753_v2  ;;  %v4824_v22 = vmul.f32 %v13768_v18, %v13768_v18 }
 0x5ed   :  { %v9897_v14 = vpop.eup %9896  ;;  %v4638_v58 = vmul.f32 %v9895_v28, %v15619_v42  ;;  %v4354_v7 = vpop.xlane.xlu0 %4353  ;;  %v5265_v45 = vmul.f32 0.5, %v5201_v13  ;;  %v5077_v36 = vmul.f32 0.7978846, %v5013_v15  ;;  %v13787_v27 = vadd.f32 %v13641_v20, %v13664_v54 }
 0x5ee   :  { %v4450_v17 = vmul.f32 0.125, %v4354_v7  ;;  %9906 = vrsqrt.f32 %v4511_v32  ;;  %v5202_v16 = vadd.f32 1.0, %v9897_v14  ;;  %v5014_v37 = vadd.f32 %v4950_v60, %v13739_v51  ;;  %v15621_v14 = vld [vmem:[#allocation69_spill] sm:$0xff] }
 0x5ef   :  { %v13771_v6 = vmul.f32 %v13614_v50, %v4638_v58  ;;  %v4951_v55 = vmul.f32 0.044715, %v4887_v23  ;;  %v5329_v35 = vmul.f32 %v5265_v45, %v13659_v59  ;;  %9908 = vtanh.f32 %v5077_v36 }
 0x5f0   :  { %v9899_v63 = vpop.eup %9898  ;;  %v4514_v43 = vadd.f32 1e-06, %v4450_v17  ;;  %v5266_v11 = vmul.f32 0.5, %v5202_v16  ;;  %v5078_v21 = vmul.f32 0.7978846, %v5014_v37  ;;  %v4888_v56 = vmul.f32 %v4824_v22, %v13768_v18 }
 0x5f1   :  { %v4637_v57 = vmul.f32 %v9899_v63, %v15620_v30  ;;  %v4351_v0 = vpop.xlane.xlu1 %4350  ;;  %v5015_v1 = vadd.f32 %v4951_v55, %v13753_v2  ;;  %9087 = vmatprep.mubr.msk.f32.mxu1 %vm987_vm1, %v5329_v35  ;;  %v9901_v59 = vpop.eup %9900  ;;  %v4825_v7 = vmul.f32 %v13787_v27, %v13787_v27  ;;  %v13799_v54 = vadd.f32 %v13641_v20, %v13680_v49 }
 0x5f2   :  { %9910 = vrsqrt.f32 %v4514_v43  ;;  %v4449_v62 = vmul.f32 0.125, %v4351_v0  ;;  %v5330_v46 = vmul.f32 %v5266_v11, %v13677_v39  ;;  %v5203_v13 = vadd.f32 1.0, %v9901_v59  ;;  %v15622_v11 = vld [vmem:[#allocation70_spill] sm:$0xff] }
 0x5f3   :  { %v13783_v29 = vmul.f32 %v13614_v50, %v4637_v57  ;;  %9912 = vtanh.f32 %v5078_v21  ;;  %v5079_v48 = vmul.f32 0.7978846, %v5015_v1  ;;  %v4952_v15 = vmul.f32 0.044715, %v4888_v56 }
 0x5f4   :  { %v9903_v28 = vpop.eup %9902  ;;  %v4513_v32 = vadd.f32 1e-06, %v4449_v62  ;;  %9088 = vmatmul.mubr.msk.f32.gmra.mrb[88].mxu1 %vm987_vm1, %v5330_v46  ;;  %v13792_v39 = vadd.f32 %v13641_v20, %v13620_v26  ;;  %v5267_v17 = vmul.f32 0.5, %v5203_v13  ;;  %v4889_v36 = vmul.f32 %v4825_v7, %v13787_v27 }
 0x5f5   :  { %v4640_v42 = vmul.f32 %v9903_v28, %v15621_v14  ;;  %v4360_v58 = vpop.xlane.xlu0 %4359  ;;  %9914 = vtanh.f32 %v5079_v48  ;;  %v9905_v60 = vpop.eup %9904  ;;  %v5016_v45 = vadd.f32 %v4952_v15, %v13768_v18  ;;  %v4827_v35 = vmul.f32 %v13799_v54, %v13799_v54 }
 0x5f6   :  { %v4452_v23 = vmul.f32 0.125, %v4360_v58  ;;  %9916 = vrsqrt.f32 %v4513_v32  ;;  %v5204_v16 = vadd.f32 1.0, %v9905_v60  ;;  %v4826_v37 = vmul.f32 %v13792_v39, %v13792_v39  ;;  %v15623_v58 = vld [vmem:[#allocation71_spill] sm:$0xff] }
 0x5f7   :  { %v13803_v26 = vmul.f32 %v13614_v50, %v4640_v42  ;;  %v5331_v49 = vmul.f32 %v5267_v17, %v13699_v61  ;;  %v5080_v43 = vmul.f32 0.7978846, %v5016_v45  ;;  %v4953_v0 = vmul.f32 0.044715, %v4889_v36 }
 0x5f8   :  { %v9907_v55 = vpop.eup %9906  ;;  %v4516_v63 = vadd.f32 1e-06, %v4452_v23  ;;  %v5268_v57 = vmul.f32 0.5, %v5204_v16  ;;  %v4890_v21 = vmul.f32 %v4826_v37, %v13792_v39  ;;  %v4891_v62 = vmul.f32 %v4827_v35, %v13799_v54 }
 0x5f9   :  { %v4639_v22 = vmul.f32 %v9907_v55, %v15622_v11  ;;  %v4357_v30 = vpop.xlane.xlu1 %4356  ;;  %9090 = vmatprep.mubr.msk.f32.mxu1 %vm987_vm1, %v5331_v49  ;;  %v13817_v61 = vadd.f32 %v13641_v20, %v13648_v38  ;;  %v9909_v46 = vpop.eup %9908  ;;  %v5017_v48 = vadd.f32 %v4953_v0, %v13787_v27 }
 0x5fa   :  { %9918 = vrsqrt.f32 %v4516_v63  ;;  %v4451_v1 = vmul.f32 0.125, %v4357_v30  ;;  %v5332_v59 = vmul.f32 %v5268_v57, %v13704_v33  ;;  %v5205_v13 = vadd.f32 1.0, %v9909_v46 }
 0x5fb   :  { %v13820_v56 = vmul.f32 %v13614_v50, %v4639_v22  ;;  %9920 = vtanh.f32 %v5080_v43  ;;  %v4954_v15 = vmul.f32 0.044715, %v4890_v21  ;;  %v4828_v14 = vmul.f32 %v13817_v61, %v13817_v61  ;;  %v15624_v22 = vld [vmem:[#allocation10_spill] sm:$0xff] }
 0x5fc   :  { %v9911_v28 = vpop.eup %9910  ;;  %v4515_v32 = vadd.f32 1e-06, %v4451_v1  ;;  %9091 = vmatmul.mubr.msk.f32.gmra.mrb[90].mxu1 %vm987_vm1, %v5332_v59  ;;  %v5081_v60 = vmul.f32 0.7978846, %v5017_v48  ;;  %v4955_v23 = vmul.f32 0.044715, %v4891_v62  ;;  %v13830_v33 = vadd.f32 %v13641_v20, %v13695_v40 }
 0x5fd   :  { %v9913_v42 = vpop.eup %9912  ;;  %v4642_v38 = vmul.f32 %v9911_v28, %v15623_v58  ;;  %v4366_v7 = vpop.xlane.xlu0 %4365  ;;  %v5269_v45 = vmul.f32 0.5, %v5205_v13  ;;  %v5018_v55 = vadd.f32 %v4954_v15, %v13792_v39  ;;  %v4892_v1 = vmul.f32 %v4828_v14, %v13817_v61 }
 0x5fe   :  { %v4454_v17 = vmul.f32 0.125, %v4366_v7  ;;  %9922 = vrsqrt.f32 %v4515_v32  ;;  %v5206_v16 = vadd.f32 1.0, %v9913_v42  ;;  %v5019_v63 = vadd.f32 %v4955_v23, %v13799_v54  ;;  %v15625_v42 = vld [vmem:[#allocation72_spill] sm:$0xff] }
 0x5ff   :  { %v9915_v36 = vpop.eup %9914  ;;  %v13833_v37 = vmul.f32 %v13614_v50, %v4642_v38  ;;  %9924 = vtanh.f32 %v5081_v60  ;;  %v5333_v35 = vmul.f32 %v5269_v45, %v13730_v8  ;;  %v5082_v0 = vmul.f32 0.7978846, %v5018_v55 }
 0x600   :  { %v9917_v49 = vpop.eup %9916  ;;  %v4518_v43 = vadd.f32 1e-06, %v4454_v17  ;;  %v5270_v11 = vmul.f32 0.5, %v5206_v16  ;;  %v5207_v40 = vadd.f32 1.0, %v9915_v36  ;;  %v5083_v21 = vmul.f32 0.7978846, %v5019_v63 }
 0x601   :  { %v4641_v30 = vmul.f32 %v9917_v49, %v15624_v22  ;;  %v4363_v57 = vpop.xlane.xlu1 %4362  ;;  %9093 = vmatprep.mubr.msk.f32.mxu1 %vm987_vm1, %v5333_v35  ;;  %v4956_v8 = vmul.f32 0.044715, %v4892_v1  ;;  %v4829_v28 = vmul.f32 %v13830_v33, %v13830_v33  ;;  %v13851_v14 = vadd.f32 %v13641_v20, %v13669_v52 }
 0x602   :  { %9926 = vrsqrt.f32 %v4518_v43  ;;  %v4453_v62 = vmul.f32 0.125, %v4363_v57  ;;  %v5334_v46 = vmul.f32 %v5270_v11, %v13739_v51  ;;  %v5271_v59 = vmul.f32 0.5, %v5207_v40  ;;  %v15626_v40 = vld [vmem:[#allocation13_spill] sm:$0xff] }
 0x603   :  { %v13843_v48 = vmul.f32 %v13614_v50, %v4641_v30  ;;  %9928 = vtanh.f32 %v5082_v0  ;;  %v5020_v7 = vadd.f32 %v4956_v8, %v13817_v61  ;;  %v4893_v60 = vmul.f32 %v4829_v28, %v13830_v33 }
 0x604   :  { %v9919_v32 = vpop.eup %9918  ;;  %v4517_v13 = vadd.f32 1e-06, %v4453_v62  ;;  %9094 = vmatmul.mubr.msk.f32.gmra.mrb[92].mxu1 %vm987_vm1, %v5334_v46  ;;  %v5335_v15 = vmul.f32 %v5271_v59, %v13753_v2  ;;  %9930 = vtanh.f32 %v5083_v21  ;;  %v13858_v23 = vadd.f32 %v13641_v20, %v13713_v10 }
 0x605   :  { %v9921_v51 = vpop.eup %9920  ;;  %v4644_v58 = vmul.f32 %v9919_v32, %v15625_v42  ;;  %v4372_v38 = vpop.xlane.xlu0 %4371  ;;  %v4830_v52 = vmul.f32 %v13851_v14, %v13851_v14  ;;  %v5084_v16 = vmul.f32 0.7978846, %v5020_v7  ;;  %v4957_v36 = vmul.f32 0.044715, %v4893_v60  ;;  %v15627_v42 = vld [vmem:[#allocation73_spill] sm:$0xff] }
 0x606   :  { %v4456_v17 = vmul.f32 0.125, %v4372_v38  ;;  %9932 = vrsqrt.f32 %v4517_v13  ;;  %9096 = vmatprep.mubr.msk.f32.mxu1 %vm987_vm1, %v5335_v15  ;;  %v5208_v2 = vadd.f32 1.0, %v9921_v51  ;;  %v4831_v55 = vmul.f32 %v13858_v23, %v13858_v23 }
 0x607   :  { %v13864_v45 = vmul.f32 %v13614_v50, %v4644_v58  ;;  %v4894_v43 = vmul.f32 %v4830_v52, %v13851_v14  ;;  %v13871_v35 = vadd.f32 %v13641_v20, %v13690_v9  ;;  %9934 = vtanh.f32 %v5084_v16 }
 0x608   :  { %v9923_v63 = vpop.eup %9922  ;;  %v4520_v49 = vadd.f32 1e-06, %v4456_v17  ;;  %v5272_v10 = vmul.f32 0.5, %v5208_v2  ;;  %v5021_v57 = vadd.f32 %v4957_v36, %v13830_v33  ;;  %v4895_v0 = vmul.f32 %v4831_v55, %v13858_v23 }
 0x609   :  { %v9925_v11 = vpop.eup %9924  ;;  %v4643_v22 = vmul.f32 %v9923_v63, %v15626_v40  ;;  %v4369_v30 = vpop.xlane.xlu1 %4368  ;;  %v4958_v9 = vmul.f32 0.044715, %v4894_v43  ;;  %v4832_v15 = vmul.f32 %v13871_v35, %v13871_v35  ;;  %v13885_v51 = vadd.f32 %v13641_v20, %v13725_v34 }
 0x60a   :  { %9936 = vrsqrt.f32 %v4520_v49  ;;  %v4455_v21 = vmul.f32 0.125, %v4369_v30  ;;  %v5336_v1 = vmul.f32 %v5272_v10, %v13768_v18  ;;  %v5209_v62 = vadd.f32 1.0, %v9925_v11 }
 0x60b   :  { %v13878_v46 = vmul.f32 %v13614_v50, %v4643_v22  ;;  %v5085_v59 = vmul.f32 0.7978846, %v5021_v57  ;;  %v4959_v8 = vmul.f32 0.044715, %v4895_v0  ;;  %v5022_v7 = vadd.f32 %v4958_v9, %v13851_v14  ;;  %v15628_v22 = vld [vmem:[#allocation74_spill] sm:$0xff] }
 0x60c   :  { %v9927_v28 = vpop.eup %9926  ;;  %v4519_v32 = vadd.f32 1e-06, %v4455_v21  ;;  %9097 = vmatmul.mubr.msk.f32.gmra.mrb[94].mxu1 %vm987_vm1, %v5336_v1  ;;  %v5273_v13 = vmul.f32 0.5, %v5209_v62  ;;  %v4896_v11 = vmul.f32 %v4832_v15, %v13871_v35  ;;  %v4833_v40 = vmul.f32 %v13885_v51, %v13885_v51 }
 0x60d   :  { %v9929_v18 = vpop.eup %9928  ;;  %v4646_v58 = vmul.f32 %v9927_v28, %v15627_v42  ;;  %v4378_v38 = vpop.xlane.xlu0 %4377  ;;  %9938 = vtanh.f32 %v5085_v59  ;;  %v5023_v60 = vadd.f32 %v4959_v8, %v13858_v23  ;;  %v5086_v55 = vmul.f32 0.7978846, %v5022_v7  ;;  %v15629_v42 = vld [vmem:[#allocation16_spill] sm:$0xff] }
 0x60e   :  { %v9931_v17 = vpop.eup %9930  ;;  %v4458_v2 = vmul.f32 0.125, %v4378_v38  ;;  %9940 = vrsqrt.f32 %v4519_v32  ;;  %v5337_v52 = vmul.f32 %v5273_v13, %v13787_v27  ;;  %v5210_v16 = vadd.f32 1.0, %v9929_v18  ;;  %v6251_v18 = vld [vmem:[%s14925_s1] sm:$0x3]  ;;  %s10114_s1 = smov 64  }
 0x60f   :  { %v13892_v36 = vmul.f32 %v13614_v50, %v4646_v58  ;;  %v5211_v34 = vadd.f32 1.0, %v9931_v17  ;;  %v5087_v63 = vmul.f32 0.7978846, %v5023_v60  ;;  %9942 = vtanh.f32 %v5086_v55 }
 0x610   :  { %v9933_v49 = vpop.eup %9932  ;;  %v4522_v10 = vadd.f32 1e-06, %v4458_v2  ;;  %9099 = vmatprep.mubr.msk.f32.mxu1 %vm987_vm1, %v5337_v52  ;;  %v5274_v43 = vmul.f32 0.5, %v5210_v16  ;;  %v13901_v0 = vadd.f32 %v13641_v20, %v13717_v53  ;;  %v4960_v62 = vmul.f32 0.044715, %v4896_v11 }
 0x611   :  { %v4645_v30 = vmul.f32 %v9933_v49, %v15628_v22  ;;  %v4375_v27 = vpop.xlane.xlu1 %4374  ;;  %v5275_v57 = vmul.f32 0.5, %v5211_v34  ;;  %v9935_v59 = vpop.eup %9934  ;;  %v4897_v28 = vmul.f32 %v4833_v40, %v13885_v51  ;;  %v10112_v2 = vmov 0.0   ;;  %v15630_v40 = vld [vmem:[#allocation75_spill] sm:$0xff] }
 0x612   :  { %9944 = vrsqrt.f32 %v4522_v10  ;;  %v4457_v21 = vmul.f32 0.125, %v4375_v27  ;;  %v5338_v1 = vmul.f32 %v5274_v43, %v13792_v39  ;;  %v5212_v53 = vadd.f32 1.0, %v9935_v59  ;;  %9154 = vmatprep.mubr.msk.f32.mxu0 %vm15178_vm2, %v10112_v2 }
 0x613   :  { %v13905_v9 = vmul.f32 %v13614_v50, %v4645_v30  ;;  %v5339_v8 = vmul.f32 %v5275_v57, %v13799_v54  ;;  %9946 = vtanh.f32 %v5087_v63  ;;  %v5024_v15 = vadd.f32 %v4960_v62, %v13871_v35  ;;  %9155 = vmatmul.mubr.msk.f32.vlgmr.msra.gmra.mrb[126].mxu0 %vm89_vm0, %v6251_v18 }
 0x614   :  { %v9937_v32 = vpop.eup %9936  ;;  %v4521_v13 = vadd.f32 1e-06, %v4457_v21  ;;  %9100 = vmatmul.mubr.msk.f32.gmra.mrb[96].mxu1 %vm987_vm1, %v5338_v1  ;;  %v4834_v39 = vmul.f32 %v13901_v0, %v13901_v0  ;;  %v4961_v38 = vmul.f32 0.044715, %v4897_v28  ;;  %v5276_v60 = vmul.f32 0.5, %v5212_v53 }
 0x615   :  { %v4648_v58 = vmul.f32 %v9937_v32, %v15629_v42  ;;  %v4384_v54 = vpop.xlane.xlu0 %4383  ;;  %9102 = vmatprep.mubr.msk.f32.mxu1 %vm987_vm1, %v5339_v8  ;;  %v5088_v17 = vmul.f32 0.7978846, %v5024_v15  ;;  %v13928_v63 = vadd.f32 %v13641_v20, %v13756_v4  ;;  %v13937_v62 = vadd.f32 %v13641_v20, %v13742_v24  ;;  %v15631_v24 = vld [vmem:[#allocation76_spill] sm:$0xff] }
 0x616   :  { %v4460_v7 = vmul.f32 0.125, %v4384_v54  ;;  %9948 = vrsqrt.f32 %v4521_v13  ;;  %v5025_v34 = vadd.f32 %v4961_v38, %v13885_v51  ;;  %v4898_v55 = vmul.f32 %v4834_v39, %v13901_v0 }
 0x617   :  { %v9939_v52 = vpop.eup %9938  ;;  %v13921_v16 = vmul.f32 %v13614_v50, %v4648_v58  ;;  %v5340_v43 = vmul.f32 %v5276_v60, %v13817_v61  ;;  %9950 = vtanh.f32 %v5088_v17  ;;  %v4835_v21 = vmul.f32 %v13928_v63, %v13928_v63 }
 0x618   :  { %v9941_v49 = vpop.eup %9940  ;;  %v4524_v10 = vadd.f32 1e-06, %v4460_v7  ;;  %v5213_v11 = vadd.f32 1.0, %v9939_v52  ;;  %v5089_v27 = vmul.f32 0.7978846, %v5025_v34  ;;  %v4836_v39 = vmul.f32 %v13937_v62, %v13937_v62 }
 0x619   :  { %v4647_v22 = vmul.f32 %v9941_v49, %v15630_v40  ;;  %v4381_v30 = vpop.xlane.xlu1 %4380  ;;  %v4962_v57 = vmul.f32 0.044715, %v4898_v55  ;;  %9103 = vmatmul.mubr.msk.f32.gmra.mrb[98].mxu1 %vm987_vm1, %v5340_v43  ;;  %v9943_v61 = vpop.eup %9942  ;;  %v4899_v28 = vmul.f32 %v4835_v21, %v13928_v63  ;;  %v13950_v7 = vadd.f32 %v13641_v20, %v13783_v29  ;;  %v15632_v40 = vld [vmem:[#allocation18_spill] sm:$0xff] }
 0x61a   :  { %9952 = vrsqrt.f32 %v4524_v10  ;;  %v4459_v1 = vmul.f32 0.125, %v4381_v30  ;;  %v5277_v4 = vmul.f32 0.5, %v5213_v11  ;;  %v5214_v15 = vadd.f32 1.0, %v9943_v61 }
 0x61b   :  { %v13940_v59 = vmul.f32 %v13614_v50, %v4647_v22  ;;  %9954 = vtanh.f32 %v5089_v27  ;;  %v5026_v8 = vadd.f32 %v4962_v57, %v13901_v0  ;;  %v4963_v38 = vmul.f32 0.044715, %v4899_v28 }
 0x61c   :  { %v9945_v32 = vpop.eup %9944  ;;  %v4523_v13 = vadd.f32 1e-06, %v4459_v1  ;;  %v5341_v53 = vmul.f32 %v5277_v4, %v13830_v33  ;;  %v5278_v17 = vmul.f32 0.5, %v5214_v15  ;;  %v4900_v55 = vmul.f32 %v4836_v39, %v13937_v62 }
 0x61d   :  { %v9947_v18 = vpop.eup %9946  ;;  %v4650_v42 = vmul.f32 %v9945_v32, %v15631_v24  ;;  %v4390_v58 = vpop.xlane.xlu0 %4389  ;;  %v5090_v54 = vmul.f32 0.7978846, %v5026_v8  ;;  %v5027_v34 = vadd.f32 %v4963_v38, %v13928_v63  ;;  %v4837_v11 = vmul.f32 %v13950_v7, %v13950_v7 }
 0x61e   :  { %v4462_v60 = vmul.f32 0.125, %v4390_v58  ;;  %9956 = vrsqrt.f32 %v4523_v13  ;;  %9105 = vmatprep.mubr.msk.f32.mxu1 %vm987_vm1, %v5341_v53  ;;  %v5215_v33 = vadd.f32 1.0, %v9947_v18  ;;  %v5342_v43 = vmul.f32 %v5278_v17, %v13851_v14 }
 0x61f   :  { %v13954_v52 = vmul.f32 %v13614_v50, %v4650_v42  ;;  %9958 = vtanh.f32 %v5090_v54  ;;  %v5091_v27 = vmul.f32 0.7978846, %v5027_v34  ;;  %v4964_v57 = vmul.f32 0.044715, %v4900_v55 }
 0x620   :  { %v9949_v49 = vpop.eup %9948  ;;  %v4526_v10 = vadd.f32 1e-06, %v4462_v60  ;;  %v5279_v29 = vmul.f32 0.5, %v5215_v33  ;;  %v13964_v21 = vadd.f32 %v13641_v20, %v13771_v6  ;;  %9106 = vmatmul.mubr.msk.f32.gmra.mrb[100].mxu1 %vm987_vm1, %v5342_v43  ;;  %v4901_v61 = vmul.f32 %v4837_v11, %v13950_v7 }
 0x621   :  { %v4649_v22 = vmul.f32 %v9949_v49, %v15632_v40  ;;  %v4387_v30 = vpop.xlane.xlu1 %4386  ;;  %v9951_v1 = vpop.eup %9950  ;;  %v5028_v32 = vadd.f32 %v4964_v57, %v13937_v62  ;;  %v13983_v54 = vadd.f32 %v13641_v20, %v13803_v26 }
 0x622   :  { %9960 = vrsqrt.f32 %v4526_v10  ;;  %v4461_v4 = vmul.f32 0.125, %v4387_v30  ;;  %v5343_v14 = vmul.f32 %v5279_v29, %v13858_v23  ;;  %v5216_v28 = vadd.f32 1.0, %v9951_v1 }
 0x623   :  { %v13970_v8 = vmul.f32 %v13614_v50, %v4649_v22  ;;  %9962 = vtanh.f32 %v5091_v27  ;;  %v4965_v6 = vmul.f32 0.044715, %v4901_v61  ;;  %v4838_v15 = vmul.f32 %v13964_v21, %v13964_v21 }
 0x624   :  { %v9953_v13 = vpop.eup %9952  ;;  %v4525_v53 = vadd.f32 1e-06, %v4461_v4  ;;  %9108 = vmatprep.mubr.msk.f32.mxu1 %vm987_vm1, %v5343_v14  ;;  %v13978_v23 = vadd.f32 %v13641_v20, %v13820_v56  ;;  %v5280_v42 = vmul.f32 0.5, %v5216_v28  ;;  %v5092_v58 = vmul.f32 0.7978846, %v5028_v32 }
 0x625   :  { %v9955_v39 = vpop.eup %9954  ;;  %v4652_v18 = vmul.f32 %v9953_v13, %v13364_v31  ;;  %v4396_v24 = vpop.xlane.xlu0 %4395  ;;  %v5029_v17 = vadd.f32 %v4965_v6, %v13950_v7  ;;  %v4902_v31 = vmul.f32 %v4838_v15, %v13964_v21  ;;  %v13999_v22 = vadd.f32 %v13641_v20, %v13843_v48 }
 0x626   :  { %9964 = vrsqrt.f32 %v4525_v53  ;;  %v4464_v38 = vmul.f32 0.125, %v4396_v24  ;;  %v5217_v60 = vadd.f32 1.0, %v9955_v39  ;;  %v5344_v56 = vmul.f32 %v5280_v42, %v13871_v35  ;;  %v14020_v42 = vld [vmem:[%s14927_s3 + $0x4] ss:$0 sm:$0xff] }
 0x627   :  { %v13987_v33 = vmul.f32 %v13614_v50, %v4652_v18  ;;  %9966 = vtanh.f32 %v5092_v58  ;;  %v5093_v10 = vmul.f32 0.7978846, %v5029_v17  ;;  %v4839_v26 = vmul.f32 %v13978_v23, %v13978_v23 }
 0x628   :  { %v9957_v34 = vpop.eup %9956  ;;  %v4528_v55 = vadd.f32 1e-06, %v4464_v38  ;;  %v5281_v49 = vmul.f32 0.5, %v5217_v60  ;;  %9109 = vmatmul.mubr.msk.f32.gmra.mrb[102].mxu1 %vm987_vm1, %v5344_v56  ;;  %v4966_v40 = vmul.f32 0.044715, %v4902_v31  ;;  %v4840_v35 = vmul.f32 %v13983_v54, %v13983_v54 }
 0x629   :  { %v9959_v43 = vpop.eup %9958  ;;  %v4651_v29 = vmul.f32 %v9957_v34, %v13376_v41  ;;  %v4393_v11 = vpop.xlane.xlu1 %4392  ;;  %v4903_v4 = vmul.f32 %v4839_v26, %v13978_v23  ;;  %v4841_v32 = vmul.f32 %v13999_v22, %v13999_v22  ;;  %v14014_v15 = vadd.f32 %v13641_v20, %v13833_v37 }
 0x62a   :  { %9968 = vrsqrt.f32 %v4528_v55  ;;  %v4463_v30 = vmul.f32 0.125, %v4393_v11  ;;  %v5345_v27 = vmul.f32 %v5281_v49, %v13885_v51  ;;  %v5218_v57 = vadd.f32 1.0, %v9959_v43 }
 0x62b   :  { %v14003_v1 = vmul.f32 %v13614_v50, %v4651_v29  ;;  %9970 = vtanh.f32 %v5093_v10  ;;  %v5030_v41 = vadd.f32 %v4966_v40, %v13964_v21  ;;  %v4904_v48 = vmul.f32 %v4840_v35, %v13983_v54 }
 0x62c   :  { %v9961_v14 = vpop.eup %9960  ;;  %v4527_v61 = vadd.f32 1e-06, %v4463_v30  ;;  %9111 = vmatprep.mubr.msk.f32.mxu1 %vm987_vm1, %v5345_v27  ;;  %v5282_v28 = vmul.f32 0.5, %v5218_v57  ;;  %v4967_v6 = vmul.f32 0.044715, %v4903_v4  ;;  %v4842_v56 = vmul.f32 %v14014_v15, %v14014_v15 }
 0x62d   :  { %v9963_v51 = vpop.eup %9962  ;;  %v4654_v13 = vmul.f32 %v9961_v14, %v13393_v47  ;;  %v4402_v50 = vpop.xlane.xlu0 %4401  ;;  %v5094_v53 = vmul.f32 0.7978846, %v5030_v41  ;;  %v4968_v38 = vmul.f32 0.044715, %v4904_v48  ;;  %v14034_v26 = vadd.f32 %v13641_v20, %v13878_v46  ;;  %v14049_v14 = vld [vmem:[%s14927_s3 + $0x5] ss:$0 sm:$0xff] }
 0x62e   :  { %9972 = vrsqrt.f32 %v4527_v61  ;;  %v4466_v39 = vmul.f32 0.125, %v4402_v50  ;;  %v5346_v18 = vmul.f32 %v5282_v28, %v13901_v0  ;;  %v5219_v24 = vadd.f32 1.0, %v9963_v51 }
 0x62f   :  { %v14023_v58 = vmul.f32 %v14020_v42, %v4654_v13  ;;  %9974 = vtanh.f32 %v5094_v53  ;;  %v5031_v47 = vadd.f32 %v4967_v6, %v13978_v23  ;;  %v4905_v0 = vmul.f32 %v4841_v32, %v13999_v22 }
 0x630   :  { %v9965_v60 = vpop.eup %9964  ;;  %v4530_v37 = vadd.f32 1e-06, %v4466_v39  ;;  %9112 = vmatmul.mubr.msk.f32.gmra.mrb[104].mxu1 %vm987_vm1, %v5346_v18  ;;  %v5283_v17 = vmul.f32 0.5, %v5219_v24  ;;  %v5032_v10 = vadd.f32 %v4968_v38, %v13983_v54  ;;  %v4906_v41 = vmul.f32 %v4842_v56, %v14014_v15 }
 0x631   :  { %v9967_v31 = vpop.eup %9966  ;;  %v4653_v34 = vmul.f32 %v9965_v60, %v13414_v19  ;;  %v4399_v55 = vpop.xlane.xlu1 %4398  ;;  %v5095_v49 = vmul.f32 0.7978846, %v5031_v47  ;;  %v4969_v30 = vmul.f32 0.044715, %v4905_v0  ;;  %v4843_v20 = vmul.f32 %v14034_v26, %v14034_v26 }
 0x632   :  { %9976 = vrsqrt.f32 %v4530_v37  ;;  %v4465_v43 = vmul.f32 0.125, %v4399_v55  ;;  %v5347_v29 = vmul.f32 %v5283_v17, %v13928_v63  ;;  %v5220_v11 = vadd.f32 1.0, %v9967_v31 }
 0x633   :  { %v14038_v40 = vmul.f32 %v14020_v42, %v4653_v34  ;;  %9978 = vtanh.f32 %v5095_v49  ;;  %v5096_v35 = vmul.f32 0.7978846, %v5032_v10  ;;  %v5033_v4 = vadd.f32 %v4969_v30, %v13999_v22 }
 0x634   :  { %v9969_v19 = vpop.eup %9968  ;;  %v4529_v27 = vadd.f32 1e-06, %v4465_v43  ;;  %9114 = vmatprep.mubr.msk.f32.mxu1 %vm987_vm1, %v5347_v29  ;;  %v5284_v57 = vmul.f32 0.5, %v5220_v11  ;;  %v14053_v61 = vadd.f32 %v14049_v14, %v13864_v45  ;;  %v4970_v32 = vmul.f32 0.044715, %v4906_v41 }
 0x635   :  { %v9971_v46 = vpop.eup %9970  ;;  %v4656_v63 = vmul.f32 %v9969_v19, %v13429_v12  ;;  %9980 = vtanh.f32 %v5096_v35  ;;  %v5097_v12 = vmul.f32 0.7978846, %v5033_v4  ;;  %v4907_v13 = vmul.f32 %v4843_v20, %v14034_v26 }
 0x636   :  { %9982 = vrsqrt.f32 %v4529_v27  ;;  %v5348_v28 = vmul.f32 %v5284_v57, %v13937_v62  ;;  %v5221_v48 = vadd.f32 1.0, %v9971_v46  ;;  %v4844_v50 = vmul.f32 %v14053_v61, %v14053_v61 }
 0x637   :  { %v14057_v51 = vmul.f32 %v14020_v42, %v4656_v63  ;;  %v5034_v45 = vadd.f32 %v4970_v32, %v14014_v15  ;;  %v14066_v62 = vadd.f32 %v14049_v14, %v13905_v9  ;;  %v14070_v39 = vadd.f32 %v14049_v14, %v13892_v36 }
 0x638   :  { %v9973_v53 = vpop.eup %9972  ;;  %9115 = vmatmul.mubr.msk.f32.gmra.mrb[106].mxu1 %vm987_vm1, %v5348_v28  ;;  %v5285_v6 = vmul.f32 0.5, %v5221_v48  ;;  %9984 = vtanh.f32 %v5097_v12  ;;  %v4971_v47 = vmul.f32 0.044715, %v4907_v13  ;;  %v4908_v38 = vmul.f32 %v4844_v50, %v14053_v61 }
 0x639   :  { %v9975_v18 = vpop.eup %9974  ;;  %v4655_v24 = vmul.f32 %v9973_v53, %v13438_v44  ;;  %v5098_v17 = vmul.f32 0.7978846, %v5034_v45  ;;  %v4845_v0 = vmul.f32 %v14066_v62, %v14066_v62  ;;  %v4846_v44 = vmul.f32 %v14070_v39, %v14070_v39 }
 0x63a   :  { %v5349_v60 = vmul.f32 %v5285_v6, %v13950_v7  ;;  %v5222_v37 = vadd.f32 1.0, %v9975_v18  ;;  %v5035_v36 = vadd.f32 %v4971_v47, %v14034_v26  ;;  %v4972_v56 = vmul.f32 0.044715, %v4908_v38 }
 0x63b   :  { %v14078_v9 = vmul.f32 %v14020_v42, %v4655_v24  ;;  %9986 = vtanh.f32 %v5098_v17  ;;  %v4909_v7 = vmul.f32 %v4845_v0, %v14066_v62  ;;  %v14087_v55 = vadd.f32 %v14049_v14, %v13940_v59 }
 0x63c   :  { %v9977_v31 = vpop.eup %9976  ;;  %9117 = vmatprep.mubr.msk.f32.mxu1 %vm987_vm1, %v5349_v60  ;;  %v5286_v34 = vmul.f32 0.5, %v5222_v37  ;;  %v5099_v43 = vmul.f32 0.7978846, %v5035_v36  ;;  %v5036_v29 = vadd.f32 %v4972_v56, %v14053_v61  ;;  %v4910_v11 = vmul.f32 %v4846_v44, %v14070_v39 }
 0x63d   :  { %v9979_v49 = vpop.eup %9978  ;;  %v4658_v10 = vmul.f32 %v9977_v31, %v13456_v3  ;;  %v4973_v19 = vmul.f32 0.044715, %v4909_v7  ;;  %v4847_v27 = vmul.f32 %v14087_v55, %v14087_v55  ;;  %v14105_v32 = vadd.f32 %v14049_v14, %v13921_v16 }
 0x63e   :  { %v5350_v35 = vmul.f32 %v5286_v34, %v13964_v21  ;;  %v5223_v30 = vadd.f32 1.0, %v9979_v49  ;;  %9988 = vtanh.f32 %v5099_v43  ;;  %v5100_v59 = vmul.f32 0.7978846, %v5036_v29 }
 0x63f   :  { %v9981_v57 = vpop.eup %9980  ;;  %v14096_v41 = vmul.f32 %v14020_v42, %v4658_v10  ;;  %v4974_v20 = vmul.f32 0.044715, %v4910_v11  ;;  %v5037_v4 = vadd.f32 %v4973_v19, %v14066_v62  ;;  %v4911_v21 = vmul.f32 %v4847_v27, %v14087_v55 }
 0x640   :  { %v9983_v3 = vpop.eup %9982  ;;  %9118 = vmatmul.mubr.msk.f32.gmra.mrb[108].mxu1 %vm987_vm1, %v5350_v35  ;;  %v5287_v46 = vmul.f32 0.5, %v5223_v30  ;;  %v5224_v63 = vadd.f32 1.0, %v9981_v57  ;;  %9990 = vtanh.f32 %v5100_v59  ;;  %v14115_v24 = vadd.f32 %v14049_v14, %v13970_v8 }
 0x641   :  { %v4657_v28 = vmul.f32 %v9983_v3, %v13477_v25  ;;  %v5038_v48 = vadd.f32 %v4974_v20, %v14070_v39  ;;  %v5101_v50 = vmul.f32 0.7978846, %v5037_v4  ;;  %v4975_v53 = vmul.f32 0.044715, %v4911_v21 }
 0x642   :  { %v5351_v12 = vmul.f32 %v5287_v46, %v13978_v23  ;;  %v5288_v13 = vmul.f32 0.5, %v5224_v63  ;;  %v9985_v6 = vpop.eup %9984  ;;  %v4848_v25 = vmul.f32 %v14105_v32, %v14105_v32  ;;  %v4849_v38 = vmul.f32 %v14115_v24, %v14115_v24 }
 0x643   :  { %v14109_v45 = vmul.f32 %v14020_v42, %v4657_v28  ;;  %v5102_v18 = vmul.f32 0.7978846, %v5038_v48  ;;  %v5225_v23 = vadd.f32 1.0, %v9985_v6  ;;  %9992 = vtanh.f32 %v5101_v50 }
 0x644   :  { %9120 = vmatprep.mubr.msk.f32.mxu1 %vm987_vm1, %v5351_v12  ;;  %v5352_v16 = vmul.f32 %v5288_v13, %v13983_v54  ;;  %v5039_v47 = vadd.f32 %v4975_v53, %v14087_v55  ;;  %v4912_v42 = vmul.f32 %v4848_v25, %v14105_v32  ;;  %v14125_v60 = vadd.f32 %v14049_v14, %v13954_v52 }
 0x645   :  { %9994 = vtanh.f32 %v5102_v18  ;;  %v9987_v8 = vpop.eup %9986  ;;  %v5289_v37 = vmul.f32 0.5, %v5225_v23  ;;  %v14130_v54 = vadd.f32 %v14049_v14, %v14003_v1  ;;  %v14134_v0 = vadd.f32 %v14049_v14, %v13987_v33 }
 0x646   :  { %9121 = vmatmul.mubr.msk.f32.gmra.mrb[110].mxu1 %vm987_vm1, %v5352_v16  ;;  %v5103_v17 = vmul.f32 0.7978846, %v5039_v47  ;;  %v5226_v36 = vadd.f32 1.0, %v9987_v8  ;;  %v4976_v56 = vmul.f32 0.044715, %v4912_v42  ;;  %v4913_v44 = vmul.f32 %v4849_v38, %v14115_v24 }
 0x647   :  { %v4850_v52 = vmul.f32 %v14125_v60, %v14125_v60  ;;  %v5353_v31 = vmul.f32 %v5289_v37, %v13999_v22  ;;  %v4851_v34 = vmul.f32 %v14130_v54, %v14130_v54  ;;  %v4852_v1 = vmul.f32 %v14134_v0, %v14134_v0 }
 0x648   :  { %9996 = vtanh.f32 %v5103_v17  ;;  %v9989_v7 = vpop.eup %9988  ;;  %v5290_v49 = vmul.f32 0.5, %v5226_v36  ;;  %v5040_v33 = vadd.f32 %v4976_v56, %v14105_v32  ;;  %v4977_v10 = vmul.f32 0.044715, %v4913_v44 }
 0x649   :  { %v4914_v43 = vmul.f32 %v4850_v52, %v14125_v60  ;;  %9123 = vmatprep.mubr.msk.f32.mxu1 %vm987_vm1, %v5353_v31  ;;  %v5227_v29 = vadd.f32 1.0, %v9989_v7  ;;  %v4915_v11 = vmul.f32 %v4851_v34, %v14130_v54  ;;  %v4916_v22 = vmul.f32 %v4852_v1, %v14134_v0 }
 0x64a   :  { %v14151_v35 = vadd.f32 %v14049_v14, %v14038_v40  ;;  %v9991_v30 = vpop.eup %9990  ;;  %v5354_v19 = vmul.f32 %v5290_v49, %v14014_v15  ;;  %v5104_v27 = vmul.f32 0.7978846, %v5040_v33  ;;  %v5041_v57 = vadd.f32 %v4977_v10, %v14115_v24  ;;  %v14203_v33 = vld [vmem:[%s14927_s3 + $0x6] ss:$0 sm:$0xff] }
 0x64b   :  { %v4978_v59 = vmul.f32 0.044715, %v4914_v43  ;;  %v5291_v20 = vmul.f32 0.5, %v5227_v29  ;;  %v5228_v3 = vadd.f32 1.0, %v9991_v30  ;;  %v4979_v46 = vmul.f32 0.044715, %v4915_v11 }
 0x64c   :  { %v4980_v63 = vmul.f32 0.044715, %v4916_v22  ;;  %9124 = vmatmul.mubr.msk.f32.gmra.mrb[112].mxu1 %vm987_vm1, %v5354_v19  ;;  %9998 = vtanh.f32 %v5104_v27  ;;  %v5105_v4 = vmul.f32 0.7978846, %v5041_v57  ;;  %v4853_v40 = vmul.f32 %v14151_v35, %v14151_v35  ;;  %v5955_v43 = vld [vmem:[%s14924_s0 + $0x208] sm:$0xff] }
 0x64d   :  { %v5042_v21 = vadd.f32 %v4978_v59, %v14125_v60  ;;  %v9993_v28 = vpop.eup %9992  ;;  %v5355_v15 = vmul.f32 %v5291_v20, %v14034_v26  ;;  %v5292_v48 = vmul.f32 0.5, %v5228_v3  ;;  %v5043_v12 = vadd.f32 %v4979_v46, %v14130_v54 }
 0x64e   :  { %v5044_v13 = vadd.f32 %v4980_v63, %v14134_v0  ;;  %v5229_v53 = vadd.f32 1.0, %v9993_v28  ;;  %10000 = vtanh.f32 %v5105_v4  ;;  %v4917_v18 = vmul.f32 %v4853_v40, %v14151_v35 }
 0x64f   :  { %v9995_v50 = vpop.eup %9994  ;;  %v5106_v6 = vmul.f32 0.7978846, %v5042_v21  ;;  %9126 = vmatprep.mubr.msk.f32.mxu1 %vm987_vm1, %v5355_v15  ;;  %v5356_v25 = vmul.f32 %v5292_v48, %v14053_v61  ;;  %v5107_v23 = vmul.f32 0.7978846, %v5043_v12  ;;  %v14167_v38 = vadd.f32 %v14049_v14, %v14023_v58 }
 0x650   :  { %v5230_v16 = vadd.f32 1.0, %v9995_v50  ;;  %v5108_v47 = vmul.f32 0.7978846, %v5044_v13  ;;  %v5293_v42 = vmul.f32 0.5, %v5229_v53  ;;  %v4981_v26 = vmul.f32 0.044715, %v4917_v18 }
 0x651   :  { %10002 = vtanh.f32 %v5106_v6  ;;  %9127 = vmatmul.mubr.msk.f32.gmra.mrb[114].mxu1 %vm987_vm1, %v5356_v25  ;;  %v14172_v17 = vadd.f32 %v14049_v14, %v14078_v9  ;;  %v14176_v61 = vadd.f32 %v14049_v14, %v14057_v51  ;;  %v4854_v52 = vmul.f32 %v14167_v38, %v14167_v38 }
 0x652   :  { %v9997_v8 = vpop.eup %9996  ;;  %v5294_v37 = vmul.f32 0.5, %v5230_v16  ;;  %10004 = vtanh.f32 %v5107_v23  ;;  %v5357_v36 = vmul.f32 %v5293_v42, %v14066_v62  ;;  %v5045_v58 = vadd.f32 %v4981_v26, %v14151_v35 }
 0x653   :  { %v5231_v56 = vadd.f32 1.0, %v9997_v8  ;;  %10006 = vtanh.f32 %v5108_v47  ;;  %v4855_v31 = vmul.f32 %v14172_v17, %v14172_v17  ;;  %v4856_v9 = vmul.f32 %v14176_v61, %v14176_v61 }
 0x654   :  { %v5358_v44 = vmul.f32 %v5294_v37, %v14070_v39  ;;  %9129 = vmatprep.mubr.msk.f32.mxu1 %vm987_vm1, %v5357_v36  ;;  %v5109_v34 = vmul.f32 0.7978846, %v5045_v58  ;;  %v14190_v62 = vadd.f32 %v14049_v14, %v14109_v45  ;;  %v14194_v39 = vadd.f32 %v14049_v14, %v14096_v41 }
 0x655   :  { %v5295_v51 = vmul.f32 0.5, %v5231_v56  ;;  %v4918_v1 = vmul.f32 %v4854_v52, %v14167_v38  ;;  %v4919_v7 = vmul.f32 %v4855_v31, %v14172_v17  ;;  %v4920_v49 = vmul.f32 %v4856_v9, %v14176_v61 }
 0x656   :  { %9130 = vmatmul.mubr.msk.f32.gmra.mrb[116].mxu1 %vm987_vm1, %v5358_v44  ;;  %v9999_v10 = vpop.eup %9998  ;;  %10008 = vtanh.f32 %v5109_v34  ;;  %v4857_v14 = vmul.f32 %v14190_v62, %v14190_v62  ;;  %v4858_v41 = vmul.f32 %v14194_v39, %v14194_v39  ;;  %v9056_v30 = vpop.f32.mrb[66].mxu1  ;;  %v5954_v44 = vld [vmem:[%s14924_s0 + $0x200] sm:$0xff] }
 0x657   :  { %v5359_v45 = vmul.f32 %v5295_v51, %v14087_v55  ;;  %v5232_v29 = vadd.f32 1.0, %v9999_v10  ;;  %v4982_v11 = vmul.f32 0.044715, %v4918_v1  ;;  %v4983_v22 = vmul.f32 0.044715, %v4919_v7  ;;  %v5635_v20 = vpop.f32.mrb[67].mxu1 }
 0x658   :  { %v10001_v19 = vpop.eup %10000  ;;  %v4984_v27 = vmul.f32 0.044715, %v4920_v49  ;;  %v4921_v55 = vmul.f32 %v4857_v14, %v14190_v62  ;;  %v4922_v57 = vmul.f32 %v4858_v41, %v14194_v39  ;;  %v5641_v59 = vadd.f32 %v9056_v30, %v14203_v33  ;;  %v5957_v49 = vld [vmem:[%s14924_s0 + $0x218] sm:$0xff] }
 0x659   :  { %9132 = vmatprep.mubr.msk.f32.mxu1 %vm987_vm1, %v5359_v45  ;;  %v5296_v3 = vmul.f32 0.5, %v5232_v29  ;;  %v5233_v46 = vadd.f32 1.0, %v10001_v19  ;;  %v5046_v63 = vadd.f32 %v4982_v11, %v14167_v38  ;;  %v5047_v4 = vadd.f32 %v4983_v22, %v14172_v17 }
 0x65a   :  { %v5048_v40 = vadd.f32 %v4984_v27, %v14176_v61  ;;  %v4985_v28 = vmul.f32 0.044715, %v4921_v55  ;;  %v4986_v15 = vmul.f32 0.044715, %v4922_v57  ;;  %v6019_v48 = vadd.f32 %v5955_v43, %v5641_v59 }
 0x65b   :  { %v10003_v21 = vpop.eup %10002  ;;  %v5360_v13 = vmul.f32 %v5296_v3, %v14105_v32  ;;  %v5297_v50 = vmul.f32 0.5, %v5233_v46  ;;  %v5110_v6 = vmul.f32 0.7978846, %v5046_v63  ;;  %v5111_v16 = vmul.f32 0.7978846, %v5047_v4 }
 0x65c   :  { %v10005_v12 = vpop.eup %10004  ;;  %v5234_v53 = vadd.f32 1.0, %v10003_v21  ;;  %v5112_v23 = vmul.f32 0.7978846, %v5048_v40  ;;  %v5049_v47 = vadd.f32 %v4985_v28, %v14190_v62  ;;  %v5050_v32 = vadd.f32 %v4986_v15, %v14194_v39 }
 0x65d   :  { %v10007_v18 = vpop.eup %10006  ;;  %v5235_v25 = vadd.f32 1.0, %v10005_v12  ;;  %9133 = vmatmul.mubr.msk.f32.gmra.mrb[118].mxu1 %vm987_vm1, %v5360_v13  ;;  %v5361_v42 = vmul.f32 %v5297_v50, %v14115_v24  ;;  %10010 = vtanh.f32 %v5110_v6  ;;  %v5636_v51 = vadd.f32 %v14203_v33, %v5635_v20 }
 0x65e   :  { %v5298_v26 = vmul.f32 0.5, %v5234_v53  ;;  %v5236_v8 = vadd.f32 1.0, %v10007_v18  ;;  %10012 = vtanh.f32 %v5111_v16  ;;  %v5113_v36 = vmul.f32 0.7978846, %v5049_v47  ;;  %v9059_v24 = vpop.f32.mrb[68].mxu1 }
 0x65f   :  { %v5299_v37 = vmul.f32 0.5, %v5235_v25  ;;  %9135 = vmatprep.mubr.msk.f32.mxu1 %vm987_vm1, %v5361_v42  ;;  %10014 = vtanh.f32 %v5112_v23  ;;  %v5114_v9 = vmul.f32 0.7978846, %v5050_v32  ;;  %v5645_v34 = vpop.f32.mrb[69].mxu1  ;;  %v5651_v7 = vadd.f32 %v9059_v24, %v14203_v33 }
 0x660   :  { %v5362_v56 = vmul.f32 %v5298_v26, %v14125_v60  ;;  %v5300_v58 = vmul.f32 0.5, %v5236_v8  ;;  %v10009_v52 = vpop.eup %10008  ;;  %10016 = vtanh.f32 %v5113_v36  ;;  %v5956_v60 = vld [vmem:[%s14924_s0 + $0x210] sm:$0xff]  ;;  %v6084_v10 = vsel %vm15180_vm3, %v6019_v48, -inf }
 0x661   :  { %v5363_v31 = vmul.f32 %v5299_v37, %v14130_v54  ;;  %v5237_v1 = vadd.f32 1.0, %v10009_v52  ;;  %v5646_v54 = vadd.f32 %v14203_v33, %v5645_v34  ;;  %10018 = vtanh.f32 %v5114_v9 }
 0x662   :  { %9136 = vmatmul.mubr.msk.f32.gmra.mrb[120].mxu1 %vm987_vm1, %v5362_v56  ;;  %v6018_v45 = vadd.f32 %v5954_v44, %v5636_v51  ;;  %v5364_v14 = vmul.f32 %v5300_v58, %v14134_v0  ;;  %v6021_v11 = vadd.f32 %v5957_v49, %v5651_v7  ;;  %v5961_v58 = vld [vmem:[%s14924_s0 + $0x238] sm:$0xff]  ;;  %v5963_v7 = vld [vmem:[%s14924_s0 + $0x248] sm:$0xff] }
 0x663   :  { %9138 = vmatprep.mubr.msk.f32.mxu1 %vm987_vm1, %v5363_v31  ;;  %v5301_v41 = vmul.f32 0.5, %v5237_v1  ;;  %v6020_v43 = vadd.f32 %v5956_v60, %v5646_v54 }
 0x664   :  { %v6083_v29 = vsel %vm15180_vm3, %v6018_v45, -inf  ;;  %v6088_v0 = vsel %vm15180_vm3, %v6021_v11, -inf }
 0x665   :  { %v5365_v22 = vmul.f32 %v5301_v41, %v14151_v35  ;;  %v6085_v30 = vmax.f32 %v6083_v29, %v6084_v10  ;;  %v6086_v19 = vsel %vm15180_vm3, %v6020_v43, -inf  ;;  %v5962_v10 = vld [vmem:[%s14924_s0 + $0x240] sm:$0xff] }
 0x666   :  { %9139 = vmatmul.mubr.msk.f32.gmra.mrb[122].mxu1 %vm987_vm1, %v5364_v14 }
 0x667   :  { %v10011_v27 = vpop.eup %10010  ;;  %9141 = vmatprep.mubr.msk.f32.mxu1 %vm987_vm1, %v5365_v22  ;;  %v6087_v55 = vmax.f32 %v6085_v30, %v6086_v19  ;;  %v5965_v19 = vld [vmem:[%s14924_s0 + $0x258] sm:$0xff] }
 0x668   :  { %v10013_v57 = vpop.eup %10012  ;;  %v5238_v59 = vadd.f32 1.0, %v10011_v27 }
 0x669   :  { %v10015_v20 = vpop.eup %10014  ;;  %v5239_v3 = vadd.f32 1.0, %v10013_v57  ;;  %v6089_v46 = vmax.f32 %v6087_v55, %v6088_v0  ;;  %v5964_v55 = vld [vmem:[%s14924_s0 + $0x250] sm:$0xff] }
 0x66a   :  { %v10017_v63 = vpop.eup %10016  ;;  %v5302_v4 = vmul.f32 0.5, %v5238_v59  ;;  %v5240_v21 = vadd.f32 1.0, %v10015_v20 }
 0x66b   :  { %v5303_v40 = vmul.f32 0.5, %v5239_v3  ;;  %v5241_v28 = vadd.f32 1.0, %v10017_v63  ;;  %v10019_v35 = vpop.eup %10018 }
 0x66c   :  { %v5366_v15 = vmul.f32 %v5302_v4, %v14167_v38  ;;  %v5304_v48 = vmul.f32 0.5, %v5240_v21  ;;  %v5242_v50 = vadd.f32 1.0, %v10019_v35  ;;  %v5959_v38 = vld [vmem:[%s14924_s0 + $0x228] sm:$0xff] }
 0x66d   :  { %v5367_v12 = vmul.f32 %v5303_v40, %v14172_v17  ;;  %v5305_v13 = vmul.f32 0.5, %v5241_v28  ;;  %v5958_v17 = vld [vmem:[%s14924_s0 + $0x220] sm:$0xff]  ;;  %v5967_v4 = vld [vmem:[%s14924_s0 + $0x268] sm:$0xff] }
 0x66e   :  { %9142 = vmatmul.mubr.msk.f32.gmra.mrb[124].mxu1 %vm987_vm1, %v5366_v15  ;;  %v9062_v6 = vpop.f32.mrb[70].mxu1  ;;  %v5368_v18 = vmul.f32 %v5304_v48, %v14176_v61  ;;  %v5306_v25 = vmul.f32 0.5, %v5242_v50  ;;  %v5966_v40 = vld [vmem:[%s14924_s0 + $0x260] sm:$0xff] }
 0x66f   :  { %9144 = vmatprep.mubr.msk.f32.mxu1 %vm987_vm1, %v5367_v12  ;;  %v5369_v53 = vmul.f32 %v5305_v13, %v14190_v62  ;;  %v5661_v16 = vadd.f32 %v9062_v6, %v14203_v33  ;;  %v5655_v23 = vpop.f32.mrb[71].mxu1 }
 0x670   :  { %v5656_v47 = vadd.f32 %v14203_v33, %v5655_v23  ;;  %v5370_v42 = vmul.f32 %v5306_v25, %v14194_v39  ;;  %v5960_v39 = vld [vmem:[%s14924_s0 + $0x230] sm:$0xff] }
 0x671   :  { %v6023_v62 = vadd.f32 %v5959_v38, %v5661_v16  ;;  %v5969_v38 = vld [vmem:[%s14924_s0 + $0x278] sm:$0xff] }
 0x672   :  { %9145 = vmatmul.mubr.msk.f32.gmra.mrb[126].mxu1 %vm987_vm1, %v5368_v18  ;;  %v6022_v61 = vadd.f32 %v5958_v17, %v5656_v47  ;;  %v5968_v17 = vld [vmem:[%s14924_s0 + $0x270] sm:$0xff] }
 0x673   :  { %9147 = vmatprep.mubr.msk.f32.mxu1 %vm987_vm1, %v5369_v53  ;;  %v6092_v37 = vsel %vm15180_vm3, %v6023_v62, -inf }
 0x674   :  { %v6090_v26 = vsel %vm15180_vm3, %v6022_v61, -inf }
 0x675   :  { %v6091_v8 = vmax.f32 %v6089_v46, %v6090_v26 }
 0x676   :  { %9148 = vmatmul.mubr.msk.f32.gmra.mrb[128].mxu1 %vm987_vm1, %v5370_v42 }
 0x677   :  { %v6093_v36 = vmax.f32 %v6091_v8, %v6092_v37 }
 0x679   :  { %v9065_v32 = vpop.f32.mrb[72].mxu1 }
 0x67a   :  { %v5671_v56 = vadd.f32 %v9065_v32, %v14203_v33  ;;  %v5665_v44 = vpop.f32.mrb[73].mxu1 }
 0x67b   :  { %v5666_v24 = vadd.f32 %v14203_v33, %v5665_v44 }
 0x67c   :  { %v6025_v52 = vadd.f32 %v5961_v58, %v5671_v56 }
 0x67d   :  { %v6024_v31 = vadd.f32 %v5960_v39, %v5666_v24  ;;  %v5971_v24 = vld [vmem:[%s14924_s0 + $0x288] sm:$0xff] }
 0x67e   :  { %v6096_v34 = vsel %vm15180_vm3, %v6025_v52, -inf }
 0x67f   :  { %v6094_v9 = vsel %vm15180_vm3, %v6024_v31, -inf }
 0x680   :  { %v6095_v51 = vmax.f32 %v6093_v36, %v6094_v9  ;;  %v5970_v9 = vld [vmem:[%s14924_s0 + $0x280] sm:$0xff] }
 0x682   :  { %v6097_v60 = vmax.f32 %v6095_v51, %v6096_v34 }
 0x684   :  { %v9068_v1 = vpop.f32.mrb[74].mxu1  ;;  %v6098_v25 = vrot.slane %v6097_v60, 4 }
 0x685   :  { %v5681_v49 = vadd.f32 %v9068_v1, %v14203_v33  ;;  %v5675_v54 = vpop.f32.mrb[75].mxu1 }
 0x686   :  { %v5676_v45 = vadd.f32 %v14203_v33, %v5675_v54  ;;  %v6099_v42 = vmax.f32 %v6097_v60, %v6098_v25 }
 0x687   :  { %v6027_v14 = vadd.f32 %v5963_v7, %v5681_v49 }
 0x688   :  { %v6026_v41 = vadd.f32 %v5962_v10, %v5676_v45  ;;  %v6100_v36 = vrot.slane %v6099_v42, 2 }
 0x689   :  { %v6105_v43 = vsel %vm15180_vm3, %v6027_v14, -inf }
 0x68a   :  { %v6104_v29 = vsel %vm15180_vm3, %v6026_v41, -inf  ;;  %v6101_v58 = vmax.f32 %v6099_v42, %v6100_v36 }
 0x68b   :  { %v6106_v11 = vmax.f32 %v6104_v29, %v6105_v43 }
 0x68c   :  { %v6102_v1 = vrot.slane %v6101_v58, 1 }
 0x68e   :  { %v6103_v41 = vmax.f32 %v6101_v58, %v6102_v1 }
 0x68f   :  { %v9071_v22 = vpop.f32.mrb[76].mxu1 }
 0x690   :  { %v5691_v30 = vadd.f32 %v9071_v22, %v14203_v33  ;;  %v5685_v27 = vpop.f32.mrb[77].mxu1 }
 0x691   :  { %v5686_v57 = vadd.f32 %v14203_v33, %v5685_v27  ;;  %v5972_v27 = vld [vmem:[%s14924_s0 + $0x290] sm:$0xff] }
 0x692   :  { %v6029_v59 = vadd.f32 %v5965_v19, %v5691_v30  ;;  %v5973_v30 = vld [vmem:[%s14924_s0 + $0x298] sm:$0xff] }
 0x693   :  { %v6028_v0 = vadd.f32 %v5964_v55, %v5686_v57 }
 0x694   :  { %v6109_v28 = vsel %vm15180_vm3, %v6029_v59, -inf }
 0x695   :  { %v6107_v20 = vsel %vm15180_vm3, %v6028_v0, -inf  ;;  %v9074_v3 = vpop.f32.mrb[78].mxu1 }
 0x696   :  { %v6108_v46 = vmax.f32 %v6106_v11, %v6107_v20  ;;  %v5701_v63 = vadd.f32 %v9074_v3, %v14203_v33  ;;  %v5695_v21 = vpop.f32.mrb[79].mxu1 }
 0x697   :  { %v5696_v35 = vadd.f32 %v14203_v33, %v5695_v21 }
 0x698   :  { %v6110_v15 = vmax.f32 %v6108_v46, %v6109_v28  ;;  %v6031_v48 = vadd.f32 %v5967_v4, %v5701_v63  ;;  %v5975_v4 = vld [vmem:[%s14924_s0 + $0x2a8] sm:$0xff] }
 0x699   :  { %v6030_v12 = vadd.f32 %v5966_v40, %v5696_v35  ;;  %v5974_v40 = vld [vmem:[%s14924_s0 + $0x2a0] sm:$0xff] }
 0x69a   :  { %v6113_v53 = vsel %vm15180_vm3, %v6031_v48, -inf }
 0x69b   :  { %v6111_v13 = vsel %vm15180_vm3, %v6030_v12, -inf }
 0x69c   :  { %v6112_v50 = vmax.f32 %v6110_v15, %v6111_v13 }
 0x69e   :  { %v6114_v6 = vmax.f32 %v6112_v50, %v6113_v53 }
 0x6a0   :  { %v9077_v18 = vpop.f32.mrb[80].mxu1 }
 0x6a1   :  { %v5711_v16 = vadd.f32 %v9077_v18, %v14203_v33  ;;  %v5705_v23 = vpop.f32.mrb[81].mxu1  ;;  %v5977_v18 = vld [vmem:[%s14924_s0 + $0x2b8] sm:$0xff] }
 0x6a2   :  { %v5706_v47 = vadd.f32 %v14203_v33, %v5705_v23 }
 0x6a3   :  { %v6033_v62 = vadd.f32 %v5969_v38, %v5711_v16  ;;  %v5976_v16 = vld [vmem:[%s14924_s0 + $0x2b0] sm:$0xff] }
 0x6a4   :  { %v6032_v61 = vadd.f32 %v5968_v17, %v5706_v47 }
 0x6a5   :  { %v6117_v37 = vsel %vm15180_vm3, %v6033_v62, -inf }
 0x6a6   :  { %v6115_v26 = vsel %vm15180_vm3, %v6032_v61, -inf }
 0x6a7   :  { %v6116_v8 = vmax.f32 %v6114_v6, %v6115_v26 }
 0x6a9   :  { %v6118_v32 = vmax.f32 %v6116_v8, %v6117_v37  ;;  %v5979_v37 = vld [vmem:[%s14924_s0 + $0x2c8] sm:$0xff] }
 0x6ab   :  { %v6119_v56 = vrot.slane %v6118_v32, 4 }
 0x6ac   :  { %v9080_v39 = vpop.f32.mrb[82].mxu1 }
 0x6ad   :  { %v6120_v44 = vmax.f32 %v6118_v32, %v6119_v56  ;;  %v5721_v52 = vadd.f32 %v9080_v39, %v14203_v33  ;;  %v5715_v31 = vpop.f32.mrb[83].mxu1  ;;  %v5978_v56 = vld [vmem:[%s14924_s0 + $0x2c0] sm:$0xff] }
 0x6ae   :  { %v5716_v34 = vadd.f32 %v14203_v33, %v5715_v31 }
 0x6af   :  { %v6121_v51 = vrot.slane %v6120_v44, 2  ;;  %v6035_v60 = vadd.f32 %v5971_v24, %v5721_v52 }
 0x6b0   :  { %v6034_v49 = vadd.f32 %v5970_v9, %v5716_v34 }
 0x6b1   :  { %v6122_v7 = vmax.f32 %v6120_v44, %v6121_v51  ;;  %v6126_v54 = vsel %vm15180_vm3, %v6035_v60, -inf }
 0x6b2   :  { %v6125_v45 = vsel %vm15180_vm3, %v6034_v49, -inf  ;;  %v5981_v49 = vld [vmem:[%s14924_s0 + $0x2d8] sm:$0xff] }
 0x6b3   :  { %v6123_v10 = vrot.slane %v6122_v7, 1  ;;  %v6127_v14 = vmax.f32 %v6125_v45, %v6126_v54 }
 0x6b5   :  { %v6124_v43 = vmax.f32 %v6122_v7, %v6123_v10  ;;  %v5980_v10 = vld [vmem:[%s14924_s0 + $0x2d0] sm:$0xff] }
 0x6b7   :  { %v14330_v29 = vsel %vm6336_vm4, %v6124_v43, %v6103_v41  ;;  %vm14638_vm4 = vmpackc.low %vm6653_vm14, %vm10115_vm15 }
 0x6b9   :  { %v9083_v11 = vpop.f32.mrb[84].mxu1 }
 0x6ba   :  { %v5731_v22 = vadd.f32 %v9083_v11, %v14203_v33  ;;  %v5725_v19 = vpop.f32.mrb[85].mxu1 }
 0x6bb   :  { %v5726_v55 = vadd.f32 %v14203_v33, %v5725_v19 }
 0x6bc   :  { %v6037_v57 = vadd.f32 %v5973_v30, %v5731_v22 }
 0x6bd   :  { %v6036_v59 = vadd.f32 %v5972_v27, %v5726_v55 }
 0x6be   :  { %v6130_v46 = vsel %vm15180_vm3, %v6037_v57, -inf }
 0x6bf   :  { %v6128_v0 = vsel %vm15180_vm3, %v6036_v59, -inf  ;;  %v9086_v3 = vpop.f32.mrb[86].mxu1  ;;  %v5983_v59 = vld [vmem:[%s14924_s0 + $0x2e8] sm:$0xff] }
 0x6c0   :  { %v6129_v20 = vmax.f32 %v6127_v14, %v6128_v0  ;;  %v5741_v63 = vadd.f32 %v9086_v3, %v14203_v33  ;;  %v5735_v21 = vpop.f32.mrb[87].mxu1 }
 0x6c1   :  { %v5736_v28 = vadd.f32 %v14203_v33, %v5735_v21 }
 0x6c2   :  { %v6131_v35 = vmax.f32 %v6129_v20, %v6130_v46  ;;  %v6039_v15 = vadd.f32 %v5975_v4, %v5741_v63  ;;  %v5982_v20 = vld [vmem:[%s14924_s0 + $0x2e0] sm:$0xff] }
 0x6c3   :  { %v6038_v48 = vadd.f32 %v5974_v40, %v5736_v28 }
 0x6c4   :  { %v6134_v53 = vsel %vm15180_vm3, %v6039_v15, -inf  ;;  %v5985_v15 = vld [vmem:[%s14924_s0 + $0x2f8] sm:$0xff] }
 0x6c5   :  { %v6132_v12 = vsel %vm15180_vm3, %v6038_v48, -inf }
 0x6c6   :  { %v6133_v13 = vmax.f32 %v6131_v35, %v6132_v12  ;;  %v5984_v12 = vld [vmem:[%s14924_s0 + $0x2f0] sm:$0xff] }
 0x6c7   :  { %v9089_v50 = vpop.f32.mrb[88].mxu1 }
 0x6c8   :  { %v5751_v6 = vadd.f32 %v9089_v50, %v14203_v33  ;;  %v5745_v25 = vpop.f32.mrb[89].mxu1  ;;  %v6135_v23 = vmax.f32 %v6133_v13, %v6134_v53 }
 0x6c9   :  { %v5746_v38 = vadd.f32 %v14203_v33, %v5745_v25 }
 0x6ca   :  { %v6041_v17 = vadd.f32 %v5977_v18, %v5751_v6 }
 0x6cb   :  { %v6040_v47 = vadd.f32 %v5976_v16, %v5746_v38 }
 0x6cc   :  { %v6138_v42 = vsel %vm15180_vm3, %v6041_v17, -inf }
 0x6cd   :  { %v6136_v62 = vsel %vm15180_vm3, %v6040_v47, -inf }
 0x6ce   :  { %v6137_v61 = vmax.f32 %v6135_v23, %v6136_v62  ;;  %v5987_v23 = vld [vmem:[%s14924_s0 + $0x308] sm:$0xff] }
 0x6cf   :  { %v9092_v8 = vpop.f32.mrb[90].mxu1 }
 0x6d0   :  { %v6139_v26 = vmax.f32 %v6137_v61, %v6138_v42  ;;  %v5761_v36 = vadd.f32 %v9092_v8, %v14203_v33  ;;  %v5755_v32 = vpop.f32.mrb[91].mxu1  ;;  %v5986_v61 = vld [vmem:[%s14924_s0 + $0x300] sm:$0xff] }
 0x6d1   :  { %v5756_v44 = vadd.f32 %v14203_v33, %v5755_v32 }
 0x6d2   :  { %v6140_v58 = vrot.slane %v6139_v26, 4  ;;  %v6043_v39 = vadd.f32 %v5979_v37, %v5761_v36 }
 0x6d3   :  { %v6042_v52 = vadd.f32 %v5978_v56, %v5756_v44 }
 0x6d4   :  { %v6141_v24 = vmax.f32 %v6139_v26, %v6140_v58  ;;  %v6147_v31 = vsel %vm15180_vm3, %v6043_v39, -inf }
 0x6d5   :  { %v6146_v51 = vsel %vm15180_vm3, %v6042_v52, -inf }
 0x6d6   :  { %v6142_v9 = vrot.slane %v6141_v24, 2  ;;  %v6148_v34 = vmax.f32 %v6146_v51, %v6147_v31  ;;  %v5989_v51 = vld [vmem:[%s14924_s0 + $0x318] sm:$0xff] }
 0x6d7   :  { %v9095_v60 = vpop.f32.mrb[92].mxu1 }
 0x6d8   :  { %v6143_v1 = vmax.f32 %v6141_v24, %v6142_v9  ;;  %v5771_v7 = vadd.f32 %v9095_v60, %v14203_v33  ;;  %v5765_v54 = vpop.f32.mrb[93].mxu1  ;;  %v8354_v24 = vld [vmem:[%s14927_s3 + $0x7] ss:$0 sm:$0xff]  ;;  %v5988_v60 = vld [vmem:[%s14924_s0 + $0x310] sm:$0xff] }
 0x6d9   :  { %v5766_v45 = vadd.f32 %v14203_v33, %v5765_v54 }
 0x6da   :  { %v6144_v14 = vrot.slane %v6143_v1, 1  ;;  %v6045_v41 = vadd.f32 %v5981_v49, %v5771_v7 }
 0x6db   :  { %v6044_v43 = vadd.f32 %v5980_v10, %v5766_v45 }
 0x6dc   :  { %v6145_v11 = vmax.f32 %v6143_v1, %v6144_v14  ;;  %v6151_v27 = vsel %vm15180_vm3, %v6045_v41, -inf }
 0x6dd   :  { %v6149_v22 = vsel %vm15180_vm3, %v6044_v43, -inf }
 0x6de   :  { %v6150_v30 = vmax.f32 %v6148_v34, %v6149_v22  ;;  %v14382_v19 = vsel %vm6338_vm5, %v6145_v11, %v14330_v29 }
 0x6df   :  { %v9098_v55 = vpop.f32.mrb[94].mxu1 }
 0x6e0   :  { %v5781_v57 = vadd.f32 %v9098_v55, %v14203_v33  ;;  %v5775_v0 = vpop.f32.mrb[95].mxu1  ;;  %v6152_v3 = vmax.f32 %v6150_v30, %v6151_v27  ;;  %v5991_v55 = vld [vmem:[%s14924_s0 + $0x328] sm:$0xff] }
 0x6e1   :  { %v5776_v46 = vadd.f32 %v14203_v33, %v5775_v0 }
 0x6e2   :  { %v6047_v63 = vadd.f32 %v5983_v59, %v5781_v57  ;;  %v5990_v59 = vld [vmem:[%s14924_s0 + $0x320] sm:$0xff] }
 0x6e3   :  { %v6046_v29 = vadd.f32 %v5982_v20, %v5776_v46 }
 0x6e4   :  { %v6155_v40 = vsel %vm15180_vm3, %v6047_v63, -inf }
 0x6e5   :  { %v6153_v4 = vsel %vm15180_vm3, %v6046_v29, -inf }
 0x6e6   :  { %v6154_v21 = vmax.f32 %v6152_v3, %v6153_v4  ;;  %v6328_v53 = vpop.f32.mrb[126].mxu0 }
 0x6e7   :  { %v9101_v28 = vpop.f32.mrb[96].mxu1  ;;  %v9156_v25 = vpop.f32.mrb[127].mxu0  ;;  %v14426_v7 = vadd.f32 %v8354_v24, %v6328_v53 }
 0x6e8   :  { %v5791_v35 = vadd.f32 %v9101_v28, %v14203_v33  ;;  %v5785_v48 = vpop.f32.mrb[97].mxu1  ;;  %v6156_v13 = vmax.f32 %v6154_v21, %v6155_v40 }
 0x6e9   :  { %v5786_v50 = vadd.f32 %v14203_v33, %v5785_v48  ;;  %v6344_v41 = vrot.slane %v14426_v7, 4 }
 0x6ea   :  { %v6049_v6 = vadd.f32 %v5985_v15, %v5791_v35  ;;  %v5993_v15 = vld [vmem:[%s14924_s0 + $0x338] sm:$0xff] }
 0x6eb   :  { %v6048_v18 = vadd.f32 %v5984_v12, %v5786_v50 }
 0x6ec   :  { %v9104_v38 = vpop.f32.mrb[98].mxu1  ;;  %v6159_v42 = vsel %vm15180_vm3, %v6049_v6, -inf }
 0x6ed   :  { %v6157_v16 = vsel %vm15180_vm3, %v6048_v18, -inf  ;;  %v5801_v47 = vadd.f32 %v9104_v38, %v14203_v33  ;;  %v5795_v62 = vpop.f32.mrb[99].mxu1  ;;  %v5995_v38 = vld [vmem:[%s14924_s0 + $0x348] sm:$0xff] }
 0x6ee   :  { %v6158_v17 = vmax.f32 %v6156_v13, %v6157_v16  ;;  %v5796_v26 = vadd.f32 %v14203_v33, %v5795_v62  ;;  %v5994_v62 = vld [vmem:[%s14924_s0 + $0x340] sm:$0xff] }
 0x6ef   :  { %v6051_v37 = vadd.f32 %v5987_v23, %v5801_v47 }
 0x6f0   :  { %v6160_v8 = vmax.f32 %v6158_v17, %v6159_v42  ;;  %v6050_v36 = vadd.f32 %v5986_v61, %v5796_v26 }
 0x6f1   :  { %v6168_v56 = vsel %vm15180_vm3, %v6051_v37, -inf }
 0x6f2   :  { %v6161_v32 = vrot.slane %v6160_v8, 4  ;;  %v6167_v58 = vsel %vm15180_vm3, %v6050_v36, -inf }
 0x6f3   :  { %v6169_v39 = vmax.f32 %v6167_v58, %v6168_v56  ;;  %v9107_v52 = vpop.f32.mrb[100].mxu1  ;;  %v5997_v58 = vld [vmem:[%s14924_s0 + $0x358] sm:$0xff] }
 0x6f4   :  { %v6162_v44 = vmax.f32 %v6160_v8, %v6161_v32  ;;  %v5811_v9 = vadd.f32 %v9107_v52, %v14203_v33  ;;  %v5805_v34 = vpop.f32.mrb[101].mxu1 }
 0x6f5   :  { %v5806_v1 = vadd.f32 %v14203_v33, %v5805_v34 }
 0x6f6   :  { %v6163_v31 = vrot.slane %v6162_v44, 2  ;;  %v6053_v54 = vadd.f32 %v5989_v51, %v5811_v9 }
 0x6f7   :  { %v6052_v10 = vadd.f32 %v5988_v60, %v5806_v1  ;;  %v5999_v1 = vld [vmem:[%s14924_s0 + $0x368] sm:$0xff] }
 0x6f8   :  { %v6164_v49 = vmax.f32 %v6162_v44, %v6163_v31  ;;  %v6172_v30 = vsel %vm15180_vm3, %v6053_v54, -inf  ;;  %v5998_v54 = vld [vmem:[%s14924_s0 + $0x360] sm:$0xff] }
 0x6f9   :  { %v6170_v14 = vsel %vm15180_vm3, %v6052_v10, -inf }
 0x6fa   :  { %v6165_v45 = vrot.slane %v6164_v49, 1  ;;  %v6171_v43 = vmax.f32 %v6169_v39, %v6170_v14  ;;  %v5996_v39 = vld [vmem:[%s14924_s0 + $0x350] sm:$0xff] }
 0x6fb   :  { %v9110_v11 = vpop.f32.mrb[102].mxu1 }
 0x6fc   :  { %v6166_v22 = vmax.f32 %v6164_v49, %v6165_v45  ;;  %v5821_v27 = vadd.f32 %v9110_v11, %v14203_v33  ;;  %v5815_v57 = vpop.f32.mrb[103].mxu1  ;;  %v6173_v20 = vmax.f32 %v6171_v43, %v6172_v30 }
 0x6fd   :  { %v5816_v0 = vadd.f32 %v14203_v33, %v5815_v57 }
 0x6fe   :  { %v6341_v3 = vsel %vm6340_vm6, %v6166_v22, %v14382_v19  ;;  %v6055_v63 = vadd.f32 %v5991_v55, %v5821_v27  ;;  %v5992_v19 = vld [vmem:[%s14924_s0 + $0x330] sm:$0xff] }
 0x6ff   :  { %v14440_v46 = vsel %vm6356_vm7, %v6341_v3, %v6344_v41  ;;  %v6054_v29 = vadd.f32 %v5990_v59, %v5816_v0  ;;  %v6001_v59 = vld [vmem:[%s14924_s0 + $0x378] sm:$0xff] }
 0x700   :  { %v6176_v28 = vsel %vm15180_vm3, %v6055_v63, -inf }
 0x701   :  { %v6174_v4 = vsel %vm15180_vm3, %v6054_v29, -inf }
 0x702   :  { %v6175_v21 = vmax.f32 %v6173_v20, %v6174_v4  ;;  %v6000_v20 = vld [vmem:[%s14924_s0 + $0x370] sm:$0xff] }
 0x703   :  { %v9113_v40 = vpop.f32.mrb[104].mxu1 }
 0x704   :  { %v5831_v35 = vadd.f32 %v9113_v40, %v14203_v33  ;;  %v5825_v48 = vpop.f32.mrb[105].mxu1  ;;  %v6177_v13 = vmax.f32 %v6175_v21, %v6176_v28  ;;  %v6003_v28 = vld [vmem:[%s14924_s0 + $0x388] sm:$0xff] }
 0x705   :  { %v5826_v12 = vadd.f32 %v14203_v33, %v5825_v48 }
 0x706   :  { %v6057_v50 = vadd.f32 %v5993_v15, %v5831_v35 }
 0x707   :  { %v6056_v53 = vadd.f32 %v5992_v19, %v5826_v12  ;;  %v6002_v19 = vld [vmem:[%s14924_s0 + $0x380] sm:$0xff] }
 0x708   :  { %v6180_v25 = vsel %vm15180_vm3, %v6057_v50, -inf }
 0x709   :  { %v6178_v6 = vsel %vm15180_vm3, %v6056_v53, -inf }
 0x70a   :  { %v6179_v18 = vmax.f32 %v6177_v13, %v6178_v6 }
 0x70b   :  { %v9116_v16 = vpop.f32.mrb[106].mxu1 }
 0x70c   :  { %v6181_v23 = vmax.f32 %v6179_v18, %v6180_v25  ;;  %v5841_v17 = vadd.f32 %v9116_v16, %v14203_v33  ;;  %v5835_v47 = vpop.f32.mrb[107].mxu1 }
 0x70d   :  { %v5836_v61 = vadd.f32 %v14203_v33, %v5835_v47 }
 0x70e   :  { %v6059_v42 = vadd.f32 %v5995_v38, %v5841_v17  ;;  %v6182_v27 = vrot.slane %v6181_v23, 4  ;;  %v6005_v17 = vld [vmem:[%s14924_s0 + $0x398] sm:$0xff] }
 0x70f   :  { %v6058_v26 = vadd.f32 %v5994_v62, %v5836_v61  ;;  %v6004_v62 = vld [vmem:[%s14924_s0 + $0x390] sm:$0xff] }
 0x710   :  { %v6189_v8 = vsel %vm15180_vm3, %v6059_v42, -inf  ;;  %v6183_v21 = vmax.f32 %v6181_v23, %v6182_v27 }
 0x711   :  { %v6188_v37 = vsel %vm15180_vm3, %v6058_v26, -inf }
 0x712   :  { %v6190_v36 = vmax.f32 %v6188_v37, %v6189_v8  ;;  %v6184_v6 = vrot.slane %v6183_v21, 2 }
 0x713   :  { %v9119_v32 = vpop.f32.mrb[108].mxu1 }
 0x714   :  { %v5851_v56 = vadd.f32 %v9119_v32, %v14203_v33  ;;  %v5845_v44 = vpop.f32.mrb[109].mxu1  ;;  %v6185_v37 = vmax.f32 %v6183_v21, %v6184_v6  ;;  %v6011_v21 = vld [vmem:[%s14924_s0 + $0x3c8] sm:$0xff] }
 0x715   :  { %v5846_v24 = vadd.f32 %v14203_v33, %v5845_v44 }
 0x716   :  { %v6061_v52 = vadd.f32 %v5997_v58, %v5851_v56 }
 0x717   :  { %v6060_v31 = vadd.f32 %v5996_v39, %v5846_v24  ;;  %v6186_v24 = vrot.slane %v6185_v37, 1 }
 0x718   :  { %v6193_v10 = vsel %vm15180_vm3, %v6061_v52, -inf }
 0x719   :  { %v6191_v9 = vsel %vm15180_vm3, %v6060_v31, -inf  ;;  %v9122_v51 = vpop.f32.mrb[110].mxu1 }
 0x71a   :  { %v6192_v34 = vmax.f32 %v6190_v36, %v6191_v9  ;;  %v5861_v60 = vadd.f32 %v9122_v51, %v14203_v33  ;;  %v5855_v49 = vpop.f32.mrb[111].mxu1 }
 0x71b   :  { %v5856_v45 = vadd.f32 %v14203_v33, %v5855_v49 }
 0x71c   :  { %v6194_v14 = vmax.f32 %v6192_v34, %v6193_v10  ;;  %v6063_v41 = vadd.f32 %v5999_v1, %v5861_v60  ;;  %v6007_v34 = vld [vmem:[%s14924_s0 + $0x3a8] sm:$0xff]  ;;  %v6006_v1 = vld [vmem:[%s14924_s0 + $0x3a0] sm:$0xff] }
 0x71d   :  { %v6062_v43 = vadd.f32 %v5998_v54, %v5856_v45 }
 0x71e   :  { %v6197_v55 = vsel %vm15180_vm3, %v6063_v41, -inf }
 0x71f   :  { %v6195_v11 = vsel %vm15180_vm3, %v6062_v43, -inf  ;;  %v9125_v30 = vpop.f32.mrb[112].mxu1  ;;  %v6187_v43 = vmax.f32 %v6185_v37, %v6186_v24  ;;  %v6014_v24 = vld [vmem:[%s14924_s0 + $0x3e0] sm:$0xff] }
 0x720   :  { %v6196_v22 = vmax.f32 %v6194_v14, %v6195_v11  ;;  %v5871_v57 = vadd.f32 %v9125_v30, %v14203_v33  ;;  %v5865_v0 = vpop.f32.mrb[113].mxu1  ;;  %v6009_v30 = vld [vmem:[%s14924_s0 + $0x3b8] sm:$0xff] }
 0x721   :  { %v5866_v3 = vadd.f32 %v14203_v33, %v5865_v0 }
 0x722   :  { %v6198_v63 = vmax.f32 %v6196_v22, %v6197_v55  ;;  %v6065_v29 = vadd.f32 %v6001_v59, %v5871_v57  ;;  %v6008_v55 = vld [vmem:[%s14924_s0 + $0x3b0] sm:$0xff] }
 0x723   :  { %v6064_v4 = vadd.f32 %v6000_v20, %v5866_v3 }
 0x724   :  { %v9128_v40 = vpop.f32.mrb[114].mxu1  ;;  %v6201_v50 = vsel %vm15180_vm3, %v6065_v29, -inf }
 0x725   :  { %v6199_v35 = vsel %vm15180_vm3, %v6064_v4, -inf  ;;  %v5881_v15 = vadd.f32 %v9128_v40, %v14203_v33  ;;  %v5875_v48 = vpop.f32.mrb[115].mxu1 }
 0x726   :  { %v6200_v12 = vmax.f32 %v6198_v63, %v6199_v35  ;;  %v5876_v13 = vadd.f32 %v14203_v33, %v5875_v48 }
 0x727   :  { %v6067_v53 = vadd.f32 %v6003_v28, %v5881_v15  ;;  %v6010_v15 = vld [vmem:[%s14924_s0 + $0x3c0] sm:$0xff] }
 0x728   :  { %v6202_v18 = vmax.f32 %v6200_v12, %v6201_v50  ;;  %v6066_v25 = vadd.f32 %v6002_v19, %v5876_v13 }
 0x729   :  { %v9131_v16 = vpop.f32.mrb[116].mxu1  ;;  %v6210_v38 = vsel %vm15180_vm3, %v6067_v53, -inf }
 0x72a   :  { %v5891_v23 = vadd.f32 %v9131_v16, %v14203_v33  ;;  %v5885_v47 = vpop.f32.mrb[117].mxu1  ;;  %v6203_v61 = vrot.slane %v6202_v18, 4  ;;  %v6209_v42 = vsel %vm15180_vm3, %v6066_v25, -inf }
 0x72b   :  { %v5886_v26 = vadd.f32 %v14203_v33, %v5885_v47  ;;  %v6211_v8 = vmax.f32 %v6209_v42, %v6210_v38  ;;  %v6012_v42 = vld [vmem:[%s14924_s0 + $0x3d0] sm:$0xff] }
 0x72c   :  { %v6204_v36 = vmax.f32 %v6202_v18, %v6203_v61  ;;  %v6069_v32 = vadd.f32 %v6005_v17, %v5891_v23 }
 0x72d   :  { %v6068_v56 = vadd.f32 %v6004_v62, %v5886_v26  ;;  %v6013_v62 = vld [vmem:[%s14924_s0 + $0x3d8] sm:$0xff] }
 0x72e   :  { %v6205_v58 = vrot.slane %v6204_v36, 2  ;;  %v6214_v31 = vsel %vm15180_vm3, %v6069_v32, -inf }
 0x72f   :  { %v6212_v44 = vsel %vm15180_vm3, %v6068_v56, -inf }
 0x730   :  { %v6213_v39 = vmax.f32 %v6211_v8, %v6212_v44  ;;  %v6206_v52 = vmax.f32 %v6204_v36, %v6205_v58  ;;  %v9134_v9 = vpop.f32.mrb[118].mxu1  ;;  %v6015_v44 = vld [vmem:[%s14924_s0 + $0x3e8] sm:$0xff] }
 0x731   :  { %v5901_v51 = vadd.f32 %v9134_v9, %v14203_v33  ;;  %v5895_v60 = vpop.f32.mrb[119].mxu1 }
 0x732   :  { %v6215_v49 = vmax.f32 %v6213_v39, %v6214_v31  ;;  %v6207_v54 = vrot.slane %v6206_v52, 1  ;;  %v5896_v10 = vadd.f32 %v14203_v33, %v5895_v60 }
 0x733   :  { %v6071_v45 = vadd.f32 %v6007_v34, %v5901_v51 }
 0x734   :  { %v6070_v14 = vadd.f32 %v6006_v1, %v5896_v10  ;;  %v6208_v11 = vmax.f32 %v6206_v52, %v6207_v54 }
 0x735   :  { %v9137_v41 = vpop.f32.mrb[120].mxu1  ;;  %v6218_v3 = vsel %vm15180_vm3, %v6071_v45, -inf }
 0x736   :  { %v5911_v22 = vadd.f32 %v9137_v41, %v14203_v33  ;;  %v5905_v27 = vpop.f32.mrb[121].mxu1  ;;  %v6216_v57 = vsel %vm15180_vm3, %v6070_v14, -inf  ;;  %v6351_v0 = vsel %vm6350_vm8, %v6208_v11, %v6187_v43  ;;  %v6017_v14 = vld [vmem:[%s14924_s0 + $0x3f8] sm:$0xff]  ;;  %v6016_v43 = vld [vmem:[%s14924_s0 + $0x3f0] sm:$0xff] }
 0x737   :  { %v5906_v59 = vadd.f32 %v14203_v33, %v5905_v27  ;;  %v6217_v20 = vmax.f32 %v6215_v49, %v6216_v57 }
 0x738   :  { %v6073_v63 = vadd.f32 %v6009_v30, %v5911_v22 }
 0x739   :  { %v6072_v29 = vadd.f32 %v6008_v55, %v5906_v59  ;;  %v9140_v4 = vpop.f32.mrb[122].mxu1  ;;  %v6219_v40 = vmax.f32 %v6217_v20, %v6218_v3 }
 0x73a   :  { %v5921_v28 = vadd.f32 %v9140_v4, %v14203_v33  ;;  %v5915_v35 = vpop.f32.mrb[123].mxu1  ;;  %v6222_v50 = vsel %vm15180_vm3, %v6073_v63, -inf }
 0x73b   :  { %v6220_v48 = vsel %vm15180_vm3, %v6072_v29, -inf  ;;  %v5916_v19 = vadd.f32 %v14203_v33, %v5915_v35 }
 0x73c   :  { %v6221_v12 = vmax.f32 %v6219_v40, %v6220_v48  ;;  %v6075_v13 = vadd.f32 %v6011_v21, %v5921_v28 }
 0x73d   :  { %v6074_v53 = vadd.f32 %v6010_v15, %v5916_v19 }
 0x73e   :  { %v6223_v6 = vmax.f32 %v6221_v12, %v6222_v50  ;;  %v6231_v18 = vsel %vm15180_vm3, %v6075_v13, -inf  ;;  %v6404_v12 = vld [vmem:[%s14926_s2 + $0x40] sm:$0xff]  ;;  %v6405_v13 = vld [vmem:[%s14926_s2 + $0x48] sm:$0xff]  ;;  %v6406_v50 = vld [vmem:[%s14926_s2 + $0x50] sm:$0xff] }
 0x73f   :  { %v6230_v25 = vsel %vm15180_vm3, %v6074_v53, -inf  ;;  %v9321_v53 = vpack.c.bf16 %v6405_v13, %v6404_v12 }
 0x740   :  { %v6224_v16 = vrot.slane %v6223_v6, 4  ;;  %v6232_v38 = vmax.f32 %v6230_v25, %v6231_v18 }
 0x741   :  { %v9143_v17 = vpop.f32.mrb[124].mxu1  ;;  %9322 = vmatprep.subr.bf16.mxu1 %v9321_v53 }
 0x742   :  { %v6225_v23 = vmax.f32 %v6223_v6, %v6224_v16  ;;  %v5931_v47 = vadd.f32 %v9143_v17, %v14203_v33  ;;  %v5925_v61 = vpop.f32.mrb[125].mxu1  ;;  %9324 = vmatpush3.bf16.msra.mxu1 %v9321_v53 }
 0x743   :  { %v5926_v8 = vadd.f32 %v14203_v33, %v5925_v61 }
 0x744   :  { %v6226_v26 = vrot.slane %v6225_v23, 2  ;;  %v6077_v36 = vadd.f32 %v6013_v62, %v5931_v47 }
 0x745   :  { %v6076_v32 = vadd.f32 %v6012_v42, %v5926_v8  ;;  %v9146_v56 = vpop.f32.mrb[126].mxu1 }
 0x746   :  { %v6227_v37 = vmax.f32 %v6225_v23, %v6226_v26  ;;  %v5941_v58 = vadd.f32 %v9146_v56, %v14203_v33  ;;  %v5935_v39 = vpop.f32.mrb[127].mxu1  ;;  %v6235_v34 = vsel %vm15180_vm3, %v6077_v36, -inf }
 0x747   :  { %v6233_v52 = vsel %vm15180_vm3, %v6076_v32, -inf  ;;  %v5936_v31 = vadd.f32 %v14203_v33, %v5935_v39  ;;  %v8356_v32 = vld [vmem:[%s14927_s3 + $0x8] ss:$0 sm:$0xff] }
 0x748   :  { %v6228_v9 = vrot.slane %v6227_v37, 1  ;;  %v6234_v51 = vmax.f32 %v6232_v38, %v6233_v52  ;;  %v6079_v60 = vadd.f32 %v6015_v44, %v5941_v58  ;;  %v8357_v58 = vld [vmem:[%s14927_s3 + $0x9] ss:$0 sm:$0xff] }
 0x749   :  { %v6078_v1 = vadd.f32 %v6014_v24, %v5936_v31  ;;  %v9149_v49 = vpop.f32.mrb[128].mxu1 }
 0x74a   :  { %v6229_v54 = vmax.f32 %v6227_v37, %v6228_v9  ;;  %v6236_v10 = vmax.f32 %v6234_v51, %v6235_v34  ;;  %v5951_v45 = vadd.f32 %v9149_v49, %v14203_v33  ;;  %v5945_v41 = vpop.f32.mrb[129].mxu1  ;;  %v6239_v57 = vsel %vm15180_vm3, %v6079_v60, -inf }
 0x74b   :  { %v6237_v11 = vsel %vm15180_vm3, %v6078_v1, -inf  ;;  %v5946_v22 = vadd.f32 %v14203_v33, %v5945_v41  ;;  %v8358_v1 = vld [vmem:[%s14927_s3 + $0xa] ss:$0 sm:$0xff] }
 0x74c   :  { %v6353_v30 = vsel %vm6352_vm9, %v6229_v54, %v6351_v0  ;;  %v6238_v27 = vmax.f32 %v6236_v10, %v6237_v11  ;;  %v6081_v59 = vadd.f32 %v6017_v14, %v5951_v45 }
 0x74d   :  { %v14572_v55 = vsel %vm6358_vm10, %v14440_v46, %v6353_v30  ;;  %v6080_v20 = vadd.f32 %v6016_v43, %v5946_v22 }
 0x74e   :  { %v6364_v3 = vsel %vm15180_vm3, %v14572_v55, 0.0  ;;  %v6240_v63 = vmax.f32 %v6238_v27, %v6239_v57  ;;  %v6243_v21 = vsel %vm15180_vm3, %v6081_v59, -inf }
 0x74f   :  { %6365 = vadd.xlane.f32.xlu1 %v6364_v3  ;;  %v6241_v29 = vsel %vm15180_vm3, %v6080_v20, -inf  ;;  %v7379_v20 = vld [vmem:[%s14926_s2 + $0x70] sm:$0xff] }
 0x750   :  { %v6242_v4 = vmax.f32 %v6240_v63, %v6241_v29  ;;  %v6494_v63 = vlaneseq }
 0x752   :  { %v6244_v33 = vmax.f32 %v6242_v4, %v6243_v21  ;;  %v6498_v29 = vand.u32 127, %v6494_v63  ;;  %v6495_v4 = vshrl.u32 %v6494_v63, 7 }
 0x754   :  { %v6245_v0 = vrot.slane %v6244_v33, 4  ;;  %vm6516_vm5 = vcmp.ge.s32.totalorder %v6498_v29, 5  ;;  %vm6517_vm6 = vcmp.lt.s32.totalorder %v6498_v29, 10  ;;  %vm6501_vm7 = vcmp.lt.s32.totalorder %v6495_v4, 5 }
 0x755   :  { %vm6506_vm8 = vcmp.lt.s32.totalorder %v6498_v29, 5  ;;  %vm6518_vm9 = vmand %vm6516_vm5, %vm6517_vm6  ;;  %vm6510_vm10 = vcmp.ge.s32.totalorder %v6495_v4, 5  ;;  %v6496_v21 = vadd.s32 8, %v6495_v4  ;;  %vm6622_vm5 = vcmask 74752  }
 0x756   :  { %v6246_v40 = vmax.f32 %v6244_v33, %v6245_v0  ;;  %vm6508_vm14 = vmand %vm6501_vm7, %vm6506_vm8  ;;  %v10116_v0 = vmov -1e+30  }
 0x757   :  { %vm6519_vm15 = vmand %vm6510_vm10, %vm6518_vm9  ;;  %vm15647_vm10 = vmmov 0  }
 0x758   :  { %v6247_v28 = vrot.slane %v6246_v40, 2  ;;  %vm6521_vm2 = vmor %vm6508_vm14, %vm6519_vm15  ;;  %vm7935_vm14 = vcmask 1024   ;;  %vm7899_vm15 = vcmask 4096  }
 0x75a   :  { %v6248_v46 = vmax.f32 %v6246_v40, %v6247_v28  ;;  %v14648_v40 = vsel %vm6521_vm2, 0.0, %v10116_v0  ;;  %vm7374_vm2 = vcmask 195584  }
 0x75c   :  { %v6249_v35 = vrot.slane %v6248_v46, 1 }
 0x75e   :  { %v6250_v15 = vmax.f32 %v6248_v46, %v6249_v35 }
 0x760   :  { %v14581_v48 = vsel %vm15177_vm11, %v6250_v15, %v14426_v7  ;;  %v6407_v7 = vld [vmem:[%s14926_s2 + $0x58] sm:$0xff]  ;;  %vm6513_vm11 = vcmp.lt.s32.totalorder %v6496_v21, 10 }
 0x761   :  { %v6368_v19 = vsel %vm15179_vm12, %v14581_v48, 0.0  ;;  %v9325_v6 = vpack.c.bf16 %v6407_v7, %v6406_v50 }
 0x762   :  { %6369 = vadd.xlane.f32.xlu0 %v6368_v19 }
 0x763   :  { %9326 = vmatprep.subr.bf16.mxu1 %v9325_v6 }
 0x764   :  { %9328 = vmatpush3.bf16.msra.mxu1 %v9325_v6 }
 0x7dc   :  { %v6366_v18 = vpop.xlane.xlu1 %6365 }
 0x7dd   :  { %v6372_v25 = vmul.f32 0.03125, %v6366_v18 }
 0x7df   :  { %v6374_v16 = vsub.f32 %v14572_v55, %v6372_v25 }
 0x7e1   :  { %v6376_v38 = vmul.f32 %v6374_v16, %v6374_v16 }
 0x7e3   :  { %v6378_v23 = vsel %vm15180_vm3, %v6376_v38, 0.0 }
 0x7e4   :  { %6379 = vadd.xlane.f32.xlu1 %v6378_v23 }
 0x7ef   :  { %v6370_v17 = vpop.xlane.xlu0 %6369 }
 0x7f0   :  { %v6373_v47 = vmul.f32 0.03125, %v6370_v17 }
 0x7f2   :  { %v6375_v62 = vsub.f32 %v14581_v48, %v6373_v47 }
 0x7f4   :  { %v6377_v61 = vmul.f32 %v6375_v62, %v6375_v62 }
 0x7f6   :  { %v6381_v42 = vsel %vm15179_vm12, %v6377_v61, 0.0  ;;  %vm6520_vm12 = vmand %vm6513_vm11, %vm6518_vm9 }
 0x7f7   :  { %6382 = vadd.xlane.f32.xlu0 %v6381_v42  ;;  %v14650_v15 = vsel %vm6520_vm12, 0.0, %v10116_v0 }
 0x871   :  { %v6380_v26 = vpop.xlane.xlu1 %6379 }
 0x872   :  { %v6384_v8 = vmul.f32 0.03125, %v6380_v26 }
 0x874   :  { %v6386_v37 = vadd.f32 1e-05, %v6384_v8 }
 0x876   :  { %10020 = vrsqrt.f32 %v6386_v37 }
 0x880   :  { %v10021_v36 = vpop.eup %10020 }
 0x881   :  { %v6390_v56 = vmul.f32 %v10021_v36, %v6374_v16 }
 0x883   :  { %v6396_v44 = vmul.f32 %v8356_v32, %v6390_v56 }
 0x884   :  { %v6383_v39 = vpop.xlane.xlu0 %6382 }
 0x885   :  { %v6402_v24 = vadd.f32 %v8357_v58, %v6396_v44  ;;  %v6385_v52 = vmul.f32 0.03125, %v6383_v39 }
 0x887   :  { %9165 = vmatprep.mubr.msk.f32.mxu1 %vm15180_vm3, %v6402_v24  ;;  %v6387_v31 = vadd.f32 1e-05, %v6385_v52 }
 0x889   :  { %10022 = vrsqrt.f32 %v6387_v31 }
 0x893   :  { %v10023_v9 = vpop.eup %10022 }
 0x894   :  { %v6391_v51 = vmul.f32 %v10023_v9, %v6375_v62 }
 0x896   :  { %v6397_v34 = vmul.f32 %v8356_v32, %v6391_v51 }
 0x898   :  { %v6403_v60 = vadd.f32 %v8357_v58, %v6397_v34 }
 0x89a   :  { %9166 = vmatmul.mubr.msk.f32.vlgmr.msra.gmra.mrb[130].mxu1 %vm15180_vm3, %v6403_v60  ;;  %vm6618_vm3 = vcmask 80896  }
 0x96d   :  { %v9167_v49 = vpop.f32.mrb[130].mxu1 }
 0x96e   :  { %v14612_v54 = vadd.f32 %v9167_v49, %v8358_v1  ;;  %v6485_v10 = vpop.f32.mrb[131].mxu1 }
 0x96f   :  { %v14614_v45 = vadd.f32 %v8358_v1, %v6485_v10 }
 0x971   :  { %9172 = vmatprep.mubr.msk.f32.mxu0 %vm987_vm1, %v14614_v45  ;;  %v14620_v14 = vpack.i.bf16 %v14612_v54, %v14614_v45 }
 0x973   :  { %9467 = vrot.lane.b32.xlu1 %v14620_v14, %s10113_s28 }
 0x977   :  { %9472 = vrot.lane.b32.xlu1 %v14620_v14, %s10114_s1 }
 0x97b   :  { %6731 = vrot.lane.b32.xlu1 %v14614_v45, %s10109_s26 }
 0x97f   :  { %6733 = vrot.lane.b32.xlu1 %v14612_v54, %s10109_s26  ;;  %s10117_s26 = smov 88  }
 0x9e5   :  { %v9468_v41 = vpop.permute.xlu1 %9467 }
 0x9e6   :  { %v9470_v43 = vunpack.i.h.bf16 %v9468_v41  ;;  %v9469_v11 = vunpack.i.l.bf16 %v9468_v41 }
 0x9e8   :  { %v9329_v30 = vpack.c.bf16 %v9470_v43, %v9469_v11 }
 0x9e9   :  { %v9473_v27 = vpop.permute.xlu1 %9472 }
 0x9ea   :  { %v9475_v57 = vunpack.i.h.bf16 %v9473_v27  ;;  %v9474_v59 = vunpack.i.l.bf16 %v9473_v27  ;;  %9331 = vmatprep.subr.msk.bf16.mxu0 %vm14630_vm13, %v9329_v30 }
 0x9eb   :  { %9334 = vmatpush3.bf16.xpose.msk.msra.mxu0 %vm14630_vm13, %v9329_v30 }
 0x9ec   :  { %v9335_v3 = vpack.c.bf16 %v9475_v57, %v9474_v59 }
 0x9ed   :  { %v6732_v44 = vpop.permute.xlu1 %6731 }
 0x9ee   :  { %9337 = vmatprep.subr.msk.bf16.mxu1 %vm14638_vm4, %v9335_v3 }
 0x9ef   :  { %9340 = vmatpush3.bf16.msk.msra.mxu1 %vm14638_vm4, %v9335_v3 }
 0x9f1   :  { %v6734_v39 = vpop.permute.xlu1 %6733 }
 0x9f2   :  { %9173 = vmatmul.mubr.msk.f32.vlgmr.msra.gmra.mrb[128].mxu0 %vm987_vm1, %v14612_v54 }
 0xac5   :  { %v9174_v33 = vpop.f32.mrb[128].mxu0 }
 0xac6   :  { %v6605_v28 = vpop.f32.mrb[129].mxu0  ;;  %v6615_v46 = vmul.f32 0.35355338, %v9174_v33 }
 0xac7   :  { %v6614_v35 = vmul.f32 0.35355338, %v6605_v28 }
 0xac8   :  { %v6617_v12 = vadd.f32 %v6615_v46, %v14650_v15 }
 0xac9   :  { %v6616_v19 = vadd.f32 %v6614_v35, %v14648_v40 }
 0xaca   :  { %v6623_v50 = vsel %vm6622_vm5, %v6617_v12, -inf }
 0xacb   :  { %v6619_v13 = vsel %vm6618_vm3, %v6616_v19, -inf }
 0xacc   :  { %6620 = vmax.xlane.f32.xlu0 %v6619_v13 }
 0xad0   :  { %6624 = vmax.xlane.f32.xlu0 %v6623_v50 }
 0xb59   :  { %v6621_v53 = vpop.xlane.xlu0 %6620 }
 0xb5a   :  { %v6626_v7 = vsub.f32 %v6616_v19, %v6621_v53 }
 0xb5c   :  { %v6628_v25 = vmul.f32 1.442695, %v6626_v7 }
 0xb5d   :  { %v6625_v6 = vpop.xlane.xlu0 %6624 }
 0xb5e   :  { %v6627_v18 = vsub.f32 %v6617_v12, %v6625_v6 }
 0xb60   :  { %v6630_v16 = vmul.f32 1.442695, %v6627_v18 }
 0xb62   :  { %10024 = vpow2.f32 %v6630_v16 }
 0xb63   :  { %10026 = vpow2.f32 %v6628_v25 }
 0xb6c   :  { %v10025_v38 = vpop.eup %10024 }
 0xb6d   :  { %v6635_v23 = vsel %vm6622_vm5, %v10025_v38, 0.0  ;;  %v10027_v17 = vpop.eup %10026 }
 0xb6e   :  { %6636 = vadd.xlane.f32.xlu0 %v6635_v23  ;;  %v6632_v47 = vsel %vm6618_vm3, %v10027_v17, 0.0 }
 0xb72   :  { %6633 = vadd.xlane.f32.xlu0 %v6632_v47 }
 0xb88   :  { %9477 = vrot.lane.b32.xlu0 %v14620_v14, %s10117_s26 }
 0xbfb   :  { %v6637_v62 = vpop.xlane.xlu0 %6636 }
 0xbfc   :  { %10028 = vrcp.f32 %v6637_v62 }
 0xbff   :  { %v6634_v61 = vpop.xlane.xlu0 %6633 }
 0xc00   :  { %10030 = vrcp.f32 %v6634_v61 }
 0xc03   :  { %v9478_v42 = vpop.permute.xlu0 %9477 }
 0xc04   :  { %v9480_v26 = vunpack.i.h.bf16 %v9478_v42  ;;  %v9479_v8 = vunpack.i.l.bf16 %v9478_v42 }
 0xc06   :  { %v9341_v37 = vpack.c.bf16 %v9480_v26, %v9479_v8  ;;  %v10029_v36 = vpop.eup %10028 }
 0xc07   :  { %v6641_v58 = vmul.f32 %v10029_v36, %v10025_v38 }
 0xc08   :  { %9343 = vmatprep.subr.msk.bf16.mxu1 %vm14630_vm13, %v9341_v37 }
 0xc0a   :  { %v10031_v32 = vpop.eup %10030 }
 0xc0b   :  { %v6640_v56 = vmul.f32 %v10031_v32, %v10027_v17 }
 0xc0d   :  { %9179 = vmatprep.mubr.msk.f32.mxu1 %vm6618_vm3, %v6640_v56 }
 0xc0e   :  { %9180 = vmatmul.mubr.msk.f32.vlgmr.msra.gmra.mrb[132].mxu1 %vm6618_vm3, %v6641_v58 }
 0xc0f   :  { %9346 = vmatpush3.bf16.xpose.msk.msra.mxu1 %vm14630_vm13, %v9341_v37  ;;  %9186 = vmatprep.mubr.msk.f32.mxu1 %vm987_vm1, %v6732_v44 }
 0xc16   :  { %9187 = vmatmul.mubr.msk.f32.vlgmr.msra.gmra.mrb[134].mxu1 %vm987_vm1, %v6734_v39 }
 0xce1   :  { %v14667_v24 = vpop.f32.mrb[132].mxu1 }
 0xce2   :  { %v14669_v52 = vpop.f32.mrb[133].mxu1 }
 0xce9   :  { %v9188_v31 = vpop.f32.mrb[134].mxu1 }
 0xcea   :  { %v6823_v9 = vmul.f32 0.35355338, %v9188_v31  ;;  %v6813_v51 = vpop.f32.mrb[135].mxu1 }
 0xceb   :  { %v6822_v34 = vmul.f32 0.35355338, %v6813_v51 }
 0xcec   :  { %v6825_v60 = vadd.f32 %v6823_v9, %v14650_v15 }
 0xced   :  { %v6824_v1 = vadd.f32 %v6822_v34, %v14648_v40 }
 0xcee   :  { %v6829_v49 = vsel %vm6622_vm5, %v6825_v60, -inf }
 0xcef   :  { %6830 = vmax.xlane.f32.xlu0 %v6829_v49  ;;  %v6826_v10 = vsel %vm6618_vm3, %v6824_v1, -inf }
 0xcf0   :  { %6827 = vmax.xlane.f32.xlu1 %v6826_v10 }
 0xd01   :  { %9487 = vrot.lane.b32.xlu1 %v14620_v14, %s10118_s29 }
 0xd05   :  { %9482 = vrot.lane.b32.xlu0 %v14620_v14, %s10119_s30 }
 0xd09   :  { %6938 = vrot.lane.b32.xlu0 %v14612_v54, %s10120_s5 }
 0xd7c   :  { %v6831_v41 = vpop.xlane.xlu0 %6830 }
 0xd7d   :  { %v6833_v43 = vsub.f32 %v6825_v60, %v6831_v41  ;;  %v6828_v11 = vpop.xlane.xlu1 %6827 }
 0xd7e   :  { %v6832_v30 = vsub.f32 %v6824_v1, %v6828_v11 }
 0xd7f   :  { %v6836_v27 = vmul.f32 1.442695, %v6833_v43 }
 0xd80   :  { %v6834_v57 = vmul.f32 1.442695, %v6832_v30  ;;  %v9483_v59 = vpop.permute.xlu0 %9482 }
 0xd81   :  { %10032 = vpow2.f32 %v6836_v27  ;;  %v9485_v3 = vunpack.i.h.bf16 %v9483_v59  ;;  %v9484_v63 = vunpack.i.l.bf16 %v9483_v59  ;;  %v9488_v29 = vpop.permute.xlu1 %9487 }
 0xd82   :  { %v9490_v4 = vunpack.i.h.bf16 %v9488_v29  ;;  %v9489_v21 = vunpack.i.l.bf16 %v9488_v29  ;;  %10034 = vpow2.f32 %v6834_v57 }
 0xd83   :  { %v9347_v33 = vpack.c.bf16 %v9485_v3, %v9484_v63 }
 0xd84   :  { %v9353_v0 = vpack.c.bf16 %v9490_v4, %v9489_v21  ;;  %v6939_v25 = vpop.permute.xlu0 %6938 }
 0xd85   :  { %9349 = vmatprep.subr.msk.bf16.mxu0 %vm14638_vm4, %v9347_v33 }
 0xd86   :  { %9352 = vmatpush3.bf16.msk.msra.mxu0 %vm14638_vm4, %v9347_v33 }
 0xd87   :  { %9355 = vmatprep.subr.msk.bf16.mxu0 %vm14630_vm13, %v9353_v0 }
 0xd8b   :  { %v10033_v28 = vpop.eup %10032 }
 0xd8c   :  { %v6841_v46 = vsel %vm6622_vm5, %v10033_v28, 0.0  ;;  %v10035_v35 = vpop.eup %10034 }
 0xd8d   :  { %6842 = vadd.xlane.f32.xlu1 %v6841_v46  ;;  %v6838_v19 = vsel %vm6618_vm3, %v10035_v35, 0.0 }
 0xd91   :  { %6839 = vadd.xlane.f32.xlu1 %v6838_v19 }
 0xda2   :  { %6936 = vrot.lane.b32.xlu1 %v14614_v45, %s10120_s5 }
 0xe1a   :  { %v6843_v12 = vpop.xlane.xlu1 %6842 }
 0xe1b   :  { %10036 = vrcp.f32 %v6843_v12 }
 0xe1e   :  { %v6840_v13 = vpop.xlane.xlu1 %6839 }
 0xe1f   :  { %10038 = vrcp.f32 %v6840_v13 }
 0xe22   :  { %v6937_v18 = vpop.permute.xlu1 %6936 }
 0xe25   :  { %v10037_v50 = vpop.eup %10036 }
 0xe26   :  { %v6847_v6 = vmul.f32 %v10037_v50, %v10033_v28 }
 0xe29   :  { %v10039_v53 = vpop.eup %10038 }
 0xe2a   :  { %v6846_v7 = vmul.f32 %v10039_v53, %v10035_v35 }
 0xe2c   :  { %9193 = vmatprep.mubr.msk.f32.mxu0 %vm6618_vm3, %v6846_v7 }
 0xe2d   :  { %9194 = vmatmul.mubr.msk.f32.vlgmr.msra.gmra.mrb[130].mxu0 %vm6618_vm3, %v6847_v6 }
 0xe2e   :  { %9358 = vmatpush3.bf16.xpose.msk.msra.mxu0 %vm14630_vm13, %v9353_v0  ;;  %9200 = vmatprep.mubr.msk.f32.mxu0 %vm987_vm1, %v6937_v18 }
 0xe35   :  { %9201 = vmatmul.mubr.msk.f32.vlgmr.msra.gmra.mrb[132].mxu0 %vm987_vm1, %v6939_v25 }
 0xf00   :  { %v14693_v16 = vpop.f32.mrb[130].mxu0 }
 0xf01   :  { %v14695_v38 = vpop.f32.mrb[131].mxu0 }
 0xf08   :  { %v9202_v23 = vpop.f32.mrb[132].mxu0 }
 0xf09   :  { %v7028_v17 = vmul.f32 0.35355338, %v9202_v23  ;;  %v7018_v47 = vpop.f32.mrb[133].mxu0 }
 0xf0a   :  { %v7027_v62 = vmul.f32 0.35355338, %v7018_v47 }
 0xf0b   :  { %v7030_v61 = vadd.f32 %v7028_v17, %v14650_v15 }
 0xf0c   :  { %v7029_v42 = vadd.f32 %v7027_v62, %v14648_v40 }
 0xf0d   :  { %v7034_v26 = vsel %vm6622_vm5, %v7030_v61, -inf }
 0xf0e   :  { %7035 = vmax.xlane.f32.xlu0 %v7034_v26  ;;  %v7031_v8 = vsel %vm6618_vm3, %v7029_v42, -inf }
 0xf0f   :  { %7032 = vmax.xlane.f32.xlu1 %v7031_v8  ;;  %v7377_v8 = vld [vmem:[%s14926_s2 + $0x60] sm:$0xff] }
 0xf9b   :  { %v7036_v37 = vpop.xlane.xlu0 %7035 }
 0xf9c   :  { %v7038_v36 = vsub.f32 %v7030_v61, %v7036_v37  ;;  %v7033_v32 = vpop.xlane.xlu1 %7032  ;;  %v7378_v37 = vld [vmem:[%s14926_s2 + $0x68] sm:$0xff] }
 0xf9d   :  { %v7037_v56 = vsub.f32 %v7029_v42, %v7033_v32  ;;  %v7380_v32 = vld [vmem:[%s14926_s2 + $0x78] sm:$0xff] }
 0xf9e   :  { %v7041_v58 = vmul.f32 1.442695, %v7038_v36  ;;  %v9377_v36 = vpack.c.bf16 %v7378_v37, %v7377_v8  ;;  %v7620_v8 = vld [vmem:[%s14926_s2 + $0xa8] sm:$0xff]  ;;  %v7621_v37 = vld [vmem:[%s14926_s2 + $0xb0] sm:$0xff] }
 0xf9f   :  { %v7039_v44 = vmul.f32 1.442695, %v7037_v56  ;;  %v9381_v56 = vpack.c.bf16 %v7380_v32, %v7379_v20 }
 0xfa0   :  { %10040 = vpow2.f32 %v7041_v58 }
 0xfa1   :  { %10042 = vpow2.f32 %v7039_v44 }
 0xfaa   :  { %v10041_v39 = vpop.eup %10040 }
 0xfab   :  { %v10043_v31 = vpop.eup %10042  ;;  %v7046_v9 = vsel %vm6622_vm5, %v10041_v39, 0.0 }
 0xfac   :  { %7047 = vadd.xlane.f32.xlu1 %v7046_v9  ;;  %v7043_v51 = vsel %vm6618_vm3, %v10043_v31, 0.0 }
 0xfad   :  { %7044 = vadd.xlane.f32.xlu0 %v7043_v51 }
 0xfbd   :  { %9497 = vrot.lane.b32.xlu1 %v14620_v14, %s10121_s6 }
 0xfc1   :  { %7141 = vrot.lane.b32.xlu1 %v14614_v45, %s10122_s7 }
 0xfc3   :  { %9492 = vrot.lane.b32.xlu0 %v14620_v14, %s10123_s8 }
 0xfc7   :  { %7143 = vrot.lane.b32.xlu0 %v14612_v54, %s10122_s7 }
0x1039   :  { %v7048_v34 = vpop.xlane.xlu1 %7047 }
0x103a   :  { %10044 = vrcp.f32 %v7048_v34  ;;  %v7045_v60 = vpop.xlane.xlu0 %7044 }
0x103b   :  { %10046 = vrcp.f32 %v7045_v60 }
0x103d   :  { %v9498_v1 = vpop.permute.xlu1 %9497 }
0x103e   :  { %v9493_v49 = vpop.permute.xlu0 %9492  ;;  %v9500_v10 = vunpack.i.h.bf16 %v9498_v1  ;;  %v9499_v41 = vunpack.i.l.bf16 %v9498_v1 }
0x103f   :  { %v9495_v43 = vunpack.i.h.bf16 %v9493_v49  ;;  %v9494_v11 = vunpack.i.l.bf16 %v9493_v49 }
0x1040   :  { %v9365_v27 = vpack.c.bf16 %v9500_v10, %v9499_v41 }
0x1041   :  { %v9359_v30 = vpack.c.bf16 %v9495_v43, %v9494_v11  ;;  %v7142_v3 = vpop.permute.xlu1 %7141 }
0x1042   :  { %v7144_v63 = vpop.permute.xlu0 %7143 }
0x1043   :  { %9361 = vmatprep.subr.msk.bf16.mxu1 %vm14638_vm4, %v9359_v30 }
0x1044   :  { %v10045_v45 = vpop.eup %10044  ;;  %9364 = vmatpush3.bf16.msk.msra.mxu1 %vm14638_vm4, %v9359_v30 }
0x1045   :  { %v10047_v54 = vpop.eup %10046  ;;  %9367 = vmatprep.subr.msk.bf16.mxu1 %vm14630_vm13, %v9365_v27  ;;  %v7052_v59 = vmul.f32 %v10045_v45, %v10041_v39 }
0x1046   :  { %v7051_v57 = vmul.f32 %v10047_v54, %v10043_v31 }
0x1048   :  { %9207 = vmatprep.mubr.msk.f32.mxu1 %vm6618_vm3, %v7051_v57 }
0x1049   :  { %9208 = vmatmul.mubr.msk.f32.vlgmr.msra.gmra.mrb[136].mxu1 %vm6618_vm3, %v7052_v59 }
0x104a   :  { %9214 = vmatprep.mubr.msk.f32.mxu1 %vm987_vm1, %v7142_v3 }
0x104d   :  { %9370 = vmatpush3.bf16.xpose.msk.msra.mxu1 %vm14630_vm13, %v9365_v27 }
0x1054   :  { %9215 = vmatmul.mubr.msk.f32.vlgmr.msra.gmra.mrb[138].mxu1 %vm987_vm1, %v7144_v63 }
0x111c   :  { %v9209_v29 = vpop.f32.mrb[136].mxu1 }
0x111d   :  { %v7132_v4 = vpop.f32.mrb[137].mxu1 }
0x1127   :  { %v9216_v21 = vpop.f32.mrb[138].mxu1 }
0x1128   :  { %v7233_v33 = vmul.f32 0.35355338, %v9216_v21  ;;  %v7223_v0 = vpop.f32.mrb[139].mxu1 }
0x1129   :  { %v7232_v28 = vmul.f32 0.35355338, %v7223_v0 }
0x112a   :  { %v7235_v46 = vadd.f32 %v7233_v33, %v14650_v15 }
0x112b   :  { %v7234_v35 = vadd.f32 %v7232_v28, %v14648_v40 }
0x112c   :  { %v7239_v19 = vsel %vm6622_vm5, %v7235_v46, -inf }
0x112d   :  { %7240 = vmax.xlane.f32.xlu0 %v7239_v19  ;;  %v7236_v12 = vsel %vm6618_vm3, %v7234_v35, -inf  ;;  %v7512_v19 = vld [vmem:[%s14926_s2 + $0x88] sm:$0xff] }
0x112e   :  { %7237 = vmax.xlane.f32.xlu1 %v7236_v12  ;;  %v7513_v12 = vld [vmem:[%s14926_s2 + $0x90] sm:$0xff] }
0x11ba   :  { %v7241_v22 = vpop.xlane.xlu0 %7240 }
0x11bb   :  { %v7243_v13 = vsub.f32 %v7235_v46, %v7241_v22  ;;  %v7238_v50 = vpop.xlane.xlu1 %7237 }
0x11bc   :  { %v7242_v53 = vsub.f32 %v7234_v35, %v7238_v50  ;;  %v7511_v35 = vld [vmem:[%s14926_s2 + $0x80] sm:$0xff] }
0x11bd   :  { %v7246_v7 = vmul.f32 1.442695, %v7243_v13  ;;  %v9385_v22 = vpack.c.bf16 %v7512_v19, %v7511_v35  ;;  %v7514_v13 = vld [vmem:[%s14926_s2 + $0x98] sm:$0xff] }
0x11be   :  { %v7244_v6 = vmul.f32 1.442695, %v7242_v53  ;;  %v9389_v50 = vpack.c.bf16 %v7514_v13, %v7513_v12 }
0x11bf   :  { %10048 = vpow2.f32 %v7246_v7  ;;  %9386 = vmatprep.subr.bf16.mxu1 %v9385_v22 }
0x11c0   :  { %10050 = vpow2.f32 %v7244_v6  ;;  %9388 = vmatpush3.bf16.msra.mxu1 %v9385_v22 }
0x11c1   :  { %9390 = vmatprep.subr.bf16.mxu1 %v9389_v50 }
0x11c4   :  { %9392 = vmatpush3.bf16.msra.mxu1 %v9389_v50 }
0x11c9   :  { %v10049_v18 = vpop.eup %10048 }
0x11ca   :  { %v10051_v25 = vpop.eup %10050  ;;  %v7251_v15 = vsel %vm6622_vm5, %v10049_v18, 0.0  ;;  %vm7933_vm5 = vcmask 7173  }
0x11cb   :  { %7252 = vadd.xlane.f32.xlu1 %v7251_v15  ;;  %v7248_v40 = vsel %vm6618_vm3, %v10051_v25, 0.0 }
0x11cc   :  { %7249 = vadd.xlane.f32.xlu0 %v7248_v40 }
0x11dc   :  { %7348 = vrot.lane.b32.xlu1 %v14695_v38, %s10108_s23 }
0x11e0   :  { %7350 = vrot.lane.b32.xlu1 %v14693_v16, %s10108_s23  ;;  %s10128_s23 = smov [#allocation2]  }
0x11e1   :  { %s8083_s11 = sshll.u32 %s10128_s23, 4  ;;  %s8084_s11 = int_to_ptr.vmem [resolvable:$true] %s8083_s11 }
0x11e2   :  { %9502 = vrot.lane.b32.xlu0 %v14620_v14, %s10124_s9  ;;  %s10084_s12 = scalar_lea.vmem %s8084_s11, 32  ;;  %p10089_p1 = scmp.lt.s32.totalorder %s8084_s11, %s8084_s11 }
0x11e3   :  { %p10085_p0 = scmp.ne.s32.totalorder %s8084_s11, %s10084_s12  ;;  %p10090_p2 = scmp.lt.s32.totalorder %s10084_s12, %s10084_s12 }
0x11e4   :  { %7358 = vrot.lane.b32.xlu1 %v9209_v29, %s10125_s10 }
0x11e5   :  { %p10091_p3 = por %p10090_p2, %p10089_p1 }
0x11e6   :  { %7356 = vrot.lane.b32.xlu0 %v7132_v4, %s10125_s10 }
0x11e7   :  { %p10092_p4 = pnand %p10091_p3, %p10085_p0 }
0x1258   :  { %v7253_v23 = vpop.xlane.xlu1 %7252 }
0x1259   :  { %10052 = vrcp.f32 %v7253_v23  ;;  %v7250_v17 = vpop.xlane.xlu0 %7249  ;;  %v8392_v23 = vld [vmem:[%s14927_s3 + $0xc] ss:$0 sm:$0xff] }
0x125a   :  { %10054 = vrcp.f32 %v7250_v17 }
0x125c   :  { %v7349_v39 = vpop.permute.xlu1 %7348 }
0x125d   :  { %v9503_v47 = vpop.permute.xlu0 %9502  ;;  %v7370_v34 = vsel %vm987_vm1, %v14669_v52, %v7349_v39  ;;  %v8391_v52 = vld [vmem:[%s14927_s3 + $0xb] ss:$0 sm:$0xff]  ;;  %v7625_v39 = vld [vmem:[%s14926_s2 + $0xd0] sm:$0xff] }
0x125e   :  { %v9505_v62 = vunpack.i.h.bf16 %v9503_v47  ;;  %v9504_v61 = vunpack.i.l.bf16 %v9503_v47  ;;  %v8393_v47 = vld [vmem:[%s14927_s3 + $0xd] ss:$0 sm:$0xff] }
0x1260   :  { %v9371_v42 = vpack.c.bf16 %v9505_v62, %v9504_v61  ;;  %v7351_v31 = vpop.permute.xlu1 %7350 }
0x1261   :  { %v7357_v51 = vpop.permute.xlu0 %7356  ;;  %v7371_v1 = vsel %vm987_vm1, %v14667_v24, %v7351_v31  ;;  %vm15639_vm1 = vcmask 254976   ;;  %v7626_v31 = vld [vmem:[%s14926_s2 + $0xd8] sm:$0xff] }
0x1262   :  { %9373 = vmatprep.subr.msk.bf16.mxu0 %vm14638_vm4, %v9371_v42  ;;  %v7372_v49 = vsel %vm89_vm0, %v7370_v34, %v7357_v51  ;;  %v7627_v51 = vld [vmem:[%s14926_s2 + $0xe0] sm:$0xff]  ;;  %v7628_v34 = vld [vmem:[%s14926_s2 + $0xe8] sm:$0xff] }
0x1263   :  { %v10053_v38 = vpop.eup %10052  ;;  %9376 = vmatpush3.bf16.msk.msra.mxu0 %vm14638_vm4, %v9371_v42  ;;  %vm15642_vm4 = vmmov %vm15639_vm1 }
0x1264   :  { %v10055_v16 = vpop.eup %10054  ;;  %v7257_v26 = vmul.f32 %v10053_v38, %v10049_v18  ;;  %9378 = vmatprep.subr.bf16.mxu0 %v9377_v36  ;;  %v7359_v9 = vpop.permute.xlu1 %7358 }
0x1265   :  { %v7256_v14 = vmul.f32 %v10055_v16, %v10051_v25  ;;  %v7373_v41 = vsel %vm89_vm0, %v7371_v1, %v7359_v9  ;;  %v9405_v9 = vpack.c.bf16 %v7626_v31, %v7625_v39  ;;  %v7629_v1 = vld [vmem:[%s14926_s2 + $0xf0] sm:$0xff] }
0x1266   :  { %v8401_v39 = vld [vmem:[%s14927_s3 + $0x11] ss:$0 sm:$0xff] }
0x1267   :  { %9221 = vmatprep.mubr.msk.f32.mxu0 %vm6618_vm3, %v7256_v14 }
0x1268   :  { %9222 = vmatmul.mubr.msk.f32.vlgmr.msra.gmra.mrb[134].mxu0 %vm6618_vm3, %v7257_v26  ;;  %vm15637_vm3 = vcmask 261120   ;;  %v7619_v26 = vld [vmem:[%s14926_s2 + $0xa0] sm:$0xff] }
0x1269   :  { %9380 = vmatpush3.bf16.msra.mxu0 %v9377_v36  ;;  %vm15638_vm11 = vmmov %vm15637_vm3  ;;  %v9393_v20 = vpack.c.bf16 %v7620_v8, %v7619_v26  ;;  %v7622_v36 = vld [vmem:[%s14926_s2 + $0xb8] sm:$0xff]  ;;  %v7812_v26 = vld [vmem:[%s14926_s2 + $0x148] sm:$0xff] }
0x126a   :  { %9382 = vmatprep.subr.bf16.mxu0 %v9381_v56  ;;  %vm15640_vm12 = vmmov %vm15637_vm3  ;;  %v9397_v32 = vpack.c.bf16 %v7622_v36, %v7621_v37 }
0x126b   :  { %vm15641_vm13 = vmmov %vm15637_vm3 }
0x126c   :  { %vm15643_vm6 = vmmov %vm15637_vm3 }
0x126d   :  { %9384 = vmatpush3.bf16.msra.mxu0 %v9381_v56  ;;  %vm15644_vm7 = vmmov %vm15637_vm3  ;;  %v7623_v56 = vld [vmem:[%s14926_s2 + $0xc0] sm:$0xff] }
0x126e   :  { %9394 = vmatprep.subr.bf16.mxu0 %v9393_v20  ;;  %vm15645_vm8 = vmmov %vm15637_vm3 }
0x126f   :  { %vm15646_vm9 = vmmov %vm15637_vm3 }
0x133b   :  { %v9223_v58 = vpop.f32.mrb[134].mxu0 }
0x133c   :  { %7366 = vrot.lane.b32.xlu1 %v9223_v58, %s10126_s17  ;;  %v7337_v44 = vpop.f32.mrb[135].mxu0  ;;  %v7624_v58 = vld [vmem:[%s14926_s2 + $0xc8] sm:$0xff] }
0x133d   :  { %7364 = vrot.lane.b32.xlu0 %v7337_v44, %s10126_s17  ;;  %v9401_v44 = vpack.c.bf16 %v7624_v58, %v7623_v56 }
0x13ae   :  { %v7367_v60 = vpop.permute.xlu1 %7366 }
0x13af   :  { %v7365_v10 = vpop.permute.xlu0 %7364  ;;  %v7376_v11 = vsel %vm7374_vm2, %v7373_v41, %v7367_v60  ;;  %v9409_v60 = vpack.c.bf16 %v7628_v34, %v7627_v51  ;;  %v7631_v41 = vld [vmem:[%s14926_s2 + $0x100] sm:$0xff] }
0x13b0   :  { %v7375_v43 = vsel %vm7374_vm2, %v7372_v49, %v7365_v10  ;;  %v7630_v49 = vld [vmem:[%s14926_s2 + $0xf8] sm:$0xff]  ;;  %vm7925_vm2 = vcmask 258048  }
0x13b1   :  { %9232 = vmatprep.mubr.msk.f32.mxu0 %vm15637_vm3, %v7375_v43  ;;  %v9413_v10 = vpack.c.bf16 %v7630_v49, %v7629_v1  ;;  %v7632_v43 = vld [vmem:[%s14926_s2 + $0x108] sm:$0xff]  ;;  %vm15648_vm3 = vcmask 1040384  }
0x13b2   :  { %9233 = vmatmul.mubr.msk.f32.vlgmr.msra.gmra.mrb[136].mxu0 %vm15638_vm11, %v7376_v11  ;;  %v7719_v11 = vld [vmem:[%s14926_s2 + $0x120] sm:$0xff]  ;;  %vm15649_vm11 = vmmov %vm15643_vm6 }
0x13b3   :  { %9396 = vmatpush3.bf16.msra.mxu0 %v9393_v20 }
0x13b4   :  { %9398 = vmatprep.subr.bf16.mxu0 %v9397_v32 }
0x13b7   :  { %9400 = vmatpush3.bf16.msra.mxu0 %v9397_v32 }
0x13b8   :  { %9402 = vmatprep.subr.bf16.mxu0 %v9401_v44 }
0x13bb   :  { %9404 = vmatpush3.bf16.msra.mxu0 %v9401_v44  ;;  %v10127_v44 = vmov 0  }
0x13bc   :  { %9406 = vmatprep.subr.bf16.mxu0 %v9405_v9  ;;  %9507 = vset.pattern.permute.xlu0 %v10127_v44 }
0x13bd   :  { %9506 = vset.pattern.permute.xlu1 %v10127_v44 }
0x13bf   :  { %9408 = vmatpush3.bf16.msra.mxu0 %v9405_v9 }
0x13c0   :  { %9410 = vmatprep.subr.bf16.mxu0 %v9409_v60 }
0x13c3   :  { %9412 = vmatpush3.bf16.msra.mxu0 %v9409_v60 }
0x13c4   :  { %9414 = vmatprep.subr.bf16.mxu0 %v9413_v10 }
0x13c7   :  { %9416 = vmatpush3.bf16.msra.mxu0 %v9413_v10 }
0x1485   :  { %v9234_v30 = vpop.f32.mrb[136].mxu0 }
0x1486   :  { %v7463_v27 = vadd.f32 %v9234_v30, %v14581_v48  ;;  %v7453_v45 = vpop.f32.mrb[137].mxu0  ;;  %v7720_v30 = vld [vmem:[%s14926_s2 + $0x128] sm:$0xff] }
0x1487   :  { %v7462_v24 = vadd.f32 %v7453_v45, %v14572_v55  ;;  %v7633_v45 = vld [vmem:[%s14926_s2 + $0x110] sm:$0xff] }
0x1488   :  { %v14761_v54 = vadd.f32 %v8391_v52, %v7463_v27  ;;  %v9417_v27 = vpack.c.bf16 %v7632_v43, %v7631_v41 }
0x1489   :  { %v14763_v57 = vadd.f32 %v8391_v52, %v7462_v24  ;;  %v9425_v52 = vpack.c.bf16 %v7720_v30, %v7719_v11  ;;  %v7634_v24 = vld [vmem:[%s14926_s2 + $0x118] sm:$0xff] }
0x148a   :  { %v7476_v59 = vsel %vm15639_vm1, %v14761_v54, 0.0  ;;  %9418 = vmatprep.subr.bf16.mxu0 %v9417_v27  ;;  %vm8075_vm1 = vcmask 17408  }
0x148b   :  { %7477 = vadd.xlane.f32.xlu1 %v7476_v59  ;;  %v7473_v3 = vsel %vm15640_vm12, %v14763_v57, 0.0  ;;  %9426 = vmatprep.subr.bf16.mxu1 %v9425_v52  ;;  %v9421_v59 = vpack.c.bf16 %v7634_v24, %v7633_v45 }
0x148c   :  { %7474 = vadd.xlane.f32.xlu0 %v7473_v3  ;;  %9420 = vmatpush3.bf16.msra.mxu0 %v9417_v27  ;;  %v8394_v3 = vld [vmem:[%s14927_s3 + $0xe] ss:$0 sm:$0xff] }
0x148d   :  { %9422 = vmatprep.subr.bf16.mxu0 %v9421_v59 }
0x1490   :  { %9424 = vmatpush3.bf16.msra.mxu0 %v9421_v59 }
0x1518   :  { %v7478_v63 = vpop.xlane.xlu1 %7477 }
0x1519   :  { %v7480_v29 = vmul.f32 0.03125, %v7478_v63  ;;  %v7475_v4 = vpop.xlane.xlu0 %7474 }
0x151a   :  { %v7479_v21 = vmul.f32 0.03125, %v7475_v4 }
0x151b   :  { %v7482_v48 = vsub.f32 %v14761_v54, %v7480_v29 }
0x151c   :  { %v7481_v55 = vsub.f32 %v14763_v57, %v7479_v21 }
0x151d   :  { %v7484_v28 = vmul.f32 %v7482_v48, %v7482_v48 }
0x151e   :  { %v7483_v33 = vmul.f32 %v7481_v55, %v7481_v55 }
0x151f   :  { %v7488_v46 = vsel %vm15642_vm4, %v7484_v28, 0.0 }
0x1520   :  { %v7485_v0 = vsel %vm15641_vm13, %v7483_v33, 0.0 }
0x1521   :  { %7486 = vadd.xlane.f32.xlu0 %v7485_v0 }
0x1525   :  { %7489 = vadd.xlane.f32.xlu0 %v7488_v46 }
0x15ae   :  { %v7487_v53 = vpop.xlane.xlu0 %7486 }
0x15af   :  { %v7491_v7 = vmul.f32 0.03125, %v7487_v53 }
0x15b1   :  { %v7493_v6 = vadd.f32 1e-05, %v7491_v7 }
0x15b2   :  { %v7490_v18 = vpop.xlane.xlu0 %7489 }
0x15b3   :  { %10056 = vrsqrt.f32 %v7493_v6  ;;  %v7492_v25 = vmul.f32 0.03125, %v7490_v18 }
0x15b5   :  { %v7494_v15 = vadd.f32 1e-05, %v7492_v25 }
0x15b7   :  { %10058 = vrsqrt.f32 %v7494_v15 }
0x15bd   :  { %v10057_v40 = vpop.eup %10056 }
0x15be   :  { %v7497_v17 = vmul.f32 %v10057_v40, %v7481_v55  ;;  %v7721_v40 = vld [vmem:[%s14926_s2 + $0x130] sm:$0xff] }
0x15c0   :  { %v7503_v62 = vmul.f32 %v8392_v23, %v7497_v17 }
0x15c1   :  { %v10059_v61 = vpop.eup %10058 }
0x15c2   :  { %v7498_v42 = vmul.f32 %v10059_v61, %v7482_v48  ;;  %v7509_v38 = vadd.f32 %v8393_v47, %v7503_v62  ;;  %v8397_v61 = vld [vmem:[%s14927_s3 + $0xf] ss:$0 sm:$0xff] }
0x15c4   :  { %v7504_v16 = vmul.f32 %v8392_v23, %v7498_v42  ;;  %9243 = vmatprep.mubr.msk.f32.mxu1 %vm15643_vm6, %v7509_v38  ;;  %v7722_v23 = vld [vmem:[%s14926_s2 + $0x138] sm:$0xff] }
0x15c5   :  { %v9429_v17 = vpack.c.bf16 %v7722_v23, %v7721_v40 }
0x15c6   :  { %v7510_v14 = vadd.f32 %v8393_v47, %v7504_v16 }
0x15c8   :  { %9244 = vmatmul.mubr.msk.f32.vlgmr.msra.gmra.mrb[140].mxu1 %vm15644_vm7, %v7510_v14 }
0x15c9   :  { %9428 = vmatpush3.bf16.msra.mxu1 %v9425_v52 }
0x15ca   :  { %9430 = vmatprep.subr.bf16.mxu1 %v9429_v17 }
0x15cd   :  { %9432 = vmatpush3.bf16.msra.mxu1 %v9429_v17 }
0x169b   :  { %v9245_v63 = vpop.f32.mrb[140].mxu1 }
0x169c   :  { %v7598_v29 = vadd.f32 %v9245_v63, %v8394_v3  ;;  %v7592_v4 = vpop.f32.mrb[141].mxu1 }
0x169d   :  { %v7593_v21 = vadd.f32 %v8394_v3, %v7592_v4 }
0x169e   :  { %v7602_v48 = vmul.f32 %v7598_v29, %v7598_v29 }
0x169f   :  { %v7601_v55 = vmul.f32 %v7593_v21, %v7593_v21 }
0x16a0   :  { %v7604_v33 = vmul.f32 %v7602_v48, %v7598_v29 }
0x16a1   :  { %v7603_v0 = vmul.f32 %v7601_v55, %v7593_v21 }
0x16a2   :  { %v7606_v28 = vmul.f32 0.044715, %v7604_v33 }
0x16a3   :  { %v7605_v46 = vmul.f32 0.044715, %v7603_v0 }
0x16a4   :  { %v7608_v35 = vadd.f32 %v7606_v28, %v7598_v29 }
0x16a5   :  { %v7607_v19 = vadd.f32 %v7605_v46, %v7593_v21 }
0x16a6   :  { %v7610_v12 = vmul.f32 0.7978846, %v7608_v35 }
0x16a7   :  { %v7609_v22 = vmul.f32 0.7978846, %v7607_v19 }
0x16a8   :  { %10060 = vtanh.f32 %v7610_v12 }
0x16a9   :  { %10062 = vtanh.f32 %v7609_v22 }
0x16b2   :  { %v10061_v13 = vpop.eup %10060 }
0x16b3   :  { %v10063_v50 = vpop.eup %10062  ;;  %v7614_v53 = vadd.f32 1.0, %v10061_v13 }
0x16b4   :  { %v7613_v7 = vadd.f32 1.0, %v10063_v50 }
0x16b5   :  { %v7616_v6 = vmul.f32 0.5, %v7614_v53 }
0x16b6   :  { %v7615_v18 = vmul.f32 0.5, %v7613_v7 }
0x16b7   :  { %v7618_v15 = vmul.f32 %v7616_v6, %v7598_v29 }
0x16b8   :  { %v7617_v25 = vmul.f32 %v7615_v18, %v7593_v21 }
0x16ba   :  { %9278 = vmatprep.mubr.f32.mxu0 %v7617_v25 }
0x16bb   :  { %9279 = vmatmul.mubr.f32.vlgmr.msra.gmra.mrb[138].mxu0 %v7618_v15 }
0x178e   :  { %v9280_v47 = vpop.f32.mrb[138].mxu0 }
0x178f   :  { %v7711_v62 = vadd.f32 %v9280_v47, %v14761_v54  ;;  %v7701_v42 = vpop.f32.mrb[139].mxu0  ;;  %v7811_v54 = vld [vmem:[%s14926_s2 + $0x140] sm:$0xff] }
0x1790   :  { %v7710_v38 = vadd.f32 %v7701_v42, %v14763_v57  ;;  %v9433_v8 = vpack.c.bf16 %v7812_v26, %v7811_v54  ;;  %v8398_v57 = vld [vmem:[%s14927_s3 + $0x10] ss:$0 sm:$0xff] }
0x1791   :  { %v14863_v14 = vadd.f32 %v8397_v61, %v7711_v62 }
0x1792   :  { %v14861_v16 = vadd.f32 %v8397_v61, %v7710_v38  ;;  %9434 = vmatprep.subr.bf16.mxu1 %v9433_v8 }
0x1794   :  { %9289 = vmatprep.mubr.msk.f32.mxu1 %vm15645_vm8, %v14861_v16 }
0x1795   :  { %9290 = vmatmul.mubr.msk.f32.vlgmr.msra.gmra.mrb[142].mxu1 %vm15646_vm9, %v14863_v14 }
0x1796   :  { %9436 = vmatpush3.bf16.msra.mxu1 %v9433_v8  ;;  %v7993_v8 = vld [vmem:[%s14926_s2 + $0x150] sm:$0xff] }
0x1797   :  { %9437 = vmatprep.subr.bf16.mxu1 %v10110_v5 }
0x1868   :  { %v9291_v37 = vpop.f32.mrb[142].mxu1 }
0x1869   :  { %v7806_v20 = vadd.f32 %v9291_v37, %v8398_v57  ;;  %v7800_v36 = vpop.f32.mrb[143].mxu1  ;;  %v7995_v37 = vld [vmem:[%s14926_s2 + $0x160] sm:$0xff] }
0x186a   :  { %v7801_v32 = vadd.f32 %v8398_v57, %v7800_v36  ;;  %v7994_v57 = vld [vmem:[%s14926_s2 + $0x158] sm:$0xff]  ;;  %v7996_v36 = vld [vmem:[%s14926_s2 + $0x168] sm:$0xff] }
0x186c   :  { %10064 = vtanh.f32 %v7801_v32  ;;  %v9441_v32 = vpack.c.bf16 %v7996_v36, %v7995_v37 }
0x186d   :  { %10066 = vtanh.f32 %v7806_v20  ;;  %v9438_v20 = vpack.c.bf16 %v7994_v57, %v7993_v8 }
0x1876   :  { %v10065_v56 = vpop.eup %10064 }
0x1877   :  { %v10067_v58 = vpop.eup %10066  ;;  %9296 = vmatprep.mubr.msk.f32.mxu1 %vm89_vm0, %v10065_v56 }
0x1878   :  { %9297 = vmatmul.mubr.msk.f32.vlgmr.msra.gmra.mrb[144].mxu1 %vm89_vm0, %v10067_v58  ;;  %vm7952_vm0 = vcmask 1042432  }
0x1879   :  { %9307 = vmatprep.mubr.msk.f32.mxu1 %vm15647_vm10, %v10112_v2  ;;  %9439 = vmatpush3.bf16.msra.mxu1 %v9438_v20 }
0x187a   :  { %9440 = vmatprep.subr.bf16.mxu1 %v10110_v5 }
0x187d   :  { %9442 = vmatpush3.bf16.msra.mxu1 %v9441_v32 }
0x194b   :  { %v9298_v31 = vpop.f32.mrb[144].mxu1 }
0x194c   :  { %v7896_v9 = vadd.f32 %v9298_v31, %v8401_v39  ;;  %v7890_v51 = vpop.f32.mrb[145].mxu1 }
0x194d   :  { %v7891_v34 = vadd.f32 %v8401_v39, %v7890_v51 }
0x194e   :  { %v7936_v60 = vsel %vm7935_vm14, %v7896_v9, -inf }
0x194f   :  { %v7900_v1 = vsel %vm7899_vm15, %v7891_v34, -inf  ;;  %v7934_v49 = vsel %vm7933_vm5, %v7891_v34, -inf }
0x1950   :  { %v7901_v10 = vrot.slane %v7900_v1, 4  ;;  %v7937_v2 = vmax.f32 %v7934_v49, %v7936_v60 }
0x1952   :  { %v7902_v41 = vmax.f32 %v7900_v1, %v7901_v10  ;;  %v7938_v43 = vrot.slane %v7937_v2, 4 }
0x1954   :  { %v7903_v11 = vrot.slane %v7902_v41, 2  ;;  %v7939_v30 = vmax.f32 %v7937_v2, %v7938_v43 }
0x1956   :  { %v7904_v52 = vmax.f32 %v7902_v41, %v7903_v11  ;;  %v7940_v27 = vrot.slane %v7939_v30, 2 }
0x1958   :  { %v7905_v45 = vrot.slane %v7904_v52, 1  ;;  %v7941_v24 = vmax.f32 %v7939_v30, %v7940_v27 }
0x195a   :  { %v7906_v59 = vmax.f32 %v7904_v52, %v7905_v45  ;;  %v7942_v3 = vrot.slane %v7941_v24, 1 }
0x195c   :  { %v7907_v63 = vsub.f32 %v7891_v34, %v7906_v59  ;;  %v7943_v29 = vmax.f32 %v7941_v24, %v7942_v3 }
0x195e   :  { %v7908_v4 = vmul.f32 1.442695, %v7907_v63  ;;  %v7944_v21 = vsub.f32 %v7891_v34, %v7943_v29  ;;  %v7945_v48 = vsub.f32 %v7896_v9, %v7943_v29 }
0x1960   :  { %10068 = vpow2.f32 %v7908_v4  ;;  %v7946_v55 = vmul.f32 1.442695, %v7944_v21  ;;  %v7948_v33 = vmul.f32 1.442695, %v7945_v48 }
0x1962   :  { %10070 = vpow2.f32 %v7946_v55 }
0x1963   :  { %10072 = vpow2.f32 %v7948_v33 }
0x196a   :  { %v10069_v0 = vpop.eup %10068 }
0x196b   :  { %v7910_v28 = vsel %vm7899_vm15, %v10069_v0, 0.0 }
0x196c   :  { %v10071_v46 = vpop.eup %10070  ;;  %v7911_v35 = vrot.slane %v7910_v28, 4 }
0x196d   :  { %v10073_v19 = vpop.eup %10072  ;;  %v7953_v12 = vrot.slane %v10071_v46, 5 }
0x196e   :  { %v7912_v22 = vadd.f32 %v7911_v35, %v7910_v28  ;;  %v7954_v13 = vrot.slane %v10073_v19, 5 }
0x1970   :  { %v7913_v50 = vrot.slane %v7912_v22, 2  ;;  %v7955_v53 = vsel %vm7952_vm0, %v7953_v12, %v7954_v13 }
0x1971   :  { %v7957_v7 = vsel %vm7899_vm15, %v7955_v53, 0.0 }
0x1972   :  { %v7958_v6 = vrot.slane %v7957_v7, 4  ;;  %v7914_v18 = vadd.f32 %v7913_v50, %v7912_v22 }
0x1974   :  { %v7959_v25 = vadd.f32 %v7958_v6, %v7957_v7  ;;  %v7915_v40 = vrot.slane %v7914_v18, 1 }
0x1976   :  { %v7960_v15 = vrot.slane %v7959_v25, 2  ;;  %v7916_v47 = vadd.f32 %v7915_v40, %v7914_v18 }
0x1978   :  { %v7961_v23 = vadd.f32 %v7960_v15, %v7959_v25 }
0x197a   :  { %v7962_v17 = vrot.slane %v7961_v23, 1 }
0x197c   :  { %v7963_v62 = vadd.f32 %v7962_v17, %v7961_v23 }
0x197e   :  { %10074 = vrcp.f32 %v7963_v62 }
0x197f   :  { %10076 = vrcp.f32 %v7916_v47 }
0x1988   :  { %v10075_v61 = vpop.eup %10074 }
0x1989   :  { %v7966_v42 = vmul.f32 %v10075_v61, %v10073_v19  ;;  %v7965_v38 = vmul.f32 %v10075_v61, %v10071_v46  ;;  %v10077_v54 = vpop.eup %10076 }
0x198a   :  { %v7918_v26 = vmul.f32 %v10077_v54, %v10069_v0 }
0x198b   :  { %7974 = vperm.xlu0 %9507, %v7966_v42   ;;  %7969 = vperm.xlu1 %9506, %v7965_v38  }
0x198f   :  { %7921 = vperm.xlu1 %9506, %v7918_v26  }
0x1a0a   :  { %v7975_v56 = vpop.permute.xlu0 %7974  ;;  %v7970_v58 = vpop.permute.xlu1 %7969 }
0x1a0b   :  { %v7978_v44 = vmul.f32 %v7975_v56, %v14863_v14  ;;  %v7977_v39 = vmul.f32 %v7970_v58, %v14861_v16 }
0x1a0d   :  { %v7982_v31 = vrot.slane %v7978_v44, 5  ;;  %v7981_v9 = vrot.slane %v7977_v39, 5 }
0x1a0e   :  { %v7922_v51 = vpop.permute.xlu1 %7921 }
0x1a0f   :  { %v7983_v34 = vsel %vm7952_vm0, %v7981_v9, %v7982_v31  ;;  %v7924_v60 = vmul.f32 %v7922_v51, %v14861_v16  ;;  %v8404_v16 = vld [vmem:[%s14927_s3 + $0x12] ss:$0 sm:$0xff] }
0x1a10   :  { %v7985_v1 = vsel %vm7925_vm2, %v7983_v34, 0.0 }
0x1a11   :  { %v7986_v49 = vrot.slane %v7985_v1, 4  ;;  %v7926_v10 = vsel %vm7925_vm2, %v7924_v60, 0.0 }
0x1a12   :  { %v7927_v2 = vrot.slane %v7926_v10, 4 }
0x1a13   :  { %v7987_v5 = vadd.f32 %v7986_v49, %v7985_v1 }
0x1a14   :  { %v7928_v41 = vadd.f32 %v7927_v2, %v7926_v10 }
0x1a15   :  { %v7988_v43 = vrot.slane %v7987_v5, 2 }
0x1a16   :  { %v7929_v11 = vrot.slane %v7928_v41, 2 }
0x1a17   :  { %v7989_v30 = vadd.f32 %v7988_v43, %v7987_v5 }
0x1a18   :  { %v7930_v14 = vadd.f32 %v7929_v11, %v7928_v41 }
0x1a19   :  { %v7990_v52 = vrot.slane %v7989_v30, 1 }
0x1a1a   :  { %v7931_v27 = vrot.slane %v7930_v14, 1 }
0x1a1b   :  { %v7991_v45 = vadd.f32 %v7990_v52, %v7989_v30 }
0x1a1c   :  { %v7932_v24 = vadd.f32 %v7931_v27, %v7930_v14 }
0x1a1e   :  { %v7992_v59 = vsel %vm15648_vm3, %v7932_v24, %v7991_v45 }
0x1a1f   :  { %9308 = vmatmul.mubr.msk.f32.vlgmr.msra.gmra.mrb[146].mxu1 %vm15649_vm11, %v7992_v59 }
0x1af2   :  { %v8071_v3 = vpop.f32.mrb[146].mxu1 }
0x1af3   :  { %v8072_v63 = vadd.f32 %v8404_v16, %v8071_v3  ;;  %v9309_v29 = vpop.f32.mrb[147].mxu1 }
0x1af5   :  { %8076 = vst.msk [vmem:[#allocation2] sm:$0x3] %vm8075_vm1, %v8072_v63 }
0x1af6   :  { %10095 = shalt.err (!%p10092_p4)
}
0x1af7   :  { %s10096_s14 = scalar_lea.hbm %s14928_s4, 32 }
0x1af8   :  { %p10097_p5 = scmp.ne.s32.totalorder %s14928_s4, %s10096_s14  ;;  %p10100_p6 = scmp.lt.u32.totalorder %s10096_s14, %s14928_s4 }
0x1afa   :  { %p10102_p7 = pnand %p10100_p6, %p10097_p5 }
0x1afc   :  { %10105 = shalt.err (!%p10102_p7)
}
0x1afd   :  { %8086 = dma.vmem_to_hbm [thread:$0]  %s8084_s11, 32, %s14928_s4, [#allocation3]  }
0x1afe   :  { %10106 = dma.done.wait [#allocation3], 32  }
0x1aff   :  { %10107 = vsyncadd [#allocation3], 4294967264 }
0x1b00   :  { %8090 = vsyncpa [#allocation3], 1 }

</bundles_post_ra>
